<compile_context>
chip_gen: v5e
topology: v5e:2x2
jax: 0.10.0
libtpu: 0.0.40
codegen_flags: <defaults>
</compile_context>

<pallas_src>
import functools

import jax
import jax.numpy as jnp
from jax import lax
from jax.experimental import pallas as pl
from jax.experimental.pallas import tpu as pltpu

EMB = 100        # embedding_dim
HID = 50         # hidden_size
LAYERS = 2       # layer_num
CLASSES = 8      # class_num

GP = 128         # per-gate lane padding (each gate occupies a full 128-lane slab)
HP = 128         # padded hidden width (one direction)
DP = 128         # padded layer-0 input width (EMB=100 -> 128)


# ----------------------------- Pallas kernel --------------------------------

def _sigmoid(x):
    # Single EUP op (tanh) instead of exp + reciprocal.
    return 0.5 * jnp.tanh(0.5 * x) + 0.5


def _lstm_cell(g, c_prev):
    """One LSTM cell from gate pre-activations g: (bp, 4*GP), gates [i,f,g,o].

    Pad lanes (HID..GP) of g are exactly zero, so c/h stay exactly zero there.
    """
    i = _sigmoid(g[:, 0 * GP:1 * GP])
    f = _sigmoid(g[:, 1 * GP:2 * GP])
    gg = jnp.tanh(g[:, 2 * GP:3 * GP])
    o = _sigmoid(g[:, 3 * GP:4 * GP])
    c = f * c_prev + i * gg          # pad lanes: 0.5*0 + 0.5*0 = 0
    h = o * jnp.tanh(c)              # pad lanes: 0.5*tanh(0) = 0
    return h, c


def _textrnn_kernel(x_ref,
                    wih0_ref, b0_ref, whh0f_ref, whh0b_ref,
                    wih1_ref, b1_ref, whh1f_ref, whh1b_ref,
                    fcw_ref, fcb_ref,
                    logits_ref,
                    xp0_ref, xp1_ref, outf_ref, outb_ref,
                    *, bp):
    """Fused TextRNN forward: 2-layer biLSTM + Linear, all data resident in VMEM."""
    T = x_ref.shape[0] // bp
    unroll = min(T, 8)

    # ---- layer 0: ONE fused input projection for both directions ----------
    # xp0 columns: [i_f f_f g_f o_f | i_b f_b g_b o_b], each GP lanes wide.
    x_bf = x_ref[...].astype(jnp.bfloat16)                       # (T*bp, DP)
    xp0_ref[...] = jnp.dot(x_bf, wih0_ref[...],
                           preferred_element_type=jnp.float32) + b0_ref[...]

    # ---- layer 0: interleaved fwd/bwd recurrence in a single time loop ----
    def l0_step(s, carry):
        hf, cf, hb, cb = carry
        row_f = pl.multiple_of(s * bp, bp)
        row_b = pl.multiple_of((T - 1 - s) * bp, bp)
        hhf = jnp.dot(hf.astype(jnp.bfloat16), whh0f_ref[...],
                      preferred_element_type=jnp.float32)
        hhb = jnp.dot(hb.astype(jnp.bfloat16), whh0b_ref[...],
                      preferred_element_type=jnp.float32)
        gf = xp0_ref[pl.ds(row_f, bp), 0:4 * GP] + hhf
        gb = xp0_ref[pl.ds(row_b, bp), 4 * GP:8 * GP] + hhb
        hf, cf = _lstm_cell(gf, cf)
        hb, cb = _lstm_cell(gb, cb)
        outf_ref[pl.ds(row_f, bp), :] = hf                       # original time order
        outb_ref[pl.ds(row_b, bp), :] = hb
        return (hf, cf, hb, cb)

    z = jnp.zeros((bp, GP), jnp.float32)
    lax.fori_loop(0, T, l0_step, (z, z, z, z), unroll=unroll)

    # ---- layer 1: ONE fused input projection (contraction depth 256) ------
    x1_bf = jnp.concatenate([outf_ref[...], outb_ref[...]],
                            axis=1).astype(jnp.bfloat16)         # (T*bp, 2*GP)
    xp1_ref[...] = jnp.dot(x1_bf, wih1_ref[...],
                           preferred_element_type=jnp.float32) + b1_ref[...]

    # ---- layer 1 forward recurrence (only the final h feeds the classifier) ---
    def l1_step(s, carry):
        h, c = carry
        row = pl.multiple_of(s * bp, bp)
        g = xp1_ref[pl.ds(row, bp), 0:4 * GP] + jnp.dot(
            h.astype(jnp.bfloat16), whh1f_ref[...],
            preferred_element_type=jnp.float32)
        return _lstm_cell(g, c)

    h_f1, _ = lax.fori_loop(0, T, l1_step, (z, z), unroll=unroll)

    # layer-1 backward output at original t = T-1 == its FIRST step from zero
    # state: a single cell evaluation, no loop needed.
    g_last = xp1_ref[pl.ds((T - 1) * bp, bp), 4 * GP:8 * GP]
    h_b1, _ = _lstm_cell(g_last, z)

    # ---- classifier: single fused dot on [h_f1 | h_b1], lane-dense output ----
    hcat = jnp.concatenate([h_f1, h_b1], axis=1)                 # (bp, 2*GP) f32
    logits_ref[...] = jnp.dot(hcat, fcw_ref[...],
                              preferred_element_type=jnp.float32) + fcb_ref[...]


# --------------------------- parameter packing -------------------------------

def _gate_pad(w_t, rows):
    """w_t: (d_in, 4*HID) -> (rows, 4*GP), gate k at lanes [k*GP, k*GP+HID), rest zero."""
    d_in = w_t.shape[0]
    out = jnp.zeros((rows, 4 * GP), jnp.float32)
    for k in range(4):
        out = out.at[:d_in, k * GP:k * GP + HID].set(w_t[:, k * HID:(k + 1) * HID])
    return out


def _gate_pad_bias(b):
    out = jnp.zeros((1, 4 * GP), jnp.float32)
    for k in range(4):
        out = out.at[0, k * GP:k * GP + HID].set(b[k * HID:(k + 1) * HID])
    return out


def pack_params(params):
    """One-time pre-pack: transpose, fuse biases, pad gates, cast weights to bf16."""
    bf = jnp.bfloat16

    # layer 0 (input = embedding): fuse fwd|bwd gate columns into one matrix.
    l0 = params["lstm"][0]
    w_ih_f, w_hh_f, b_ih_f, b_hh_f = l0["fwd"]
    w_ih_b, w_hh_b, b_ih_b, b_hh_b = l0["bwd"]
    wih0 = jnp.concatenate([_gate_pad(w_ih_f.T, DP), _gate_pad(w_ih_b.T, DP)], axis=1)
    b0 = jnp.concatenate([_gate_pad_bias(b_ih_f + b_hh_f),
                          _gate_pad_bias(b_ih_b + b_hh_b)], axis=1)
    whh0f = _gate_pad(w_hh_f.T, HP)
    whh0b = _gate_pad(w_hh_b.T, HP)

    # layer 1 (input = [fwd_out | bwd_out], 256 padded lanes).
    l1 = params["lstm"][1]
    w_ih_f1, w_hh_f1, b_ih_f1, b_hh_f1 = l1["fwd"]
    w_ih_b1, w_hh_b1, b_ih_b1, b_hh_b1 = l1["bwd"]

    def _pack_l1_dir(w_ih):
        w_t = w_ih.T                               # (2*HID, 4*HID)
        top = _gate_pad(w_t[:HID], HP)             # acts on fwd half (lanes 0:GP)
        bot = _gate_pad(w_t[HID:], HP)             # acts on bwd half (lanes GP:2GP)
        return jnp.concatenate([top, bot], axis=0)  # (2*HP, 4*GP)

    wih1 = jnp.concatenate([_pack_l1_dir(w_ih_f1), _pack_l1_dir(w_ih_b1)], axis=1)
    b1 = jnp.concatenate([_gate_pad_bias(b_ih_f1 + b_hh_f1),
                          _gate_pad_bias(b_ih_b1 + b_hh_b1)], axis=1)
    whh1f = _gate_pad(w_hh_f1.T, HP)
    whh1b = _gate_pad(w_hh_b1.T, HP)

    # classifier: single (2*HP, GP) weight acting on [h_f1 | h_b1] (kept f32).
    fcw_t = params["fc_w"].T                       # (2*HID, CLASSES)
    fcw = jnp.zeros((2 * HP, GP), jnp.float32)
    fcw = fcw.at[:HID, :CLASSES].set(fcw_t[:HID])
    fcw = fcw.at[HP:HP + HID, :CLASSES].set(fcw_t[HID:])
    fcb = jnp.zeros((1, GP), jnp.float32).at[0, :CLASSES].set(params["fc_b"])

    return (wih0.astype(bf), b0, whh0f.astype(bf), whh0b.astype(bf),
            wih1.astype(bf), b1, whh1f.astype(bf), whh1b.astype(bf),
            fcw, fcb)


# ----------------------------- host wrapper ----------------------------------

def text_rnn_forward(x_btd, packed):
    """Equivalent of TextRNN.forward. x_btd: (B, T, EMB) -> logits (B, CLASSES)."""
    B, T, E = x_btd.shape
    bp = ((B + 7) // 8) * 8                              # pad batch to sublane multiple
    x = jnp.transpose(x_btd, (1, 0, 2))                  # (T, B, E) time-major
    x = jnp.pad(x, ((0, 0), (0, bp - B), (0, DP - E)))   # pad batch & emb lanes
    x2d = x.reshape(T * bp, DP)

    kernel = functools.partial(_textrnn_kernel, bp=bp)
    logits_pad = pl.pallas_call(
        kernel,
        out_shape=jax.ShapeDtypeStruct((bp, GP), jnp.float32),
        in_specs=[pl.BlockSpec(memory_space=pltpu.MemorySpace.VMEM)] * 11,
        out_specs=pl.BlockSpec(memory_space=pltpu.MemorySpace.VMEM),
        scratch_shapes=[
            pltpu.VMEM((T * bp, 8 * GP), jnp.float32),   # layer-0 xproj (fwd|bwd gates)
            pltpu.VMEM((T * bp, 8 * GP), jnp.float32),   # layer-1 xproj (own buffer, no WAR reuse)
            pltpu.VMEM((T * bp, GP), jnp.float32),       # layer-0 fwd hidden states
            pltpu.VMEM((T * bp, GP), jnp.float32),       # layer-0 bwd hidden states
        ],
    )(x2d, *packed)
    return logits_pad[:B, :CLASSES]


# --------------------------- parameter creation ------------------------------

def init_params(key):
    """Deterministic init, uniform(-1/sqrt(H), 1/sqrt(H)) like PyTorch."""
    k = 1.0 / jnp.sqrt(jnp.float32(HID))
    params = {"lstm": []}
    for l in range(LAYERS):
        d_in = EMB if l == 0 else 2 * HID
        layer = {}
        for d in ("fwd", "bwd"):
            key, k1, k2, k3, k4 = jax.random.split(key, 5)
            layer[d] = (
                jax.random.uniform(k1, (4 * HID, d_in), jnp.float32, -k, k),  # W_ih
                jax.random.uniform(k2, (4 * HID, HID), jnp.float32, -k, k),   # W_hh
                jax.random.uniform(k3, (4 * HID,), jnp.float32, -k, k),       # b_ih
                jax.random.uniform(k4, (4 * HID,), jnp.float32, -k, k),       # b_hh
            )
        params["lstm"].append(layer)
    key, k1, k2 = jax.random.split(key, 3)
    kf = 1.0 / jnp.sqrt(jnp.float32(2 * HID))
    params["fc_w"] = jax.random.uniform(k1, (CLASSES, 2 * HID), jnp.float32, -kf, kf)
    params["fc_b"] = jax.random.uniform(k2, (CLASSES,), jnp.float32, -kf, kf)
    return params


# ----------------------------- pure-JAX reference ----------------------------

def _lstm_dir_ref(x_tbd, w_ih, w_hh, b_ih, b_hh):
    T, B, _ = x_tbd.shape
    H = w_hh.shape[1]
    b = b_ih + b_hh

    def step(carry, x_t):
        h, c = carry
        gates = x_t @ w_ih.T + h @ w_hh.T + b
        i = jax.nn.sigmoid(gates[:, 0 * H:1 * H])
        f = jax.nn.sigmoid(gates[:, 1 * H:2 * H])
        g = jnp.tanh(gates[:, 2 * H:3 * H])
        o = jax.nn.sigmoid(gates[:, 3 * H:4 * H])
        c = f * c + i * g
        h = o * jnp.tanh(c)
        return (h, c), h

    h0 = jnp.zeros((B, H), jnp.float32)
    (_, _), out = lax.scan(step, (h0, h0), x_tbd)
    return out


def text_rnn_ref(x_btd, params):
    x = jnp.transpose(x_btd, (1, 0, 2))
    for l in range(LAYERS):
        lp = params["lstm"][l]
        fwd = _lstm_dir_ref(x, *lp["fwd"])
        bwd = _lstm_dir_ref(x[::-1], *lp["bwd"])[::-1]
        x = jnp.concatenate([fwd, bwd], axis=-1)
    last = x[-1]
    return last @ params["fc_w"].T + params["fc_b"]


# ----------------------------------- main ------------------------------------

if __name__ == "__main__":
    key = jax.random.PRNGKey(0)
    k_params, k_x = jax.random.split(key)

    B, T = 2, 8                         # small batch / sequence length
    x = jax.random.normal(k_x, (B, T, EMB), jnp.float32)
    params = init_params(k_params)
    packed = pack_params(params)        # one-time weight pre-pack (done outside forward)

    fwd = jax.jit(text_rnn_forward)
    logits = jax.block_until_ready(fwd(x, packed))

    ref = text_rnn_ref(x, params)
    assert logits.shape == (B, CLASSES)
    # Kernel uses bf16 MXU operands with f32 accumulation (per perf review);
    # tolerance relaxed accordingly vs the pure-f32 reference.
    assert jnp.allclose(logits, ref, atol=3e-2, rtol=3e-2), "mismatch vs reference"

    print("KERNEL_OK")
</pallas_src>

<mosaic_0001>
module attributes {stable_mosaic.version = 11 : i64} {
  func.func @_textrnn_kernel(%arg0: memref<64x128xf32, #tpu.memory_space<vmem>>, %arg1: memref<128x1024xbf16, #tpu.memory_space<vmem>>, %arg2: memref<1x1024xf32, #tpu.memory_space<vmem>>, %arg3: memref<128x512xbf16, #tpu.memory_space<vmem>>, %arg4: memref<128x512xbf16, #tpu.memory_space<vmem>>, %arg5: memref<256x1024xbf16, #tpu.memory_space<vmem>>, %arg6: memref<1x1024xf32, #tpu.memory_space<vmem>>, %arg7: memref<128x512xbf16, #tpu.memory_space<vmem>>, %arg8: memref<128x512xbf16, #tpu.memory_space<vmem>>, %arg9: memref<256x128xf32, #tpu.memory_space<vmem>>, %arg10: memref<1x128xf32, #tpu.memory_space<vmem>>, %arg11: memref<8x128xf32, #tpu.memory_space<vmem>>, %arg12: memref<64x1024xf32, #tpu.memory_space<vmem>>, %arg13: memref<64x1024xf32, #tpu.memory_space<vmem>>, %arg14: memref<64x128xf32, #tpu.memory_space<vmem>>, %arg15: memref<64x128xf32, #tpu.memory_space<vmem>>) attributes {dimension_semantics = [], scalar_prefetch = 0 : i64, scratch_operands = 4 : i64, tpu.core_type = #tpu.core_type<tc>} {
    %c0 = arith.constant 0 : index
    %c0_0 = arith.constant 0 : index
    %0 = vector.load %arg0[%c0, %c0_0] : memref<64x128xf32, #tpu.memory_space<vmem>>, vector<64x128xf32>
    %1 = arith.truncf %0 : vector<64x128xf32> to vector<64x128xbf16>
    %c0_1 = arith.constant 0 : index
    %c0_2 = arith.constant 0 : index
    %2 = vector.load %arg1[%c0_1, %c0_2] : memref<128x1024xbf16, #tpu.memory_space<vmem>>, vector<128x1024xbf16>
    %cst = arith.constant dense<0.000000e+00> : vector<64x1024xf32>
    %3 = tpu.matmul %1, %2, %cst {dimension_numbers = #tpu.dot_dimension_numbers<[1], [0], [0], [1], [0, 0, 1, 1], [], []>} : vector<64x128xbf16>, vector<128x1024xbf16>, vector<64x1024xf32> -> vector<64x1024xf32>
    %c0_3 = arith.constant 0 : index
    %c0_4 = arith.constant 0 : index
    %4 = vector.load %arg2[%c0_3, %c0_4] : memref<1x1024xf32, #tpu.memory_space<vmem>>, vector<1x1024xf32>
    %5 = vector.broadcast %4 : vector<1x1024xf32> to vector<64x1024xf32>
    %6 = arith.addf %3, %5 : vector<64x1024xf32>
    %c0_5 = arith.constant 0 : index
    %c0_6 = arith.constant 0 : index
    %7 = vector.load %arg12[%c0_5, %c0_6] : memref<64x1024xf32, #tpu.memory_space<vmem>>, vector<64x1024xf32>
    tpu.vector_store %arg12[%c0_5, %c0_6], %6 {strides = array<i32>} : memref<64x1024xf32, #tpu.memory_space<vmem>>, vector<64x1024xf32>,
    %cst_7 = arith.constant 0.000000e+00 : f32
    %8 = vector.broadcast %cst_7 : f32 to vector<8x128xf32>
    %c0_i32 = arith.constant 0 : i32
    %c8_i32 = arith.constant 8 : i32
    %9 = arith.muli %c0_i32, %c8_i32 : i32
    %10 = tpu.assume_multiple %9, 8 : i32
    %c7_i32 = arith.constant 7 : i32
    %11 = arith.subi %c7_i32, %c0_i32 : i32
    %c8_i32_8 = arith.constant 8 : i32
    %12 = arith.muli %11, %c8_i32_8 : i32
    %13 = tpu.assume_multiple %12, 8 : i32
    %14 = arith.truncf %8 : vector<8x128xf32> to vector<8x128xbf16>
    %c0_9 = arith.constant 0 : index
    %c0_10 = arith.constant 0 : index
    %15 = vector.load %arg3[%c0_9, %c0_10] : memref<128x512xbf16, #tpu.memory_space<vmem>>, vector<128x512xbf16>
    %cst_11 = arith.constant dense<0.000000e+00> : vector<8x512xf32>
    %16 = tpu.matmul %14, %15, %cst_11 {dimension_numbers = #tpu.dot_dimension_numbers<[1], [0], [0], [1], [0, 0, 1, 1], [], []>} : vector<8x128xbf16>, vector<128x512xbf16>, vector<8x512xf32> -> vector<8x512xf32>
    %17 = arith.truncf %8 : vector<8x128xf32> to vector<8x128xbf16>
    %c0_12 = arith.constant 0 : index
    %c0_13 = arith.constant 0 : index
    %18 = vector.load %arg4[%c0_12, %c0_13] : memref<128x512xbf16, #tpu.memory_space<vmem>>, vector<128x512xbf16>
    %cst_14 = arith.constant dense<0.000000e+00> : vector<8x512xf32>
    %19 = tpu.matmul %17, %18, %cst_14 {dimension_numbers = #tpu.dot_dimension_numbers<[1], [0], [0], [1], [0, 0, 1, 1], [], []>} : vector<8x128xbf16>, vector<128x512xbf16>, vector<8x512xf32> -> vector<8x512xf32>
    %20 = arith.index_cast %10 : i32 to index
    %c0_15 = arith.constant 0 : index
    %21 = vector.load %arg12[%20, %c0_15] : memref<64x1024xf32, #tpu.memory_space<vmem>>, vector<8x512xf32>
    %22 = arith.addf %21, %16 : vector<8x512xf32>
    %23 = arith.index_cast %13 : i32 to index
    %c512 = arith.constant 512 : index
    %24 = vector.load %arg12[%23, %c512] : memref<64x1024xf32, #tpu.memory_space<vmem>>, vector<8x512xf32>
    %25 = arith.addf %24, %19 : vector<8x512xf32>
    %26 = vector.extract_strided_slice %22 {offsets = [0, 0], sizes = [8, 128], strides = [1, 1]} : vector<8x512xf32> to vector<8x128xf32>
    %cst_16 = arith.constant 5.000000e-01 : f32
    %27 = vector.broadcast %cst_16 : f32 to vector<8x128xf32>
    %28 = arith.mulf %27, %26 : vector<8x128xf32>
    %29 = math.tanh %28 : vector<8x128xf32>
    %cst_17 = arith.constant 5.000000e-01 : f32
    %30 = vector.broadcast %cst_17 : f32 to vector<8x128xf32>
    %31 = arith.mulf %30, %29 : vector<8x128xf32>
    %cst_18 = arith.constant 5.000000e-01 : f32
    %32 = vector.broadcast %cst_18 : f32 to vector<8x128xf32>
    %33 = arith.addf %31, %32 : vector<8x128xf32>
    %34 = vector.extract_strided_slice %22 {offsets = [0, 128], sizes = [8, 128], strides = [1, 1]} : vector<8x512xf32> to vector<8x128xf32>
    %cst_19 = arith.constant 5.000000e-01 : f32
    %35 = vector.broadcast %cst_19 : f32 to vector<8x128xf32>
    %36 = arith.mulf %35, %34 : vector<8x128xf32>
    %37 = math.tanh %36 : vector<8x128xf32>
    %cst_20 = arith.constant 5.000000e-01 : f32
    %38 = vector.broadcast %cst_20 : f32 to vector<8x128xf32>
    %39 = arith.mulf %38, %37 : vector<8x128xf32>
    %cst_21 = arith.constant 5.000000e-01 : f32
    %40 = vector.broadcast %cst_21 : f32 to vector<8x128xf32>
    %41 = arith.addf %39, %40 : vector<8x128xf32>
    %42 = vector.extract_strided_slice %22 {offsets = [0, 256], sizes = [8, 128], strides = [1, 1]} : vector<8x512xf32> to vector<8x128xf32>
    %43 = math.tanh %42 : vector<8x128xf32>
    %44 = vector.extract_strided_slice %22 {offsets = [0, 384], sizes = [8, 128], strides = [1, 1]} : vector<8x512xf32> to vector<8x128xf32>
    %cst_22 = arith.constant 5.000000e-01 : f32
    %45 = vector.broadcast %cst_22 : f32 to vector<8x128xf32>
    %46 = arith.mulf %45, %44 : vector<8x128xf32>
    %47 = math.tanh %46 : vector<8x128xf32>
    %cst_23 = arith.constant 5.000000e-01 : f32
    %48 = vector.broadcast %cst_23 : f32 to vector<8x128xf32>
    %49 = arith.mulf %48, %47 : vector<8x128xf32>
    %cst_24 = arith.constant 5.000000e-01 : f32
    %50 = vector.broadcast %cst_24 : f32 to vector<8x128xf32>
    %51 = arith.addf %49, %50 : vector<8x128xf32>
    %52 = arith.mulf %41, %8 : vector<8x128xf32>
    %53 = arith.mulf %33, %43 : vector<8x128xf32>
    %54 = arith.addf %52, %53 : vector<8x128xf32>
    %55 = math.tanh %54 : vector<8x128xf32>
    %56 = arith.mulf %51, %55 : vector<8x128xf32>
    %57 = vector.extract_strided_slice %25 {offsets = [0, 0], sizes = [8, 128], strides = [1, 1]} : vector<8x512xf32> to vector<8x128xf32>
    %cst_25 = arith.constant 5.000000e-01 : f32
    %58 = vector.broadcast %cst_25 : f32 to vector<8x128xf32>
    %59 = arith.mulf %58, %57 : vector<8x128xf32>
    %60 = math.tanh %59 : vector<8x128xf32>
    %cst_26 = arith.constant 5.000000e-01 : f32
    %61 = vector.broadcast %cst_26 : f32 to vector<8x128xf32>
    %62 = arith.mulf %61, %60 : vector<8x128xf32>
    %cst_27 = arith.constant 5.000000e-01 : f32
    %63 = vector.broadcast %cst_27 : f32 to vector<8x128xf32>
    %64 = arith.addf %62, %63 : vector<8x128xf32>
    %65 = vector.extract_strided_slice %25 {offsets = [0, 128], sizes = [8, 128], strides = [1, 1]} : vector<8x512xf32> to vector<8x128xf32>
    %cst_28 = arith.constant 5.000000e-01 : f32
    %66 = vector.broadcast %cst_28 : f32 to vector<8x128xf32>
    %67 = arith.mulf %66, %65 : vector<8x128xf32>
    %68 = math.tanh %67 : vector<8x128xf32>
    %cst_29 = arith.constant 5.000000e-01 : f32
    %69 = vector.broadcast %cst_29 : f32 to vector<8x128xf32>
    %70 = arith.mulf %69, %68 : vector<8x128xf32>
    %cst_30 = arith.constant 5.000000e-01 : f32
    %71 = vector.broadcast %cst_30 : f32 to vector<8x128xf32>
    %72 = arith.addf %70, %71 : vector<8x128xf32>
    %73 = vector.extract_strided_slice %25 {offsets = [0, 256], sizes = [8, 128], strides = [1, 1]} : vector<8x512xf32> to vector<8x128xf32>
    %74 = math.tanh %73 : vector<8x128xf32>
    %75 = vector.extract_strided_slice %25 {offsets = [0, 384], sizes = [8, 128], strides = [1, 1]} : vector<8x512xf32> to vector<8x128xf32>
    %cst_31 = arith.constant 5.000000e-01 : f32
    %76 = vector.broadcast %cst_31 : f32 to vector<8x128xf32>
    %77 = arith.mulf %76, %75 : vector<8x128xf32>
    %78 = math.tanh %77 : vector<8x128xf32>
    %cst_32 = arith.constant 5.000000e-01 : f32
    %79 = vector.broadcast %cst_32 : f32 to vector<8x128xf32>
    %80 = arith.mulf %79, %78 : vector<8x128xf32>
    %cst_33 = arith.constant 5.000000e-01 : f32
    %81 = vector.broadcast %cst_33 : f32 to vector<8x128xf32>
    %82 = arith.addf %80, %81 : vector<8x128xf32>
    %83 = arith.mulf %72, %8 : vector<8x128xf32>
    %84 = arith.mulf %64, %74 : vector<8x128xf32>
    %85 = arith.addf %83, %84 : vector<8x128xf32>
    %86 = math.tanh %85 : vector<8x128xf32>
    %87 = arith.mulf %82, %86 : vector<8x128xf32>
    %88 = arith.index_cast %10 : i32 to index
    %c0_34 = arith.constant 0 : index
    %89 = vector.load %arg14[%88, %c0_34] : memref<64x128xf32, #tpu.memory_space<vmem>>, vector<8x128xf32>
    tpu.vector_store %arg14[%88, %c0_34], %56 {strides = array<i32>} : memref<64x128xf32, #tpu.memory_space<vmem>>, vector<8x128xf32>,
    %90 = arith.index_cast %13 : i32 to index
    %c0_35 = arith.constant 0 : index
    %91 = vector.load %arg15[%90, %c0_35] : memref<64x128xf32, #tpu.memory_space<vmem>>, vector<8x128xf32>
    tpu.vector_store %arg15[%90, %c0_35], %87 {strides = array<i32>} : memref<64x128xf32, #tpu.memory_space<vmem>>, vector<8x128xf32>,
    %c1_i32 = arith.constant 1 : i32
    %c8_i32_36 = arith.constant 8 : i32
    %92 = arith.muli %c1_i32, %c8_i32_36 : i32
    %93 = tpu.assume_multiple %92, 8 : i32
    %c7_i32_37 = arith.constant 7 : i32
    %94 = arith.subi %c7_i32_37, %c1_i32 : i32
    %c8_i32_38 = arith.constant 8 : i32
    %95 = arith.muli %94, %c8_i32_38 : i32
    %96 = tpu.assume_multiple %95, 8 : i32
    %97 = arith.truncf %56 : vector<8x128xf32> to vector<8x128xbf16>
    %c0_39 = arith.constant 0 : index
    %c0_40 = arith.constant 0 : index
    %98 = vector.load %arg3[%c0_39, %c0_40] : memref<128x512xbf16, #tpu.memory_space<vmem>>, vector<128x512xbf16>
    %cst_41 = arith.constant dense<0.000000e+00> : vector<8x512xf32>
    %99 = tpu.matmul %97, %98, %cst_41 {dimension_numbers = #tpu.dot_dimension_numbers<[1], [0], [0], [1], [0, 0, 1, 1], [], []>} : vector<8x128xbf16>, vector<128x512xbf16>, vector<8x512xf32> -> vector<8x512xf32>
    %100 = arith.truncf %87 : vector<8x128xf32> to vector<8x128xbf16>
    %c0_42 = arith.constant 0 : index
    %c0_43 = arith.constant 0 : index
    %101 = vector.load %arg4[%c0_42, %c0_43] : memref<128x512xbf16, #tpu.memory_space<vmem>>, vector<128x512xbf16>
    %cst_44 = arith.constant dense<0.000000e+00> : vector<8x512xf32>
    %102 = tpu.matmul %100, %101, %cst_44 {dimension_numbers = #tpu.dot_dimension_numbers<[1], [0], [0], [1], [0, 0, 1, 1], [], []>} : vector<8x128xbf16>, vector<128x512xbf16>, vector<8x512xf32> -> vector<8x512xf32>
    %103 = arith.index_cast %93 : i32 to index
    %c0_45 = arith.constant 0 : index
    %104 = vector.load %arg12[%103, %c0_45] : memref<64x1024xf32, #tpu.memory_space<vmem>>, vector<8x512xf32>
    %105 = arith.addf %104, %99 : vector<8x512xf32>
    %106 = arith.index_cast %96 : i32 to index
    %c512_46 = arith.constant 512 : index
    %107 = vector.load %arg12[%106, %c512_46] : memref<64x1024xf32, #tpu.memory_space<vmem>>, vector<8x512xf32>
    %108 = arith.addf %107, %102 : vector<8x512xf32>
    %109 = vector.extract_strided_slice %105 {offsets = [0, 0], sizes = [8, 128], strides = [1, 1]} : vector<8x512xf32> to vector<8x128xf32>
    %cst_47 = arith.constant 5.000000e-01 : f32
    %110 = vector.broadcast %cst_47 : f32 to vector<8x128xf32>
    %111 = arith.mulf %110, %109 : vector<8x128xf32>
    %112 = math.tanh %111 : vector<8x128xf32>
    %cst_48 = arith.constant 5.000000e-01 : f32
    %113 = vector.broadcast %cst_48 : f32 to vector<8x128xf32>
    %114 = arith.mulf %113, %112 : vector<8x128xf32>
    %cst_49 = arith.constant 5.000000e-01 : f32
    %115 = vector.broadcast %cst_49 : f32 to vector<8x128xf32>
    %116 = arith.addf %114, %115 : vector<8x128xf32>
    %117 = vector.extract_strided_slice %105 {offsets = [0, 128], sizes = [8, 128], strides = [1, 1]} : vector<8x512xf32> to vector<8x128xf32>
    %cst_50 = arith.constant 5.000000e-01 : f32
    %118 = vector.broadcast %cst_50 : f32 to vector<8x128xf32>
    %119 = arith.mulf %118, %117 : vector<8x128xf32>
    %120 = math.tanh %119 : vector<8x128xf32>
    %cst_51 = arith.constant 5.000000e-01 : f32
    %121 = vector.broadcast %cst_51 : f32 to vector<8x128xf32>
    %122 = arith.mulf %121, %120 : vector<8x128xf32>
    %cst_52 = arith.constant 5.000000e-01 : f32
    %123 = vector.broadcast %cst_52 : f32 to vector<8x128xf32>
    %124 = arith.addf %122, %123 : vector<8x128xf32>
    %125 = vector.extract_strided_slice %105 {offsets = [0, 256], sizes = [8, 128], strides = [1, 1]} : vector<8x512xf32> to vector<8x128xf32>
    %126 = math.tanh %125 : vector<8x128xf32>
    %127 = vector.extract_strided_slice %105 {offsets = [0, 384], sizes = [8, 128], strides = [1, 1]} : vector<8x512xf32> to vector<8x128xf32>
    %cst_53 = arith.constant 5.000000e-01 : f32
    %128 = vector.broadcast %cst_53 : f32 to vector<8x128xf32>
    %129 = arith.mulf %128, %127 : vector<8x128xf32>
    %130 = math.tanh %129 : vector<8x128xf32>
    %cst_54 = arith.constant 5.000000e-01 : f32
    %131 = vector.broadcast %cst_54 : f32 to vector<8x128xf32>
    %132 = arith.mulf %131, %130 : vector<8x128xf32>
    %cst_55 = arith.constant 5.000000e-01 : f32
    %133 = vector.broadcast %cst_55 : f32 to vector<8x128xf32>
    %134 = arith.addf %132, %133 : vector<8x128xf32>
    %135 = arith.mulf %124, %54 : vector<8x128xf32>
    %136 = arith.mulf %116, %126 : vector<8x128xf32>
    %137 = arith.addf %135, %136 : vector<8x128xf32>
    %138 = math.tanh %137 : vector<8x128xf32>
    %139 = arith.mulf %134, %138 : vector<8x128xf32>
    %140 = vector.extract_strided_slice %108 {offsets = [0, 0], sizes = [8, 128], strides = [1, 1]} : vector<8x512xf32> to vector<8x128xf32>
    %cst_56 = arith.constant 5.000000e-01 : f32
    %141 = vector.broadcast %cst_56 : f32 to vector<8x128xf32>
    %142 = arith.mulf %141, %140 : vector<8x128xf32>
    %143 = math.tanh %142 : vector<8x128xf32>
    %cst_57 = arith.constant 5.000000e-01 : f32
    %144 = vector.broadcast %cst_57 : f32 to vector<8x128xf32>
    %145 = arith.mulf %144, %143 : vector<8x128xf32>
    %cst_58 = arith.constant 5.000000e-01 : f32
    %146 = vector.broadcast %cst_58 : f32 to vector<8x128xf32>
    %147 = arith.addf %145, %146 : vector<8x128xf32>
    %148 = vector.extract_strided_slice %108 {offsets = [0, 128], sizes = [8, 128], strides = [1, 1]} : vector<8x512xf32> to vector<8x128xf32>
    %cst_59 = arith.constant 5.000000e-01 : f32
    %149 = vector.broadcast %cst_59 : f32 to vector<8x128xf32>
    %150 = arith.mulf %149, %148 : vector<8x128xf32>
    %151 = math.tanh %150 : vector<8x128xf32>
    %cst_60 = arith.constant 5.000000e-01 : f32
    %152 = vector.broadcast %cst_60 : f32 to vector<8x128xf32>
    %153 = arith.mulf %152, %151 : vector<8x128xf32>
    %cst_61 = arith.constant 5.000000e-01 : f32
    %154 = vector.broadcast %cst_61 : f32 to vector<8x128xf32>
    %155 = arith.addf %153, %154 : vector<8x128xf32>
    %156 = vector.extract_strided_slice %108 {offsets = [0, 256], sizes = [8, 128], strides = [1, 1]} : vector<8x512xf32> to vector<8x128xf32>
    %157 = math.tanh %156 : vector<8x128xf32>
    %158 = vector.extract_strided_slice %108 {offsets = [0, 384], sizes = [8, 128], strides = [1, 1]} : vector<8x512xf32> to vector<8x128xf32>
    %cst_62 = arith.constant 5.000000e-01 : f32
    %159 = vector.broadcast %cst_62 : f32 to vector<8x128xf32>
    %160 = arith.mulf %159, %158 : vector<8x128xf32>
    %161 = math.tanh %160 : vector<8x128xf32>
    %cst_63 = arith.constant 5.000000e-01 : f32
    %162 = vector.broadcast %cst_63 : f32 to vector<8x128xf32>
    %163 = arith.mulf %162, %161 : vector<8x128xf32>
    %cst_64 = arith.constant 5.000000e-01 : f32
    %164 = vector.broadcast %cst_64 : f32 to vector<8x128xf32>
    %165 = arith.addf %163, %164 : vector<8x128xf32>
    %166 = arith.mulf %155, %85 : vector<8x128xf32>
    %167 = arith.mulf %147, %157 : vector<8x128xf32>
    %168 = arith.addf %166, %167 : vector<8x128xf32>
    %169 = math.tanh %168 : vector<8x128xf32>
    %170 = arith.mulf %165, %169 : vector<8x128xf32>
    %171 = arith.index_cast %93 : i32 to index
    %c0_65 = arith.constant 0 : index
    %172 = vector.load %arg14[%171, %c0_65] : memref<64x128xf32, #tpu.memory_space<vmem>>, vector<8x128xf32>
    tpu.vector_store %arg14[%171, %c0_65], %139 {strides = array<i32>} : memref<64x128xf32, #tpu.memory_space<vmem>>, vector<8x128xf32>,
    %173 = arith.index_cast %96 : i32 to index
    %c0_66 = arith.constant 0 : index
    %174 = vector.load %arg15[%173, %c0_66] : memref<64x128xf32, #tpu.memory_space<vmem>>, vector<8x128xf32>
    tpu.vector_store %arg15[%173, %c0_66], %170 {strides = array<i32>} : memref<64x128xf32, #tpu.memory_space<vmem>>, vector<8x128xf32>,
    %c2_i32 = arith.constant 2 : i32
    %c8_i32_67 = arith.constant 8 : i32
    %175 = arith.muli %c2_i32, %c8_i32_67 : i32
    %176 = tpu.assume_multiple %175, 8 : i32
    %c7_i32_68 = arith.constant 7 : i32
    %177 = arith.subi %c7_i32_68, %c2_i32 : i32
    %c8_i32_69 = arith.constant 8 : i32
    %178 = arith.muli %177, %c8_i32_69 : i32
    %179 = tpu.assume_multiple %178, 8 : i32
    %180 = arith.truncf %139 : vector<8x128xf32> to vector<8x128xbf16>
    %c0_70 = arith.constant 0 : index
    %c0_71 = arith.constant 0 : index
    %181 = vector.load %arg3[%c0_70, %c0_71] : memref<128x512xbf16, #tpu.memory_space<vmem>>, vector<128x512xbf16>
    %cst_72 = arith.constant dense<0.000000e+00> : vector<8x512xf32>
    %182 = tpu.matmul %180, %181, %cst_72 {dimension_numbers = #tpu.dot_dimension_numbers<[1], [0], [0], [1], [0, 0, 1, 1], [], []>} : vector<8x128xbf16>, vector<128x512xbf16>, vector<8x512xf32> -> vector<8x512xf32>
    %183 = arith.truncf %170 : vector<8x128xf32> to vector<8x128xbf16>
    %c0_73 = arith.constant 0 : index
    %c0_74 = arith.constant 0 : index
    %184 = vector.load %arg4[%c0_73, %c0_74] : memref<128x512xbf16, #tpu.memory_space<vmem>>, vector<128x512xbf16>
    %cst_75 = arith.constant dense<0.000000e+00> : vector<8x512xf32>
    %185 = tpu.matmul %183, %184, %cst_75 {dimension_numbers = #tpu.dot_dimension_numbers<[1], [0], [0], [1], [0, 0, 1, 1], [], []>} : vector<8x128xbf16>, vector<128x512xbf16>, vector<8x512xf32> -> vector<8x512xf32>
    %186 = arith.index_cast %176 : i32 to index
    %c0_76 = arith.constant 0 : index
    %187 = vector.load %arg12[%186, %c0_76] : memref<64x1024xf32, #tpu.memory_space<vmem>>, vector<8x512xf32>
    %188 = arith.addf %187, %182 : vector<8x512xf32>
    %189 = arith.index_cast %179 : i32 to index
    %c512_77 = arith.constant 512 : index
    %190 = vector.load %arg12[%189, %c512_77] : memref<64x1024xf32, #tpu.memory_space<vmem>>, vector<8x512xf32>
    %191 = arith.addf %190, %185 : vector<8x512xf32>
    %192 = vector.extract_strided_slice %188 {offsets = [0, 0], sizes = [8, 128], strides = [1, 1]} : vector<8x512xf32> to vector<8x128xf32>
    %cst_78 = arith.constant 5.000000e-01 : f32
    %193 = vector.broadcast %cst_78 : f32 to vector<8x128xf32>
    %194 = arith.mulf %193, %192 : vector<8x128xf32>
    %195 = math.tanh %194 : vector<8x128xf32>
    %cst_79 = arith.constant 5.000000e-01 : f32
    %196 = vector.broadcast %cst_79 : f32 to vector<8x128xf32>
    %197 = arith.mulf %196, %195 : vector<8x128xf32>
    %cst_80 = arith.constant 5.000000e-01 : f32
    %198 = vector.broadcast %cst_80 : f32 to vector<8x128xf32>
    %199 = arith.addf %197, %198 : vector<8x128xf32>
    %200 = vector.extract_strided_slice %188 {offsets = [0, 128], sizes = [8, 128], strides = [1, 1]} : vector<8x512xf32> to vector<8x128xf32>
    %cst_81 = arith.constant 5.000000e-01 : f32
    %201 = vector.broadcast %cst_81 : f32 to vector<8x128xf32>
    %202 = arith.mulf %201, %200 : vector<8x128xf32>
    %203 = math.tanh %202 : vector<8x128xf32>
    %cst_82 = arith.constant 5.000000e-01 : f32
    %204 = vector.broadcast %cst_82 : f32 to vector<8x128xf32>
    %205 = arith.mulf %204, %203 : vector<8x128xf32>
    %cst_83 = arith.constant 5.000000e-01 : f32
    %206 = vector.broadcast %cst_83 : f32 to vector<8x128xf32>
    %207 = arith.addf %205, %206 : vector<8x128xf32>
    %208 = vector.extract_strided_slice %188 {offsets = [0, 256], sizes = [8, 128], strides = [1, 1]} : vector<8x512xf32> to vector<8x128xf32>
    %209 = math.tanh %208 : vector<8x128xf32>
    %210 = vector.extract_strided_slice %188 {offsets = [0, 384], sizes = [8, 128], strides = [1, 1]} : vector<8x512xf32> to vector<8x128xf32>
    %cst_84 = arith.constant 5.000000e-01 : f32
    %211 = vector.broadcast %cst_84 : f32 to vector<8x128xf32>
    %212 = arith.mulf %211, %210 : vector<8x128xf32>
    %213 = math.tanh %212 : vector<8x128xf32>
    %cst_85 = arith.constant 5.000000e-01 : f32
    %214 = vector.broadcast %cst_85 : f32 to vector<8x128xf32>
    %215 = arith.mulf %214, %213 : vector<8x128xf32>
    %cst_86 = arith.constant 5.000000e-01 : f32
    %216 = vector.broadcast %cst_86 : f32 to vector<8x128xf32>
    %217 = arith.addf %215, %216 : vector<8x128xf32>
    %218 = arith.mulf %207, %137 : vector<8x128xf32>
    %219 = arith.mulf %199, %209 : vector<8x128xf32>
    %220 = arith.addf %218, %219 : vector<8x128xf32>
    %221 = math.tanh %220 : vector<8x128xf32>
    %222 = arith.mulf %217, %221 : vector<8x128xf32>
    %223 = vector.extract_strided_slice %191 {offsets = [0, 0], sizes = [8, 128], strides = [1, 1]} : vector<8x512xf32> to vector<8x128xf32>
    %cst_87 = arith.constant 5.000000e-01 : f32
    %224 = vector.broadcast %cst_87 : f32 to vector<8x128xf32>
    %225 = arith.mulf %224, %223 : vector<8x128xf32>
    %226 = math.tanh %225 : vector<8x128xf32>
    %cst_88 = arith.constant 5.000000e-01 : f32
    %227 = vector.broadcast %cst_88 : f32 to vector<8x128xf32>
    %228 = arith.mulf %227, %226 : vector<8x128xf32>
    %cst_89 = arith.constant 5.000000e-01 : f32
    %229 = vector.broadcast %cst_89 : f32 to vector<8x128xf32>
    %230 = arith.addf %228, %229 : vector<8x128xf32>
    %231 = vector.extract_strided_slice %191 {offsets = [0, 128], sizes = [8, 128], strides = [1, 1]} : vector<8x512xf32> to vector<8x128xf32>
    %cst_90 = arith.constant 5.000000e-01 : f32
    %232 = vector.broadcast %cst_90 : f32 to vector<8x128xf32>
    %233 = arith.mulf %232, %231 : vector<8x128xf32>
    %234 = math.tanh %233 : vector<8x128xf32>
    %cst_91 = arith.constant 5.000000e-01 : f32
    %235 = vector.broadcast %cst_91 : f32 to vector<8x128xf32>
    %236 = arith.mulf %235, %234 : vector<8x128xf32>
    %cst_92 = arith.constant 5.000000e-01 : f32
    %237 = vector.broadcast %cst_92 : f32 to vector<8x128xf32>
    %238 = arith.addf %236, %237 : vector<8x128xf32>
    %239 = vector.extract_strided_slice %191 {offsets = [0, 256], sizes = [8, 128], strides = [1, 1]} : vector<8x512xf32> to vector<8x128xf32>
    %240 = math.tanh %239 : vector<8x128xf32>
    %241 = vector.extract_strided_slice %191 {offsets = [0, 384], sizes = [8, 128], strides = [1, 1]} : vector<8x512xf32> to vector<8x128xf32>
    %cst_93 = arith.constant 5.000000e-01 : f32
    %242 = vector.broadcast %cst_93 : f32 to vector<8x128xf32>
    %243 = arith.mulf %242, %241 : vector<8x128xf32>
    %244 = math.tanh %243 : vector<8x128xf32>
    %cst_94 = arith.constant 5.000000e-01 : f32
    %245 = vector.broadcast %cst_94 : f32 to vector<8x128xf32>
    %246 = arith.mulf %245, %244 : vector<8x128xf32>
    %cst_95 = arith.constant 5.000000e-01 : f32
    %247 = vector.broadcast %cst_95 : f32 to vector<8x128xf32>
    %248 = arith.addf %246, %247 : vector<8x128xf32>
    %249 = arith.mulf %238, %168 : vector<8x128xf32>
    %250 = arith.mulf %230, %240 : vector<8x128xf32>
    %251 = arith.addf %249, %250 : vector<8x128xf32>
    %252 = math.tanh %251 : vector<8x128xf32>
    %253 = arith.mulf %248, %252 : vector<8x128xf32>
    %254 = arith.index_cast %176 : i32 to index
    %c0_96 = arith.constant 0 : index
    %255 = vector.load %arg14[%254, %c0_96] : memref<64x128xf32, #tpu.memory_space<vmem>>, vector<8x128xf32>
    tpu.vector_store %arg14[%254, %c0_96], %222 {strides = array<i32>} : memref<64x128xf32, #tpu.memory_space<vmem>>, vector<8x128xf32>,
    %256 = arith.index_cast %179 : i32 to index
    %c0_97 = arith.constant 0 : index
    %257 = vector.load %arg15[%256, %c0_97] : memref<64x128xf32, #tpu.memory_space<vmem>>, vector<8x128xf32>
    tpu.vector_store %arg15[%256, %c0_97], %253 {strides = array<i32>} : memref<64x128xf32, #tpu.memory_space<vmem>>, vector<8x128xf32>,
    %c3_i32 = arith.constant 3 : i32
    %c8_i32_98 = arith.constant 8 : i32
    %258 = arith.muli %c3_i32, %c8_i32_98 : i32
    %259 = tpu.assume_multiple %258, 8 : i32
    %c7_i32_99 = arith.constant 7 : i32
    %260 = arith.subi %c7_i32_99, %c3_i32 : i32
    %c8_i32_100 = arith.constant 8 : i32
    %261 = arith.muli %260, %c8_i32_100 : i32
    %262 = tpu.assume_multiple %261, 8 : i32
    %263 = arith.truncf %222 : vector<8x128xf32> to vector<8x128xbf16>
    %c0_101 = arith.constant 0 : index
    %c0_102 = arith.constant 0 : index
    %264 = vector.load %arg3[%c0_101, %c0_102] : memref<128x512xbf16, #tpu.memory_space<vmem>>, vector<128x512xbf16>
    %cst_103 = arith.constant dense<0.000000e+00> : vector<8x512xf32>
    %265 = tpu.matmul %263, %264, %cst_103 {dimension_numbers = #tpu.dot_dimension_numbers<[1], [0], [0], [1], [0, 0, 1, 1], [], []>} : vector<8x128xbf16>, vector<128x512xbf16>, vector<8x512xf32> -> vector<8x512xf32>
    %266 = arith.truncf %253 : vector<8x128xf32> to vector<8x128xbf16>
    %c0_104 = arith.constant 0 : index
    %c0_105 = arith.constant 0 : index
    %267 = vector.load %arg4[%c0_104, %c0_105] : memref<128x512xbf16, #tpu.memory_space<vmem>>, vector<128x512xbf16>
    %cst_106 = arith.constant dense<0.000000e+00> : vector<8x512xf32>
    %268 = tpu.matmul %266, %267, %cst_106 {dimension_numbers = #tpu.dot_dimension_numbers<[1], [0], [0], [1], [0, 0, 1, 1], [], []>} : vector<8x128xbf16>, vector<128x512xbf16>, vector<8x512xf32> -> vector<8x512xf32>
    %269 = arith.index_cast %259 : i32 to index
    %c0_107 = arith.constant 0 : index
    %270 = vector.load %arg12[%269, %c0_107] : memref<64x1024xf32, #tpu.memory_space<vmem>>, vector<8x512xf32>
    %271 = arith.addf %270, %265 : vector<8x512xf32>
    %272 = arith.index_cast %262 : i32 to index
    %c512_108 = arith.constant 512 : index
    %273 = vector.load %arg12[%272, %c512_108] : memref<64x1024xf32, #tpu.memory_space<vmem>>, vector<8x512xf32>
    %274 = arith.addf %273, %268 : vector<8x512xf32>
    %275 = vector.extract_strided_slice %271 {offsets = [0, 0], sizes = [8, 128], strides = [1, 1]} : vector<8x512xf32> to vector<8x128xf32>
    %cst_109 = arith.constant 5.000000e-01 : f32
    %276 = vector.broadcast %cst_109 : f32 to vector<8x128xf32>
    %277 = arith.mulf %276, %275 : vector<8x128xf32>
    %278 = math.tanh %277 : vector<8x128xf32>
    %cst_110 = arith.constant 5.000000e-01 : f32
    %279 = vector.broadcast %cst_110 : f32 to vector<8x128xf32>
    %280 = arith.mulf %279, %278 : vector<8x128xf32>
    %cst_111 = arith.constant 5.000000e-01 : f32
    %281 = vector.broadcast %cst_111 : f32 to vector<8x128xf32>
    %282 = arith.addf %280, %281 : vector<8x128xf32>
    %283 = vector.extract_strided_slice %271 {offsets = [0, 128], sizes = [8, 128], strides = [1, 1]} : vector<8x512xf32> to vector<8x128xf32>
    %cst_112 = arith.constant 5.000000e-01 : f32
    %284 = vector.broadcast %cst_112 : f32 to vector<8x128xf32>
    %285 = arith.mulf %284, %283 : vector<8x128xf32>
    %286 = math.tanh %285 : vector<8x128xf32>
    %cst_113 = arith.constant 5.000000e-01 : f32
    %287 = vector.broadcast %cst_113 : f32 to vector<8x128xf32>
    %288 = arith.mulf %287, %286 : vector<8x128xf32>
    %cst_114 = arith.constant 5.000000e-01 : f32
    %289 = vector.broadcast %cst_114 : f32 to vector<8x128xf32>
    %290 = arith.addf %288, %289 : vector<8x128xf32>
    %291 = vector.extract_strided_slice %271 {offsets = [0, 256], sizes = [8, 128], strides = [1, 1]} : vector<8x512xf32> to vector<8x128xf32>
    %292 = math.tanh %291 : vector<8x128xf32>
    %293 = vector.extract_strided_slice %271 {offsets = [0, 384], sizes = [8, 128], strides = [1, 1]} : vector<8x512xf32> to vector<8x128xf32>
    %cst_115 = arith.constant 5.000000e-01 : f32
    %294 = vector.broadcast %cst_115 : f32 to vector<8x128xf32>
    %295 = arith.mulf %294, %293 : vector<8x128xf32>
    %296 = math.tanh %295 : vector<8x128xf32>
    %cst_116 = arith.constant 5.000000e-01 : f32
    %297 = vector.broadcast %cst_116 : f32 to vector<8x128xf32>
    %298 = arith.mulf %297, %296 : vector<8x128xf32>
    %cst_117 = arith.constant 5.000000e-01 : f32
    %299 = vector.broadcast %cst_117 : f32 to vector<8x128xf32>
    %300 = arith.addf %298, %299 : vector<8x128xf32>
    %301 = arith.mulf %290, %220 : vector<8x128xf32>
    %302 = arith.mulf %282, %292 : vector<8x128xf32>
    %303 = arith.addf %301, %302 : vector<8x128xf32>
    %304 = math.tanh %303 : vector<8x128xf32>
    %305 = arith.mulf %300, %304 : vector<8x128xf32>
    %306 = vector.extract_strided_slice %274 {offsets = [0, 0], sizes = [8, 128], strides = [1, 1]} : vector<8x512xf32> to vector<8x128xf32>
    %cst_118 = arith.constant 5.000000e-01 : f32
    %307 = vector.broadcast %cst_118 : f32 to vector<8x128xf32>
    %308 = arith.mulf %307, %306 : vector<8x128xf32>
    %309 = math.tanh %308 : vector<8x128xf32>
    %cst_119 = arith.constant 5.000000e-01 : f32
    %310 = vector.broadcast %cst_119 : f32 to vector<8x128xf32>
    %311 = arith.mulf %310, %309 : vector<8x128xf32>
    %cst_120 = arith.constant 5.000000e-01 : f32
    %312 = vector.broadcast %cst_120 : f32 to vector<8x128xf32>
    %313 = arith.addf %311, %312 : vector<8x128xf32>
    %314 = vector.extract_strided_slice %274 {offsets = [0, 128], sizes = [8, 128], strides = [1, 1]} : vector<8x512xf32> to vector<8x128xf32>
    %cst_121 = arith.constant 5.000000e-01 : f32
    %315 = vector.broadcast %cst_121 : f32 to vector<8x128xf32>
    %316 = arith.mulf %315, %314 : vector<8x128xf32>
    %317 = math.tanh %316 : vector<8x128xf32>
    %cst_122 = arith.constant 5.000000e-01 : f32
    %318 = vector.broadcast %cst_122 : f32 to vector<8x128xf32>
    %319 = arith.mulf %318, %317 : vector<8x128xf32>
    %cst_123 = arith.constant 5.000000e-01 : f32
    %320 = vector.broadcast %cst_123 : f32 to vector<8x128xf32>
    %321 = arith.addf %319, %320 : vector<8x128xf32>
    %322 = vector.extract_strided_slice %274 {offsets = [0, 256], sizes = [8, 128], strides = [1, 1]} : vector<8x512xf32> to vector<8x128xf32>
    %323 = math.tanh %322 : vector<8x128xf32>
    %324 = vector.extract_strided_slice %274 {offsets = [0, 384], sizes = [8, 128], strides = [1, 1]} : vector<8x512xf32> to vector<8x128xf32>
    %cst_124 = arith.constant 5.000000e-01 : f32
    %325 = vector.broadcast %cst_124 : f32 to vector<8x128xf32>
    %326 = arith.mulf %325, %324 : vector<8x128xf32>
    %327 = math.tanh %326 : vector<8x128xf32>
    %cst_125 = arith.constant 5.000000e-01 : f32
    %328 = vector.broadcast %cst_125 : f32 to vector<8x128xf32>
    %329 = arith.mulf %328, %327 : vector<8x128xf32>
    %cst_126 = arith.constant 5.000000e-01 : f32
    %330 = vector.broadcast %cst_126 : f32 to vector<8x128xf32>
    %331 = arith.addf %329, %330 : vector<8x128xf32>
    %332 = arith.mulf %321, %251 : vector<8x128xf32>
    %333 = arith.mulf %313, %323 : vector<8x128xf32>
    %334 = arith.addf %332, %333 : vector<8x128xf32>
    %335 = math.tanh %334 : vector<8x128xf32>
    %336 = arith.mulf %331, %335 : vector<8x128xf32>
    %337 = arith.index_cast %259 : i32 to index
    %c0_127 = arith.constant 0 : index
    %338 = vector.load %arg14[%337, %c0_127] : memref<64x128xf32, #tpu.memory_space<vmem>>, vector<8x128xf32>
    tpu.vector_store %arg14[%337, %c0_127], %305 {strides = array<i32>} : memref<64x128xf32, #tpu.memory_space<vmem>>, vector<8x128xf32>,
    %339 = arith.index_cast %262 : i32 to index
    %c0_128 = arith.constant 0 : index
    %340 = vector.load %arg15[%339, %c0_128] : memref<64x128xf32, #tpu.memory_space<vmem>>, vector<8x128xf32>
    tpu.vector_store %arg15[%339, %c0_128], %336 {strides = array<i32>} : memref<64x128xf32, #tpu.memory_space<vmem>>, vector<8x128xf32>,
    %c4_i32 = arith.constant 4 : i32
    %c8_i32_129 = arith.constant 8 : i32
    %341 = arith.muli %c4_i32, %c8_i32_129 : i32
    %342 = tpu.assume_multiple %341, 8 : i32
    %c7_i32_130 = arith.constant 7 : i32
    %343 = arith.subi %c7_i32_130, %c4_i32 : i32
    %c8_i32_131 = arith.constant 8 : i32
    %344 = arith.muli %343, %c8_i32_131 : i32
    %345 = tpu.assume_multiple %344, 8 : i32
    %346 = arith.truncf %305 : vector<8x128xf32> to vector<8x128xbf16>
    %c0_132 = arith.constant 0 : index
    %c0_133 = arith.constant 0 : index
    %347 = vector.load %arg3[%c0_132, %c0_133] : memref<128x512xbf16, #tpu.memory_space<vmem>>, vector<128x512xbf16>
    %cst_134 = arith.constant dense<0.000000e+00> : vector<8x512xf32>
    %348 = tpu.matmul %346, %347, %cst_134 {dimension_numbers = #tpu.dot_dimension_numbers<[1], [0], [0], [1], [0, 0, 1, 1], [], []>} : vector<8x128xbf16>, vector<128x512xbf16>, vector<8x512xf32> -> vector<8x512xf32>
    %349 = arith.truncf %336 : vector<8x128xf32> to vector<8x128xbf16>
    %c0_135 = arith.constant 0 : index
    %c0_136 = arith.constant 0 : index
    %350 = vector.load %arg4[%c0_135, %c0_136] : memref<128x512xbf16, #tpu.memory_space<vmem>>, vector<128x512xbf16>
    %cst_137 = arith.constant dense<0.000000e+00> : vector<8x512xf32>
    %351 = tpu.matmul %349, %350, %cst_137 {dimension_numbers = #tpu.dot_dimension_numbers<[1], [0], [0], [1], [0, 0, 1, 1], [], []>} : vector<8x128xbf16>, vector<128x512xbf16>, vector<8x512xf32> -> vector<8x512xf32>
    %352 = arith.index_cast %342 : i32 to index
    %c0_138 = arith.constant 0 : index
    %353 = vector.load %arg12[%352, %c0_138] : memref<64x1024xf32, #tpu.memory_space<vmem>>, vector<8x512xf32>
    %354 = arith.addf %353, %348 : vector<8x512xf32>
    %355 = arith.index_cast %345 : i32 to index
    %c512_139 = arith.constant 512 : index
    %356 = vector.load %arg12[%355, %c512_139] : memref<64x1024xf32, #tpu.memory_space<vmem>>, vector<8x512xf32>
    %357 = arith.addf %356, %351 : vector<8x512xf32>
    %358 = vector.extract_strided_slice %354 {offsets = [0, 0], sizes = [8, 128], strides = [1, 1]} : vector<8x512xf32> to vector<8x128xf32>
    %cst_140 = arith.constant 5.000000e-01 : f32
    %359 = vector.broadcast %cst_140 : f32 to vector<8x128xf32>
    %360 = arith.mulf %359, %358 : vector<8x128xf32>
    %361 = math.tanh %360 : vector<8x128xf32>
    %cst_141 = arith.constant 5.000000e-01 : f32
    %362 = vector.broadcast %cst_141 : f32 to vector<8x128xf32>
    %363 = arith.mulf %362, %361 : vector<8x128xf32>
    %cst_142 = arith.constant 5.000000e-01 : f32
    %364 = vector.broadcast %cst_142 : f32 to vector<8x128xf32>
    %365 = arith.addf %363, %364 : vector<8x128xf32>
    %366 = vector.extract_strided_slice %354 {offsets = [0, 128], sizes = [8, 128], strides = [1, 1]} : vector<8x512xf32> to vector<8x128xf32>
    %cst_143 = arith.constant 5.000000e-01 : f32
    %367 = vector.broadcast %cst_143 : f32 to vector<8x128xf32>
    %368 = arith.mulf %367, %366 : vector<8x128xf32>
    %369 = math.tanh %368 : vector<8x128xf32>
    %cst_144 = arith.constant 5.000000e-01 : f32
    %370 = vector.broadcast %cst_144 : f32 to vector<8x128xf32>
    %371 = arith.mulf %370, %369 : vector<8x128xf32>
    %cst_145 = arith.constant 5.000000e-01 : f32
    %372 = vector.broadcast %cst_145 : f32 to vector<8x128xf32>
    %373 = arith.addf %371, %372 : vector<8x128xf32>
    %374 = vector.extract_strided_slice %354 {offsets = [0, 256], sizes = [8, 128], strides = [1, 1]} : vector<8x512xf32> to vector<8x128xf32>
    %375 = math.tanh %374 : vector<8x128xf32>
    %376 = vector.extract_strided_slice %354 {offsets = [0, 384], sizes = [8, 128], strides = [1, 1]} : vector<8x512xf32> to vector<8x128xf32>
    %cst_146 = arith.constant 5.000000e-01 : f32
    %377 = vector.broadcast %cst_146 : f32 to vector<8x128xf32>
    %378 = arith.mulf %377, %376 : vector<8x128xf32>
    %379 = math.tanh %378 : vector<8x128xf32>
    %cst_147 = arith.constant 5.000000e-01 : f32
    %380 = vector.broadcast %cst_147 : f32 to vector<8x128xf32>
    %381 = arith.mulf %380, %379 : vector<8x128xf32>
    %cst_148 = arith.constant 5.000000e-01 : f32
    %382 = vector.broadcast %cst_148 : f32 to vector<8x128xf32>
    %383 = arith.addf %381, %382 : vector<8x128xf32>
    %384 = arith.mulf %373, %303 : vector<8x128xf32>
    %385 = arith.mulf %365, %375 : vector<8x128xf32>
    %386 = arith.addf %384, %385 : vector<8x128xf32>
    %387 = math.tanh %386 : vector<8x128xf32>
    %388 = arith.mulf %383, %387 : vector<8x128xf32>
    %389 = vector.extract_strided_slice %357 {offsets = [0, 0], sizes = [8, 128], strides = [1, 1]} : vector<8x512xf32> to vector<8x128xf32>
    %cst_149 = arith.constant 5.000000e-01 : f32
    %390 = vector.broadcast %cst_149 : f32 to vector<8x128xf32>
    %391 = arith.mulf %390, %389 : vector<8x128xf32>
    %392 = math.tanh %391 : vector<8x128xf32>
    %cst_150 = arith.constant 5.000000e-01 : f32
    %393 = vector.broadcast %cst_150 : f32 to vector<8x128xf32>
    %394 = arith.mulf %393, %392 : vector<8x128xf32>
    %cst_151 = arith.constant 5.000000e-01 : f32
    %395 = vector.broadcast %cst_151 : f32 to vector<8x128xf32>
    %396 = arith.addf %394, %395 : vector<8x128xf32>
    %397 = vector.extract_strided_slice %357 {offsets = [0, 128], sizes = [8, 128], strides = [1, 1]} : vector<8x512xf32> to vector<8x128xf32>
    %cst_152 = arith.constant 5.000000e-01 : f32
    %398 = vector.broadcast %cst_152 : f32 to vector<8x128xf32>
    %399 = arith.mulf %398, %397 : vector<8x128xf32>
    %400 = math.tanh %399 : vector<8x128xf32>
    %cst_153 = arith.constant 5.000000e-01 : f32
    %401 = vector.broadcast %cst_153 : f32 to vector<8x128xf32>
    %402 = arith.mulf %401, %400 : vector<8x128xf32>
    %cst_154 = arith.constant 5.000000e-01 : f32
    %403 = vector.broadcast %cst_154 : f32 to vector<8x128xf32>
    %404 = arith.addf %402, %403 : vector<8x128xf32>
    %405 = vector.extract_strided_slice %357 {offsets = [0, 256], sizes = [8, 128], strides = [1, 1]} : vector<8x512xf32> to vector<8x128xf32>
    %406 = math.tanh %405 : vector<8x128xf32>
    %407 = vector.extract_strided_slice %357 {offsets = [0, 384], sizes = [8, 128], strides = [1, 1]} : vector<8x512xf32> to vector<8x128xf32>
    %cst_155 = arith.constant 5.000000e-01 : f32
    %408 = vector.broadcast %cst_155 : f32 to vector<8x128xf32>
    %409 = arith.mulf %408, %407 : vector<8x128xf32>
    %410 = math.tanh %409 : vector<8x128xf32>
    %cst_156 = arith.constant 5.000000e-01 : f32
    %411 = vector.broadcast %cst_156 : f32 to vector<8x128xf32>
    %412 = arith.mulf %411, %410 : vector<8x128xf32>
    %cst_157 = arith.constant 5.000000e-01 : f32
    %413 = vector.broadcast %cst_157 : f32 to vector<8x128xf32>
    %414 = arith.addf %412, %413 : vector<8x128xf32>
    %415 = arith.mulf %404, %334 : vector<8x128xf32>
    %416 = arith.mulf %396, %406 : vector<8x128xf32>
    %417 = arith.addf %415, %416 : vector<8x128xf32>
    %418 = math.tanh %417 : vector<8x128xf32>
    %419 = arith.mulf %414, %418 : vector<8x128xf32>
    %420 = arith.index_cast %342 : i32 to index
    %c0_158 = arith.constant 0 : index
    %421 = vector.load %arg14[%420, %c0_158] : memref<64x128xf32, #tpu.memory_space<vmem>>, vector<8x128xf32>
    tpu.vector_store %arg14[%420, %c0_158], %388 {strides = array<i32>} : memref<64x128xf32, #tpu.memory_space<vmem>>, vector<8x128xf32>,
    %422 = arith.index_cast %345 : i32 to index
    %c0_159 = arith.constant 0 : index
    %423 = vector.load %arg15[%422, %c0_159] : memref<64x128xf32, #tpu.memory_space<vmem>>, vector<8x128xf32>
    tpu.vector_store %arg15[%422, %c0_159], %419 {strides = array<i32>} : memref<64x128xf32, #tpu.memory_space<vmem>>, vector<8x128xf32>,
    %c5_i32 = arith.constant 5 : i32
    %c8_i32_160 = arith.constant 8 : i32
    %424 = arith.muli %c5_i32, %c8_i32_160 : i32
    %425 = tpu.assume_multiple %424, 8 : i32
    %c7_i32_161 = arith.constant 7 : i32
    %426 = arith.subi %c7_i32_161, %c5_i32 : i32
    %c8_i32_162 = arith.constant 8 : i32
    %427 = arith.muli %426, %c8_i32_162 : i32
    %428 = tpu.assume_multiple %427, 8 : i32
    %429 = arith.truncf %388 : vector<8x128xf32> to vector<8x128xbf16>
    %c0_163 = arith.constant 0 : index
    %c0_164 = arith.constant 0 : index
    %430 = vector.load %arg3[%c0_163, %c0_164] : memref<128x512xbf16, #tpu.memory_space<vmem>>, vector<128x512xbf16>
    %cst_165 = arith.constant dense<0.000000e+00> : vector<8x512xf32>
    %431 = tpu.matmul %429, %430, %cst_165 {dimension_numbers = #tpu.dot_dimension_numbers<[1], [0], [0], [1], [0, 0, 1, 1], [], []>} : vector<8x128xbf16>, vector<128x512xbf16>, vector<8x512xf32> -> vector<8x512xf32>
    %432 = arith.truncf %419 : vector<8x128xf32> to vector<8x128xbf16>
    %c0_166 = arith.constant 0 : index
    %c0_167 = arith.constant 0 : index
    %433 = vector.load %arg4[%c0_166, %c0_167] : memref<128x512xbf16, #tpu.memory_space<vmem>>, vector<128x512xbf16>
    %cst_168 = arith.constant dense<0.000000e+00> : vector<8x512xf32>
    %434 = tpu.matmul %432, %433, %cst_168 {dimension_numbers = #tpu.dot_dimension_numbers<[1], [0], [0], [1], [0, 0, 1, 1], [], []>} : vector<8x128xbf16>, vector<128x512xbf16>, vector<8x512xf32> -> vector<8x512xf32>
    %435 = arith.index_cast %425 : i32 to index
    %c0_169 = arith.constant 0 : index
    %436 = vector.load %arg12[%435, %c0_169] : memref<64x1024xf32, #tpu.memory_space<vmem>>, vector<8x512xf32>
    %437 = arith.addf %436, %431 : vector<8x512xf32>
    %438 = arith.index_cast %428 : i32 to index
    %c512_170 = arith.constant 512 : index
    %439 = vector.load %arg12[%438, %c512_170] : memref<64x1024xf32, #tpu.memory_space<vmem>>, vector<8x512xf32>
    %440 = arith.addf %439, %434 : vector<8x512xf32>
    %441 = vector.extract_strided_slice %437 {offsets = [0, 0], sizes = [8, 128], strides = [1, 1]} : vector<8x512xf32> to vector<8x128xf32>
    %cst_171 = arith.constant 5.000000e-01 : f32
    %442 = vector.broadcast %cst_171 : f32 to vector<8x128xf32>
    %443 = arith.mulf %442, %441 : vector<8x128xf32>
    %444 = math.tanh %443 : vector<8x128xf32>
    %cst_172 = arith.constant 5.000000e-01 : f32
    %445 = vector.broadcast %cst_172 : f32 to vector<8x128xf32>
    %446 = arith.mulf %445, %444 : vector<8x128xf32>
    %cst_173 = arith.constant 5.000000e-01 : f32
    %447 = vector.broadcast %cst_173 : f32 to vector<8x128xf32>
    %448 = arith.addf %446, %447 : vector<8x128xf32>
    %449 = vector.extract_strided_slice %437 {offsets = [0, 128], sizes = [8, 128], strides = [1, 1]} : vector<8x512xf32> to vector<8x128xf32>
    %cst_174 = arith.constant 5.000000e-01 : f32
    %450 = vector.broadcast %cst_174 : f32 to vector<8x128xf32>
    %451 = arith.mulf %450, %449 : vector<8x128xf32>
    %452 = math.tanh %451 : vector<8x128xf32>
    %cst_175 = arith.constant 5.000000e-01 : f32
    %453 = vector.broadcast %cst_175 : f32 to vector<8x128xf32>
    %454 = arith.mulf %453, %452 : vector<8x128xf32>
    %cst_176 = arith.constant 5.000000e-01 : f32
    %455 = vector.broadcast %cst_176 : f32 to vector<8x128xf32>
    %456 = arith.addf %454, %455 : vector<8x128xf32>
    %457 = vector.extract_strided_slice %437 {offsets = [0, 256], sizes = [8, 128], strides = [1, 1]} : vector<8x512xf32> to vector<8x128xf32>
    %458 = math.tanh %457 : vector<8x128xf32>
    %459 = vector.extract_strided_slice %437 {offsets = [0, 384], sizes = [8, 128], strides = [1, 1]} : vector<8x512xf32> to vector<8x128xf32>
    %cst_177 = arith.constant 5.000000e-01 : f32
    %460 = vector.broadcast %cst_177 : f32 to vector<8x128xf32>
    %461 = arith.mulf %460, %459 : vector<8x128xf32>
    %462 = math.tanh %461 : vector<8x128xf32>
    %cst_178 = arith.constant 5.000000e-01 : f32
    %463 = vector.broadcast %cst_178 : f32 to vector<8x128xf32>
    %464 = arith.mulf %463, %462 : vector<8x128xf32>
    %cst_179 = arith.constant 5.000000e-01 : f32
    %465 = vector.broadcast %cst_179 : f32 to vector<8x128xf32>
    %466 = arith.addf %464, %465 : vector<8x128xf32>
    %467 = arith.mulf %456, %386 : vector<8x128xf32>
    %468 = arith.mulf %448, %458 : vector<8x128xf32>
    %469 = arith.addf %467, %468 : vector<8x128xf32>
    %470 = math.tanh %469 : vector<8x128xf32>
    %471 = arith.mulf %466, %470 : vector<8x128xf32>
    %472 = vector.extract_strided_slice %440 {offsets = [0, 0], sizes = [8, 128], strides = [1, 1]} : vector<8x512xf32> to vector<8x128xf32>
    %cst_180 = arith.constant 5.000000e-01 : f32
    %473 = vector.broadcast %cst_180 : f32 to vector<8x128xf32>
    %474 = arith.mulf %473, %472 : vector<8x128xf32>
    %475 = math.tanh %474 : vector<8x128xf32>
    %cst_181 = arith.constant 5.000000e-01 : f32
    %476 = vector.broadcast %cst_181 : f32 to vector<8x128xf32>
    %477 = arith.mulf %476, %475 : vector<8x128xf32>
    %cst_182 = arith.constant 5.000000e-01 : f32
    %478 = vector.broadcast %cst_182 : f32 to vector<8x128xf32>
    %479 = arith.addf %477, %478 : vector<8x128xf32>
    %480 = vector.extract_strided_slice %440 {offsets = [0, 128], sizes = [8, 128], strides = [1, 1]} : vector<8x512xf32> to vector<8x128xf32>
    %cst_183 = arith.constant 5.000000e-01 : f32
    %481 = vector.broadcast %cst_183 : f32 to vector<8x128xf32>
    %482 = arith.mulf %481, %480 : vector<8x128xf32>
    %483 = math.tanh %482 : vector<8x128xf32>
    %cst_184 = arith.constant 5.000000e-01 : f32
    %484 = vector.broadcast %cst_184 : f32 to vector<8x128xf32>
    %485 = arith.mulf %484, %483 : vector<8x128xf32>
    %cst_185 = arith.constant 5.000000e-01 : f32
    %486 = vector.broadcast %cst_185 : f32 to vector<8x128xf32>
    %487 = arith.addf %485, %486 : vector<8x128xf32>
    %488 = vector.extract_strided_slice %440 {offsets = [0, 256], sizes = [8, 128], strides = [1, 1]} : vector<8x512xf32> to vector<8x128xf32>
    %489 = math.tanh %488 : vector<8x128xf32>
    %490 = vector.extract_strided_slice %440 {offsets = [0, 384], sizes = [8, 128], strides = [1, 1]} : vector<8x512xf32> to vector<8x128xf32>
    %cst_186 = arith.constant 5.000000e-01 : f32
    %491 = vector.broadcast %cst_186 : f32 to vector<8x128xf32>
    %492 = arith.mulf %491, %490 : vector<8x128xf32>
    %493 = math.tanh %492 : vector<8x128xf32>
    %cst_187 = arith.constant 5.000000e-01 : f32
    %494 = vector.broadcast %cst_187 : f32 to vector<8x128xf32>
    %495 = arith.mulf %494, %493 : vector<8x128xf32>
    %cst_188 = arith.constant 5.000000e-01 : f32
    %496 = vector.broadcast %cst_188 : f32 to vector<8x128xf32>
    %497 = arith.addf %495, %496 : vector<8x128xf32>
    %498 = arith.mulf %487, %417 : vector<8x128xf32>
    %499 = arith.mulf %479, %489 : vector<8x128xf32>
    %500 = arith.addf %498, %499 : vector<8x128xf32>
    %501 = math.tanh %500 : vector<8x128xf32>
    %502 = arith.mulf %497, %501 : vector<8x128xf32>
    %503 = arith.index_cast %425 : i32 to index
    %c0_189 = arith.constant 0 : index
    %504 = vector.load %arg14[%503, %c0_189] : memref<64x128xf32, #tpu.memory_space<vmem>>, vector<8x128xf32>
    tpu.vector_store %arg14[%503, %c0_189], %471 {strides = array<i32>} : memref<64x128xf32, #tpu.memory_space<vmem>>, vector<8x128xf32>,
    %505 = arith.index_cast %428 : i32 to index
    %c0_190 = arith.constant 0 : index
    %506 = vector.load %arg15[%505, %c0_190] : memref<64x128xf32, #tpu.memory_space<vmem>>, vector<8x128xf32>
    tpu.vector_store %arg15[%505, %c0_190], %502 {strides = array<i32>} : memref<64x128xf32, #tpu.memory_space<vmem>>, vector<8x128xf32>,
    %c6_i32 = arith.constant 6 : i32
    %c8_i32_191 = arith.constant 8 : i32
    %507 = arith.muli %c6_i32, %c8_i32_191 : i32
    %508 = tpu.assume_multiple %507, 8 : i32
    %c7_i32_192 = arith.constant 7 : i32
    %509 = arith.subi %c7_i32_192, %c6_i32 : i32
    %c8_i32_193 = arith.constant 8 : i32
    %510 = arith.muli %509, %c8_i32_193 : i32
    %511 = tpu.assume_multiple %510, 8 : i32
    %512 = arith.truncf %471 : vector<8x128xf32> to vector<8x128xbf16>
    %c0_194 = arith.constant 0 : index
    %c0_195 = arith.constant 0 : index
    %513 = vector.load %arg3[%c0_194, %c0_195] : memref<128x512xbf16, #tpu.memory_space<vmem>>, vector<128x512xbf16>
    %cst_196 = arith.constant dense<0.000000e+00> : vector<8x512xf32>
    %514 = tpu.matmul %512, %513, %cst_196 {dimension_numbers = #tpu.dot_dimension_numbers<[1], [0], [0], [1], [0, 0, 1, 1], [], []>} : vector<8x128xbf16>, vector<128x512xbf16>, vector<8x512xf32> -> vector<8x512xf32>
    %515 = arith.truncf %502 : vector<8x128xf32> to vector<8x128xbf16>
    %c0_197 = arith.constant 0 : index
    %c0_198 = arith.constant 0 : index
    %516 = vector.load %arg4[%c0_197, %c0_198] : memref<128x512xbf16, #tpu.memory_space<vmem>>, vector<128x512xbf16>
    %cst_199 = arith.constant dense<0.000000e+00> : vector<8x512xf32>
    %517 = tpu.matmul %515, %516, %cst_199 {dimension_numbers = #tpu.dot_dimension_numbers<[1], [0], [0], [1], [0, 0, 1, 1], [], []>} : vector<8x128xbf16>, vector<128x512xbf16>, vector<8x512xf32> -> vector<8x512xf32>
    %518 = arith.index_cast %508 : i32 to index
    %c0_200 = arith.constant 0 : index
    %519 = vector.load %arg12[%518, %c0_200] : memref<64x1024xf32, #tpu.memory_space<vmem>>, vector<8x512xf32>
    %520 = arith.addf %519, %514 : vector<8x512xf32>
    %521 = arith.index_cast %511 : i32 to index
    %c512_201 = arith.constant 512 : index
    %522 = vector.load %arg12[%521, %c512_201] : memref<64x1024xf32, #tpu.memory_space<vmem>>, vector<8x512xf32>
    %523 = arith.addf %522, %517 : vector<8x512xf32>
    %524 = vector.extract_strided_slice %520 {offsets = [0, 0], sizes = [8, 128], strides = [1, 1]} : vector<8x512xf32> to vector<8x128xf32>
    %cst_202 = arith.constant 5.000000e-01 : f32
    %525 = vector.broadcast %cst_202 : f32 to vector<8x128xf32>
    %526 = arith.mulf %525, %524 : vector<8x128xf32>
    %527 = math.tanh %526 : vector<8x128xf32>
    %cst_203 = arith.constant 5.000000e-01 : f32
    %528 = vector.broadcast %cst_203 : f32 to vector<8x128xf32>
    %529 = arith.mulf %528, %527 : vector<8x128xf32>
    %cst_204 = arith.constant 5.000000e-01 : f32
    %530 = vector.broadcast %cst_204 : f32 to vector<8x128xf32>
    %531 = arith.addf %529, %530 : vector<8x128xf32>
    %532 = vector.extract_strided_slice %520 {offsets = [0, 128], sizes = [8, 128], strides = [1, 1]} : vector<8x512xf32> to vector<8x128xf32>
    %cst_205 = arith.constant 5.000000e-01 : f32
    %533 = vector.broadcast %cst_205 : f32 to vector<8x128xf32>
    %534 = arith.mulf %533, %532 : vector<8x128xf32>
    %535 = math.tanh %534 : vector<8x128xf32>
    %cst_206 = arith.constant 5.000000e-01 : f32
    %536 = vector.broadcast %cst_206 : f32 to vector<8x128xf32>
    %537 = arith.mulf %536, %535 : vector<8x128xf32>
    %cst_207 = arith.constant 5.000000e-01 : f32
    %538 = vector.broadcast %cst_207 : f32 to vector<8x128xf32>
    %539 = arith.addf %537, %538 : vector<8x128xf32>
    %540 = vector.extract_strided_slice %520 {offsets = [0, 256], sizes = [8, 128], strides = [1, 1]} : vector<8x512xf32> to vector<8x128xf32>
    %541 = math.tanh %540 : vector<8x128xf32>
    %542 = vector.extract_strided_slice %520 {offsets = [0, 384], sizes = [8, 128], strides = [1, 1]} : vector<8x512xf32> to vector<8x128xf32>
    %cst_208 = arith.constant 5.000000e-01 : f32
    %543 = vector.broadcast %cst_208 : f32 to vector<8x128xf32>
    %544 = arith.mulf %543, %542 : vector<8x128xf32>
    %545 = math.tanh %544 : vector<8x128xf32>
    %cst_209 = arith.constant 5.000000e-01 : f32
    %546 = vector.broadcast %cst_209 : f32 to vector<8x128xf32>
    %547 = arith.mulf %546, %545 : vector<8x128xf32>
    %cst_210 = arith.constant 5.000000e-01 : f32
    %548 = vector.broadcast %cst_210 : f32 to vector<8x128xf32>
    %549 = arith.addf %547, %548 : vector<8x128xf32>
    %550 = arith.mulf %539, %469 : vector<8x128xf32>
    %551 = arith.mulf %531, %541 : vector<8x128xf32>
    %552 = arith.addf %550, %551 : vector<8x128xf32>
    %553 = math.tanh %552 : vector<8x128xf32>
    %554 = arith.mulf %549, %553 : vector<8x128xf32>
    %555 = vector.extract_strided_slice %523 {offsets = [0, 0], sizes = [8, 128], strides = [1, 1]} : vector<8x512xf32> to vector<8x128xf32>
    %cst_211 = arith.constant 5.000000e-01 : f32
    %556 = vector.broadcast %cst_211 : f32 to vector<8x128xf32>
    %557 = arith.mulf %556, %555 : vector<8x128xf32>
    %558 = math.tanh %557 : vector<8x128xf32>
    %cst_212 = arith.constant 5.000000e-01 : f32
    %559 = vector.broadcast %cst_212 : f32 to vector<8x128xf32>
    %560 = arith.mulf %559, %558 : vector<8x128xf32>
    %cst_213 = arith.constant 5.000000e-01 : f32
    %561 = vector.broadcast %cst_213 : f32 to vector<8x128xf32>
    %562 = arith.addf %560, %561 : vector<8x128xf32>
    %563 = vector.extract_strided_slice %523 {offsets = [0, 128], sizes = [8, 128], strides = [1, 1]} : vector<8x512xf32> to vector<8x128xf32>
    %cst_214 = arith.constant 5.000000e-01 : f32
    %564 = vector.broadcast %cst_214 : f32 to vector<8x128xf32>
    %565 = arith.mulf %564, %563 : vector<8x128xf32>
    %566 = math.tanh %565 : vector<8x128xf32>
    %cst_215 = arith.constant 5.000000e-01 : f32
    %567 = vector.broadcast %cst_215 : f32 to vector<8x128xf32>
    %568 = arith.mulf %567, %566 : vector<8x128xf32>
    %cst_216 = arith.constant 5.000000e-01 : f32
    %569 = vector.broadcast %cst_216 : f32 to vector<8x128xf32>
    %570 = arith.addf %568, %569 : vector<8x128xf32>
    %571 = vector.extract_strided_slice %523 {offsets = [0, 256], sizes = [8, 128], strides = [1, 1]} : vector<8x512xf32> to vector<8x128xf32>
    %572 = math.tanh %571 : vector<8x128xf32>
    %573 = vector.extract_strided_slice %523 {offsets = [0, 384], sizes = [8, 128], strides = [1, 1]} : vector<8x512xf32> to vector<8x128xf32>
    %cst_217 = arith.constant 5.000000e-01 : f32
    %574 = vector.broadcast %cst_217 : f32 to vector<8x128xf32>
    %575 = arith.mulf %574, %573 : vector<8x128xf32>
    %576 = math.tanh %575 : vector<8x128xf32>
    %cst_218 = arith.constant 5.000000e-01 : f32
    %577 = vector.broadcast %cst_218 : f32 to vector<8x128xf32>
    %578 = arith.mulf %577, %576 : vector<8x128xf32>
    %cst_219 = arith.constant 5.000000e-01 : f32
    %579 = vector.broadcast %cst_219 : f32 to vector<8x128xf32>
    %580 = arith.addf %578, %579 : vector<8x128xf32>
    %581 = arith.mulf %570, %500 : vector<8x128xf32>
    %582 = arith.mulf %562, %572 : vector<8x128xf32>
    %583 = arith.addf %581, %582 : vector<8x128xf32>
    %584 = math.tanh %583 : vector<8x128xf32>
    %585 = arith.mulf %580, %584 : vector<8x128xf32>
    %586 = arith.index_cast %508 : i32 to index
    %c0_220 = arith.constant 0 : index
    %587 = vector.load %arg14[%586, %c0_220] : memref<64x128xf32, #tpu.memory_space<vmem>>, vector<8x128xf32>
    tpu.vector_store %arg14[%586, %c0_220], %554 {strides = array<i32>} : memref<64x128xf32, #tpu.memory_space<vmem>>, vector<8x128xf32>,
    %588 = arith.index_cast %511 : i32 to index
    %c0_221 = arith.constant 0 : index
    %589 = vector.load %arg15[%588, %c0_221] : memref<64x128xf32, #tpu.memory_space<vmem>>, vector<8x128xf32>
    tpu.vector_store %arg15[%588, %c0_221], %585 {strides = array<i32>} : memref<64x128xf32, #tpu.memory_space<vmem>>, vector<8x128xf32>,
    %c7_i32_222 = arith.constant 7 : i32
    %c8_i32_223 = arith.constant 8 : i32
    %590 = arith.muli %c7_i32_222, %c8_i32_223 : i32
    %591 = tpu.assume_multiple %590, 8 : i32
    %c7_i32_224 = arith.constant 7 : i32
    %592 = arith.subi %c7_i32_224, %c7_i32_222 : i32
    %c8_i32_225 = arith.constant 8 : i32
    %593 = arith.muli %592, %c8_i32_225 : i32
    %594 = tpu.assume_multiple %593, 8 : i32
    %595 = arith.truncf %554 : vector<8x128xf32> to vector<8x128xbf16>
    %c0_226 = arith.constant 0 : index
    %c0_227 = arith.constant 0 : index
    %596 = vector.load %arg3[%c0_226, %c0_227] : memref<128x512xbf16, #tpu.memory_space<vmem>>, vector<128x512xbf16>
    %cst_228 = arith.constant dense<0.000000e+00> : vector<8x512xf32>
    %597 = tpu.matmul %595, %596, %cst_228 {dimension_numbers = #tpu.dot_dimension_numbers<[1], [0], [0], [1], [0, 0, 1, 1], [], []>} : vector<8x128xbf16>, vector<128x512xbf16>, vector<8x512xf32> -> vector<8x512xf32>
    %598 = arith.truncf %585 : vector<8x128xf32> to vector<8x128xbf16>
    %c0_229 = arith.constant 0 : index
    %c0_230 = arith.constant 0 : index
    %599 = vector.load %arg4[%c0_229, %c0_230] : memref<128x512xbf16, #tpu.memory_space<vmem>>, vector<128x512xbf16>
    %cst_231 = arith.constant dense<0.000000e+00> : vector<8x512xf32>
    %600 = tpu.matmul %598, %599, %cst_231 {dimension_numbers = #tpu.dot_dimension_numbers<[1], [0], [0], [1], [0, 0, 1, 1], [], []>} : vector<8x128xbf16>, vector<128x512xbf16>, vector<8x512xf32> -> vector<8x512xf32>
    %601 = arith.index_cast %591 : i32 to index
    %c0_232 = arith.constant 0 : index
    %602 = vector.load %arg12[%601, %c0_232] : memref<64x1024xf32, #tpu.memory_space<vmem>>, vector<8x512xf32>
    %603 = arith.addf %602, %597 : vector<8x512xf32>
    %604 = arith.index_cast %594 : i32 to index
    %c512_233 = arith.constant 512 : index
    %605 = vector.load %arg12[%604, %c512_233] : memref<64x1024xf32, #tpu.memory_space<vmem>>, vector<8x512xf32>
    %606 = arith.addf %605, %600 : vector<8x512xf32>
    %607 = vector.extract_strided_slice %603 {offsets = [0, 0], sizes = [8, 128], strides = [1, 1]} : vector<8x512xf32> to vector<8x128xf32>
    %cst_234 = arith.constant 5.000000e-01 : f32
    %608 = vector.broadcast %cst_234 : f32 to vector<8x128xf32>
    %609 = arith.mulf %608, %607 : vector<8x128xf32>
    %610 = math.tanh %609 : vector<8x128xf32>
    %cst_235 = arith.constant 5.000000e-01 : f32
    %611 = vector.broadcast %cst_235 : f32 to vector<8x128xf32>
    %612 = arith.mulf %611, %610 : vector<8x128xf32>
    %cst_236 = arith.constant 5.000000e-01 : f32
    %613 = vector.broadcast %cst_236 : f32 to vector<8x128xf32>
    %614 = arith.addf %612, %613 : vector<8x128xf32>
    %615 = vector.extract_strided_slice %603 {offsets = [0, 128], sizes = [8, 128], strides = [1, 1]} : vector<8x512xf32> to vector<8x128xf32>
    %cst_237 = arith.constant 5.000000e-01 : f32
    %616 = vector.broadcast %cst_237 : f32 to vector<8x128xf32>
    %617 = arith.mulf %616, %615 : vector<8x128xf32>
    %618 = math.tanh %617 : vector<8x128xf32>
    %cst_238 = arith.constant 5.000000e-01 : f32
    %619 = vector.broadcast %cst_238 : f32 to vector<8x128xf32>
    %620 = arith.mulf %619, %618 : vector<8x128xf32>
    %cst_239 = arith.constant 5.000000e-01 : f32
    %621 = vector.broadcast %cst_239 : f32 to vector<8x128xf32>
    %622 = arith.addf %620, %621 : vector<8x128xf32>
    %623 = vector.extract_strided_slice %603 {offsets = [0, 256], sizes = [8, 128], strides = [1, 1]} : vector<8x512xf32> to vector<8x128xf32>
    %624 = math.tanh %623 : vector<8x128xf32>
    %625 = vector.extract_strided_slice %603 {offsets = [0, 384], sizes = [8, 128], strides = [1, 1]} : vector<8x512xf32> to vector<8x128xf32>
    %cst_240 = arith.constant 5.000000e-01 : f32
    %626 = vector.broadcast %cst_240 : f32 to vector<8x128xf32>
    %627 = arith.mulf %626, %625 : vector<8x128xf32>
    %628 = math.tanh %627 : vector<8x128xf32>
    %cst_241 = arith.constant 5.000000e-01 : f32
    %629 = vector.broadcast %cst_241 : f32 to vector<8x128xf32>
    %630 = arith.mulf %629, %628 : vector<8x128xf32>
    %cst_242 = arith.constant 5.000000e-01 : f32
    %631 = vector.broadcast %cst_242 : f32 to vector<8x128xf32>
    %632 = arith.addf %630, %631 : vector<8x128xf32>
    %633 = arith.mulf %622, %552 : vector<8x128xf32>
    %634 = arith.mulf %614, %624 : vector<8x128xf32>
    %635 = arith.addf %633, %634 : vector<8x128xf32>
    %636 = math.tanh %635 : vector<8x128xf32>
    %637 = arith.mulf %632, %636 : vector<8x128xf32>
    %638 = vector.extract_strided_slice %606 {offsets = [0, 0], sizes = [8, 128], strides = [1, 1]} : vector<8x512xf32> to vector<8x128xf32>
    %cst_243 = arith.constant 5.000000e-01 : f32
    %639 = vector.broadcast %cst_243 : f32 to vector<8x128xf32>
    %640 = arith.mulf %639, %638 : vector<8x128xf32>
    %641 = math.tanh %640 : vector<8x128xf32>
    %cst_244 = arith.constant 5.000000e-01 : f32
    %642 = vector.broadcast %cst_244 : f32 to vector<8x128xf32>
    %643 = arith.mulf %642, %641 : vector<8x128xf32>
    %cst_245 = arith.constant 5.000000e-01 : f32
    %644 = vector.broadcast %cst_245 : f32 to vector<8x128xf32>
    %645 = arith.addf %643, %644 : vector<8x128xf32>
    %646 = vector.extract_strided_slice %606 {offsets = [0, 128], sizes = [8, 128], strides = [1, 1]} : vector<8x512xf32> to vector<8x128xf32>
    %cst_246 = arith.constant 5.000000e-01 : f32
    %647 = vector.broadcast %cst_246 : f32 to vector<8x128xf32>
    %648 = arith.mulf %647, %646 : vector<8x128xf32>
    %649 = math.tanh %648 : vector<8x128xf32>
    %cst_247 = arith.constant 5.000000e-01 : f32
    %650 = vector.broadcast %cst_247 : f32 to vector<8x128xf32>
    %651 = arith.mulf %650, %649 : vector<8x128xf32>
    %cst_248 = arith.constant 5.000000e-01 : f32
    %652 = vector.broadcast %cst_248 : f32 to vector<8x128xf32>
    %653 = arith.addf %651, %652 : vector<8x128xf32>
    %654 = vector.extract_strided_slice %606 {offsets = [0, 256], sizes = [8, 128], strides = [1, 1]} : vector<8x512xf32> to vector<8x128xf32>
    %655 = math.tanh %654 : vector<8x128xf32>
    %656 = vector.extract_strided_slice %606 {offsets = [0, 384], sizes = [8, 128], strides = [1, 1]} : vector<8x512xf32> to vector<8x128xf32>
    %cst_249 = arith.constant 5.000000e-01 : f32
    %657 = vector.broadcast %cst_249 : f32 to vector<8x128xf32>
    %658 = arith.mulf %657, %656 : vector<8x128xf32>
    %659 = math.tanh %658 : vector<8x128xf32>
    %cst_250 = arith.constant 5.000000e-01 : f32
    %660 = vector.broadcast %cst_250 : f32 to vector<8x128xf32>
    %661 = arith.mulf %660, %659 : vector<8x128xf32>
    %cst_251 = arith.constant 5.000000e-01 : f32
    %662 = vector.broadcast %cst_251 : f32 to vector<8x128xf32>
    %663 = arith.addf %661, %662 : vector<8x128xf32>
    %664 = arith.mulf %653, %583 : vector<8x128xf32>
    %665 = arith.mulf %645, %655 : vector<8x128xf32>
    %666 = arith.addf %664, %665 : vector<8x128xf32>
    %667 = math.tanh %666 : vector<8x128xf32>
    %668 = arith.mulf %663, %667 : vector<8x128xf32>
    %669 = arith.index_cast %591 : i32 to index
    %c0_252 = arith.constant 0 : index
    %670 = vector.load %arg14[%669, %c0_252] : memref<64x128xf32, #tpu.memory_space<vmem>>, vector<8x128xf32>
    tpu.vector_store %arg14[%669, %c0_252], %637 {strides = array<i32>} : memref<64x128xf32, #tpu.memory_space<vmem>>, vector<8x128xf32>,
    %671 = arith.index_cast %594 : i32 to index
    %c0_253 = arith.constant 0 : index
    %672 = vector.load %arg15[%671, %c0_253] : memref<64x128xf32, #tpu.memory_space<vmem>>, vector<8x128xf32>
    tpu.vector_store %arg15[%671, %c0_253], %668 {strides = array<i32>} : memref<64x128xf32, #tpu.memory_space<vmem>>, vector<8x128xf32>,
    %c8_i32_254 = arith.constant 8 : i32
    %c0_255 = arith.constant 0 : index
    %c0_256 = arith.constant 0 : index
    %673 = vector.load %arg14[%c0_255, %c0_256] : memref<64x128xf32, #tpu.memory_space<vmem>>, vector<64x128xf32>
    %c0_257 = arith.constant 0 : index
    %c0_258 = arith.constant 0 : index
    %674 = vector.load %arg15[%c0_257, %c0_258] : memref<64x128xf32, #tpu.memory_space<vmem>>, vector<64x128xf32>
    %675 = tpu.concatenate %673, %674 in 1 : vector<64x128xf32>, vector<64x128xf32> -> vector<64x256xf32>
    %676 = arith.truncf %675 : vector<64x256xf32> to vector<64x256xbf16>
    %c0_259 = arith.constant 0 : index
    %c0_260 = arith.constant 0 : index
    %677 = vector.load %arg5[%c0_259, %c0_260] : memref<256x1024xbf16, #tpu.memory_space<vmem>>, vector<256x1024xbf16>
    %cst_261 = arith.constant dense<0.000000e+00> : vector<64x1024xf32>
    %678 = tpu.matmul %676, %677, %cst_261 {dimension_numbers = #tpu.dot_dimension_numbers<[1], [0], [0], [1], [0, 0, 1, 1], [], []>} : vector<64x256xbf16>, vector<256x1024xbf16>, vector<64x1024xf32> -> vector<64x1024xf32>
    %c0_262 = arith.constant 0 : index
    %c0_263 = arith.constant 0 : index
    %679 = vector.load %arg6[%c0_262, %c0_263] : memref<1x1024xf32, #tpu.memory_space<vmem>>, vector<1x1024xf32>
    %680 = vector.broadcast %679 : vector<1x1024xf32> to vector<64x1024xf32>
    %681 = arith.addf %678, %680 : vector<64x1024xf32>
    %c0_264 = arith.constant 0 : index
    %c0_265 = arith.constant 0 : index
    %682 = vector.load %arg13[%c0_264, %c0_265] : memref<64x1024xf32, #tpu.memory_space<vmem>>, vector<64x1024xf32>
    tpu.vector_store %arg13[%c0_264, %c0_265], %681 {strides = array<i32>} : memref<64x1024xf32, #tpu.memory_space<vmem>>, vector<64x1024xf32>,
    %c0_i32_266 = arith.constant 0 : i32
    %c8_i32_267 = arith.constant 8 : i32
    %683 = arith.muli %c0_i32_266, %c8_i32_267 : i32
    %684 = tpu.assume_multiple %683, 8 : i32
    %685 = arith.index_cast %684 : i32 to index
    %c0_268 = arith.constant 0 : index
    %686 = vector.load %arg13[%685, %c0_268] : memref<64x1024xf32, #tpu.memory_space<vmem>>, vector<8x512xf32>
    %687 = arith.truncf %8 : vector<8x128xf32> to vector<8x128xbf16>
    %c0_269 = arith.constant 0 : index
    %c0_270 = arith.constant 0 : index
    %688 = vector.load %arg7[%c0_269, %c0_270] : memref<128x512xbf16, #tpu.memory_space<vmem>>, vector<128x512xbf16>
    %cst_271 = arith.constant dense<0.000000e+00> : vector<8x512xf32>
    %689 = tpu.matmul %687, %688, %cst_271 {dimension_numbers = #tpu.dot_dimension_numbers<[1], [0], [0], [1], [0, 0, 1, 1], [], []>} : vector<8x128xbf16>, vector<128x512xbf16>, vector<8x512xf32> -> vector<8x512xf32>
    %690 = arith.addf %686, %689 : vector<8x512xf32>
    %691 = vector.extract_strided_slice %690 {offsets = [0, 0], sizes = [8, 128], strides = [1, 1]} : vector<8x512xf32> to vector<8x128xf32>
    %cst_272 = arith.constant 5.000000e-01 : f32
    %692 = vector.broadcast %cst_272 : f32 to vector<8x128xf32>
    %693 = arith.mulf %692, %691 : vector<8x128xf32>
    %694 = math.tanh %693 : vector<8x128xf32>
    %cst_273 = arith.constant 5.000000e-01 : f32
    %695 = vector.broadcast %cst_273 : f32 to vector<8x128xf32>
    %696 = arith.mulf %695, %694 : vector<8x128xf32>
    %cst_274 = arith.constant 5.000000e-01 : f32
    %697 = vector.broadcast %cst_274 : f32 to vector<8x128xf32>
    %698 = arith.addf %696, %697 : vector<8x128xf32>
    %699 = vector.extract_strided_slice %690 {offsets = [0, 128], sizes = [8, 128], strides = [1, 1]} : vector<8x512xf32> to vector<8x128xf32>
    %cst_275 = arith.constant 5.000000e-01 : f32
    %700 = vector.broadcast %cst_275 : f32 to vector<8x128xf32>
    %701 = arith.mulf %700, %699 : vector<8x128xf32>
    %702 = math.tanh %701 : vector<8x128xf32>
    %cst_276 = arith.constant 5.000000e-01 : f32
    %703 = vector.broadcast %cst_276 : f32 to vector<8x128xf32>
    %704 = arith.mulf %703, %702 : vector<8x128xf32>
    %cst_277 = arith.constant 5.000000e-01 : f32
    %705 = vector.broadcast %cst_277 : f32 to vector<8x128xf32>
    %706 = arith.addf %704, %705 : vector<8x128xf32>
    %707 = vector.extract_strided_slice %690 {offsets = [0, 256], sizes = [8, 128], strides = [1, 1]} : vector<8x512xf32> to vector<8x128xf32>
    %708 = math.tanh %707 : vector<8x128xf32>
    %709 = vector.extract_strided_slice %690 {offsets = [0, 384], sizes = [8, 128], strides = [1, 1]} : vector<8x512xf32> to vector<8x128xf32>
    %cst_278 = arith.constant 5.000000e-01 : f32
    %710 = vector.broadcast %cst_278 : f32 to vector<8x128xf32>
    %711 = arith.mulf %710, %709 : vector<8x128xf32>
    %712 = math.tanh %711 : vector<8x128xf32>
    %cst_279 = arith.constant 5.000000e-01 : f32
    %713 = vector.broadcast %cst_279 : f32 to vector<8x128xf32>
    %714 = arith.mulf %713, %712 : vector<8x128xf32>
    %cst_280 = arith.constant 5.000000e-01 : f32
    %715 = vector.broadcast %cst_280 : f32 to vector<8x128xf32>
    %716 = arith.addf %714, %715 : vector<8x128xf32>
    %717 = arith.mulf %706, %8 : vector<8x128xf32>
    %718 = arith.mulf %698, %708 : vector<8x128xf32>
    %719 = arith.addf %717, %718 : vector<8x128xf32>
    %720 = math.tanh %719 : vector<8x128xf32>
    %721 = arith.mulf %716, %720 : vector<8x128xf32>
    %c1_i32_281 = arith.constant 1 : i32
    %c8_i32_282 = arith.constant 8 : i32
    %722 = arith.muli %c1_i32_281, %c8_i32_282 : i32
    %723 = tpu.assume_multiple %722, 8 : i32
    %724 = arith.index_cast %723 : i32 to index
    %c0_283 = arith.constant 0 : index
    %725 = vector.load %arg13[%724, %c0_283] : memref<64x1024xf32, #tpu.memory_space<vmem>>, vector<8x512xf32>
    %726 = arith.truncf %721 : vector<8x128xf32> to vector<8x128xbf16>
    %c0_284 = arith.constant 0 : index
    %c0_285 = arith.constant 0 : index
    %727 = vector.load %arg7[%c0_284, %c0_285] : memref<128x512xbf16, #tpu.memory_space<vmem>>, vector<128x512xbf16>
    %cst_286 = arith.constant dense<0.000000e+00> : vector<8x512xf32>
    %728 = tpu.matmul %726, %727, %cst_286 {dimension_numbers = #tpu.dot_dimension_numbers<[1], [0], [0], [1], [0, 0, 1, 1], [], []>} : vector<8x128xbf16>, vector<128x512xbf16>, vector<8x512xf32> -> vector<8x512xf32>
    %729 = arith.addf %725, %728 : vector<8x512xf32>
    %730 = vector.extract_strided_slice %729 {offsets = [0, 0], sizes = [8, 128], strides = [1, 1]} : vector<8x512xf32> to vector<8x128xf32>
    %cst_287 = arith.constant 5.000000e-01 : f32
    %731 = vector.broadcast %cst_287 : f32 to vector<8x128xf32>
    %732 = arith.mulf %731, %730 : vector<8x128xf32>
    %733 = math.tanh %732 : vector<8x128xf32>
    %cst_288 = arith.constant 5.000000e-01 : f32
    %734 = vector.broadcast %cst_288 : f32 to vector<8x128xf32>
    %735 = arith.mulf %734, %733 : vector<8x128xf32>
    %cst_289 = arith.constant 5.000000e-01 : f32
    %736 = vector.broadcast %cst_289 : f32 to vector<8x128xf32>
    %737 = arith.addf %735, %736 : vector<8x128xf32>
    %738 = vector.extract_strided_slice %729 {offsets = [0, 128], sizes = [8, 128], strides = [1, 1]} : vector<8x512xf32> to vector<8x128xf32>
    %cst_290 = arith.constant 5.000000e-01 : f32
    %739 = vector.broadcast %cst_290 : f32 to vector<8x128xf32>
    %740 = arith.mulf %739, %738 : vector<8x128xf32>
    %741 = math.tanh %740 : vector<8x128xf32>
    %cst_291 = arith.constant 5.000000e-01 : f32
    %742 = vector.broadcast %cst_291 : f32 to vector<8x128xf32>
    %743 = arith.mulf %742, %741 : vector<8x128xf32>
    %cst_292 = arith.constant 5.000000e-01 : f32
    %744 = vector.broadcast %cst_292 : f32 to vector<8x128xf32>
    %745 = arith.addf %743, %744 : vector<8x128xf32>
    %746 = vector.extract_strided_slice %729 {offsets = [0, 256], sizes = [8, 128], strides = [1, 1]} : vector<8x512xf32> to vector<8x128xf32>
    %747 = math.tanh %746 : vector<8x128xf32>
    %748 = vector.extract_strided_slice %729 {offsets = [0, 384], sizes = [8, 128], strides = [1, 1]} : vector<8x512xf32> to vector<8x128xf32>
    %cst_293 = arith.constant 5.000000e-01 : f32
    %749 = vector.broadcast %cst_293 : f32 to vector<8x128xf32>
    %750 = arith.mulf %749, %748 : vector<8x128xf32>
    %751 = math.tanh %750 : vector<8x128xf32>
    %cst_294 = arith.constant 5.000000e-01 : f32
    %752 = vector.broadcast %cst_294 : f32 to vector<8x128xf32>
    %753 = arith.mulf %752, %751 : vector<8x128xf32>
    %cst_295 = arith.constant 5.000000e-01 : f32
    %754 = vector.broadcast %cst_295 : f32 to vector<8x128xf32>
    %755 = arith.addf %753, %754 : vector<8x128xf32>
    %756 = arith.mulf %745, %719 : vector<8x128xf32>
    %757 = arith.mulf %737, %747 : vector<8x128xf32>
    %758 = arith.addf %756, %757 : vector<8x128xf32>
    %759 = math.tanh %758 : vector<8x128xf32>
    %760 = arith.mulf %755, %759 : vector<8x128xf32>
    %c2_i32_296 = arith.constant 2 : i32
    %c8_i32_297 = arith.constant 8 : i32
    %761 = arith.muli %c2_i32_296, %c8_i32_297 : i32
    %762 = tpu.assume_multiple %761, 8 : i32
    %763 = arith.index_cast %762 : i32 to index
    %c0_298 = arith.constant 0 : index
    %764 = vector.load %arg13[%763, %c0_298] : memref<64x1024xf32, #tpu.memory_space<vmem>>, vector<8x512xf32>
    %765 = arith.truncf %760 : vector<8x128xf32> to vector<8x128xbf16>
    %c0_299 = arith.constant 0 : index
    %c0_300 = arith.constant 0 : index
    %766 = vector.load %arg7[%c0_299, %c0_300] : memref<128x512xbf16, #tpu.memory_space<vmem>>, vector<128x512xbf16>
    %cst_301 = arith.constant dense<0.000000e+00> : vector<8x512xf32>
    %767 = tpu.matmul %765, %766, %cst_301 {dimension_numbers = #tpu.dot_dimension_numbers<[1], [0], [0], [1], [0, 0, 1, 1], [], []>} : vector<8x128xbf16>, vector<128x512xbf16>, vector<8x512xf32> -> vector<8x512xf32>
    %768 = arith.addf %764, %767 : vector<8x512xf32>
    %769 = vector.extract_strided_slice %768 {offsets = [0, 0], sizes = [8, 128], strides = [1, 1]} : vector<8x512xf32> to vector<8x128xf32>
    %cst_302 = arith.constant 5.000000e-01 : f32
    %770 = vector.broadcast %cst_302 : f32 to vector<8x128xf32>
    %771 = arith.mulf %770, %769 : vector<8x128xf32>
    %772 = math.tanh %771 : vector<8x128xf32>
    %cst_303 = arith.constant 5.000000e-01 : f32
    %773 = vector.broadcast %cst_303 : f32 to vector<8x128xf32>
    %774 = arith.mulf %773, %772 : vector<8x128xf32>
    %cst_304 = arith.constant 5.000000e-01 : f32
    %775 = vector.broadcast %cst_304 : f32 to vector<8x128xf32>
    %776 = arith.addf %774, %775 : vector<8x128xf32>
    %777 = vector.extract_strided_slice %768 {offsets = [0, 128], sizes = [8, 128], strides = [1, 1]} : vector<8x512xf32> to vector<8x128xf32>
    %cst_305 = arith.constant 5.000000e-01 : f32
    %778 = vector.broadcast %cst_305 : f32 to vector<8x128xf32>
    %779 = arith.mulf %778, %777 : vector<8x128xf32>
    %780 = math.tanh %779 : vector<8x128xf32>
    %cst_306 = arith.constant 5.000000e-01 : f32
    %781 = vector.broadcast %cst_306 : f32 to vector<8x128xf32>
    %782 = arith.mulf %781, %780 : vector<8x128xf32>
    %cst_307 = arith.constant 5.000000e-01 : f32
    %783 = vector.broadcast %cst_307 : f32 to vector<8x128xf32>
    %784 = arith.addf %782, %783 : vector<8x128xf32>
    %785 = vector.extract_strided_slice %768 {offsets = [0, 256], sizes = [8, 128], strides = [1, 1]} : vector<8x512xf32> to vector<8x128xf32>
    %786 = math.tanh %785 : vector<8x128xf32>
    %787 = vector.extract_strided_slice %768 {offsets = [0, 384], sizes = [8, 128], strides = [1, 1]} : vector<8x512xf32> to vector<8x128xf32>
    %cst_308 = arith.constant 5.000000e-01 : f32
    %788 = vector.broadcast %cst_308 : f32 to vector<8x128xf32>
    %789 = arith.mulf %788, %787 : vector<8x128xf32>
    %790 = math.tanh %789 : vector<8x128xf32>
    %cst_309 = arith.constant 5.000000e-01 : f32
    %791 = vector.broadcast %cst_309 : f32 to vector<8x128xf32>
    %792 = arith.mulf %791, %790 : vector<8x128xf32>
    %cst_310 = arith.constant 5.000000e-01 : f32
    %793 = vector.broadcast %cst_310 : f32 to vector<8x128xf32>
    %794 = arith.addf %792, %793 : vector<8x128xf32>
    %795 = arith.mulf %784, %758 : vector<8x128xf32>
    %796 = arith.mulf %776, %786 : vector<8x128xf32>
    %797 = arith.addf %795, %796 : vector<8x128xf32>
    %798 = math.tanh %797 : vector<8x128xf32>
    %799 = arith.mulf %794, %798 : vector<8x128xf32>
    %c3_i32_311 = arith.constant 3 : i32
    %c8_i32_312 = arith.constant 8 : i32
    %800 = arith.muli %c3_i32_311, %c8_i32_312 : i32
    %801 = tpu.assume_multiple %800, 8 : i32
    %802 = arith.index_cast %801 : i32 to index
    %c0_313 = arith.constant 0 : index
    %803 = vector.load %arg13[%802, %c0_313] : memref<64x1024xf32, #tpu.memory_space<vmem>>, vector<8x512xf32>
    %804 = arith.truncf %799 : vector<8x128xf32> to vector<8x128xbf16>
    %c0_314 = arith.constant 0 : index
    %c0_315 = arith.constant 0 : index
    %805 = vector.load %arg7[%c0_314, %c0_315] : memref<128x512xbf16, #tpu.memory_space<vmem>>, vector<128x512xbf16>
    %cst_316 = arith.constant dense<0.000000e+00> : vector<8x512xf32>
    %806 = tpu.matmul %804, %805, %cst_316 {dimension_numbers = #tpu.dot_dimension_numbers<[1], [0], [0], [1], [0, 0, 1, 1], [], []>} : vector<8x128xbf16>, vector<128x512xbf16>, vector<8x512xf32> -> vector<8x512xf32>
    %807 = arith.addf %803, %806 : vector<8x512xf32>
    %808 = vector.extract_strided_slice %807 {offsets = [0, 0], sizes = [8, 128], strides = [1, 1]} : vector<8x512xf32> to vector<8x128xf32>
    %cst_317 = arith.constant 5.000000e-01 : f32
    %809 = vector.broadcast %cst_317 : f32 to vector<8x128xf32>
    %810 = arith.mulf %809, %808 : vector<8x128xf32>
    %811 = math.tanh %810 : vector<8x128xf32>
    %cst_318 = arith.constant 5.000000e-01 : f32
    %812 = vector.broadcast %cst_318 : f32 to vector<8x128xf32>
    %813 = arith.mulf %812, %811 : vector<8x128xf32>
    %cst_319 = arith.constant 5.000000e-01 : f32
    %814 = vector.broadcast %cst_319 : f32 to vector<8x128xf32>
    %815 = arith.addf %813, %814 : vector<8x128xf32>
    %816 = vector.extract_strided_slice %807 {offsets = [0, 128], sizes = [8, 128], strides = [1, 1]} : vector<8x512xf32> to vector<8x128xf32>
    %cst_320 = arith.constant 5.000000e-01 : f32
    %817 = vector.broadcast %cst_320 : f32 to vector<8x128xf32>
    %818 = arith.mulf %817, %816 : vector<8x128xf32>
    %819 = math.tanh %818 : vector<8x128xf32>
    %cst_321 = arith.constant 5.000000e-01 : f32
    %820 = vector.broadcast %cst_321 : f32 to vector<8x128xf32>
    %821 = arith.mulf %820, %819 : vector<8x128xf32>
    %cst_322 = arith.constant 5.000000e-01 : f32
    %822 = vector.broadcast %cst_322 : f32 to vector<8x128xf32>
    %823 = arith.addf %821, %822 : vector<8x128xf32>
    %824 = vector.extract_strided_slice %807 {offsets = [0, 256], sizes = [8, 128], strides = [1, 1]} : vector<8x512xf32> to vector<8x128xf32>
    %825 = math.tanh %824 : vector<8x128xf32>
    %826 = vector.extract_strided_slice %807 {offsets = [0, 384], sizes = [8, 128], strides = [1, 1]} : vector<8x512xf32> to vector<8x128xf32>
    %cst_323 = arith.constant 5.000000e-01 : f32
    %827 = vector.broadcast %cst_323 : f32 to vector<8x128xf32>
    %828 = arith.mulf %827, %826 : vector<8x128xf32>
    %829 = math.tanh %828 : vector<8x128xf32>
    %cst_324 = arith.constant 5.000000e-01 : f32
    %830 = vector.broadcast %cst_324 : f32 to vector<8x128xf32>
    %831 = arith.mulf %830, %829 : vector<8x128xf32>
    %cst_325 = arith.constant 5.000000e-01 : f32
    %832 = vector.broadcast %cst_325 : f32 to vector<8x128xf32>
    %833 = arith.addf %831, %832 : vector<8x128xf32>
    %834 = arith.mulf %823, %797 : vector<8x128xf32>
    %835 = arith.mulf %815, %825 : vector<8x128xf32>
    %836 = arith.addf %834, %835 : vector<8x128xf32>
    %837 = math.tanh %836 : vector<8x128xf32>
    %838 = arith.mulf %833, %837 : vector<8x128xf32>
    %c4_i32_326 = arith.constant 4 : i32
    %c8_i32_327 = arith.constant 8 : i32
    %839 = arith.muli %c4_i32_326, %c8_i32_327 : i32
    %840 = tpu.assume_multiple %839, 8 : i32
    %841 = arith.index_cast %840 : i32 to index
    %c0_328 = arith.constant 0 : index
    %842 = vector.load %arg13[%841, %c0_328] : memref<64x1024xf32, #tpu.memory_space<vmem>>, vector<8x512xf32>
    %843 = arith.truncf %838 : vector<8x128xf32> to vector<8x128xbf16>
    %c0_329 = arith.constant 0 : index
    %c0_330 = arith.constant 0 : index
    %844 = vector.load %arg7[%c0_329, %c0_330] : memref<128x512xbf16, #tpu.memory_space<vmem>>, vector<128x512xbf16>
    %cst_331 = arith.constant dense<0.000000e+00> : vector<8x512xf32>
    %845 = tpu.matmul %843, %844, %cst_331 {dimension_numbers = #tpu.dot_dimension_numbers<[1], [0], [0], [1], [0, 0, 1, 1], [], []>} : vector<8x128xbf16>, vector<128x512xbf16>, vector<8x512xf32> -> vector<8x512xf32>
    %846 = arith.addf %842, %845 : vector<8x512xf32>
    %847 = vector.extract_strided_slice %846 {offsets = [0, 0], sizes = [8, 128], strides = [1, 1]} : vector<8x512xf32> to vector<8x128xf32>
    %cst_332 = arith.constant 5.000000e-01 : f32
    %848 = vector.broadcast %cst_332 : f32 to vector<8x128xf32>
    %849 = arith.mulf %848, %847 : vector<8x128xf32>
    %850 = math.tanh %849 : vector<8x128xf32>
    %cst_333 = arith.constant 5.000000e-01 : f32
    %851 = vector.broadcast %cst_333 : f32 to vector<8x128xf32>
    %852 = arith.mulf %851, %850 : vector<8x128xf32>
    %cst_334 = arith.constant 5.000000e-01 : f32
    %853 = vector.broadcast %cst_334 : f32 to vector<8x128xf32>
    %854 = arith.addf %852, %853 : vector<8x128xf32>
    %855 = vector.extract_strided_slice %846 {offsets = [0, 128], sizes = [8, 128], strides = [1, 1]} : vector<8x512xf32> to vector<8x128xf32>
    %cst_335 = arith.constant 5.000000e-01 : f32
    %856 = vector.broadcast %cst_335 : f32 to vector<8x128xf32>
    %857 = arith.mulf %856, %855 : vector<8x128xf32>
    %858 = math.tanh %857 : vector<8x128xf32>
    %cst_336 = arith.constant 5.000000e-01 : f32
    %859 = vector.broadcast %cst_336 : f32 to vector<8x128xf32>
    %860 = arith.mulf %859, %858 : vector<8x128xf32>
    %cst_337 = arith.constant 5.000000e-01 : f32
    %861 = vector.broadcast %cst_337 : f32 to vector<8x128xf32>
    %862 = arith.addf %860, %861 : vector<8x128xf32>
    %863 = vector.extract_strided_slice %846 {offsets = [0, 256], sizes = [8, 128], strides = [1, 1]} : vector<8x512xf32> to vector<8x128xf32>
    %864 = math.tanh %863 : vector<8x128xf32>
    %865 = vector.extract_strided_slice %846 {offsets = [0, 384], sizes = [8, 128], strides = [1, 1]} : vector<8x512xf32> to vector<8x128xf32>
    %cst_338 = arith.constant 5.000000e-01 : f32
    %866 = vector.broadcast %cst_338 : f32 to vector<8x128xf32>
    %867 = arith.mulf %866, %865 : vector<8x128xf32>
    %868 = math.tanh %867 : vector<8x128xf32>
    %cst_339 = arith.constant 5.000000e-01 : f32
    %869 = vector.broadcast %cst_339 : f32 to vector<8x128xf32>
    %870 = arith.mulf %869, %868 : vector<8x128xf32>
    %cst_340 = arith.constant 5.000000e-01 : f32
    %871 = vector.broadcast %cst_340 : f32 to vector<8x128xf32>
    %872 = arith.addf %870, %871 : vector<8x128xf32>
    %873 = arith.mulf %862, %836 : vector<8x128xf32>
    %874 = arith.mulf %854, %864 : vector<8x128xf32>
    %875 = arith.addf %873, %874 : vector<8x128xf32>
    %876 = math.tanh %875 : vector<8x128xf32>
    %877 = arith.mulf %872, %876 : vector<8x128xf32>
    %c5_i32_341 = arith.constant 5 : i32
    %c8_i32_342 = arith.constant 8 : i32
    %878 = arith.muli %c5_i32_341, %c8_i32_342 : i32
    %879 = tpu.assume_multiple %878, 8 : i32
    %880 = arith.index_cast %879 : i32 to index
    %c0_343 = arith.constant 0 : index
    %881 = vector.load %arg13[%880, %c0_343] : memref<64x1024xf32, #tpu.memory_space<vmem>>, vector<8x512xf32>
    %882 = arith.truncf %877 : vector<8x128xf32> to vector<8x128xbf16>
    %c0_344 = arith.constant 0 : index
    %c0_345 = arith.constant 0 : index
    %883 = vector.load %arg7[%c0_344, %c0_345] : memref<128x512xbf16, #tpu.memory_space<vmem>>, vector<128x512xbf16>
    %cst_346 = arith.constant dense<0.000000e+00> : vector<8x512xf32>
    %884 = tpu.matmul %882, %883, %cst_346 {dimension_numbers = #tpu.dot_dimension_numbers<[1], [0], [0], [1], [0, 0, 1, 1], [], []>} : vector<8x128xbf16>, vector<128x512xbf16>, vector<8x512xf32> -> vector<8x512xf32>
    %885 = arith.addf %881, %884 : vector<8x512xf32>
    %886 = vector.extract_strided_slice %885 {offsets = [0, 0], sizes = [8, 128], strides = [1, 1]} : vector<8x512xf32> to vector<8x128xf32>
    %cst_347 = arith.constant 5.000000e-01 : f32
    %887 = vector.broadcast %cst_347 : f32 to vector<8x128xf32>
    %888 = arith.mulf %887, %886 : vector<8x128xf32>
    %889 = math.tanh %888 : vector<8x128xf32>
    %cst_348 = arith.constant 5.000000e-01 : f32
    %890 = vector.broadcast %cst_348 : f32 to vector<8x128xf32>
    %891 = arith.mulf %890, %889 : vector<8x128xf32>
    %cst_349 = arith.constant 5.000000e-01 : f32
    %892 = vector.broadcast %cst_349 : f32 to vector<8x128xf32>
    %893 = arith.addf %891, %892 : vector<8x128xf32>
    %894 = vector.extract_strided_slice %885 {offsets = [0, 128], sizes = [8, 128], strides = [1, 1]} : vector<8x512xf32> to vector<8x128xf32>
    %cst_350 = arith.constant 5.000000e-01 : f32
    %895 = vector.broadcast %cst_350 : f32 to vector<8x128xf32>
    %896 = arith.mulf %895, %894 : vector<8x128xf32>
    %897 = math.tanh %896 : vector<8x128xf32>
    %cst_351 = arith.constant 5.000000e-01 : f32
    %898 = vector.broadcast %cst_351 : f32 to vector<8x128xf32>
    %899 = arith.mulf %898, %897 : vector<8x128xf32>
    %cst_352 = arith.constant 5.000000e-01 : f32
    %900 = vector.broadcast %cst_352 : f32 to vector<8x128xf32>
    %901 = arith.addf %899, %900 : vector<8x128xf32>
    %902 = vector.extract_strided_slice %885 {offsets = [0, 256], sizes = [8, 128], strides = [1, 1]} : vector<8x512xf32> to vector<8x128xf32>
    %903 = math.tanh %902 : vector<8x128xf32>
    %904 = vector.extract_strided_slice %885 {offsets = [0, 384], sizes = [8, 128], strides = [1, 1]} : vector<8x512xf32> to vector<8x128xf32>
    %cst_353 = arith.constant 5.000000e-01 : f32
    %905 = vector.broadcast %cst_353 : f32 to vector<8x128xf32>
    %906 = arith.mulf %905, %904 : vector<8x128xf32>
    %907 = math.tanh %906 : vector<8x128xf32>
    %cst_354 = arith.constant 5.000000e-01 : f32
    %908 = vector.broadcast %cst_354 : f32 to vector<8x128xf32>
    %909 = arith.mulf %908, %907 : vector<8x128xf32>
    %cst_355 = arith.constant 5.000000e-01 : f32
    %910 = vector.broadcast %cst_355 : f32 to vector<8x128xf32>
    %911 = arith.addf %909, %910 : vector<8x128xf32>
    %912 = arith.mulf %901, %875 : vector<8x128xf32>
    %913 = arith.mulf %893, %903 : vector<8x128xf32>
    %914 = arith.addf %912, %913 : vector<8x128xf32>
    %915 = math.tanh %914 : vector<8x128xf32>
    %916 = arith.mulf %911, %915 : vector<8x128xf32>
    %c6_i32_356 = arith.constant 6 : i32
    %c8_i32_357 = arith.constant 8 : i32
    %917 = arith.muli %c6_i32_356, %c8_i32_357 : i32
    %918 = tpu.assume_multiple %917, 8 : i32
    %919 = arith.index_cast %918 : i32 to index
    %c0_358 = arith.constant 0 : index
    %920 = vector.load %arg13[%919, %c0_358] : memref<64x1024xf32, #tpu.memory_space<vmem>>, vector<8x512xf32>
    %921 = arith.truncf %916 : vector<8x128xf32> to vector<8x128xbf16>
    %c0_359 = arith.constant 0 : index
    %c0_360 = arith.constant 0 : index
    %922 = vector.load %arg7[%c0_359, %c0_360] : memref<128x512xbf16, #tpu.memory_space<vmem>>, vector<128x512xbf16>
    %cst_361 = arith.constant dense<0.000000e+00> : vector<8x512xf32>
    %923 = tpu.matmul %921, %922, %cst_361 {dimension_numbers = #tpu.dot_dimension_numbers<[1], [0], [0], [1], [0, 0, 1, 1], [], []>} : vector<8x128xbf16>, vector<128x512xbf16>, vector<8x512xf32> -> vector<8x512xf32>
    %924 = arith.addf %920, %923 : vector<8x512xf32>
    %925 = vector.extract_strided_slice %924 {offsets = [0, 0], sizes = [8, 128], strides = [1, 1]} : vector<8x512xf32> to vector<8x128xf32>
    %cst_362 = arith.constant 5.000000e-01 : f32
    %926 = vector.broadcast %cst_362 : f32 to vector<8x128xf32>
    %927 = arith.mulf %926, %925 : vector<8x128xf32>
    %928 = math.tanh %927 : vector<8x128xf32>
    %cst_363 = arith.constant 5.000000e-01 : f32
    %929 = vector.broadcast %cst_363 : f32 to vector<8x128xf32>
    %930 = arith.mulf %929, %928 : vector<8x128xf32>
    %cst_364 = arith.constant 5.000000e-01 : f32
    %931 = vector.broadcast %cst_364 : f32 to vector<8x128xf32>
    %932 = arith.addf %930, %931 : vector<8x128xf32>
    %933 = vector.extract_strided_slice %924 {offsets = [0, 128], sizes = [8, 128], strides = [1, 1]} : vector<8x512xf32> to vector<8x128xf32>
    %cst_365 = arith.constant 5.000000e-01 : f32
    %934 = vector.broadcast %cst_365 : f32 to vector<8x128xf32>
    %935 = arith.mulf %934, %933 : vector<8x128xf32>
    %936 = math.tanh %935 : vector<8x128xf32>
    %cst_366 = arith.constant 5.000000e-01 : f32
    %937 = vector.broadcast %cst_366 : f32 to vector<8x128xf32>
    %938 = arith.mulf %937, %936 : vector<8x128xf32>
    %cst_367 = arith.constant 5.000000e-01 : f32
    %939 = vector.broadcast %cst_367 : f32 to vector<8x128xf32>
    %940 = arith.addf %938, %939 : vector<8x128xf32>
    %941 = vector.extract_strided_slice %924 {offsets = [0, 256], sizes = [8, 128], strides = [1, 1]} : vector<8x512xf32> to vector<8x128xf32>
    %942 = math.tanh %941 : vector<8x128xf32>
    %943 = vector.extract_strided_slice %924 {offsets = [0, 384], sizes = [8, 128], strides = [1, 1]} : vector<8x512xf32> to vector<8x128xf32>
    %cst_368 = arith.constant 5.000000e-01 : f32
    %944 = vector.broadcast %cst_368 : f32 to vector<8x128xf32>
    %945 = arith.mulf %944, %943 : vector<8x128xf32>
    %946 = math.tanh %945 : vector<8x128xf32>
    %cst_369 = arith.constant 5.000000e-01 : f32
    %947 = vector.broadcast %cst_369 : f32 to vector<8x128xf32>
    %948 = arith.mulf %947, %946 : vector<8x128xf32>
    %cst_370 = arith.constant 5.000000e-01 : f32
    %949 = vector.broadcast %cst_370 : f32 to vector<8x128xf32>
    %950 = arith.addf %948, %949 : vector<8x128xf32>
    %951 = arith.mulf %940, %914 : vector<8x128xf32>
    %952 = arith.mulf %932, %942 : vector<8x128xf32>
    %953 = arith.addf %951, %952 : vector<8x128xf32>
    %954 = math.tanh %953 : vector<8x128xf32>
    %955 = arith.mulf %950, %954 : vector<8x128xf32>
    %c7_i32_371 = arith.constant 7 : i32
    %c8_i32_372 = arith.constant 8 : i32
    %956 = arith.muli %c7_i32_371, %c8_i32_372 : i32
    %957 = tpu.assume_multiple %956, 8 : i32
    %958 = arith.index_cast %957 : i32 to index
    %c0_373 = arith.constant 0 : index
    %959 = vector.load %arg13[%958, %c0_373] : memref<64x1024xf32, #tpu.memory_space<vmem>>, vector<8x512xf32>
    %960 = arith.truncf %955 : vector<8x128xf32> to vector<8x128xbf16>
    %c0_374 = arith.constant 0 : index
    %c0_375 = arith.constant 0 : index
    %961 = vector.load %arg7[%c0_374, %c0_375] : memref<128x512xbf16, #tpu.memory_space<vmem>>, vector<128x512xbf16>
    %cst_376 = arith.constant dense<0.000000e+00> : vector<8x512xf32>
    %962 = tpu.matmul %960, %961, %cst_376 {dimension_numbers = #tpu.dot_dimension_numbers<[1], [0], [0], [1], [0, 0, 1, 1], [], []>} : vector<8x128xbf16>, vector<128x512xbf16>, vector<8x512xf32> -> vector<8x512xf32>
    %963 = arith.addf %959, %962 : vector<8x512xf32>
    %964 = vector.extract_strided_slice %963 {offsets = [0, 0], sizes = [8, 128], strides = [1, 1]} : vector<8x512xf32> to vector<8x128xf32>
    %cst_377 = arith.constant 5.000000e-01 : f32
    %965 = vector.broadcast %cst_377 : f32 to vector<8x128xf32>
    %966 = arith.mulf %965, %964 : vector<8x128xf32>
    %967 = math.tanh %966 : vector<8x128xf32>
    %cst_378 = arith.constant 5.000000e-01 : f32
    %968 = vector.broadcast %cst_378 : f32 to vector<8x128xf32>
    %969 = arith.mulf %968, %967 : vector<8x128xf32>
    %cst_379 = arith.constant 5.000000e-01 : f32
    %970 = vector.broadcast %cst_379 : f32 to vector<8x128xf32>
    %971 = arith.addf %969, %970 : vector<8x128xf32>
    %972 = vector.extract_strided_slice %963 {offsets = [0, 128], sizes = [8, 128], strides = [1, 1]} : vector<8x512xf32> to vector<8x128xf32>
    %cst_380 = arith.constant 5.000000e-01 : f32
    %973 = vector.broadcast %cst_380 : f32 to vector<8x128xf32>
    %974 = arith.mulf %973, %972 : vector<8x128xf32>
    %975 = math.tanh %974 : vector<8x128xf32>
    %cst_381 = arith.constant 5.000000e-01 : f32
    %976 = vector.broadcast %cst_381 : f32 to vector<8x128xf32>
    %977 = arith.mulf %976, %975 : vector<8x128xf32>
    %cst_382 = arith.constant 5.000000e-01 : f32
    %978 = vector.broadcast %cst_382 : f32 to vector<8x128xf32>
    %979 = arith.addf %977, %978 : vector<8x128xf32>
    %980 = vector.extract_strided_slice %963 {offsets = [0, 256], sizes = [8, 128], strides = [1, 1]} : vector<8x512xf32> to vector<8x128xf32>
    %981 = math.tanh %980 : vector<8x128xf32>
    %982 = vector.extract_strided_slice %963 {offsets = [0, 384], sizes = [8, 128], strides = [1, 1]} : vector<8x512xf32> to vector<8x128xf32>
    %cst_383 = arith.constant 5.000000e-01 : f32
    %983 = vector.broadcast %cst_383 : f32 to vector<8x128xf32>
    %984 = arith.mulf %983, %982 : vector<8x128xf32>
    %985 = math.tanh %984 : vector<8x128xf32>
    %cst_384 = arith.constant 5.000000e-01 : f32
    %986 = vector.broadcast %cst_384 : f32 to vector<8x128xf32>
    %987 = arith.mulf %986, %985 : vector<8x128xf32>
    %cst_385 = arith.constant 5.000000e-01 : f32
    %988 = vector.broadcast %cst_385 : f32 to vector<8x128xf32>
    %989 = arith.addf %987, %988 : vector<8x128xf32>
    %990 = arith.mulf %979, %953 : vector<8x128xf32>
    %991 = arith.mulf %971, %981 : vector<8x128xf32>
    %992 = arith.addf %990, %991 : vector<8x128xf32>
    %993 = math.tanh %992 : vector<8x128xf32>
    %994 = arith.mulf %989, %993 : vector<8x128xf32>
    %c8_i32_386 = arith.constant 8 : i32
    %c56 = arith.constant 56 : index
    %c512_387 = arith.constant 512 : index
    %995 = vector.load %arg13[%c56, %c512_387] : memref<64x1024xf32, #tpu.memory_space<vmem>>, vector<8x512xf32>
    %996 = vector.extract_strided_slice %995 {offsets = [0, 0], sizes = [8, 128], strides = [1, 1]} : vector<8x512xf32> to vector<8x128xf32>
    %cst_388 = arith.constant 5.000000e-01 : f32
    %997 = vector.broadcast %cst_388 : f32 to vector<8x128xf32>
    %998 = arith.mulf %997, %996 : vector<8x128xf32>
    %999 = math.tanh %998 : vector<8x128xf32>
    %cst_389 = arith.constant 5.000000e-01 : f32
    %1000 = vector.broadcast %cst_389 : f32 to vector<8x128xf32>
    %1001 = arith.mulf %1000, %999 : vector<8x128xf32>
    %cst_390 = arith.constant 5.000000e-01 : f32
    %1002 = vector.broadcast %cst_390 : f32 to vector<8x128xf32>
    %1003 = arith.addf %1001, %1002 : vector<8x128xf32>
    %1004 = vector.extract_strided_slice %995 {offsets = [0, 128], sizes = [8, 128], strides = [1, 1]} : vector<8x512xf32> to vector<8x128xf32>
    %cst_391 = arith.constant 5.000000e-01 : f32
    %1005 = vector.broadcast %cst_391 : f32 to vector<8x128xf32>
    %1006 = arith.mulf %1005, %1004 : vector<8x128xf32>
    %1007 = math.tanh %1006 : vector<8x128xf32>
    %cst_392 = arith.constant 5.000000e-01 : f32
    %1008 = vector.broadcast %cst_392 : f32 to vector<8x128xf32>
    %1009 = arith.mulf %1008, %1007 : vector<8x128xf32>
    %cst_393 = arith.constant 5.000000e-01 : f32
    %1010 = vector.broadcast %cst_393 : f32 to vector<8x128xf32>
    %1011 = arith.addf %1009, %1010 : vector<8x128xf32>
    %1012 = vector.extract_strided_slice %995 {offsets = [0, 256], sizes = [8, 128], strides = [1, 1]} : vector<8x512xf32> to vector<8x128xf32>
    %1013 = math.tanh %1012 : vector<8x128xf32>
    %1014 = vector.extract_strided_slice %995 {offsets = [0, 384], sizes = [8, 128], strides = [1, 1]} : vector<8x512xf32> to vector<8x128xf32>
    %cst_394 = arith.constant 5.000000e-01 : f32
    %1015 = vector.broadcast %cst_394 : f32 to vector<8x128xf32>
    %1016 = arith.mulf %1015, %1014 : vector<8x128xf32>
    %1017 = math.tanh %1016 : vector<8x128xf32>
    %cst_395 = arith.constant 5.000000e-01 : f32
    %1018 = vector.broadcast %cst_395 : f32 to vector<8x128xf32>
    %1019 = arith.mulf %1018, %1017 : vector<8x128xf32>
    %cst_396 = arith.constant 5.000000e-01 : f32
    %1020 = vector.broadcast %cst_396 : f32 to vector<8x128xf32>
    %1021 = arith.addf %1019, %1020 : vector<8x128xf32>
    %1022 = arith.mulf %1011, %8 : vector<8x128xf32>
    %1023 = arith.mulf %1003, %1013 : vector<8x128xf32>
    %1024 = arith.addf %1022, %1023 : vector<8x128xf32>
    %1025 = math.tanh %1024 : vector<8x128xf32>
    %1026 = arith.mulf %1021, %1025 : vector<8x128xf32>
    %1027 = tpu.concatenate %994, %1026 in 1 : vector<8x128xf32>, vector<8x128xf32> -> vector<8x256xf32>
    %c0_397 = arith.constant 0 : index
    %c0_398 = arith.constant 0 : index
    %1028 = vector.load %arg9[%c0_397, %c0_398] : memref<256x128xf32, #tpu.memory_space<vmem>>, vector<256x128xf32>
    %cst_399 = arith.constant dense<0.000000e+00> : vector<8x128xf32>
    %1029 = tpu.matmul %1027, %1028, %cst_399 {dimension_numbers = #tpu.dot_dimension_numbers<[1], [0], [0], [1], [0, 0, 1, 1], [], []>} : vector<8x256xf32>, vector<256x128xf32>, vector<8x128xf32> -> vector<8x128xf32>
    %c0_400 = arith.constant 0 : index
    %c0_401 = arith.constant 0 : index
    %1030 = vector.load %arg10[%c0_400, %c0_401] : memref<1x128xf32, #tpu.memory_space<vmem>>, vector<1x128xf32>
    %1031 = vector.broadcast %1030 : vector<1x128xf32> to vector<8x128xf32>
    %1032 = arith.addf %1029, %1031 : vector<8x128xf32>
    %c0_402 = arith.constant 0 : index
    %c0_403 = arith.constant 0 : index
    %1033 = vector.load %arg11[%c0_402, %c0_403] : memref<8x128xf32, #tpu.memory_space<vmem>>, vector<8x128xf32>
    tpu.vector_store %arg11[%c0_402, %c0_403], %1032 {strides = array<i32>} : memref<8x128xf32, #tpu.memory_space<vmem>>, vector<8x128xf32>,
    return
  }
}

</mosaic_0001>

<bundles_post_ra>
// kernel: text_rnn_forward.1
= control target key start
LH: loop header
LB: loop body
LE: loop exit
PB: predicated region body
PF: predicated region fallthrough
CT: control target
= control target key end

     0   :  { %16 = vsyncpa [#allocation7], 0  ;;  %s12940_s0 = inlined_call_operand.vmem [shape: f32[64,128], index: 0, kind: input, shape index: {}]   ;;  %s12941_s1 = inlined_call_operand.hbm [shape: bf16[128,1024], index: 1, kind: input, shape index: {}]   ;;  %s12942_s2 = inlined_call_operand.vmem [shape: f32[1,1024], index: 2, kind: input, shape index: {}]   ;;  %s12943_s3 = inlined_call_operand.hbm [shape: bf16[128,512], index: 3, kind: input, shape index: {}]   ;;  %s12944_s4 = inlined_call_operand.hbm [shape: bf16[128,512], index: 4, kind: input, shape index: {}]   ;;  %s12945_s5 = inlined_call_operand.hbm [shape: bf16[256,1024], index: 5, kind: input, shape index: {}]   ;;  %s12946_s6 = inlined_call_operand.vmem [shape: f32[1,1024], index: 6, kind: input, shape index: {}]   ;;  %s12947_s7 = inlined_call_operand.hbm [shape: bf16[128,512], index: 7, kind: input, shape index: {}]   ;;  %s12948_s8 = inlined_call_operand.hbm [shape: bf16[128,512], index: 8, kind: input, shape index: {}]   ;;  %s12949_s9 = inlined_call_operand.hbm [shape: f32[256,128], index: 9, kind: input, shape index: {}]   ;;  %s12950_s10 = inlined_call_operand.vmem [shape: f32[1,128], index: 10, kind: input, shape index: {}]   ;;  %s12951_s11 = inlined_call_operand.vmem [shape: f32[8,128], index: 11, kind: output, shape index: {}]  }
   0x1   :  { %17 = vsyncpa [#allocation9], 0 }
   0x2   :  { %18 = vsyncpa [#allocation12], 0  ;;  %s41_s19 = sshll.u32 %s12943_s3, 4  ;;  %s42_s19 = int_to_ptr.hbm [resolvable:$true] %s41_s19 }
   0x3   :  { %19 = vsyncpa [#allocation15], 0  ;;  %s11665_s20 = smov [#allocation8]   ;;  %s11666_s22 = smov 256  }
   0x4   :  { %s43_s21 = sshll.u32 %s11665_s20, 4  ;;  %s11667_s23 = smov 16   ;;  %s44_s21 = int_to_ptr.vmem [resolvable:$true] %s43_s21 }
   0x5   :  { %49 = dma.hbm_to_vmem [thread:$0]  %s42_s19, 4096, %s44_s21, [#allocation9], %s11666_s22, %s11666_s22, %s11667_s23  }
   0x6   :  { %s67_s26 = sshll.u32 %s12945_s5, 4  ;;  %s11668_s27 = smov [#allocation11]   ;;  %s68_s26 = int_to_ptr.hbm [resolvable:$true] %s67_s26 }
   0x7   :  { %s69_s28 = sshll.u32 %s11668_s27, 4  ;;  %s95_s30 = sshll.u32 %s12948_s8, 4  ;;  %s70_s28 = int_to_ptr.vmem [resolvable:$true] %s69_s28  ;;  %s96_s30 = int_to_ptr.hbm [resolvable:$true] %s95_s30 }
   0x8   :  { %s11669_s12 = smov 512   ;;  %s11670_s13 = smov 32  }
   0x9   :  { %75 = dma.hbm_to_vmem [thread:$0]  %s68_s26, 16384, %s70_s28, [#allocation12], %s11669_s12, %s11669_s12, %s11670_s13  }
   0xa   :  { %s26_s16 = sshll.u32 %s12941_s1, 4  ;;  %s11671_s17 = smov [#allocation14]   ;;  %s27_s16 = int_to_ptr.hbm [resolvable:$true] %s26_s16 }
   0xb   :  { %s97_s18 = sshll.u32 %s11671_s17, 4  ;;  %s11672_s5 = smov [#allocation6]   ;;  %s98_s18 = int_to_ptr.vmem [resolvable:$true] %s97_s18 }
   0xc   :  { %103 = dma.hbm_to_vmem [thread:$0]  %s96_s30, 4096, %s98_s18, [#allocation15], %s11666_s22, %s11666_s22, %s11667_s23  }
   0xd   :  { %s28_s19 = sshll.u32 %s11672_s5, 4  ;;  %s54_s21 = sshll.u32 %s12944_s4, 4  ;;  %s29_s19 = int_to_ptr.vmem [resolvable:$true] %s28_s19  ;;  %s55_s21 = int_to_ptr.hbm [resolvable:$true] %s54_s21 }
   0xe   :  { %34 = dma.hbm_to_vmem [thread:$0]  %s27_s16, 8192, %s29_s19, [#allocation7], %s11669_s12, %s11669_s12, %s11670_s13  }
   0xf   :  { %s82_s1 = sshll.u32 %s12947_s7, 4  ;;  %s11673_s26 = smov [#allocation10]   ;;  %s83_s1 = int_to_ptr.hbm [resolvable:$true] %s82_s1 }
  0x10   :  { %s56_s27 = sshll.u32 %s11673_s26, 4  ;;  %s11674_s28 = smov [#allocation13]   ;;  %s57_s27 = int_to_ptr.vmem [resolvable:$true] %s56_s27 }
  0x11   :  { %62 = dma.hbm_to_vmem [thread:$0]  %s55_s21, 4096, %s57_s27, [#allocation9], %s11666_s22, %s11666_s22, %s11667_s23  }
  0x12   :  { %s84_s29 = sshll.u32 %s11674_s28, 4  ;;  %s108_s4 = sshll.u32 %s12949_s9, 4  ;;  %s85_s29 = int_to_ptr.vmem [resolvable:$true] %s84_s29  ;;  %s109_s4 = int_to_ptr.hbm [resolvable:$true] %s108_s4 }
  0x13   :  { %90 = dma.hbm_to_vmem [thread:$0]  %s83_s1, 4096, %s85_s29, [#allocation12], %s11666_s22, %s11666_s22, %s11667_s23  }
  0x14   :  { %s11675_s7 = smov [#allocation16]   ;;  %s11676_s13 = smov 128  }
  0x15   :  { %s110_s12 = sshll.u32 %s11675_s7, 4  ;;  %s11677_s14 = smov 8   ;;  %s111_s12 = int_to_ptr.vmem [resolvable:$true] %s110_s12 }
  0x16   :  { %116 = dma.hbm_to_vmem [thread:$0]  %s109_s4, 4096, %s111_s12, [#allocation15], %s11676_s13, %s11676_s13, %s11677_s14  }
  0x17   :  { %11657 = dma.done.wait [#allocation7], 8192  }
  0x18   :  { %11658 = vsyncadd [#allocation7], 4294959104 }
  0x19   :  { %11659 = dma.done.wait [#allocation9], 8192  }
  0x1a   :  { %11660 = vsyncadd [#allocation9], 4294959104 }
  0x1b   :  { %11661 = dma.done.wait [#allocation12], 20480  }
  0x1c   :  { %11662 = vsyncadd [#allocation12], 4294946816 }
  0x1d   :  { %11663 = dma.done.wait [#allocation15], 8192  }
  0x1e   :  { %11664 = vsyncadd [#allocation15], 4294959104  ;;  %v7770_v0 = vld [vmem:[#allocation6 + $0x1c0] sm:$0xf]  ;;  %v10544_v2 = vld [vmem:[#allocation6 + $0x1c4] sm:$0xf] }
  0x1f   :  { %v10548_v1 = vld [vmem:[#allocation6 + $0x1dc] sm:$0xf0]  ;;  %v7772_v4 = vld [vmem:[#allocation6 + $0x1e0] sm:$0xf0]  ;;  %v7778_v5 = vld [vmem:[#allocation6 + $0x1c8] sm:$0xf] }
  0x20   :  { %v7771_v3 = vor.u32 %v10548_v1, %v7770_v0  ;;  %v10549_v6 = vld [vmem:[#allocation6 + $0x1e4] sm:$0xf0]  ;;  %v7775_v7 = vor.u32 %v10544_v2, %v7772_v4  ;;  %v10545_v9 = vld [vmem:[#allocation6 + $0x1cc] sm:$0xf]  ;;  %v7738_v11 = vld [vmem:[#allocation6 + $0x180] sm:$0xf] }
  0x21   :  { %v7779_v8 = vor.u32 %v10549_v6, %v7778_v5  ;;  %v7780_v10 = vld [vmem:[#allocation6 + $0x1e8] sm:$0xf0]  ;;  %v10540_v13 = vld [vmem:[#allocation6 + $0x19c] sm:$0xf0]  ;;  %v10536_v14 = vld [vmem:[#allocation6 + $0x184] sm:$0xf] }
  0x22   :  { %562 = vmatpush.bf16.msra.mxu0 %v7771_v3  ;;  %v7783_v12 = vor.u32 %v10545_v9, %v7780_v10  ;;  %v7740_v15 = vld [vmem:[#allocation6 + $0x1a0] sm:$0xf0]  ;;  %591 = vmatpush.bf16.msra.mxu1 %v7775_v7  ;;  %v7739_v16 = vor.u32 %v10540_v13, %v7738_v11  ;;  %v7746_v18 = vld [vmem:[#allocation6 + $0x188] sm:$0xf]  ;;  %v10537_v20 = vld [vmem:[#allocation6 + $0x18c] sm:$0xf] }
  0x23   :  { %620 = vmatpush.bf16.msra.mxu2 %v7779_v8  ;;  %v7743_v17 = vor.u32 %v10536_v14, %v7740_v15  ;;  %v10541_v19 = vld [vmem:[#allocation6 + $0x1a4] sm:$0xf0]  ;;  %v7748_v22 = vld [vmem:[#allocation6 + $0x1a8] sm:$0xf0]  ;;  %v7706_v23 = vld [vmem:[#allocation6 + $0x140] sm:$0xf] }
  0x24   :  { %649 = vmatpush.bf16.msra.mxu3 %v7783_v12  ;;  %v7747_v21 = vor.u32 %v10541_v19, %v7746_v18  ;;  %v10532_v24 = vld [vmem:[#allocation6 + $0x15c] sm:$0xf0]  ;;  %v7751_v25 = vor.u32 %v10537_v20, %v7748_v22  ;;  %v10528_v26 = vld [vmem:[#allocation6 + $0x144] sm:$0xf]  ;;  %v7714_v28 = vld [vmem:[#allocation6 + $0x148] sm:$0xf] }
  0x25   :  { %v7708_v27 = vld [vmem:[#allocation6 + $0x160] sm:$0xf0]  ;;  %v7707_v29 = vor.u32 %v10532_v24, %v7706_v23  ;;  %v10533_v30 = vld [vmem:[#allocation6 + $0x164] sm:$0xf0]  ;;  %v10529_v31 = vld [vmem:[#allocation6 + $0x14c] sm:$0xf] }
  0x26   :  { %563 = vmatpush.bf16.msra.mxu0 %v7739_v16  ;;  %v7716_v32 = vld [vmem:[#allocation6 + $0x168] sm:$0xf0]  ;;  %592 = vmatpush.bf16.msra.mxu1 %v7743_v17  ;;  %v7711_v33 = vor.u32 %v10528_v26, %v7708_v27  ;;  %v7715_v34 = vor.u32 %v10533_v30, %v7714_v28  ;;  %v7674_v35 = vld [vmem:[#allocation6 + $0x100] sm:$0xf]  ;;  %v10520_v37 = vld [vmem:[#allocation6 + $0x104] sm:$0xf] }
  0x27   :  { %621 = vmatpush.bf16.msra.mxu2 %v7747_v21  ;;  %v10524_v36 = vld [vmem:[#allocation6 + $0x11c] sm:$0xf0]  ;;  %v7719_v38 = vor.u32 %v10529_v31, %v7716_v32  ;;  %v7676_v39 = vld [vmem:[#allocation6 + $0x120] sm:$0xf0]  ;;  %v7682_v40 = vld [vmem:[#allocation6 + $0x108] sm:$0xf] }
  0x28   :  { %650 = vmatpush.bf16.msra.mxu3 %v7751_v25  ;;  %v10525_v41 = vld [vmem:[#allocation6 + $0x124] sm:$0xf0]  ;;  %v10521_v42 = vld [vmem:[#allocation6 + $0x10c] sm:$0xf]  ;;  %v7675_v44 = vor.u32 %v10524_v36, %v7674_v35  ;;  %v7679_v45 = vor.u32 %v10520_v37, %v7676_v39  ;;  %v7642_v47 = vld [vmem:[#allocation6 + $0xc0] sm:$0xf] }
  0x29   :  { %v7684_v43 = vld [vmem:[#allocation6 + $0x128] sm:$0xf0]  ;;  %v7683_v46 = vor.u32 %v10525_v41, %v7682_v40  ;;  %v10516_v48 = vld [vmem:[#allocation6 + $0xdc] sm:$0xf0]  ;;  %v10512_v49 = vld [vmem:[#allocation6 + $0xc4] sm:$0xf] }
  0x2a   :  { %564 = vmatpush.bf16.msra.mxu0 %v7707_v29  ;;  %593 = vmatpush.bf16.msra.mxu1 %v7711_v33  ;;  %v7687_v50 = vor.u32 %v10521_v42, %v7684_v43  ;;  %v7644_v51 = vld [vmem:[#allocation6 + $0xe0] sm:$0xf0]  ;;  %v7650_v52 = vld [vmem:[#allocation6 + $0xc8] sm:$0xf]  ;;  %v10513_v54 = vld [vmem:[#allocation6 + $0xcc] sm:$0xf]  ;;  %v7643_v56 = vor.u32 %v10516_v48, %v7642_v47 }
  0x2b   :  { %622 = vmatpush.bf16.msra.mxu2 %v7715_v34  ;;  %v10517_v53 = vld [vmem:[#allocation6 + $0xe4] sm:$0xf0]  ;;  %v7652_v55 = vld [vmem:[#allocation6 + $0xe8] sm:$0xf0]  ;;  %v7647_v57 = vor.u32 %v10512_v49, %v7644_v51  ;;  %v7610_v59 = vld [vmem:[#allocation6 + $0x80] sm:$0xf] }
  0x2c   :  { %651 = vmatpush.bf16.msra.mxu3 %v7719_v38  ;;  %v7651_v58 = vor.u32 %v10517_v53, %v7650_v52  ;;  %v10508_v60 = vld [vmem:[#allocation6 + $0x9c] sm:$0xf0]  ;;  %v10504_v61 = vld [vmem:[#allocation6 + $0x84] sm:$0xf]  ;;  %v7655_v62 = vor.u32 %v10513_v54, %v7652_v55  ;;  %v7618_v0 = vld [vmem:[#allocation6 + $0x88] sm:$0xf] }
  0x2d   :  { %v7612_v63 = vld [vmem:[#allocation6 + $0xa0] sm:$0xf0]  ;;  %v10509_v1 = vld [vmem:[#allocation6 + $0xa4] sm:$0xf0]  ;;  %v10505_v2 = vld [vmem:[#allocation6 + $0x8c] sm:$0xf]  ;;  %v7611_v4 = vor.u32 %v10508_v60, %v7610_v59 }
  0x2e   :  { %565 = vmatpush.bf16.msra.mxu0 %v7675_v44  ;;  %594 = vmatpush.bf16.msra.mxu1 %v7679_v45  ;;  %v7620_v3 = vld [vmem:[#allocation6 + $0xa8] sm:$0xf0]  ;;  %v7615_v5 = vor.u32 %v10504_v61, %v7612_v63  ;;  %v7619_v6 = vor.u32 %v10509_v1, %v7618_v0  ;;  %v7578_v7 = vld [vmem:[#allocation6 + $0x40] sm:$0xf]  ;;  %v10496_v9 = vld [vmem:[#allocation6 + $0x44] sm:$0xf] }
  0x2f   :  { %623 = vmatpush.bf16.msra.mxu2 %v7683_v46  ;;  %v10500_v8 = vld [vmem:[#allocation6 + $0x5c] sm:$0xf0]  ;;  %v7623_v10 = vor.u32 %v10505_v2, %v7620_v3  ;;  %v7580_v11 = vld [vmem:[#allocation6 + $0x60] sm:$0xf0]  ;;  %v7586_v12 = vld [vmem:[#allocation6 + $0x48] sm:$0xf] }
  0x30   :  { %652 = vmatpush.bf16.msra.mxu3 %v7687_v50  ;;  %v10501_v13 = vld [vmem:[#allocation6 + $0x64] sm:$0xf0]  ;;  %v10497_v14 = vld [vmem:[#allocation6 + $0x4c] sm:$0xf]  ;;  %v7579_v16 = vor.u32 %v10500_v8, %v7578_v7  ;;  %v7546_v17 = vld [vmem:[#allocation6] sm:$0xf]  ;;  %v7583_v19 = vor.u32 %v10496_v9, %v7580_v11 }
  0x31   :  { %v7588_v15 = vld [vmem:[#allocation6 + $0x68] sm:$0xf0]  ;;  %v10492_v18 = vld [vmem:[#allocation6 + $0x1c] sm:$0xf0]  ;;  %v7587_v20 = vor.u32 %v10501_v13, %v7586_v12  ;;  %v10488_v21 = vld [vmem:[#allocation6 + $0x4] sm:$0xf] }
  0x32   :  { %566 = vmatpush.bf16.msra.mxu0 %v7643_v56  ;;  %595 = vmatpush.bf16.msra.mxu1 %v7647_v57  ;;  %v7548_v22 = vld [vmem:[#allocation6 + $0x20] sm:$0xf0]  ;;  %v7554_v23 = vld [vmem:[#allocation6 + $0x8] sm:$0xf]  ;;  %v7591_v24 = vor.u32 %v10497_v14, %v7588_v15  ;;  %v10489_v26 = vld [vmem:[#allocation6 + $0xc] sm:$0xf]  ;;  %v7547_v31 = vor.u32 %v10492_v18, %v7546_v17 }
  0x33   :  { %624 = vmatpush.bf16.msra.mxu2 %v7651_v58  ;;  %v10493_v25 = vld [vmem:[#allocation6 + $0x24] sm:$0xf0]  ;;  %v7556_v27 = vld [vmem:[#allocation6 + $0x28] sm:$0xf0]  ;;  %v148_v28 = vld [vmem:[%s12940_s0] sm:$0xff]  ;;  %v7551_v35 = vor.u32 %v10488_v21, %v7548_v22 }
  0x34   :  { %653 = vmatpush.bf16.msra.mxu3 %v7655_v62  ;;  %v7786_v29 = vld [vmem:[#allocation6 + $0x1d0] sm:$0xf]  ;;  %v149_v32 = vld [vmem:[%s12940_s0 + $0x8] sm:$0xff]  ;;  %v10546_v33 = vld [vmem:[#allocation6 + $0x1d4] sm:$0xf]  ;;  %v7555_v36 = vor.u32 %v10493_v25, %v7554_v23  ;;  %v7559_v37 = vor.u32 %v10489_v26, %v7556_v27 }
  0x35   :  { %v10550_v30 = vld [vmem:[#allocation6 + $0x1ec] sm:$0xf0]  ;;  %v7788_v34 = vld [vmem:[#allocation6 + $0x1f0] sm:$0xf0]  ;;  %v7794_v39 = vld [vmem:[#allocation6 + $0x1d8] sm:$0xf]  ;;  %v11778_v42 = vpack.c.bf16 %v149_v32, %v148_v28 }
  0x36   :  { %567 = vmatpush.bf16.msra.mxu0 %v7611_v4  ;;  %596 = vmatpush.bf16.msra.mxu1 %v7615_v5  ;;  %v7787_v38 = vor.u32 %v10550_v30, %v7786_v29  ;;  %v10551_v40 = vld [vmem:[#allocation6 + $0x1f4] sm:$0xf0]  ;;  %v10547_v41 = vld [vmem:[#allocation6 + $0x1dc] sm:$0xf]  ;;  %v7791_v43 = vor.u32 %v10546_v33, %v7788_v34  ;;  %v7754_v45 = vld [vmem:[#allocation6 + $0x190] sm:$0xf] }
  0x37   :  { %625 = vmatpush.bf16.msra.mxu2 %v7619_v6  ;;  %v7796_v44 = vld [vmem:[#allocation6 + $0x1f8] sm:$0xf0]  ;;  %v10542_v46 = vld [vmem:[#allocation6 + $0x1ac] sm:$0xf0]  ;;  %v10538_v47 = vld [vmem:[#allocation6 + $0x194] sm:$0xf]  ;;  %v7795_v49 = vor.u32 %v10551_v40, %v7794_v39 }
  0x38   :  { %654 = vmatpush.bf16.msra.mxu3 %v7623_v10  ;;  %v7756_v48 = vld [vmem:[#allocation6 + $0x1b0] sm:$0xf0]  ;;  %v7762_v50 = vld [vmem:[#allocation6 + $0x198] sm:$0xf]  ;;  %v7799_v51 = vor.u32 %v10547_v41, %v7796_v44  ;;  %v7755_v52 = vor.u32 %v10542_v46, %v7754_v45  ;;  %v10539_v54 = vld [vmem:[#allocation6 + $0x19c] sm:$0xf] }
  0x39   :  { %v10543_v53 = vld [vmem:[#allocation6 + $0x1b4] sm:$0xf0]  ;;  %v7764_v55 = vld [vmem:[#allocation6 + $0x1b8] sm:$0xf0]  ;;  %v7759_v56 = vor.u32 %v10538_v47, %v7756_v48  ;;  %v7722_v57 = vld [vmem:[#allocation6 + $0x150] sm:$0xf] }
  0x3a   :  { %568 = vmatpush.bf16.msra.mxu0 %v7579_v16  ;;  %597 = vmatpush.bf16.msra.mxu1 %v7583_v19  ;;  %v10534_v58 = vld [vmem:[#allocation6 + $0x16c] sm:$0xf0]  ;;  %v10530_v59 = vld [vmem:[#allocation6 + $0x154] sm:$0xf]  ;;  %v7763_v61 = vor.u32 %v10543_v53, %v7762_v50  ;;  %v7767_v62 = vor.u32 %v10539_v54, %v7764_v55  ;;  %v7730_v0 = vld [vmem:[#allocation6 + $0x158] sm:$0xf] }
  0x3b   :  { %626 = vmatpush.bf16.msra.mxu2 %v7587_v20  ;;  %v7724_v60 = vld [vmem:[#allocation6 + $0x170] sm:$0xf0]  ;;  %v7723_v63 = vor.u32 %v10534_v58, %v7722_v57  ;;  %v10535_v1 = vld [vmem:[#allocation6 + $0x174] sm:$0xf0]  ;;  %v10531_v2 = vld [vmem:[#allocation6 + $0x15c] sm:$0xf] }
  0x3c   :  { %655 = vmatpush.bf16.msra.mxu3 %v7591_v24  ;;  %v7727_v3 = vor.u32 %v10530_v59, %v7724_v60  ;;  %v7732_v4 = vld [vmem:[#allocation6 + $0x178] sm:$0xf0]  ;;  %v7690_v5 = vld [vmem:[#allocation6 + $0x110] sm:$0xf]  ;;  %v10522_v7 = vld [vmem:[#allocation6 + $0x114] sm:$0xf]  ;;  %v7731_v9 = vor.u32 %v10535_v1, %v7730_v0 }
  0x3d   :  { %v10526_v6 = vld [vmem:[#allocation6 + $0x12c] sm:$0xf0]  ;;  %v7692_v8 = vld [vmem:[#allocation6 + $0x130] sm:$0xf0]  ;;  %v7735_v11 = vor.u32 %v10531_v2, %v7732_v4  ;;  %v7698_v13 = vld [vmem:[#allocation6 + $0x118] sm:$0xf] }
  0x3e   :  { %569 = vmatpush.bf16.msra.mxu0 %v7547_v31  ;;  %598 = vmatpush.bf16.msra.mxu1 %v7551_v35  ;;  %v150_v10 = vld [vmem:[%s12940_s0 + $0x10] sm:$0xff]  ;;  %v7691_v12 = vor.u32 %v10526_v6, %v7690_v5  ;;  %v10527_v14 = vld [vmem:[#allocation6 + $0x134] sm:$0xf0]  ;;  %v10523_v15 = vld [vmem:[#allocation6 + $0x11c] sm:$0xf]  ;;  %v7695_v16 = vor.u32 %v10522_v7, %v7692_v8 }
  0x3f   :  { %627 = vmatpush.bf16.msra.mxu2 %v7555_v36  ;;  %v7700_v17 = vld [vmem:[#allocation6 + $0x138] sm:$0xf0]  ;;  %v7658_v18 = vld [vmem:[#allocation6 + $0xd0] sm:$0xf]  ;;  %v10514_v21 = vld [vmem:[#allocation6 + $0xd4] sm:$0xf]  ;;  %v7699_v23 = vor.u32 %v10527_v14, %v7698_v13 }
  0x40   :  { %656 = vmatpush.bf16.msra.mxu3 %v7559_v37  ;;  %v10518_v19 = vld [vmem:[#allocation6 + $0xec] sm:$0xf0]  ;;  %v151_v20 = vld [vmem:[%s12940_s0 + $0x18] sm:$0xff]  ;;  %v7660_v22 = vld [vmem:[#allocation6 + $0xf0] sm:$0xf0]  ;;  %v7703_v24 = vor.u32 %v10523_v15, %v7700_v17 }
  0x41   :  { %570 = vmatmul.bf16.vlgmr.msra.gmra.mxu0 %v11778_v42  ;;  %599 = vmatmul.bf16.vlgmr.msra.gmra.mxu1 %v11778_v42  ;;  %v7659_v25 = vor.u32 %v10518_v19, %v7658_v18  ;;  %v7666_v26 = vld [vmem:[#allocation6 + $0xd8] sm:$0xf]  ;;  %v10515_v28 = vld [vmem:[#allocation6 + $0xdc] sm:$0xf]  ;;  %v11790_v29 = vpack.c.bf16 %v151_v20, %v150_v10  ;;  %v7663_v30 = vor.u32 %v10514_v21, %v7660_v22  ;;  %v7626_v32 = vld [vmem:[#allocation6 + $0x90] sm:$0xf] }
  0x42   :  { %678 = vmatpush.bf16.msrb.mxu0 %v7787_v38  ;;  %707 = vmatpush.bf16.msrb.mxu1 %v7791_v43  ;;  %v10519_v27 = vld [vmem:[#allocation6 + $0xf4] sm:$0xf0]  ;;  %v7668_v31 = vld [vmem:[#allocation6 + $0xf8] sm:$0xf0]  ;;  %v10510_v33 = vld [vmem:[#allocation6 + $0xac] sm:$0xf0] }
  0x43   :  { %628 = vmatmul.bf16.vlgmr.msra.gmra.mxu2 %v11778_v42  ;;  %657 = vmatmul.bf16.vlgmr.msra.gmra.mxu3 %v11778_v42  ;;  %v10506_v34 = vld [vmem:[#allocation6 + $0x94] sm:$0xf]  ;;  %v7667_v36 = vor.u32 %v10519_v27, %v7666_v26  ;;  %v7671_v37 = vor.u32 %v10515_v28, %v7668_v31  ;;  %v7627_v38 = vor.u32 %v10510_v33, %v7626_v32  ;;  %v7634_v39 = vld [vmem:[#allocation6 + $0x98] sm:$0xf]  ;;  %v10507_v43 = vld [vmem:[#allocation6 + $0x9c] sm:$0xf] }
  0x44   :  { %736 = vmatpush.bf16.msrb.mxu2 %v7795_v49  ;;  %765 = vmatpush.bf16.msrb.mxu3 %v7799_v51  ;;  %v7628_v35 = vld [vmem:[#allocation6 + $0xb0] sm:$0xf0]  ;;  %v10511_v40 = vld [vmem:[#allocation6 + $0xb4] sm:$0xf0]  ;;  %v7636_v44 = vld [vmem:[#allocation6 + $0xb8] sm:$0xf0] }
  0x45   :  { %v7631_v41 = vor.u32 %v10506_v34, %v7628_v35  ;;  %v7635_v45 = vor.u32 %v10511_v40, %v7634_v39  ;;  %v7594_v46 = vld [vmem:[#allocation6 + $0x50] sm:$0xf]  ;;  %v10498_v48 = vld [vmem:[#allocation6 + $0x54] sm:$0xf]  ;;  %v7639_v49 = vor.u32 %v10507_v43, %v7636_v44  ;;  %v10503_v53 = vld [vmem:[#allocation6 + $0x74] sm:$0xf0] }
  0x46   :  { %679 = vmatpush.bf16.msrb.mxu0 %v7755_v52  ;;  %708 = vmatpush.bf16.msrb.mxu1 %v7759_v56  ;;  %v10502_v47 = vld [vmem:[#allocation6 + $0x6c] sm:$0xf0]  ;;  %v7596_v51 = vld [vmem:[#allocation6 + $0x70] sm:$0xf0]  ;;  %v7602_v52 = vld [vmem:[#allocation6 + $0x58] sm:$0xf] }
  0x47   :  { %v7595_v50 = vor.u32 %v10502_v47, %v7594_v46  ;;  %v7599_v54 = vor.u32 %v10498_v48, %v7596_v51  ;;  %v10499_v55 = vld [vmem:[#allocation6 + $0x5c] sm:$0xf]  ;;  %v7562_v57 = vld [vmem:[#allocation6 + $0x10] sm:$0xf]  ;;  %v10490_v59 = vld [vmem:[#allocation6 + $0x14] sm:$0xf] }
  0x48   :  { %737 = vmatpush.bf16.msrb.mxu2 %v7763_v61  ;;  %766 = vmatpush.bf16.msrb.mxu3 %v7767_v62  ;;  %v7604_v56 = vld [vmem:[#allocation6 + $0x78] sm:$0xf0]  ;;  %v10494_v58 = vld [vmem:[#allocation6 + $0x2c] sm:$0xf0]  ;;  %v7564_v60 = vld [vmem:[#allocation6 + $0x30] sm:$0xf0]  ;;  %v7603_v61 = vor.u32 %v10503_v53, %v7602_v52 }
  0x49   :  { %v7607_v62 = vor.u32 %v10499_v55, %v7604_v56  ;;  %v7570_v0 = vld [vmem:[#allocation6 + $0x18] sm:$0xf]  ;;  %v7567_v2 = vor.u32 %v10490_v59, %v7564_v60  ;;  %v7572_v4 = vld [vmem:[#allocation6 + $0x38] sm:$0xf0]  ;;  %v152_v5 = vld [vmem:[%s12940_s0 + $0x20] sm:$0xff] }
  0x4a   :  { %680 = vmatpush.bf16.msrb.mxu0 %v7723_v63  ;;  %709 = vmatpush.bf16.msrb.mxu1 %v7727_v3  ;;  %v7563_v63 = vor.u32 %v10494_v58, %v7562_v57  ;;  %v10495_v1 = vld [vmem:[#allocation6 + $0x34] sm:$0xf0]  ;;  %v10491_v3 = vld [vmem:[#allocation6 + $0x1c] sm:$0xf]  ;;  %v153_v6 = vld [vmem:[%s12940_s0 + $0x28] sm:$0xff] }
  0x4b   :  { %v7571_v7 = vor.u32 %v10495_v1, %v7570_v0  ;;  %v7575_v8 = vor.u32 %v10491_v3, %v7572_v4  ;;  %v7914_v10 = vld [vmem:[#allocation8 + $0xe0] sm:$0xf]  ;;  %v7916_v14 = vld [vmem:[#allocation8 + $0xf0] sm:$0xf0]  ;;  %v7922_v15 = vld [vmem:[#allocation8 + $0xe8] sm:$0xf] }
  0x4c   :  { %738 = vmatpush.bf16.msrb.mxu2 %v7731_v9  ;;  %767 = vmatpush.bf16.msrb.mxu3 %v7735_v11  ;;  %v11802_v9 = vpack.c.bf16 %v153_v6, %v152_v5  ;;  %v10582_v11 = vld [vmem:[#allocation8 + $0xec] sm:$0xf0]  ;;  %v10581_v19 = vld [vmem:[#allocation8 + $0xec] sm:$0xf]  ;;  %v7924_v20 = vld [vmem:[#allocation8 + $0xf8] sm:$0xf0] }
  0x4d   :  { %v7915_v13 = vor.u32 %v10582_v11, %v7914_v10  ;;  %v7898_v21 = vld [vmem:[#allocation8 + $0xc0] sm:$0xf]  ;;  %v7927_v22 = vor.u32 %v10581_v19, %v7924_v20  ;;  %v7906_v28 = vld [vmem:[#allocation8 + $0xc8] sm:$0xf]  ;;  %v10577_v31 = vld [vmem:[#allocation8 + $0xcc] sm:$0xf] }
  0x4e   :  { %681 = vmatpush.bf16.msrb.mxu0 %v7691_v12  ;;  %710 = vmatpush.bf16.msrb.mxu1 %v7695_v16  ;;  %v10580_v12 = vld [vmem:[#allocation8 + $0xe4] sm:$0xf]  ;;  %v10583_v16 = vld [vmem:[#allocation8 + $0xf4] sm:$0xf0]  ;;  %v7908_v33 = vld [vmem:[#allocation8 + $0xd8] sm:$0xf0] }
  0x4f   :  { %v7919_v17 = vor.u32 %v10580_v12, %v7916_v14  ;;  %v7923_v18 = vor.u32 %v10583_v16, %v7922_v15  ;;  %v7911_v34 = vor.u32 %v10577_v31, %v7908_v33  ;;  %v154_v35 = vld [vmem:[%s12940_s0 + $0x30] sm:$0xff]  ;;  %v10572_v40 = vld [vmem:[#allocation8 + $0xa4] sm:$0xf]  ;;  %v7890_v44 = vld [vmem:[#allocation8 + $0xa8] sm:$0xf] }
  0x50   :  { %739 = vmatpush.bf16.msrb.mxu2 %v7699_v23  ;;  %768 = vmatpush.bf16.msrb.mxu3 %v7703_v24  ;;  %v10578_v23 = vld [vmem:[#allocation8 + $0xcc] sm:$0xf0]  ;;  %v10576_v24 = vld [vmem:[#allocation8 + $0xc4] sm:$0xf]  ;;  %v7884_v43 = vld [vmem:[#allocation8 + $0xb0] sm:$0xf0] }
  0x51   :  { %575 = vmatmul.bf16.gmra.mxu0 %v11790_v29  ;;  %604 = vmatmul.bf16.gmra.mxu1 %v11790_v29  ;;  %v7899_v26 = vor.u32 %v10578_v23, %v7898_v21  ;;  %v10574_v39 = vld [vmem:[#allocation8 + $0xac] sm:$0xf0]  ;;  %v7887_v46 = vor.u32 %v10572_v40, %v7884_v43  ;;  %v10573_v48 = vld [vmem:[#allocation8 + $0xac] sm:$0xf]  ;;  %v10568_v53 = vld [vmem:[#allocation8 + $0x84] sm:$0xf] }
  0x52   :  { %682 = vmatpush.bf16.msrb.mxu0 %v7659_v25  ;;  %711 = vmatpush.bf16.msrb.mxu1 %v7663_v30  ;;  %v7900_v25 = vld [vmem:[#allocation8 + $0xd0] sm:$0xf0]  ;;  %v10579_v30 = vld [vmem:[#allocation8 + $0xd4] sm:$0xf0]  ;;  %v10570_v52 = vld [vmem:[#allocation8 + $0x8c] sm:$0xf0] }
  0x53   :  { %633 = vmatmul.bf16.gmra.mxu2 %v11790_v29  ;;  %662 = vmatmul.bf16.gmra.mxu3 %v11790_v29  ;;  %v7903_v27 = vor.u32 %v10576_v24, %v7900_v25  ;;  %v7907_v32 = vor.u32 %v10579_v30, %v7906_v28  ;;  %v7874_v57 = vld [vmem:[#allocation8 + $0x88] sm:$0xf]  ;;  %v10571_v58 = vld [vmem:[#allocation8 + $0x94] sm:$0xf0]  ;;  %v10569_v59 = vld [vmem:[#allocation8 + $0x8c] sm:$0xf] }
  0x54   :  { %740 = vmatpush.bf16.msrb.mxu2 %v7667_v36  ;;  %769 = vmatpush.bf16.msrb.mxu3 %v7671_v37  ;;  %v155_v36 = vld [vmem:[%s12940_s0 + $0x38] sm:$0xff]  ;;  %v7875_v60 = vor.u32 %v10571_v58, %v7874_v57  ;;  %v10566_v0 = vld [vmem:[#allocation8 + $0x6c] sm:$0xf0]  ;;  %v10564_v1 = vld [vmem:[#allocation8 + $0x64] sm:$0xf] }
  0x55   :  { %v11814_v37 = vpack.c.bf16 %v155_v36, %v154_v35  ;;  %v7852_v3 = vld [vmem:[#allocation8 + $0x70] sm:$0xf0]  ;;  %v7858_v4 = vld [vmem:[#allocation8 + $0x68] sm:$0xf]  ;;  %v10567_v5 = vld [vmem:[#allocation8 + $0x74] sm:$0xf0] }
  0x56   :  { %683 = vmatpush.bf16.msrb.mxu0 %v7627_v38  ;;  %712 = vmatpush.bf16.msrb.mxu1 %v7631_v41  ;;  %v7882_v38 = vld [vmem:[#allocation8 + $0xa0] sm:$0xf]  ;;  %v7855_v6 = vor.u32 %v10564_v1, %v7852_v3  ;;  %v7860_v10 = vld [vmem:[#allocation8 + $0x78] sm:$0xf0]  ;;  %v10560_v14 = vld [vmem:[#allocation8 + $0x44] sm:$0xf] }
  0x57   :  { %v7883_v41 = vor.u32 %v10574_v39, %v7882_v38  ;;  %v7834_v11 = vld [vmem:[#allocation8 + $0x40] sm:$0xf]  ;;  %v7836_v15 = vld [vmem:[#allocation8 + $0x50] sm:$0xf0]  ;;  %v10561_v19 = vld [vmem:[#allocation8 + $0x4c] sm:$0xf] }
  0x58   :  { %741 = vmatpush.bf16.msrb.mxu2 %v7635_v45  ;;  %770 = vmatpush.bf16.msrb.mxu3 %v7639_v49  ;;  %v10575_v45 = vld [vmem:[#allocation8 + $0xb4] sm:$0xf0]  ;;  %v7892_v49 = vld [vmem:[#allocation8 + $0xb8] sm:$0xf0]  ;;  %v7839_v16 = vor.u32 %v10560_v14, %v7836_v15  ;;  %v10558_v23 = vld [vmem:[#allocation8 + $0x2c] sm:$0xf0] }
  0x59   :  { %v7891_v47 = vor.u32 %v10575_v45, %v7890_v44  ;;  %v7895_v51 = vor.u32 %v10573_v48, %v7892_v49  ;;  %v7844_v21 = vld [vmem:[#allocation8 + $0x58] sm:$0xf0]  ;;  %v10556_v25 = vld [vmem:[#allocation8 + $0x24] sm:$0xf]  ;;  %v10559_v30 = vld [vmem:[#allocation8 + $0x34] sm:$0xf0] }
  0x5a   :  { %684 = vmatpush.bf16.msrb.mxu0 %v7595_v50  ;;  %713 = vmatpush.bf16.msrb.mxu1 %v7599_v54  ;;  %v7866_v50 = vld [vmem:[#allocation8 + $0x80] sm:$0xf]  ;;  %v7868_v54 = vld [vmem:[#allocation8 + $0x90] sm:$0xf0]  ;;  %v7847_v24 = vor.u32 %v10561_v19, %v7844_v21  ;;  %v10557_v31 = vld [vmem:[#allocation8 + $0x2c] sm:$0xf] }
  0x5b   :  { %v7867_v55 = vor.u32 %v10570_v52, %v7866_v50  ;;  %v7871_v56 = vor.u32 %v10568_v53, %v7868_v54  ;;  %v7802_v36 = vld [vmem:[#allocation8] sm:$0xf]  ;;  %v10554_v38 = vld [vmem:[#allocation8 + $0xc] sm:$0xf0]  ;;  %v10552_v39 = vld [vmem:[#allocation8 + $0x4] sm:$0xf] }
  0x5c   :  { %742 = vmatpush.bf16.msrb.mxu2 %v7603_v61  ;;  %771 = vmatpush.bf16.msrb.mxu3 %v7607_v62  ;;  %v7876_v61 = vld [vmem:[#allocation8 + $0x98] sm:$0xf0]  ;;  %v7803_v40 = vor.u32 %v10554_v38, %v7802_v36  ;;  %v7810_v43 = vld [vmem:[#allocation8 + $0x8] sm:$0xf]  ;;  %v10555_v44 = vld [vmem:[#allocation8 + $0x14] sm:$0xf0] }
  0x5d   :  { %v7879_v62 = vor.u32 %v10569_v59, %v7876_v61  ;;  %v7812_v48 = vld [vmem:[#allocation8 + $0x18] sm:$0xf0]  ;;  %v8042_v49 = vld [vmem:[#allocation10 + $0xe0] sm:$0xf]  ;;  %v10612_v52 = vld [vmem:[#allocation10 + $0xe4] sm:$0xf] }
  0x5e   :  { %685 = vmatpush.bf16.msrb.mxu0 %v7563_v63  ;;  %714 = vmatpush.bf16.msrb.mxu1 %v7567_v2  ;;  %v7850_v63 = vld [vmem:[#allocation8 + $0x60] sm:$0xf]  ;;  %v8044_v53 = vld [vmem:[#allocation10 + $0xf0] sm:$0xf0]  ;;  %v10615_v57 = vld [vmem:[#allocation10 + $0xf4] sm:$0xf0] }
  0x5f   :  { %v7851_v2 = vor.u32 %v10566_v0, %v7850_v63  ;;  %v10613_v58 = vld [vmem:[#allocation10 + $0xec] sm:$0xf]  ;;  %v8026_v61 = vld [vmem:[#allocation10 + $0xc0] sm:$0xf]  ;;  %v10608_v0 = vld [vmem:[#allocation10 + $0xc4] sm:$0xf] }
  0x60   :  { %743 = vmatpush.bf16.msrb.mxu2 %v7571_v7  ;;  %772 = vmatpush.bf16.msrb.mxu3 %v7575_v8  ;;  %v7859_v7 = vor.u32 %v10567_v5, %v7858_v4  ;;  %v10565_v8 = vld [vmem:[#allocation8 + $0x6c] sm:$0xf]  ;;  %v8028_v1 = vld [vmem:[#allocation10 + $0xd0] sm:$0xf0]  ;;  %v10611_v4 = vld [vmem:[#allocation10 + $0xd4] sm:$0xf0] }
  0x61   :  { %580 = vmatmul.bf16.gmra.mxu0 %v11802_v9  ;;  %609 = vmatmul.bf16.gmra.mxu1 %v11802_v9  ;;  %v7863_v12 = vor.u32 %v10565_v8, %v7860_v10  ;;  %v8031_v3 = vor.u32 %v10608_v0, %v8028_v1  ;;  %v10609_v5 = vld [vmem:[#allocation10 + $0xcc] sm:$0xf]  ;;  %v8010_v10 = vld [vmem:[#allocation10 + $0xa0] sm:$0xf]  ;;  %v8018_v14 = vld [vmem:[#allocation10 + $0xa8] sm:$0xf] }
  0x62   :  { %1050 = vmatpush.bf16.msra.mxu0 %v7915_v13  ;;  %1063 = vmatpush.bf16.msra.mxu1 %v7919_v17  ;;  %v10562_v13 = vld [vmem:[#allocation8 + $0x4c] sm:$0xf0]  ;;  %v7842_v17 = vld [vmem:[#allocation8 + $0x48] sm:$0xf]  ;;  %v10607_v15 = vld [vmem:[#allocation10 + $0xb4] sm:$0xf0] }
  0x63   :  { %638 = vmatmul.bf16.gmra.mxu2 %v11802_v9  ;;  %667 = vmatmul.bf16.gmra.mxu3 %v11802_v9  ;;  %v8019_v19 = vor.u32 %v10607_v15, %v8018_v14  ;;  %v7994_v21 = vld [vmem:[#allocation10 + $0x80] sm:$0xf]  ;;  %v10596_v36 = vld [vmem:[#allocation10 + $0x64] sm:$0xf]  ;;  %v7980_v38 = vld [vmem:[#allocation10 + $0x70] sm:$0xf0] }
  0x64   :  { %1076 = vmatpush.bf16.msra.mxu2 %v7923_v18  ;;  %1089 = vmatpush.bf16.msra.mxu3 %v7927_v22  ;;  %v10563_v18 = vld [vmem:[#allocation8 + $0x54] sm:$0xf0]  ;;  %v7818_v22 = vld [vmem:[#allocation8 + $0x20] sm:$0xf]  ;;  %v10589_v0 = vld [vmem:[#allocation10 + $0x2c] sm:$0xf] }
  0x65   :  { %v7843_v20 = vor.u32 %v10563_v18, %v7842_v17  ;;  %v7819_v28 = vor.u32 %v10558_v23, %v7818_v22  ;;  %v10605_v17 = vld [vmem:[#allocation10 + $0xac] sm:$0xf]  ;;  %v8020_v18 = vld [vmem:[#allocation10 + $0xb8] sm:$0xf0]  ;;  %v10602_v22 = vld [vmem:[#allocation10 + $0x8c] sm:$0xf0] }
  0x66   :  { %1051 = vmatpush.bf16.msra.mxu0 %v7899_v26  ;;  %1064 = vmatpush.bf16.msra.mxu1 %v7903_v27  ;;  %v7820_v26 = vld [vmem:[#allocation8 + $0x30] sm:$0xf0]  ;;  %v7826_v27 = vld [vmem:[#allocation8 + $0x28] sm:$0xf]  ;;  %v10600_v23 = vld [vmem:[#allocation10 + $0x84] sm:$0xf] }
  0x67   :  { %v7823_v33 = vor.u32 %v10556_v25, %v7820_v26  ;;  %v8002_v25 = vld [vmem:[#allocation10 + $0x88] sm:$0xf]  ;;  %v10603_v26 = vld [vmem:[#allocation10 + $0x94] sm:$0xf0]  ;;  %v7956_v1 = vld [vmem:[#allocation10 + $0x38] sm:$0xf0] }
  0x68   :  { %1077 = vmatpush.bf16.msra.mxu2 %v7907_v32  ;;  %1090 = vmatpush.bf16.msra.mxu3 %v7911_v34  ;;  %v7828_v32 = vld [vmem:[#allocation8 + $0x38] sm:$0xf0]  ;;  %v7827_v34 = vor.u32 %v10559_v30, %v7826_v27  ;;  %v7995_v27 = vor.u32 %v10602_v22, %v7994_v21  ;;  %v10585_v14 = vld [vmem:[#allocation10 + $0xc] sm:$0xf] }
  0x69   :  { %v7831_v35 = vor.u32 %v10557_v31, %v7828_v32  ;;  %v8004_v30 = vld [vmem:[#allocation10 + $0x98] sm:$0xf0]  ;;  %v8003_v32 = vor.u32 %v10603_v26, %v8002_v25 }
  0x6a   :  { %1052 = vmatpush.bf16.msra.mxu0 %v7883_v41  ;;  %1065 = vmatpush.bf16.msra.mxu1 %v7887_v46  ;;  %v7804_v41 = vld [vmem:[#allocation8 + $0x10] sm:$0xf0]  ;;  %v7811_v46 = vor.u32 %v10555_v44, %v7810_v43  ;;  %v10597_v43 = vld [vmem:[#allocation10 + $0x6c] sm:$0xf]  ;;  %v7988_v44 = vld [vmem:[#allocation10 + $0x78] sm:$0xf0] }
  0x6b   :  { %v7807_v45 = vor.u32 %v10552_v39, %v7804_v41  ;;  %v7986_v39 = vld [vmem:[#allocation10 + $0x68] sm:$0xf]  ;;  %v7940_v15 = vld [vmem:[#allocation10 + $0x18] sm:$0xf0] }
  0x6c   :  { %1078 = vmatpush.bf16.msra.mxu2 %v7891_v47  ;;  %1091 = vmatpush.bf16.msra.mxu3 %v7895_v51  ;;  %v10553_v47 = vld [vmem:[#allocation8 + $0xc] sm:$0xf]  ;;  %v10614_v51 = vld [vmem:[#allocation10 + $0xec] sm:$0xf0] }
  0x6d   :  { %v7815_v50 = vor.u32 %v10553_v47, %v7812_v48  ;;  %v8043_v54 = vor.u32 %v10614_v51, %v8042_v49  ;;  %v7991_v47 = vor.u32 %v10597_v43, %v7988_v44  ;;  %v7962_v48 = vld [vmem:[#allocation10 + $0x40] sm:$0xf]  ;;  %v10594_v49 = vld [vmem:[#allocation10 + $0x4c] sm:$0xf0]  ;;  %v7964_v51 = vld [vmem:[#allocation10 + $0x50] sm:$0xf0] }
  0x6e   :  { %1053 = vmatpush.bf16.msra.mxu0 %v7867_v55  ;;  %1066 = vmatpush.bf16.msra.mxu1 %v7871_v56  ;;  %v8047_v55 = vor.u32 %v10612_v52, %v8044_v53  ;;  %v8050_v56 = vld [vmem:[#allocation10 + $0xe8] sm:$0xf]  ;;  %v7963_v53 = vor.u32 %v10594_v49, %v7962_v48 }
  0x6f   :  { %v8051_v59 = vor.u32 %v10615_v57, %v8050_v56  ;;  %v7970_v52 = vld [vmem:[#allocation10 + $0x48] sm:$0xf] }
  0x70   :  { %1079 = vmatpush.bf16.msra.mxu2 %v7875_v60  ;;  %1092 = vmatpush.bf16.msra.mxu3 %v7879_v62  ;;  %v8052_v60 = vld [vmem:[#allocation10 + $0xf8] sm:$0xf0]  ;;  %v10610_v62 = vld [vmem:[#allocation10 + $0xcc] sm:$0xf0] }
  0x71   :  { %585 = vmatmul.bf16.gmra.mxu0 %v11814_v37  ;;  %614 = vmatmul.bf16.gmra.mxu1 %v11814_v37  ;;  %v8027_v63 = vor.u32 %v10610_v62, %v8026_v61  ;;  %v7948_v62 = vld [vmem:[#allocation10 + $0x30] sm:$0xf0] }
  0x72   :  { %1054 = vmatpush.bf16.msra.mxu0 %v7851_v2  ;;  %1067 = vmatpush.bf16.msra.mxu1 %v7855_v6  ;;  %v8034_v2 = vld [vmem:[#allocation10 + $0xc8] sm:$0xf]  ;;  %v8036_v6 = vld [vmem:[#allocation10 + $0xd8] sm:$0xf0] }
  0x73   :  { %643 = vmatmul.bf16.gmra.mxu2 %v11814_v37  ;;  %672 = vmatmul.bf16.gmra.mxu3 %v11814_v37  ;;  %v8039_v8 = vor.u32 %v10609_v5, %v8036_v6  ;;  %v7959_v5 = vor.u32 %v10589_v0, %v7956_v1  ;;  %v7930_v6 = vld [vmem:[#allocation10] sm:$0xf] }
  0x74   :  { %1080 = vmatpush.bf16.msra.mxu2 %v7859_v7  ;;  %1093 = vmatpush.bf16.msra.mxu3 %v7863_v12  ;;  %v8035_v7 = vor.u32 %v10611_v4, %v8034_v2  ;;  %v10604_v12 = vld [vmem:[#allocation10 + $0xa4] sm:$0xf] }
  0x76   :  { %1068 = vmatpush.bf16.msra.mxu1 %v7839_v16 }
  0x78   :  { %1081 = vmatpush.bf16.msra.mxu2 %v7843_v20  ;;  %1094 = vmatpush.bf16.msra.mxu3 %v7847_v24  ;;  %v8023_v20 = vor.u32 %v10605_v17, %v8020_v18  ;;  %v7996_v24 = vld [vmem:[#allocation10 + $0x90] sm:$0xf0]  ;;  %v7943_v17 = vor.u32 %v10585_v14, %v7940_v15 }
  0x79   :  { %v7999_v31 = vor.u32 %v10600_v23, %v7996_v24  ;;  %v224_v24 = vld [vmem:[%s12942_s2] sm:$0xff] }
  0x7a   :  { %1069 = vmatpush.bf16.msra.mxu1 %v7823_v33  ;;  %v11855_v25 = vperm.slane %v224_v24, 0 }
  0x7c   :  { %1082 = vmatpush.bf16.msra.mxu2 %v7827_v34  ;;  %1095 = vmatpush.bf16.msra.mxu3 %v7831_v35  ;;  %v7978_v34 = vld [vmem:[#allocation10 + $0x60] sm:$0xf]  ;;  %v10598_v35 = vld [vmem:[#allocation10 + $0x6c] sm:$0xf0] }
  0x7d   :  { %v7979_v41 = vor.u32 %v10598_v35, %v7978_v34  ;;  %v11873_v34 = vperm.slane %v224_v24, 2  ;;  %v11875_v35 = vperm.slane %v224_v24, 3 }
  0x7e   :  { %1070 = vmatpush.bf16.msra.mxu1 %v7807_v45  ;;  %v7983_v45 = vor.u32 %v10596_v36, %v7980_v38 }
  0x80   :  { %1083 = vmatpush.bf16.msra.mxu2 %v7811_v46  ;;  %1096 = vmatpush.bf16.msra.mxu3 %v7815_v50  ;;  %v10592_v50 = vld [vmem:[#allocation10 + $0x44] sm:$0xf] }
  0x81   :  { %686 = vmatmul.bf16.vlgmr.msrb.gmra.mxu0 %v11778_v42  ;;  %715 = vmatmul.bf16.vlgmr.msrb.gmra.mxu1 %v11778_v42  ;;  %v7967_v56 = vor.u32 %v10592_v50, %v7964_v51 }
  0x82   :  { %1307 = vmatpush.bf16.msrb.mxu1 %v8047_v55  ;;  %v10593_v55 = vld [vmem:[#allocation10 + $0x4c] sm:$0xf] }
  0x83   :  { %744 = vmatmul.bf16.vlgmr.msrb.gmra.mxu2 %v11778_v42  ;;  %773 = vmatmul.bf16.vlgmr.msrb.gmra.mxu3 %v11778_v42  ;;  %v7835_v42 = vor.u32 %v10562_v13, %v7834_v11  ;;  %v10606_v11 = vld [vmem:[#allocation10 + $0xac] sm:$0xf0]  ;;  %v8012_v13 = vld [vmem:[#allocation10 + $0xb0] sm:$0xf0] }
  0x84   :  { %1320 = vmatpush.bf16.msrb.mxu2 %v8051_v59  ;;  %v8015_v16 = vor.u32 %v10604_v12, %v8012_v13  ;;  %v10590_v59 = vld [vmem:[#allocation10 + $0x2c] sm:$0xf0]  ;;  %v10587_v12 = vld [vmem:[#allocation10 + $0x14] sm:$0xf0] }
  0x85   :  { %1055 = vmatpush.bf16.msra.mxu0 %v7835_v42  ;;  %v8011_v42 = vor.u32 %v10606_v11, %v8010_v10  ;;  %v7932_v10 = vld [vmem:[#allocation10 + $0x10] sm:$0xf0]  ;;  %v7938_v11 = vld [vmem:[#allocation10 + $0x8] sm:$0xf] }
  0x86   :  { %1308 = vmatpush.bf16.msrb.mxu1 %v8031_v3 }
  0x88   :  { %1321 = vmatpush.bf16.msrb.mxu2 %v8035_v7  ;;  %v10586_v7 = vld [vmem:[#allocation10 + $0xc] sm:$0xf0] }
  0x89   :  { %1056 = vmatpush.bf16.msra.mxu0 %v7819_v28  ;;  %v10601_v28 = vld [vmem:[#allocation10 + $0x8c] sm:$0xf]  ;;  %v7931_v13 = vor.u32 %v10586_v7, %v7930_v6 }
  0x8a   :  { %1309 = vmatpush.bf16.msrb.mxu1 %v8015_v16  ;;  %v8007_v33 = vor.u32 %v10601_v28, %v8004_v30  ;;  %v7939_v16 = vor.u32 %v10587_v12, %v7938_v11  ;;  %v11941_v11 = vperm.slane %v224_v24, 6  ;;  %v11943_v12 = vperm.slane %v224_v24, 7 }
  0x8c   :  { %1322 = vmatpush.bf16.msrb.mxu2 %v8019_v19 }
  0x8d   :  { %1057 = vmatpush.bf16.msra.mxu0 %v7803_v40  ;;  %v10599_v40 = vld [vmem:[#allocation10 + $0x74] sm:$0xf0] }
  0x8e   :  { %1310 = vmatpush.bf16.msrb.mxu1 %v7999_v31  ;;  %v7987_v46 = vor.u32 %v10599_v40, %v7986_v39 }
  0x90   :  { %1323 = vmatpush.bf16.msrb.mxu2 %v8003_v32 }
  0x91   :  { %691 = vmatmul.bf16.gmra.mxu0 %v11790_v29  ;;  %720 = vmatmul.bf16.gmra.mxu1 %v11790_v29 }
  0x92   :  { %1294 = vmatpush.bf16.msrb.mxu0 %v8043_v54  ;;  %v10595_v54 = vld [vmem:[#allocation10 + $0x54] sm:$0xf0]  ;;  %1311 = vmatpush.bf16.msrb.mxu1 %v7983_v45 }
  0x93   :  { %749 = vmatmul.bf16.gmra.mxu2 %v11790_v29  ;;  %778 = vmatmul.bf16.gmra.mxu3 %v11790_v29  ;;  %v8055_v29 = vor.u32 %v10613_v58, %v8052_v60  ;;  %v7971_v57 = vor.u32 %v10595_v54, %v7970_v52  ;;  %v7946_v58 = vld [vmem:[#allocation10 + $0x20] sm:$0xf]  ;;  %v10588_v60 = vld [vmem:[#allocation10 + $0x24] sm:$0xf] }
  0x94   :  { %1324 = vmatpush.bf16.msrb.mxu2 %v7987_v46  ;;  %v7947_v2 = vor.u32 %v10590_v59, %v7946_v58  ;;  %v7951_v3 = vor.u32 %v10588_v60, %v7948_v62 }
  0x95   :  { %1333 = vmatpush.bf16.msrb.mxu3 %v8055_v29  ;;  %v7954_v29 = vld [vmem:[#allocation10 + $0x28] sm:$0xf] }
  0x96   :  { %1295 = vmatpush.bf16.msrb.mxu0 %v8027_v63  ;;  %v10591_v63 = vld [vmem:[#allocation10 + $0x34] sm:$0xf0]  ;;  %1312 = vmatpush.bf16.msrb.mxu1 %v7967_v56 }
  0x97   :  { %v7955_v4 = vor.u32 %v10591_v63, %v7954_v29 }
  0x98   :  { %1325 = vmatpush.bf16.msrb.mxu2 %v7971_v57 }
  0x99   :  { %1334 = vmatpush.bf16.msrb.mxu3 %v8039_v8  ;;  %v10584_v8 = vld [vmem:[#allocation10 + $0x4] sm:$0xf] }
  0x9a   :  { %1296 = vmatpush.bf16.msrb.mxu0 %v8011_v42  ;;  %1313 = vmatpush.bf16.msrb.mxu1 %v7951_v3  ;;  %v7935_v42 = vor.u32 %v10584_v8, %v7932_v10  ;;  %v11929_v3 = vperm.slane %v224_v24, 5 }
  0x9c   :  { %1326 = vmatpush.bf16.msrb.mxu2 %v7955_v4 }
  0x9d   :  { %1335 = vmatpush.bf16.msrb.mxu3 %v8023_v20  ;;  %v12952_v20 = vmov 0  }
  0x9e   :  { %1297 = vmatpush.bf16.msrb.mxu0 %v7995_v27  ;;  %1314 = vmatpush.bf16.msrb.mxu1 %v7935_v42  ;;  %v11859_v27 = vperm.slane %v224_v24, 1 }
  0xa0   :  { %1327 = vmatpush.bf16.msrb.mxu2 %v7939_v16 }
  0xa1   :  { %696 = vmatmul.bf16.gmra.mxu0 %v11802_v9  ;;  %725 = vmatmul.bf16.gmra.mxu1 %v11802_v9 }
  0xa2   :  { %1336 = vmatpush.bf16.msrb.mxu3 %v8007_v33  ;;  %1298 = vmatpush.bf16.msrb.mxu0 %v7979_v41 }
  0xa3   :  { %754 = vmatmul.bf16.gmra.mxu2 %v11802_v9  ;;  %783 = vmatmul.bf16.gmra.mxu3 %v11802_v9  ;;  %v7972_v9 = vld [vmem:[#allocation10 + $0x58] sm:$0xf0] }
  0xa4   :  { %v7975_v61 = vor.u32 %v10593_v55, %v7972_v9 }
  0xa6   :  { %1337 = vmatpush.bf16.msrb.mxu3 %v7991_v47  ;;  %1299 = vmatpush.bf16.msrb.mxu0 %v7963_v53 }
  0xaa   :  { %1338 = vmatpush.bf16.msrb.mxu3 %v7975_v61  ;;  %1300 = vmatpush.bf16.msrb.mxu0 %v7947_v2  ;;  %v11927_v2 = vperm.slane %v224_v24, 4 }
  0xae   :  { %1339 = vmatpush.bf16.msrb.mxu3 %v7959_v5  ;;  %1301 = vmatpush.bf16.msrb.mxu0 %v7931_v13 }
  0xb1   :  { %701 = vmatmul.bf16.gmra.mxu0 %v11814_v37  ;;  %730 = vmatmul.bf16.gmra.mxu1 %v11814_v37 }
  0xb2   :  { %1340 = vmatpush.bf16.msrb.mxu3 %v7943_v17 }
  0xb3   :  { %759 = vmatmul.bf16.gmra.mxu2 %v11814_v37  ;;  %788 = vmatmul.bf16.gmra.mxu3 %v11814_v37 }
  0xbe   :  { %v11836_v18 = vpop.f32.mrf.mxu0  ;;  %v11838_v19 = vpop.f32.mrf.mxu1 }
  0xc1   :  { %1058 = vmatmul.bf16.vlgmr.msra.gmra.mxu0 %v12952_v20  ;;  %1071 = vmatmul.bf16.vlgmr.msra.gmra.mxu1 %v12952_v20 }
  0xc3   :  { %1084 = vmatmul.bf16.vlgmr.msra.gmra.mxu2 %v12952_v20  ;;  %1097 = vmatmul.bf16.vlgmr.msra.gmra.mxu3 %v12952_v20 }
  0xc6   :  { %v11844_v21 = vpop.f32.mrf.mxu2  ;;  %v11846_v37 = vpop.f32.mrf.mxu3 }
  0xc7   :  { %v11848_v22 = vpop.f32.mrf.mxu0  ;;  %v11850_v23 = vpop.f32.mrf.mxu1 }
  0xce   :  { %v11857_v26 = vpop.f32.mrf.mxu2  ;;  %v11861_v28 = vpop.f32.mrf.mxu3 }
  0xcf   :  { %v576_v30 = vpop.f32.mrf.mxu0  ;;  %v605_v32 = vpop.f32.mrf.mxu1 }
  0xd0   :  { %v11864_v31 = vadd.f32 %v576_v30, %v11855_v25  ;;  %v11867_v33 = vadd.f32 %v605_v32, %v11859_v27 }
  0xd1   :  { %1302 = vmatmul.bf16.vlgmr.msrb.gmra.mxu0 %v12952_v20  ;;  %1315 = vmatmul.bf16.vlgmr.msrb.gmra.mxu1 %v12952_v20 }
  0xd3   :  { %1328 = vmatmul.bf16.vlgmr.msrb.gmra.mxu2 %v12952_v20  ;;  %1341 = vmatmul.bf16.vlgmr.msrb.gmra.mxu3 %v12952_v20 }
  0xd6   :  { %v634_v36 = vpop.f32.mrf.mxu2  ;;  %v663_v39 = vpop.f32.mrf.mxu3 }
  0xd7   :  { %v11878_v38 = vadd.f32 %v634_v36, %v11873_v34  ;;  %v11880_v40 = vpop.f32.mrf.mxu0  ;;  %v11883_v41 = vadd.f32 %v663_v39, %v11875_v35  ;;  %v11885_v43 = vpop.f32.mrf.mxu1 }
  0xde   :  { %v11887_v44 = vpop.f32.mrf.mxu2  ;;  %v11889_v45 = vpop.f32.mrf.mxu3 }
  0xdf   :  { %v581_v46 = vpop.f32.mrf.mxu0  ;;  %v610_v48 = vpop.f32.mrf.mxu1 }
  0xe0   :  { %v11892_v47 = vadd.f32 %v581_v46, %v11855_v25  ;;  %v11895_v49 = vadd.f32 %v610_v48, %v11859_v27  ;;  %v8170_v48 = vld [vmem:[#allocation8 + $0xe0] sm:$0xf] }
  0xe2   :  { %12958 = vst [vmem:[#allocation21_spill] sm:$0xff] %v11892_v47 }
  0xe3   :  { %12959 = vst [vmem:[#allocation22_spill] sm:$0xff] %v11895_v49  ;;  %v10658_v49 = vld [vmem:[#allocation10 + $0x4c] sm:$0xf0] }
  0xe6   :  { %v639_v50 = vpop.f32.mrf.mxu2  ;;  %v668_v52 = vpop.f32.mrf.mxu3 }
  0xe7   :  { %v11898_v51 = vadd.f32 %v639_v50, %v11873_v34  ;;  %v11900_v53 = vpop.f32.mrf.mxu0  ;;  %v11903_v54 = vadd.f32 %v668_v52, %v11875_v35  ;;  %v11905_v55 = vpop.f32.mrf.mxu1  ;;  %v10646_v50 = vld [vmem:[#allocation8 + $0xec] sm:$0xf0]  ;;  %v10644_v52 = vld [vmem:[#allocation8 + $0xe4] sm:$0xf] }
  0xe8   :  { %12961 = vst [vmem:[#allocation24_spill] sm:$0xff] %v11900_v53  ;;  %v10668_v53 = vld [vmem:[#allocation10 + $0xa4] sm:$0xf] }
  0xe9   :  { %12960 = vst [vmem:[#allocation23_spill] sm:$0xff] %v11898_v51  ;;  %v8218_v51 = vld [vmem:[#allocation10 + $0x40] sm:$0xf] }
  0xea   :  { %12962 = vst [vmem:[#allocation25_spill] sm:$0xff] %v11903_v54 }
  0xeb   :  { %12963 = vst [vmem:[#allocation26_spill] sm:$0xff] %v11905_v55  ;;  %v8284_v55 = vld [vmem:[#allocation10 + $0xd0] sm:$0xf0] }
  0xee   :  { %v11907_v9 = vpop.f32.mrf.mxu2  ;;  %v11909_v56 = vpop.f32.mrf.mxu3 }
  0xef   :  { %12964 = vst [vmem:[#allocation27_spill] sm:$0xff] %v11907_v9  ;;  %v586_v57 = vpop.f32.mrf.mxu0  ;;  %v615_v59 = vpop.f32.mrf.mxu1  ;;  %v10674_v9 = vld [vmem:[#allocation10 + $0xcc] sm:$0xf0] }
  0xf0   :  { %12965 = vst [vmem:[#allocation28_spill] sm:$0xff] %v11909_v56  ;;  %v11912_v58 = vadd.f32 %v586_v57, %v11855_v25  ;;  %v11915_v60 = vadd.f32 %v615_v59, %v11859_v27  ;;  %v8171_v57 = vor.u32 %v10646_v50, %v8170_v48  ;;  %v8172_v59 = vld [vmem:[#allocation8 + $0xf0] sm:$0xf0]  ;;  %v10643_v48 = vld [vmem:[#allocation8 + $0xd4] sm:$0xf0] }
  0xf1   :  { %v8282_v56 = vld [vmem:[#allocation10 + $0xc0] sm:$0xf] }
  0xf2   :  { %12966 = vst [vmem:[#allocation29_spill] sm:$0xff] %v11912_v58  ;;  %1600 = vmatpush.bf16.msra.mxu0 %v8171_v57  ;;  %v8084_v58 = vld [vmem:[#allocation8 + $0x38] sm:$0xf0] }
  0xf3   :  { %12967 = vst [vmem:[#allocation30_spill] sm:$0xff] %v11915_v60  ;;  %v8082_v60 = vld [vmem:[#allocation8 + $0x28] sm:$0xf] }
  0xf6   :  { %v644_v61 = vpop.f32.mrf.mxu2  ;;  %v673_v29 = vpop.f32.mrf.mxu3 }
  0xf7   :  { %v11918_v62 = vadd.f32 %v644_v61, %v11873_v34  ;;  %v11920_v63 = vpop.f32.mrf.mxu0  ;;  %v11923_v0 = vadd.f32 %v673_v29, %v11875_v35  ;;  %v11925_v1 = vpop.f32.mrf.mxu1  ;;  %v8178_v61 = vld [vmem:[#allocation8 + $0xe8] sm:$0xf]  ;;  %v10647_v29 = vld [vmem:[#allocation8 + $0xf4] sm:$0xf0] }
  0xf8   :  { %12969 = vst [vmem:[#allocation32_spill] sm:$0xff] %v11920_v63  ;;  %v8148_v63 = vld [vmem:[#allocation8 + $0xb8] sm:$0xf0] }
  0xf9   :  { %12968 = vst [vmem:[#allocation31_spill] sm:$0xff] %v11918_v62  ;;  %v8076_v62 = vld [vmem:[#allocation8 + $0x30] sm:$0xf0] }
  0xfa   :  { %12970 = vst [vmem:[#allocation33_spill] sm:$0xff] %v11923_v0  ;;  %v8092_v0 = vld [vmem:[#allocation8 + $0x50] sm:$0xf0] }
  0xfb   :  { %12971 = vst [vmem:[#allocation34_spill] sm:$0xff] %v11925_v1  ;;  %v8146_v1 = vld [vmem:[#allocation8 + $0xa8] sm:$0xf] }
  0xfe   :  { %v11931_v4 = vpop.f32.mrf.mxu2  ;;  %v11933_v5 = vpop.f32.mrf.mxu3 }
  0xff   :  { %12972 = vst [vmem:[#allocation35_spill] sm:$0xff] %v11931_v4  ;;  %v687_v6 = vpop.f32.mrf.mxu0  ;;  %v716_v8 = vpop.f32.mrf.mxu1  ;;  %v8140_v4 = vld [vmem:[#allocation8 + $0xb0] sm:$0xf0] }
 0x100   :  { %12973 = vst [vmem:[#allocation36_spill] sm:$0xff] %v11933_v5  ;;  %v11936_v7 = vadd.f32 %v687_v6, %v11927_v2  ;;  %v11939_v10 = vadd.f32 %v716_v8, %v11929_v3  ;;  %v8175_v6 = vor.u32 %v10644_v52, %v8172_v59  ;;  %v8179_v8 = vor.u32 %v10647_v29, %v8178_v61  ;;  %v8162_v5 = vld [vmem:[#allocation8 + $0xc8] sm:$0xf]  ;;  %v10641_v29 = vld [vmem:[#allocation8 + $0xcc] sm:$0xf] }
 0x101   :  { %v8163_v57 = vor.u32 %v10643_v48, %v8162_v5  ;;  %v10637_v48 = vld [vmem:[#allocation8 + $0xac] sm:$0xf] }
 0x102   :  { %12974 = vst [vmem:[#allocation37_spill] sm:$0xff] %v11936_v7  ;;  %1613 = vmatpush.bf16.msra.mxu1 %v8175_v6  ;;  %1626 = vmatpush.bf16.msra.mxu2 %v8179_v8  ;;  %v8156_v7 = vld [vmem:[#allocation8 + $0xd0] sm:$0xf0]  ;;  %v8164_v6 = vld [vmem:[#allocation8 + $0xd8] sm:$0xf0] }
 0x103   :  { %12975 = vst [vmem:[#allocation38_spill] sm:$0xff] %v11939_v10 }
 0x106   :  { %v745_v13 = vpop.f32.mrf.mxu2  ;;  %v774_v15 = vpop.f32.mrf.mxu3  ;;  %1627 = vmatpush.bf16.msra.mxu2 %v8163_v57 }
 0x107   :  { %v11946_v14 = vadd.f32 %v745_v13, %v11941_v11  ;;  %v11948_v42 = vpop.f32.mrf.mxu0  ;;  %v11951_v16 = vadd.f32 %v774_v15, %v11943_v12  ;;  %v11953_v17 = vpop.f32.mrf.mxu1  ;;  %v10645_v13 = vld [vmem:[#allocation8 + $0xec] sm:$0xf]  ;;  %v8180_v15 = vld [vmem:[#allocation8 + $0xf8] sm:$0xf0] }
 0x108   :  { %12977 = vst [vmem:[#allocation40_spill] sm:$0xff] %v11948_v42  ;;  %v8183_v20 = vor.u32 %v10645_v13, %v8180_v15  ;;  %v10638_v15 = vld [vmem:[#allocation8 + $0xac] sm:$0xf0]  ;;  %v8116_v42 = vld [vmem:[#allocation8 + $0x78] sm:$0xf0] }
 0x109   :  { %12976 = vst [vmem:[#allocation39_spill] sm:$0xff] %v11946_v14  ;;  %v10640_v14 = vld [vmem:[#allocation8 + $0xc4] sm:$0xf] }
 0x10a   :  { %12978 = vst [vmem:[#allocation41_spill] sm:$0xff] %v11951_v16  ;;  %v10642_v16 = vld [vmem:[#allocation8 + $0xcc] sm:$0xf0]  ;;  %1639 = vmatpush.bf16.msra.mxu3 %v8183_v20  ;;  %v8159_v61 = vor.u32 %v10640_v14, %v8156_v7  ;;  %v8167_v20 = vor.u32 %v10641_v29, %v8164_v6  ;;  %v10639_v7 = vld [vmem:[#allocation8 + $0xb4] sm:$0xf0] }
 0x10b   :  { %12979 = vst [vmem:[#allocation42_spill] sm:$0xff] %v11953_v17  ;;  %v8147_v14 = vor.u32 %v10639_v7, %v8146_v1  ;;  %v10634_v29 = vld [vmem:[#allocation8 + $0x8c] sm:$0xf0]  ;;  %v10633_v7 = vld [vmem:[#allocation8 + $0x8c] sm:$0xf] }
 0x10c   :  { %1614 = vmatpush.bf16.msra.mxu1 %v8159_v61  ;;  %v10632_v61 = vld [vmem:[#allocation8 + $0x84] sm:$0xf] }
 0x10d   :  { %1628 = vmatpush.bf16.msra.mxu2 %v8147_v14 }
 0x10e   :  { %v11955_v30 = vpop.f32.mrf.mxu2  ;;  %v11957_v32 = vpop.f32.mrf.mxu3  ;;  %1640 = vmatpush.bf16.msra.mxu3 %v8167_v20  ;;  %v8124_v20 = vld [vmem:[#allocation8 + $0x90] sm:$0xf0] }
 0x10f   :  { %12980 = vst [vmem:[#allocation43_spill] sm:$0xff] %v11955_v30  ;;  %v692_v36 = vpop.f32.mrf.mxu0  ;;  %v721_v39 = vpop.f32.mrf.mxu1  ;;  %v8127_v1 = vor.u32 %v10632_v61, %v8124_v20  ;;  %v8108_v61 = vld [vmem:[#allocation8 + $0x70] sm:$0xf0]  ;;  %v8114_v20 = vld [vmem:[#allocation8 + $0x68] sm:$0xf] }
 0x110   :  { %12981 = vst [vmem:[#allocation44_spill] sm:$0xff] %v11957_v32  ;;  %v11960_v24 = vadd.f32 %v692_v36, %v11927_v2  ;;  %v11963_v46 = vadd.f32 %v721_v39, %v11929_v3  ;;  %v8154_v36 = vld [vmem:[#allocation8 + $0xc0] sm:$0xf] }
 0x111   :  { %v8155_v10 = vor.u32 %v10642_v16, %v8154_v36  ;;  %v8138_v16 = vld [vmem:[#allocation8 + $0xa0] sm:$0xf]  ;;  %v10636_v36 = vld [vmem:[#allocation8 + $0xa4] sm:$0xf] }
 0x112   :  { %12982 = vst [vmem:[#allocation45_spill] sm:$0xff] %v11960_v24  ;;  %v8143_v5 = vor.u32 %v10636_v36, %v8140_v4 }
 0x113   :  { %12983 = vst [vmem:[#allocation46_spill] sm:$0xff] %v11963_v46  ;;  %1601 = vmatpush.bf16.msra.mxu0 %v8155_v10  ;;  %v8122_v10 = vld [vmem:[#allocation8 + $0x80] sm:$0xf] }
 0x114   :  { %1615 = vmatpush.bf16.msra.mxu1 %v8143_v5  ;;  %v8123_v6 = vor.u32 %v10634_v29, %v8122_v10  ;;  %v10630_v10 = vld [vmem:[#allocation8 + $0x6c] sm:$0xf0]  ;;  %v10628_v29 = vld [vmem:[#allocation8 + $0x64] sm:$0xf] }
 0x116   :  { %v750_v39 = vpop.f32.mrf.mxu2  ;;  %v779_v52 = vpop.f32.mrf.mxu3 }
 0x117   :  { %v11966_v50 = vadd.f32 %v750_v39, %v11941_v11  ;;  %v11968_v59 = vpop.f32.mrf.mxu0  ;;  %v11971_v8 = vadd.f32 %v779_v52, %v11943_v12  ;;  %v11973_v13 = vpop.f32.mrf.mxu1  ;;  %v8139_v39 = vor.u32 %v10638_v15, %v8138_v16  ;;  %v8151_v52 = vor.u32 %v10637_v48, %v8148_v63  ;;  %v8130_v16 = vld [vmem:[#allocation8 + $0x88] sm:$0xf]  ;;  %v10635_v15 = vld [vmem:[#allocation8 + $0x94] sm:$0xf0] }
 0x118   :  { %12985 = vst [vmem:[#allocation48_spill] sm:$0xff] %v11968_v59  ;;  %v8131_v36 = vor.u32 %v10635_v15, %v8130_v16  ;;  %1616 = vmatpush.bf16.msra.mxu1 %v8127_v1  ;;  %v10631_v16 = vld [vmem:[#allocation8 + $0x74] sm:$0xf0]  ;;  %v8111_v15 = vor.u32 %v10628_v29, %v8108_v61  ;;  %v10624_v1 = vld [vmem:[#allocation8 + $0x44] sm:$0xf] }
 0x119   :  { %12984 = vst [vmem:[#allocation47_spill] sm:$0xff] %v11966_v50  ;;  %1602 = vmatpush.bf16.msra.mxu0 %v8139_v39  ;;  %1641 = vmatpush.bf16.msra.mxu3 %v8151_v52  ;;  %v8132_v39 = vld [vmem:[#allocation8 + $0x98] sm:$0xf0]  ;;  %v8106_v52 = vld [vmem:[#allocation8 + $0x60] sm:$0xf]  ;;  %v8115_v17 = vor.u32 %v10631_v16, %v8114_v20  ;;  %v8095_v20 = vor.u32 %v10624_v1, %v8092_v0 }
 0x11a   :  { %12986 = vst [vmem:[#allocation49_spill] sm:$0xff] %v11971_v8  ;;  %v8135_v14 = vor.u32 %v10633_v7, %v8132_v39  ;;  %1629 = vmatpush.bf16.msra.mxu2 %v8131_v36  ;;  %v8107_v30 = vor.u32 %v10630_v10, %v8106_v52  ;;  %v8090_v7 = vld [vmem:[#allocation8 + $0x40] sm:$0xf]  ;;  %v10626_v39 = vld [vmem:[#allocation8 + $0x4c] sm:$0xf0] }
 0x11b   :  { %12987 = vst [vmem:[#allocation50_spill] sm:$0xff] %v11973_v13  ;;  %v10627_v52 = vld [vmem:[#allocation8 + $0x54] sm:$0xf0]  ;;  %v8100_v16 = vld [vmem:[#allocation8 + $0x58] sm:$0xf0] }
 0x11c   :  { %1617 = vmatpush.bf16.msra.mxu1 %v8111_v15  ;;  %v10623_v0 = vld [vmem:[#allocation8 + $0x34] sm:$0xf0]  ;;  %v10678_v50 = vld [vmem:[#allocation10 + $0xec] sm:$0xf0]  ;;  %v10665_v59 = vld [vmem:[#allocation10 + $0x8c] sm:$0xf] }
 0x11d   :  { %1603 = vmatpush.bf16.msra.mxu0 %v8123_v6  ;;  %1642 = vmatpush.bf16.msra.mxu3 %v8135_v14  ;;  %v8098_v14 = vld [vmem:[#allocation8 + $0x48] sm:$0xf] }
 0x11e   :  { %v11975_v57 = vpop.f32.mrf.mxu2  ;;  %v11977_v32 = vpop.f32.mrf.mxu3  ;;  %1630 = vmatpush.bf16.msra.mxu2 %v8115_v17 }
 0x11f   :  { %12988 = vst [vmem:[#allocation51_spill] sm:$0xff] %v11975_v57  ;;  %v697_v4 = vpop.f32.mrf.mxu0  ;;  %v726_v5 = vpop.f32.mrf.mxu1  ;;  %v10667_v57 = vld [vmem:[#allocation10 + $0x94] sm:$0xf0] }
 0x120   :  { %12989 = vst [vmem:[#allocation52_spill] sm:$0xff] %v11977_v32  ;;  %v11980_v63 = vadd.f32 %v697_v4, %v11927_v2  ;;  %v11983_v48 = vadd.f32 %v726_v5, %v11929_v3  ;;  %v10629_v4 = vld [vmem:[#allocation8 + $0x6c] sm:$0xf]  ;;  %v8091_v5 = vor.u32 %v10626_v39, %v8090_v7  ;;  %1618 = vmatpush.bf16.msra.mxu1 %v8095_v20  ;;  %v10622_v7 = vld [vmem:[#allocation8 + $0x2c] sm:$0xf0] }
 0x121   :  { %1604 = vmatpush.bf16.msra.mxu0 %v8107_v30  ;;  %v8119_v6 = vor.u32 %v10629_v4, %v8116_v42  ;;  %v8099_v30 = vor.u32 %v10627_v52, %v8098_v14  ;;  %v10625_v42 = vld [vmem:[#allocation8 + $0x4c] sm:$0xf]  ;;  %v10620_v39 = vld [vmem:[#allocation8 + $0x24] sm:$0xf]  ;;  %v8083_v14 = vor.u32 %v10623_v0, %v8082_v60  ;;  %v10666_v32 = vld [vmem:[#allocation10 + $0x8c] sm:$0xf0] }
 0x122   :  { %v8103_v4 = vor.u32 %v10625_v42, %v8100_v16  ;;  %v8079_v1 = vor.u32 %v10620_v39, %v8076_v62  ;;  %v10621_v52 = vld [vmem:[#allocation8 + $0x2c] sm:$0xf]  ;;  %v10618_v42 = vld [vmem:[#allocation8 + $0xc] sm:$0xf0]  ;;  %v10616_v20 = vld [vmem:[#allocation8 + $0x4] sm:$0xf] }
 0x123   :  { %1643 = vmatpush.bf16.msra.mxu3 %v8119_v6  ;;  %1631 = vmatpush.bf16.msra.mxu2 %v8099_v30  ;;  %v8074_v6 = vld [vmem:[#allocation8 + $0x20] sm:$0xf]  ;;  %v10617_v0 = vld [vmem:[#allocation8 + $0xc] sm:$0xf] }
 0x124   :  { %1619 = vmatpush.bf16.msra.mxu1 %v8079_v1 }
 0x125   :  { %1605 = vmatpush.bf16.msra.mxu0 %v8091_v5  ;;  %v8058_v5 = vld [vmem:[#allocation8] sm:$0xf] }
 0x126   :  { %v755_v36 = vpop.f32.mrf.mxu2  ;;  %v784_v29 = vpop.f32.mrf.mxu3  ;;  %v8059_v16 = vor.u32 %v10618_v42, %v8058_v5  ;;  %v8300_v5 = vld [vmem:[#allocation10 + $0xf0] sm:$0xf0] }
 0x127   :  { %v11986_v10 = vadd.f32 %v755_v36, %v11941_v11  ;;  %v11988_v61 = vpop.f32.mrf.mxu0  ;;  %v11991_v17 = vadd.f32 %v784_v29, %v11943_v12  ;;  %v11993_v15 = vpop.f32.mrf.mxu1  ;;  %1644 = vmatpush.bf16.msra.mxu3 %v8103_v4  ;;  %v8075_v36 = vor.u32 %v10622_v7, %v8074_v6  ;;  %v8087_v29 = vor.u32 %v10621_v52, %v8084_v58  ;;  %v8060_v4 = vld [vmem:[#allocation8 + $0x10] sm:$0xf0]  ;;  %v8066_v6 = vld [vmem:[#allocation8 + $0x8] sm:$0xf]  ;;  %v10619_v7 = vld [vmem:[#allocation8 + $0x14] sm:$0xf0] }
 0x128   :  { %1632 = vmatpush.bf16.msra.mxu2 %v8083_v14  ;;  %v8063_v60 = vor.u32 %v10616_v20, %v8060_v4  ;;  %v8067_v39 = vor.u32 %v10619_v7, %v8066_v6  ;;  %v8298_v58 = vld [vmem:[#allocation10 + $0xe0] sm:$0xf]  ;;  %v8306_v4 = vld [vmem:[#allocation10 + $0xe8] sm:$0xf]  ;;  %v10679_v6 = vld [vmem:[#allocation10 + $0xf4] sm:$0xf0] }
 0x129   :  { %1606 = vmatpush.bf16.msra.mxu0 %v8075_v36  ;;  %v8068_v36 = vld [vmem:[#allocation8 + $0x18] sm:$0xf0]  ;;  %v8299_v46 = vor.u32 %v10678_v50, %v8298_v58  ;;  %v10677_v7 = vld [vmem:[#allocation10 + $0xec] sm:$0xf]  ;;  %v8307_v24 = vor.u32 %v10679_v6, %v8306_v4  ;;  %v8266_v4 = vld [vmem:[#allocation10 + $0xa0] sm:$0xf] }
 0x12a   :  { %v8071_v52 = vor.u32 %v10617_v0, %v8068_v36  ;;  %1620 = vmatpush.bf16.msra.mxu1 %v8063_v60  ;;  %v8283_v0 = vor.u32 %v10674_v9, %v8282_v56  ;;  %v10672_v36 = vld [vmem:[#allocation10 + $0xc4] sm:$0xf]  ;;  %v10673_v50 = vld [vmem:[#allocation10 + $0xcc] sm:$0xf]  ;;  %v8292_v58 = vld [vmem:[#allocation10 + $0xd8] sm:$0xf0] }
 0x12b   :  { %1645 = vmatpush.bf16.msra.mxu3 %v8087_v29  ;;  %v10676_v29 = vld [vmem:[#allocation10 + $0xe4] sm:$0xf]  ;;  %v8287_v60 = vor.u32 %v10672_v36, %v8284_v55  ;;  %v10670_v6 = vld [vmem:[#allocation10 + $0xac] sm:$0xf0]  ;;  %v8268_v55 = vld [vmem:[#allocation10 + $0xb0] sm:$0xf0] }
 0x12c   :  { %1633 = vmatpush.bf16.msra.mxu2 %v8067_v39  ;;  %v8303_v20 = vor.u32 %v10676_v29, %v8300_v5  ;;  %v10675_v39 = vld [vmem:[#allocation10 + $0xd4] sm:$0xf0]  ;;  %v8295_v5 = vor.u32 %v10673_v50, %v8292_v58  ;;  %v8267_v56 = vor.u32 %v10670_v6, %v8266_v4  ;;  %v8271_v36 = vor.u32 %v10668_v53, %v8268_v55  ;;  %v8276_v50 = vld [vmem:[#allocation10 + $0xb8] sm:$0xf0]  ;;  %v8252_v4 = vld [vmem:[#allocation10 + $0x90] sm:$0xf0] }
 0x12d   :  { %1607 = vmatpush.bf16.msra.mxu0 %v8059_v16  ;;  %v8258_v6 = vld [vmem:[#allocation10 + $0x88] sm:$0xf] }
 0x12e   :  { %v11995_v30 = vpop.f32.mrf.mxu2  ;;  %v11997_v8 = vpop.f32.mrf.mxu3  ;;  %1858 = vmatpush.bf16.msrb.mxu1 %v8303_v20  ;;  %v8259_v13 = vor.u32 %v10667_v57, %v8258_v6  ;;  %v8244_v6 = vld [vmem:[#allocation10 + $0x78] sm:$0xf0] }
 0x12f   :  { %v702_v62 = vpop.f32.mrf.mxu0  ;;  %v731_v14 = vpop.f32.mrf.mxu1  ;;  %1646 = vmatpush.bf16.msra.mxu3 %v8071_v52 }
 0x130   :  { %v12000_v1 = vadd.f32 %v702_v62, %v11927_v2  ;;  %v12003_v42 = vadd.f32 %v731_v14, %v11929_v3  ;;  %v8308_v62 = vld [vmem:[#allocation10 + $0xf8] sm:$0xf0]  ;;  %v8290_v14 = vld [vmem:[#allocation10 + $0xc8] sm:$0xf]  ;;  %1871 = vmatpush.bf16.msrb.mxu2 %v8307_v24 }
 0x131   :  { %1845 = vmatpush.bf16.msrb.mxu0 %v8299_v46  ;;  %v8311_v16 = vor.u32 %v10677_v7, %v8308_v62  ;;  %v8291_v29 = vor.u32 %v10675_v39, %v8290_v14  ;;  %v8274_v24 = vld [vmem:[#allocation10 + $0xa8] sm:$0xf]  ;;  %v10671_v7 = vld [vmem:[#allocation10 + $0xb4] sm:$0xf0]  ;;  %v10669_v39 = vld [vmem:[#allocation10 + $0xac] sm:$0xf] }
 0x132   :  { %1859 = vmatpush.bf16.msrb.mxu1 %v8287_v60  ;;  %v8275_v14 = vor.u32 %v10671_v7, %v8274_v24  ;;  %v8279_v58 = vor.u32 %v10669_v39, %v8276_v50  ;;  %v8234_v24 = vld [vmem:[#allocation10 + $0x60] sm:$0xf]  ;;  %v10662_v7 = vld [vmem:[#allocation10 + $0x6c] sm:$0xf0]  ;;  %v8236_v39 = vld [vmem:[#allocation10 + $0x70] sm:$0xf0] }
 0x133   :  { %1884 = vmatpush.bf16.msrb.mxu3 %v8311_v16  ;;  %v8235_v57 = vor.u32 %v10662_v7, %v8234_v24  ;;  %v8242_v50 = vld [vmem:[#allocation10 + $0x68] sm:$0xf]  ;;  %v8220_v24 = vld [vmem:[#allocation10 + $0x50] sm:$0xf0]  ;;  %v10659_v7 = vld [vmem:[#allocation10 + $0x54] sm:$0xf0] }
 0x134   :  { %1872 = vmatpush.bf16.msrb.mxu2 %v8291_v29  ;;  %v8260_v29 = vld [vmem:[#allocation10 + $0x98] sm:$0xf0] }
 0x135   :  { %1846 = vmatpush.bf16.msrb.mxu0 %v8283_v0  ;;  %v10664_v0 = vld [vmem:[#allocation10 + $0x84] sm:$0xf]  ;;  %v8263_v53 = vor.u32 %v10665_v59, %v8260_v29  ;;  %v10663_v59 = vld [vmem:[#allocation10 + $0x74] sm:$0xf0] }
 0x136   :  { %v760_v52 = vpop.f32.mrf.mxu2  ;;  %v789_v20 = vpop.f32.mrf.mxu3  ;;  %1860 = vmatpush.bf16.msrb.mxu1 %v8271_v36 }
 0x137   :  { %v12006_v46 = vadd.f32 %v760_v52, %v11941_v11  ;;  %v12008_v9 = vpop.f32.mrf.mxu0  ;;  %v12011_v62 = vadd.f32 %v789_v20, %v11943_v12  ;;  %v12013_v16 = vpop.f32.mrf.mxu1  ;;  %1885 = vmatpush.bf16.msrb.mxu3 %v8295_v5  ;;  %v8250_v52 = vld [vmem:[#allocation10 + $0x80] sm:$0xf]  ;;  %v8255_v20 = vor.u32 %v10664_v0, %v8252_v4  ;;  %v572_v5 = vadd.f32 %v11836_v18, %v11855_v25  ;;  %v10661_v4 = vld [vmem:[#allocation10 + $0x6c] sm:$0xf] }
 0x138   :  { %v8251_v60 = vor.u32 %v10666_v32, %v8250_v52  ;;  %1873 = vmatpush.bf16.msrb.mxu2 %v8275_v14  ;;  %v601_v32 = vadd.f32 %v11838_v19, %v11859_v27  ;;  %v8243_v0 = vor.u32 %v10663_v59, %v8242_v50  ;;  %v8247_v54 = vor.u32 %v10661_v4, %v8244_v6  ;;  %v10654_v50 = vld [vmem:[#allocation10 + $0x2c] sm:$0xf0]  ;;  %v10652_v59 = vld [vmem:[#allocation10 + $0x24] sm:$0xf]  ;;  %v8204_v4 = vld [vmem:[#allocation10 + $0x30] sm:$0xf0] }
 0x139   :  { %1847 = vmatpush.bf16.msrb.mxu0 %v8267_v56  ;;  %v10660_v56 = vld [vmem:[#allocation10 + $0x64] sm:$0xf] }
 0x13a   :  { %1861 = vmatpush.bf16.msrb.mxu1 %v8255_v20  ;;  %v8239_v18 = vor.u32 %v10660_v56, %v8236_v39  ;;  %v10656_v20 = vld [vmem:[#allocation10 + $0x44] sm:$0xf]  ;;  %v10657_v56 = vld [vmem:[#allocation10 + $0x4c] sm:$0xf] }
 0x13b   :  { %1886 = vmatpush.bf16.msrb.mxu3 %v8279_v58 }
 0x13c   :  { %1874 = vmatpush.bf16.msrb.mxu2 %v8259_v13  ;;  %v8226_v13 = vld [vmem:[#allocation10 + $0x48] sm:$0xf] }
 0x13d   :  { %1848 = vmatpush.bf16.msrb.mxu0 %v8251_v60  ;;  %v8219_v60 = vor.u32 %v10658_v49, %v8218_v51  ;;  %v8202_v51 = vld [vmem:[#allocation10 + $0x20] sm:$0xf] }
 0x13e   :  { %v12017_v55 = vpop.f32.mrf.mxu2  ;;  %v12021_v36 = vpop.f32.mrf.mxu3  ;;  %1862 = vmatpush.bf16.msrb.mxu1 %v8239_v18 }
 0x13f   :  { %v1059_v14 = vpop.f32.mrf.mxu0  ;;  %v1072_v52 = vpop.f32.mrf.mxu1  ;;  %1887 = vmatpush.bf16.msrb.mxu3 %v8263_v53  ;;  %v8227_v53 = vor.u32 %v10659_v7, %v8226_v13 }
 0x140   :  { %v1353_v58 = vadd.f32 %v1059_v14, %v572_v5  ;;  %v1354_v29 = vadd.f32 %v1072_v52, %v601_v32  ;;  %1875 = vmatpush.bf16.msrb.mxu2 %v8243_v0  ;;  %v8223_v5 = vor.u32 %v10656_v20, %v8220_v24  ;;  %v630_v32 = vadd.f32 %v11844_v21, %v11873_v34  ;;  %v8228_v14 = vld [vmem:[#allocation10 + $0x58] sm:$0xf0]  ;;  %v8210_v21 = vld [vmem:[#allocation10 + $0x28] sm:$0xf] }
 0x141   :  { %1849 = vmatpush.bf16.msrb.mxu0 %v8235_v57  ;;  %v659_v57 = vadd.f32 %v11846_v37, %v11875_v35  ;;  %v8231_v49 = vor.u32 %v10657_v56, %v8228_v14  ;;  %v8203_v0 = vor.u32 %v10654_v50, %v8202_v51  ;;  %v10653_v37 = vld [vmem:[#allocation10 + $0x2c] sm:$0xf]  ;;  %v8212_v20 = vld [vmem:[#allocation10 + $0x38] sm:$0xf0]  ;;  %v8186_v56 = vld [vmem:[#allocation10] sm:$0xf] }
 0x142   :  { %v1368_v19 = vmul.f32 0.5, %v1353_v58  ;;  %v1372_v47 = vmul.f32 0.5, %v1354_v29  ;;  %1863 = vmatpush.bf16.msrb.mxu1 %v8223_v5  ;;  %v8207_v29 = vor.u32 %v10652_v59, %v8204_v4  ;;  %v8215_v24 = vor.u32 %v10653_v37, %v8212_v20  ;;  %v8194_v50 = vld [vmem:[#allocation10 + $0x8] sm:$0xf]  ;;  %v10651_v59 = vld [vmem:[#allocation10 + $0x14] sm:$0xf0] }
 0x143   :  { %1888 = vmatpush.bf16.msrb.mxu3 %v8247_v54  ;;  %v705_v4 = vadd.f32 %v12008_v9, %v11927_v2 }
 0x144   :  { %11239 = vtanh.f32 %v1368_v19  ;;  %1876 = vmatpush.bf16.msrb.mxu2 %v8227_v53 }
 0x145   :  { %11241 = vtanh.f32 %v1372_v47  ;;  %1850 = vmatpush.bf16.msrb.mxu0 %v8219_v60  ;;  %v10655_v47 = vld [vmem:[#allocation10 + $0x34] sm:$0xf0] }
 0x146   :  { %v1085_v39 = vpop.f32.mrf.mxu2  ;;  %v1098_v52 = vpop.f32.mrf.mxu3  ;;  %v8211_v19 = vor.u32 %v10655_v47, %v8210_v21  ;;  %1864 = vmatpush.bf16.msrb.mxu1 %v8207_v29 }
 0x147   :  { %v1355_v58 = vadd.f32 %v1085_v39, %v630_v32  ;;  %v1061_v18 = vpop.f32.mrf.mxu0  ;;  %v1356_v54 = vadd.f32 %v1098_v52, %v659_v57  ;;  %v1074_v6 = vpop.f32.mrf.mxu1  ;;  %1889 = vmatpush.bf16.msrb.mxu3 %v8231_v49  ;;  %v10650_v32 = vld [vmem:[#allocation10 + $0xc] sm:$0xf0]  ;;  %v10648_v39 = vld [vmem:[#allocation10 + $0x4] sm:$0xf]  ;;  %v8188_v57 = vld [vmem:[#allocation10 + $0x10] sm:$0xf0]  ;;  %v8195_v49 = vor.u32 %v10651_v59, %v8194_v50 }
 0x148   :  { %v8187_v14 = vor.u32 %v10650_v32, %v8186_v56  ;;  %1877 = vmatpush.bf16.msrb.mxu2 %v8211_v19  ;;  %v8191_v53 = vor.u32 %v10648_v39, %v8188_v57  ;;  %v10649_v52 = vld [vmem:[#allocation10 + $0xc] sm:$0xf]  ;;  %v8196_v18 = vld [vmem:[#allocation10 + $0x18] sm:$0xf0]  ;;  %v734_v6 = vadd.f32 %v12013_v16, %v11929_v3  ;;  %v763_v16 = vadd.f32 %v12017_v55, %v11941_v11  ;;  %v8428_v55 = vld [vmem:[#allocation8 + $0xf0] sm:$0xf0] }
 0x149   :  { %11243 = vtanh.f32 %v1355_v58  ;;  %v1377_v7 = vmul.f32 0.5, %v1356_v54  ;;  %1851 = vmatpush.bf16.msrb.mxu0 %v8203_v0  ;;  %v8199_v47 = vor.u32 %v10649_v52, %v8196_v18  ;;  %v10710_v52 = vld [vmem:[#allocation8 + $0xec] sm:$0xf0]  ;;  %v10708_v18 = vld [vmem:[#allocation8 + $0xe4] sm:$0xf] }
 0x14a   :  { %v11240_v13 = vpop.eup %11239  ;;  %1865 = vmatpush.bf16.msrb.mxu1 %v8191_v53 }
 0x14b   :  { %v11242_v60 = vpop.eup %11241  ;;  %v1370_v5 = vmul.f32 0.5, %v11240_v13  ;;  %11245 = vtanh.f32 %v1377_v7  ;;  %1890 = vmatpush.bf16.msrb.mxu3 %v8215_v24 }
 0x14c   :  { %v1374_v51 = vmul.f32 0.5, %v11242_v60  ;;  %1878 = vmatpush.bf16.msrb.mxu2 %v8195_v49 }
 0x14d   :  { %v1371_v58 = vadd.f32 0.5, %v1370_v5  ;;  %1852 = vmatpush.bf16.msrb.mxu0 %v8187_v14  ;;  %v792_v14 = vadd.f32 %v12021_v36, %v11943_v12  ;;  %v10711_v36 = vld [vmem:[#allocation8 + $0xf4] sm:$0xf0] }
 0x14e   :  { %v1375_v21 = vadd.f32 0.5, %v1374_v51  ;;  %v1087_v0 = vpop.f32.mrf.mxu2  ;;  %v1100_v29 = vpop.f32.mrf.mxu3 }
 0x14f   :  { %v11244_v54 = vpop.eup %11243  ;;  %v1303_v19 = vpop.f32.mrf.mxu0  ;;  %1891 = vmatpush.bf16.msrb.mxu3 %v8199_v47  ;;  %v8434_v0 = vld [vmem:[#allocation8 + $0xe8] sm:$0xf]  ;;  %v8436_v29 = vld [vmem:[#allocation8 + $0xf8] sm:$0xf0] }
 0x150   :  { %v1381_v37 = vmul.f32 0.0, %v1375_v21  ;;  %v1382_v20 = vmul.f32 %v11244_v54, %v1371_v58  ;;  %v1364_v24 = vadd.f32 %v1303_v19, %v705_v4  ;;  %v1316_v13 = vpop.f32.mrf.mxu1  ;;  %v8426_v58 = vld [vmem:[#allocation8 + $0xe0] sm:$0xf] }
 0x151   :  { %v1365_v7 = vadd.f32 %v1316_v13, %v734_v6  ;;  %v11246_v56 = vpop.eup %11245  ;;  %v10709_v6 = vld [vmem:[#allocation8 + $0xec] sm:$0xf]  ;;  %v10706_v13 = vld [vmem:[#allocation8 + $0xcc] sm:$0xf0] }
 0x152   :  { %v12031_v9 = vadd.f32 %v1382_v20, %v1381_v37  ;;  %v1386_v32 = vmul.f32 0.5, %v1364_v24  ;;  %v1379_v5 = vmul.f32 0.5, %v11246_v56  ;;  %v8427_v20 = vor.u32 %v10710_v52, %v8426_v58  ;;  %v8410_v24 = vld [vmem:[#allocation8 + $0xc0] sm:$0xf]  ;;  %v10705_v58 = vld [vmem:[#allocation8 + $0xcc] sm:$0xf] }
 0x153   :  { %v1390_v60 = vmul.f32 0.5, %v1365_v7  ;;  %v8420_v52 = vld [vmem:[#allocation8 + $0xd8] sm:$0xf0] }
 0x154   :  { %11247 = vtanh.f32 %v12031_v9  ;;  %v1380_v49 = vadd.f32 0.5, %v1379_v5 }
 0x155   :  { %11249 = vtanh.f32 %v1386_v32  ;;  %v8431_v32 = vor.u32 %v10708_v18, %v8428_v55  ;;  %v8411_v18 = vor.u32 %v10706_v13, %v8410_v24  ;;  %v8378_v13 = vld [vmem:[#allocation8 + $0x80] sm:$0xf] }
 0x156   :  { %11251 = vtanh.f32 %v1390_v60  ;;  %v1329_v39 = vpop.f32.mrf.mxu2  ;;  %v1342_v51 = vpop.f32.mrf.mxu3  ;;  %v10704_v60 = vld [vmem:[#allocation8 + $0xc4] sm:$0xf] }
 0x157   :  { %v1366_v57 = vadd.f32 %v1329_v39, %v763_v16  ;;  %v1305_v53 = vpop.f32.mrf.mxu0  ;;  %v1367_v50 = vadd.f32 %v1342_v51, %v792_v14  ;;  %v8412_v16 = vld [vmem:[#allocation8 + $0xd0] sm:$0xf0]  ;;  %v8435_v39 = vor.u32 %v10711_v36, %v8434_v0  ;;  %v8418_v51 = vld [vmem:[#allocation8 + $0xc8] sm:$0xf]  ;;  %v10702_v0 = vld [vmem:[#allocation8 + $0xac] sm:$0xf0] }
 0x158   :  { %v1318_v59 = vpop.f32.mrf.mxu1  ;;  %v10707_v53 = vld [vmem:[#allocation8 + $0xd4] sm:$0xf0]  ;;  %v8415_v55 = vor.u32 %v10704_v60, %v8412_v16  ;;  %v10696_v60 = vld [vmem:[#allocation8 + $0x84] sm:$0xf] }
 0x159   :  { %11253 = vtanh.f32 %v1366_v57  ;;  %v1395_v21 = vmul.f32 0.5, %v1367_v50  ;;  %v8439_v57 = vor.u32 %v10709_v6, %v8436_v29  ;;  %v8419_v36 = vor.u32 %v10707_v53, %v8418_v51  ;;  %v10700_v29 = vld [vmem:[#allocation8 + $0xa4] sm:$0xf]  ;;  %v8380_v51 = vld [vmem:[#allocation8 + $0x90] sm:$0xf0] }
 0x15a   :  { %v11248_v4 = vpop.eup %11247  ;;  %v8423_v6 = vor.u32 %v10705_v58, %v8420_v52  ;;  %v8386_v53 = vld [vmem:[#allocation8 + $0x88] sm:$0xf]  ;;  %v8388_v58 = vld [vmem:[#allocation8 + $0x98] sm:$0xf0] }
 0x15b   :  { %v11250_v47 = vpop.eup %11249  ;;  %v12038_v54 = vmul.f32 %v11248_v4, %v1380_v49  ;;  %11255 = vtanh.f32 %v1395_v21 }
 0x15c   :  { %v11252_v19 = vpop.eup %11251  ;;  %v1388_v37 = vmul.f32 0.5, %v11250_v47  ;;  %v8394_v47 = vld [vmem:[#allocation8 + $0xa0] sm:$0xf] }
 0x15d   :  { %v1392_v7 = vmul.f32 0.5, %v11252_v19  ;;  %v1407_v56 = vpack.c.bf16 %v12038_v54, %v12038_v54  ;;  %v8396_v19 = vld [vmem:[#allocation8 + $0xb0] sm:$0xf0] }
 0x15e   :  { %v1389_v5 = vadd.f32 0.5, %v1388_v37  ;;  %v1331_v14 = vpop.f32.mrf.mxu2  ;;  %v1344_v49 = vpop.f32.mrf.mxu3  ;;  %v8402_v37 = vld [vmem:[#allocation8 + $0xa8] sm:$0xf]  ;;  %v8399_v24 = vor.u32 %v10700_v29, %v8396_v19  ;;  %v10694_v29 = vld [vmem:[#allocation8 + $0x6c] sm:$0xf0] }
 0x15f   :  { %v11254_v50 = vpop.eup %11253  ;;  %v1393_v59 = vadd.f32 0.5, %v1392_v7  ;;  %1608 = vmatmul.bf16.vlgmr.msra.gmra.mxu0 %v1407_v56  ;;  %1621 = vmatmul.bf16.vlgmr.msra.gmra.mxu1 %v1407_v56  ;;  %v10697_v49 = vld [vmem:[#allocation8 + $0x8c] sm:$0xf]  ;;  %v10692_v19 = vld [vmem:[#allocation8 + $0x64] sm:$0xf] }
 0x160   :  { %v1400_v4 = vmul.f32 %v11254_v50, %v1389_v5  ;;  %1634 = vmatmul.bf16.vlgmr.msra.gmra.mxu2 %v1407_v56  ;;  %1647 = vmatmul.bf16.vlgmr.msra.gmra.mxu3 %v1407_v56  ;;  %v10703_v5 = vld [vmem:[#allocation8 + $0xb4] sm:$0xf0]  ;;  %v10701_v50 = vld [vmem:[#allocation8 + $0xac] sm:$0xf]  ;;  %v8404_v56 = vld [vmem:[#allocation8 + $0xb8] sm:$0xf0] }
 0x161   :  { %v1399_v21 = vmul.f32 0.0, %v1393_v59  ;;  %2152 = vmatpush.bf16.msra.mxu0 %v8427_v20  ;;  %2165 = vmatpush.bf16.msra.mxu1 %v8431_v32  ;;  %v11256_v7 = vpop.eup %11255  ;;  %v8395_v20 = vor.u32 %v10702_v0, %v8394_v47  ;;  %v10698_v32 = vld [vmem:[#allocation8 + $0x8c] sm:$0xf0]  ;;  %v10699_v59 = vld [vmem:[#allocation8 + $0x94] sm:$0xf0] }
 0x162   :  { %2178 = vmatpush.bf16.msra.mxu2 %v8435_v39  ;;  %2191 = vmatpush.bf16.msra.mxu3 %v8439_v57  ;;  %v1397_v16 = vmul.f32 0.5, %v11256_v7  ;;  %v8403_v39 = vor.u32 %v10703_v5, %v8402_v37  ;;  %v8407_v57 = vor.u32 %v10701_v50, %v8404_v56  ;;  %v8379_v52 = vor.u32 %v10698_v32, %v8378_v13  ;;  %v8364_v7 = vld [vmem:[#allocation8 + $0x70] sm:$0xf0]  ;;  %v8370_v5 = vld [vmem:[#allocation8 + $0x68] sm:$0xf] }
 0x163   :  { %v12042_v14 = vadd.f32 %v1400_v4, %v1399_v21  ;;  %v8383_v4 = vor.u32 %v10696_v60, %v8380_v51  ;;  %v10695_v50 = vld [vmem:[#allocation8 + $0x74] sm:$0xf0]  ;;  %v8367_v56 = vor.u32 %v10692_v19, %v8364_v7  ;;  %v8372_v13 = vld [vmem:[#allocation8 + $0x78] sm:$0xf0]  ;;  %v8346_v60 = vld [vmem:[#allocation8 + $0x40] sm:$0xf] }
 0x164   :  { %v1398_v21 = vadd.f32 0.5, %v1397_v16  ;;  %v10690_v16 = vld [vmem:[#allocation8 + $0x4c] sm:$0xf0]  ;;  %v8348_v51 = vld [vmem:[#allocation8 + $0x50] sm:$0xf0] }
 0x165   :  { %11257 = vtanh.f32 %v12042_v14  ;;  %2153 = vmatpush.bf16.msra.mxu0 %v8411_v18  ;;  %2166 = vmatpush.bf16.msra.mxu1 %v8415_v55  ;;  %v8387_v18 = vor.u32 %v10699_v59, %v8386_v53  ;;  %v8391_v55 = vor.u32 %v10697_v49, %v8388_v58  ;;  %v8354_v53 = vld [vmem:[#allocation8 + $0x48] sm:$0xf]  ;;  %v10691_v59 = vld [vmem:[#allocation8 + $0x54] sm:$0xf0] }
 0x166   :  { %2179 = vmatpush.bf16.msra.mxu2 %v8419_v36  ;;  %2192 = vmatpush.bf16.msra.mxu3 %v8423_v6  ;;  %v8362_v6 = vld [vmem:[#allocation8 + $0x60] sm:$0xf]  ;;  %v8355_v58 = vor.u32 %v10691_v59, %v8354_v53  ;;  %v10687_v19 = vld [vmem:[#allocation8 + $0x34] sm:$0xf0]  ;;  %v10681_v53 = vld [vmem:[#allocation8 + $0xc] sm:$0xf] }
 0x167   :  { %v8363_v37 = vor.u32 %v10694_v29, %v8362_v6  ;;  %v8332_v6 = vld [vmem:[#allocation8 + $0x30] sm:$0xf0]  ;;  %v8338_v29 = vld [vmem:[#allocation8 + $0x28] sm:$0xf]  ;;  %v8324_v59 = vld [vmem:[#allocation8 + $0x18] sm:$0xf0] }
 0x168   :  { %v8339_v7 = vor.u32 %v10687_v19, %v8338_v29  ;;  %v8564_v19 = vld [vmem:[#allocation10 + $0xf8] sm:$0xf0] }
 0x169   :  { %2154 = vmatpush.bf16.msra.mxu0 %v8395_v20  ;;  %2167 = vmatpush.bf16.msra.mxu1 %v8399_v24  ;;  %v8371_v20 = vor.u32 %v10695_v50, %v8370_v5  ;;  %v10693_v24 = vld [vmem:[#allocation8 + $0x6c] sm:$0xf]  ;;  %v8340_v50 = vld [vmem:[#allocation8 + $0x38] sm:$0xf0] }
 0x16a   :  { %2180 = vmatpush.bf16.msra.mxu2 %v8403_v39  ;;  %2193 = vmatpush.bf16.msra.mxu3 %v8407_v57  ;;  %v8375_v32 = vor.u32 %v10693_v24, %v8372_v13  ;;  %v10688_v39 = vld [vmem:[#allocation8 + $0x44] sm:$0xf]  ;;  %v8347_v57 = vor.u32 %v10690_v16, %v8346_v60  ;;  %v10685_v5 = vld [vmem:[#allocation8 + $0x2c] sm:$0xf]  ;;  %v10682_v24 = vld [vmem:[#allocation8 + $0xc] sm:$0xf0] }
 0x16b   :  { %v11258_v47 = vpop.eup %11257  ;;  %v8351_v49 = vor.u32 %v10688_v39, %v8348_v51  ;;  %v10680_v13 = vld [vmem:[#allocation8 + $0x4] sm:$0xf]  ;;  %v8316_v60 = vld [vmem:[#allocation8 + $0x10] sm:$0xf0]  ;;  %v8322_v16 = vld [vmem:[#allocation8 + $0x8] sm:$0xf] }
 0x16c   :  { %v12045_v0 = vmul.f32 %v11258_v47, %v1398_v21  ;;  %v10684_v47 = vld [vmem:[#allocation8 + $0x24] sm:$0xf]  ;;  %v10683_v39 = vld [vmem:[#allocation8 + $0x14] sm:$0xf0] }
 0x16d   :  { %2155 = vmatpush.bf16.msra.mxu0 %v8379_v52  ;;  %2168 = vmatpush.bf16.msra.mxu1 %v8383_v4  ;;  %v10689_v52 = vld [vmem:[#allocation8 + $0x4c] sm:$0xf]  ;;  %v8356_v4 = vld [vmem:[#allocation8 + $0x58] sm:$0xf0]  ;;  %v8323_v51 = vor.u32 %v10683_v39, %v8322_v16 }
 0x16e   :  { %v1652_v36 = vpack.c.bf16 %v12045_v0, %v12045_v0  ;;  %2181 = vmatpush.bf16.msra.mxu2 %v8387_v18  ;;  %2194 = vmatpush.bf16.msra.mxu3 %v8391_v55  ;;  %v8359_v21 = vor.u32 %v10689_v52, %v8356_v4  ;;  %v8330_v18 = vld [vmem:[#allocation8 + $0x20] sm:$0xf]  ;;  %v10686_v55 = vld [vmem:[#allocation8 + $0x2c] sm:$0xf0]  ;;  %v10740_v4 = vld [vmem:[#allocation10 + $0xe4] sm:$0xf] }
 0x16f   :  { %v10742_v52 = vld [vmem:[#allocation10 + $0xec] sm:$0xf0]  ;;  %v8548_v16 = vld [vmem:[#allocation10 + $0xd8] sm:$0xf0] }
 0x170   :  { %1853 = vmatmul.bf16.vlgmr.msrb.gmra.mxu0 %v1652_v36  ;;  %1866 = vmatmul.bf16.vlgmr.msrb.gmra.mxu1 %v1652_v36 }
 0x171   :  { %1879 = vmatmul.bf16.vlgmr.msrb.gmra.mxu2 %v1652_v36  ;;  %1892 = vmatmul.bf16.vlgmr.msrb.gmra.mxu3 %v1652_v36  ;;  %v8331_v36 = vor.u32 %v10686_v55, %v8330_v18 }
 0x172   :  { %2156 = vmatpush.bf16.msra.mxu0 %v8363_v37  ;;  %2169 = vmatpush.bf16.msra.mxu1 %v8367_v56  ;;  %v8335_v37 = vor.u32 %v10684_v47, %v8332_v6  ;;  %v8343_v56 = vor.u32 %v10685_v5, %v8340_v50  ;;  %v8562_v47 = vld [vmem:[#allocation10 + $0xe8] sm:$0xf]  ;;  %v10741_v6 = vld [vmem:[#allocation10 + $0xec] sm:$0xf] }
 0x173   :  { %2182 = vmatpush.bf16.msra.mxu2 %v8371_v20  ;;  %2195 = vmatpush.bf16.msra.mxu3 %v8375_v32  ;;  %v8314_v20 = vld [vmem:[#allocation8] sm:$0xf]  ;;  %v8567_v5 = vor.u32 %v10741_v6, %v8564_v19  ;;  %v10728_v19 = vld [vmem:[#allocation10 + $0x84] sm:$0xf] }
 0x174   :  { %v8315_v32 = vor.u32 %v10682_v24, %v8314_v20  ;;  %v8540_v20 = vld [vmem:[#allocation10 + $0xd0] sm:$0xf0]  ;;  %v8546_v24 = vld [vmem:[#allocation10 + $0xc8] sm:$0xf]  ;;  %v8506_v6 = vld [vmem:[#allocation10 + $0x80] sm:$0xf] }
 0x176   :  { %2157 = vmatpush.bf16.msra.mxu0 %v8347_v57  ;;  %2170 = vmatpush.bf16.msra.mxu1 %v8351_v49  ;;  %v8319_v57 = vor.u32 %v10680_v13, %v8316_v60  ;;  %v8554_v49 = vld [vmem:[#allocation10 + $0xe0] sm:$0xf]  ;;  %v10737_v60 = vld [vmem:[#allocation10 + $0xcc] sm:$0xf] }
 0x177   :  { %2183 = vmatpush.bf16.msra.mxu2 %v8355_v58  ;;  %2196 = vmatpush.bf16.msra.mxu3 %v8359_v21  ;;  %v8327_v58 = vor.u32 %v10681_v53, %v8324_v59  ;;  %v8556_v21 = vld [vmem:[#allocation10 + $0xf0] sm:$0xf0]  ;;  %v8555_v18 = vor.u32 %v10742_v52, %v8554_v49  ;;  %v10734_v53 = vld [vmem:[#allocation10 + $0xac] sm:$0xf0]  ;;  %v10732_v59 = vld [vmem:[#allocation10 + $0xa4] sm:$0xf] }
 0x178   :  { %v8559_v55 = vor.u32 %v10740_v4, %v8556_v21  ;;  %v8530_v52 = vld [vmem:[#allocation10 + $0xa8] sm:$0xf]  ;;  %v10735_v4 = vld [vmem:[#allocation10 + $0xb4] sm:$0xf0] }
 0x17a   :  { %2158 = vmatpush.bf16.msra.mxu0 %v8331_v36  ;;  %2171 = vmatpush.bf16.msra.mxu1 %v8335_v37  ;;  %v10743_v36 = vld [vmem:[#allocation10 + $0xf4] sm:$0xf0]  ;;  %v8538_v37 = vld [vmem:[#allocation10 + $0xc0] sm:$0xf] }
 0x17b   :  { %2184 = vmatpush.bf16.msra.mxu2 %v8339_v7  ;;  %2197 = vmatpush.bf16.msra.mxu3 %v8343_v56  ;;  %v8563_v29 = vor.u32 %v10743_v36, %v8562_v47  ;;  %v10738_v7 = vld [vmem:[#allocation10 + $0xcc] sm:$0xf0]  ;;  %v10736_v56 = vld [vmem:[#allocation10 + $0xc4] sm:$0xf]  ;;  %v8532_v47 = vld [vmem:[#allocation10 + $0xb8] sm:$0xf0] }
 0x17c   :  { %v8539_v50 = vor.u32 %v10738_v7, %v8538_v37  ;;  %v8543_v13 = vor.u32 %v10736_v56, %v8540_v20  ;;  %v8508_v7 = vld [vmem:[#allocation10 + $0x90] sm:$0xf0] }
 0x17d   :  { %v8511_v56 = vor.u32 %v10728_v19, %v8508_v7  ;;  %v8474_v19 = vld [vmem:[#allocation10 + $0x40] sm:$0xf]  ;;  %v10722_v7 = vld [vmem:[#allocation10 + $0x4c] sm:$0xf0] }
 0x17e   :  { %2159 = vmatpush.bf16.msra.mxu0 %v8315_v32  ;;  %2172 = vmatpush.bf16.msra.mxu1 %v8319_v57  ;;  %v10739_v32 = vld [vmem:[#allocation10 + $0xd4] sm:$0xf0]  ;;  %v8551_v57 = vor.u32 %v10737_v60, %v8548_v16  ;;  %v574_v60 = vadd.f32 %v11848_v22, %v11855_v25  ;;  %v603_v16 = vadd.f32 %v11850_v23, %v11859_v27  ;;  %v10725_v22 = vld [vmem:[#allocation10 + $0x6c] sm:$0xf] }
 0x17f   :  { %2185 = vmatpush.bf16.msra.mxu2 %v8323_v51  ;;  %2198 = vmatpush.bf16.msra.mxu3 %v8327_v58  ;;  %v8547_v39 = vor.u32 %v10739_v32, %v8546_v24  ;;  %v8522_v51 = vld [vmem:[#allocation10 + $0xa0] sm:$0xf]  ;;  %v8524_v58 = vld [vmem:[#allocation10 + $0xb0] sm:$0xf0]  ;;  %v10729_v24 = vld [vmem:[#allocation10 + $0x8c] sm:$0xf] }
 0x180   :  { %v8523_v49 = vor.u32 %v10734_v53, %v8522_v51  ;;  %v8527_v21 = vor.u32 %v10732_v59, %v8524_v58  ;;  %v10724_v51 = vld [vmem:[#allocation10 + $0x64] sm:$0xf]  ;;  %v8492_v58 = vld [vmem:[#allocation10 + $0x70] sm:$0xf0] }
 0x182   :  { %2397 = vmatpush.bf16.msrb.mxu0 %v8555_v18  ;;  %2410 = vmatpush.bf16.msrb.mxu1 %v8559_v55  ;;  %v8531_v18 = vor.u32 %v10735_v4, %v8530_v52  ;;  %v10733_v55 = vld [vmem:[#allocation10 + $0xac] sm:$0xf]  ;;  %v8498_v52 = vld [vmem:[#allocation10 + $0x68] sm:$0xf]  ;;  %v10727_v4 = vld [vmem:[#allocation10 + $0x74] sm:$0xf0] }
 0x183   :  { %2423 = vmatpush.bf16.msrb.mxu2 %v8563_v29  ;;  %2436 = vmatpush.bf16.msrb.mxu3 %v8567_v5  ;;  %v8535_v36 = vor.u32 %v10733_v55, %v8532_v47  ;;  %v10730_v29 = vld [vmem:[#allocation10 + $0x8c] sm:$0xf0]  ;;  %v8514_v5 = vld [vmem:[#allocation10 + $0x88] sm:$0xf]  ;;  %v8495_v55 = vor.u32 %v10724_v51, %v8492_v58  ;;  %v8499_v47 = vor.u32 %v10727_v4, %v8498_v52  ;;  %v10716_v58 = vld [vmem:[#allocation10 + $0x24] sm:$0xf] }
 0x184   :  { %v8507_v37 = vor.u32 %v10730_v29, %v8506_v6 }
 0x186   :  { %2398 = vmatpush.bf16.msrb.mxu0 %v8539_v50  ;;  %2411 = vmatpush.bf16.msrb.mxu1 %v8543_v13  ;;  %v10731_v50 = vld [vmem:[#allocation10 + $0x94] sm:$0xf0]  ;;  %v8516_v13 = vld [vmem:[#allocation10 + $0x98] sm:$0xf0] }
 0x187   :  { %2424 = vmatpush.bf16.msrb.mxu2 %v8547_v39  ;;  %2437 = vmatpush.bf16.msrb.mxu3 %v8551_v57  ;;  %v8515_v20 = vor.u32 %v10731_v50, %v8514_v5  ;;  %v8519_v32 = vor.u32 %v10729_v24, %v8516_v13  ;;  %v8490_v39 = vld [vmem:[#allocation10 + $0x60] sm:$0xf]  ;;  %v10726_v57 = vld [vmem:[#allocation10 + $0x6c] sm:$0xf0]  ;;  %v10720_v5 = vld [vmem:[#allocation10 + $0x44] sm:$0xf]  ;;  %v632_v24 = vadd.f32 %v11857_v26, %v11873_v34 }
 0x188   :  { %v8476_v50 = vld [vmem:[#allocation10 + $0x50] sm:$0xf0]  ;;  %v10723_v13 = vld [vmem:[#allocation10 + $0x54] sm:$0xf0] }
 0x18a   :  { %2399 = vmatpush.bf16.msrb.mxu0 %v8523_v49  ;;  %2412 = vmatpush.bf16.msrb.mxu1 %v8527_v21  ;;  %v8491_v49 = vor.u32 %v10726_v57, %v8490_v39 }
 0x18b   :  { %2425 = vmatpush.bf16.msrb.mxu2 %v8531_v18  ;;  %2438 = vmatpush.bf16.msrb.mxu3 %v8535_v36  ;;  %v8500_v36 = vld [vmem:[#allocation10 + $0x78] sm:$0xf0] }
 0x18c   :  { %v8503_v23 = vor.u32 %v10725_v22, %v8500_v36  ;;  %v10719_v22 = vld [vmem:[#allocation10 + $0x34] sm:$0xf0] }
 0x18e   :  { %2400 = vmatpush.bf16.msrb.mxu0 %v8507_v37  ;;  %2413 = vmatpush.bf16.msrb.mxu1 %v8511_v56  ;;  %v8475_v37 = vor.u32 %v10722_v7, %v8474_v19  ;;  %v8482_v56 = vld [vmem:[#allocation10 + $0x48] sm:$0xf] }
 0x18f   :  { %2426 = vmatpush.bf16.msrb.mxu2 %v8515_v20  ;;  %2439 = vmatpush.bf16.msrb.mxu3 %v8519_v32  ;;  %v8479_v20 = vor.u32 %v10720_v5, %v8476_v50  ;;  %v8484_v32 = vld [vmem:[#allocation10 + $0x58] sm:$0xf0]  ;;  %v8483_v39 = vor.u32 %v10723_v13, %v8482_v56  ;;  %v8442_v5 = vld [vmem:[#allocation10] sm:$0xf]  ;;  %v10714_v50 = vld [vmem:[#allocation10 + $0xc] sm:$0xf0] }
 0x190   :  { %v10712_v56 = vld [vmem:[#allocation10 + $0x4] sm:$0xf]  ;;  %v8444_v13 = vld [vmem:[#allocation10 + $0x10] sm:$0xf0] }
 0x192   :  { %2401 = vmatpush.bf16.msrb.mxu0 %v8491_v49  ;;  %2414 = vmatpush.bf16.msrb.mxu1 %v8495_v55  ;;  %v10718_v49 = vld [vmem:[#allocation10 + $0x2c] sm:$0xf0]  ;;  %v8460_v55 = vld [vmem:[#allocation10 + $0x30] sm:$0xf0] }
 0x193   :  { %2427 = vmatpush.bf16.msrb.mxu2 %v8499_v47  ;;  %2440 = vmatpush.bf16.msrb.mxu3 %v8503_v23  ;;  %v8466_v47 = vld [vmem:[#allocation10 + $0x28] sm:$0xf]  ;;  %v10717_v23 = vld [vmem:[#allocation10 + $0x2c] sm:$0xf] }
 0x194   :  { %v8467_v36 = vor.u32 %v10719_v22, %v8466_v47 }
 0x196   :  { %2402 = vmatpush.bf16.msrb.mxu0 %v8475_v37  ;;  %2415 = vmatpush.bf16.msrb.mxu1 %v8479_v20  ;;  %v8443_v20 = vor.u32 %v10714_v50, %v8442_v5 }
 0x197   :  { %2428 = vmatpush.bf16.msrb.mxu2 %v8483_v39  ;;  %v10715_v39 = vld [vmem:[#allocation10 + $0x14] sm:$0xf0] }
 0x19b   :  { %2429 = vmatpush.bf16.msrb.mxu2 %v8467_v36 }
 0x1dc   :  { %v1609_v53 = vpop.f32.mrf.mxu0  ;;  %v1622_v59 = vpop.f32.mrf.mxu1 }
 0x1dd   :  { %v1904_v21 = vadd.f32 %v1609_v53, %v574_v60  ;;  %v1905_v18 = vadd.f32 %v1622_v59, %v603_v16  ;;  %v10721_v60 = vld [vmem:[#allocation10 + $0x4c] sm:$0xf]  ;;  %v661_v16 = vadd.f32 %v11861_v28, %v11875_v35  ;;  %v8458_v59 = vld [vmem:[#allocation10 + $0x20] sm:$0xf]  ;;  %v8463_v28 = vor.u32 %v10716_v58, %v8460_v55 }
 0x1de   :  { %v8487_v57 = vor.u32 %v10721_v60, %v8484_v32  ;;  %v8450_v60 = vld [vmem:[#allocation10 + $0x8] sm:$0xf] }
 0x1df   :  { %v1919_v6 = vmul.f32 0.5, %v1904_v21  ;;  %v1923_v29 = vmul.f32 0.5, %v1905_v18  ;;  %v8459_v18 = vor.u32 %v10718_v49, %v8458_v59  ;;  %2416 = vmatpush.bf16.msrb.mxu1 %v8463_v28  ;;  %v8452_v59 = vld [vmem:[#allocation10 + $0x18] sm:$0xf0] }
 0x1e0   :  { %2441 = vmatpush.bf16.msrb.mxu3 %v8487_v57  ;;  %v8451_v57 = vor.u32 %v10715_v39, %v8450_v60 }
 0x1e1   :  { %11259 = vtanh.f32 %v1919_v6  ;;  %v8468_v6 = vld [vmem:[#allocation10 + $0x38] sm:$0xf0]  ;;  %2403 = vmatpush.bf16.msrb.mxu0 %v8459_v18 }
 0x1e2   :  { %11261 = vtanh.f32 %v1923_v29  ;;  %v8471_v19 = vor.u32 %v10717_v23, %v8468_v6  ;;  %2430 = vmatpush.bf16.msrb.mxu2 %v8451_v57  ;;  %v10773_v57 = vld [vmem:[#allocation8 + $0xec] sm:$0xf] }
 0x1e3   :  { %v1635_v51 = vpop.f32.mrf.mxu2  ;;  %v1648_v53 = vpop.f32.mrf.mxu3 }
 0x1e4   :  { %v1906_v52 = vadd.f32 %v1635_v51, %v632_v24  ;;  %v1907_v26 = vadd.f32 %v1648_v53, %v661_v16  ;;  %v1611_v4 = vpop.f32.mrf.mxu0  ;;  %v1624_v21 = vpop.f32.mrf.mxu1  ;;  %v8447_v16 = vor.u32 %v10712_v56, %v8444_v13  ;;  %v10713_v51 = vld [vmem:[#allocation10 + $0xc] sm:$0xf]  ;;  %2442 = vmatpush.bf16.msrb.mxu3 %v8471_v19 }
 0x1e5   :  { %2404 = vmatpush.bf16.msrb.mxu0 %v8443_v20  ;;  %v10772_v20 = vld [vmem:[#allocation8 + $0xe4] sm:$0xf] }
 0x1e6   :  { %11263 = vtanh.f32 %v1906_v52  ;;  %v1928_v29 = vmul.f32 0.5, %v1907_v26  ;;  %v8455_v26 = vor.u32 %v10713_v51, %v8452_v59  ;;  %2417 = vmatpush.bf16.msrb.mxu1 %v8447_v16  ;;  %v8690_v16 = vld [vmem:[#allocation8 + $0xe8] sm:$0xf]  ;;  %v8692_v59 = vld [vmem:[#allocation8 + $0xf8] sm:$0xf0] }
 0x1e7   :  { %v11260_v7 = vpop.eup %11259 }
 0x1e8   :  { %v11262_v24 = vpop.eup %11261  ;;  %v1921_v37 = vmul.f32 0.5, %v11260_v7  ;;  %11265 = vtanh.f32 %v1928_v29  ;;  %2443 = vmatpush.bf16.msrb.mxu3 %v8455_v26 }
 0x1e9   :  { %v1925_v32 = vmul.f32 0.5, %v11262_v24 }
 0x1ea   :  { %v1922_v53 = vadd.f32 0.5, %v1921_v37  ;;  %v10774_v37 = vld [vmem:[#allocation8 + $0xec] sm:$0xf0] }
 0x1eb   :  { %v1926_v49 = vadd.f32 0.5, %v1925_v32  ;;  %v1637_v58 = vpop.f32.mrf.mxu2  ;;  %v1650_v52 = vpop.f32.mrf.mxu3  ;;  %v8684_v32 = vld [vmem:[#allocation8 + $0xf0] sm:$0xf0] }
 0x1ec   :  { %v11264_v4 = vpop.eup %11263  ;;  %v8666_v58 = vld [vmem:[#allocation8 + $0xc0] sm:$0xf]  ;;  %v10770_v52 = vld [vmem:[#allocation8 + $0xcc] sm:$0xf0] }
 0x1ed   :  { %v1932_v21 = vmul.f32 %v1926_v49, %v12031_v9  ;;  %v1933_v18 = vmul.f32 %v11264_v4, %v1922_v53  ;;  %v1854_v55 = vpop.f32.mrf.mxu0  ;;  %v1867_v47 = vpop.f32.mrf.mxu1  ;;  %v10775_v53 = vld [vmem:[#allocation8 + $0xf4] sm:$0xf0] }
 0x1ee   :  { %v1915_v22 = vadd.f32 %v1854_v55, %v12000_v1  ;;  %v1916_v28 = vadd.f32 %v1867_v47, %v12003_v42  ;;  %v11266_v36 = vpop.eup %11265  ;;  %v8682_v42 = vld [vmem:[#allocation8 + $0xe0] sm:$0xf]  ;;  %v8668_v55 = vld [vmem:[#allocation8 + $0xd0] sm:$0xf0] }
 0x1ef   :  { %v12060_v23 = vadd.f32 %v1933_v18, %v1932_v21  ;;  %v1930_v19 = vmul.f32 0.5, %v11266_v36  ;;  %v8687_v21 = vor.u32 %v10772_v20, %v8684_v32  ;;  %v10768_v18 = vld [vmem:[#allocation8 + $0xc4] sm:$0xf]  ;;  %v8674_v36 = vld [vmem:[#allocation8 + $0xc8] sm:$0xf] }
 0x1f0   :  { %v1937_v6 = vmul.f32 0.5, %v1915_v22  ;;  %v1941_v29 = vmul.f32 0.5, %v1916_v28  ;;  %v8691_v22 = vor.u32 %v10775_v53, %v8690_v16  ;;  %v8695_v28 = vor.u32 %v10773_v57, %v8692_v59  ;;  %v10766_v20 = vld [vmem:[#allocation8 + $0xac] sm:$0xf0]  ;;  %v10764_v32 = vld [vmem:[#allocation8 + $0xa4] sm:$0xf] }
 0x1f1   :  { %11267 = vtanh.f32 %v12060_v23  ;;  %v1931_v24 = vadd.f32 0.5, %v1930_v19  ;;  %v8652_v16 = vld [vmem:[#allocation8 + $0xb0] sm:$0xf0]  ;;  %v10767_v59 = vld [vmem:[#allocation8 + $0xb4] sm:$0xf0] }
 0x1f2   :  { %11269 = vtanh.f32 %v1937_v6  ;;  %v10771_v6 = vld [vmem:[#allocation8 + $0xd4] sm:$0xf0] }
 0x1f3   :  { %11271 = vtanh.f32 %v1941_v29 }
 0x1f4   :  { %v1880_v9 = vpop.f32.mrf.mxu2  ;;  %v1893_v7 = vpop.f32.mrf.mxu3 }
 0x1f5   :  { %v1917_v5 = vadd.f32 %v1880_v9, %v12006_v46  ;;  %v1918_v50 = vadd.f32 %v1893_v7, %v12011_v62  ;;  %v1856_v1 = vpop.f32.mrf.mxu0  ;;  %v1869_v56 = vpop.f32.mrf.mxu1  ;;  %v8683_v62 = vor.u32 %v10774_v37, %v8682_v42  ;;  %v10769_v7 = vld [vmem:[#allocation8 + $0xcc] sm:$0xf]  ;;  %v8650_v37 = vld [vmem:[#allocation8 + $0xa0] sm:$0xf] }
 0x1f6   :  { %v8667_v1 = vor.u32 %v10770_v52, %v8666_v58  ;;  %v8634_v58 = vld [vmem:[#allocation8 + $0x80] sm:$0xf]  ;;  %v10762_v52 = vld [vmem:[#allocation8 + $0x8c] sm:$0xf0] }
 0x1f7   :  { %v11268_v13 = vpop.eup %11267  ;;  %11273 = vtanh.f32 %v1917_v5  ;;  %v1946_v60 = vmul.f32 0.5, %v1918_v50  ;;  %v8676_v5 = vld [vmem:[#allocation8 + $0xd8] sm:$0xf0] }
 0x1f8   :  { %v11270_v39 = vpop.eup %11269  ;;  %v12065_v51 = vmul.f32 %v11268_v13, %v1931_v24  ;;  %v8671_v24 = vor.u32 %v10768_v18, %v8668_v55  ;;  %v8675_v13 = vor.u32 %v10771_v6, %v8674_v36  ;;  %v8636_v55 = vld [vmem:[#allocation8 + $0x90] sm:$0xf0]  ;;  %v8644_v36 = vld [vmem:[#allocation8 + $0x98] sm:$0xf0]  ;;  %v8635_v6 = vor.u32 %v10762_v52, %v8634_v58  ;;  %v8610_v52 = vld [vmem:[#allocation8 + $0x48] sm:$0xf] }
 0x1f9   :  { %v11272_v46 = vpop.eup %11271  ;;  %v1939_v49 = vmul.f32 0.5, %v11270_v39  ;;  %11275 = vtanh.f32 %v1946_v60  ;;  %v8679_v60 = vor.u32 %v10769_v7, %v8676_v5  ;;  %v8658_v39 = vld [vmem:[#allocation8 + $0xa8] sm:$0xf]  ;;  %v8604_v58 = vld [vmem:[#allocation8 + $0x50] sm:$0xf0] }
 0x1fa   :  { %v1959_v26 = vpack.c.bf16 %v12065_v51, %v12065_v51  ;;  %v1943_v4 = vmul.f32 0.5, %v11272_v46  ;;  %v10765_v46 = vld [vmem:[#allocation8 + $0xac] sm:$0xf] }
 0x1fb   :  { %v1940_v47 = vadd.f32 0.5, %v1939_v49  ;;  %v8660_v49 = vld [vmem:[#allocation8 + $0xb8] sm:$0xf0] }
 0x1fc   :  { %v1944_v29 = vadd.f32 0.5, %v1943_v4  ;;  %v1882_v19 = vpop.f32.mrf.mxu2  ;;  %v1895_v9 = vpop.f32.mrf.mxu3  ;;  %2160 = vmatmul.bf16.vlgmr.msra.gmra.mxu0 %v1959_v26  ;;  %2173 = vmatmul.bf16.vlgmr.msra.gmra.mxu1 %v1959_v26  ;;  %v8663_v18 = vor.u32 %v10765_v46, %v8660_v49  ;;  %v8602_v46 = vld [vmem:[#allocation8 + $0x40] sm:$0xf]  ;;  %v10754_v49 = vld [vmem:[#allocation8 + $0x4c] sm:$0xf0] }
 0x1fd   :  { %v11274_v50 = vpop.eup %11273  ;;  %2186 = vmatmul.bf16.vlgmr.msra.gmra.mxu2 %v1959_v26  ;;  %2199 = vmatmul.bf16.vlgmr.msra.gmra.mxu3 %v1959_v26  ;;  %v10760_v26 = vld [vmem:[#allocation8 + $0x84] sm:$0xf] }
 0x1fe   :  { %v1950_v56 = vmul.f32 %v1944_v29, %v12042_v14  ;;  %v1951_v42 = vmul.f32 %v11274_v50, %v1940_v47  ;;  %2704 = vmatpush.bf16.msra.mxu0 %v8683_v62  ;;  %2717 = vmatpush.bf16.msra.mxu1 %v8687_v21  ;;  %v8651_v14 = vor.u32 %v10766_v20, %v8650_v37  ;;  %v8642_v47 = vld [vmem:[#allocation8 + $0x88] sm:$0xf]  ;;  %v8620_v20 = vld [vmem:[#allocation8 + $0x70] sm:$0xf0] }
 0x1ff   :  { %2730 = vmatpush.bf16.msra.mxu2 %v8691_v22  ;;  %2743 = vmatpush.bf16.msra.mxu3 %v8695_v28  ;;  %v11276_v53 = vpop.eup %11275  ;;  %v8655_v62 = vor.u32 %v10764_v32, %v8652_v16  ;;  %v8659_v21 = vor.u32 %v10767_v59, %v8658_v39  ;;  %v10763_v22 = vld [vmem:[#allocation8 + $0x94] sm:$0xf0]  ;;  %v10761_v28 = vld [vmem:[#allocation8 + $0x8c] sm:$0xf]  ;;  %v8639_v29 = vor.u32 %v10760_v26, %v8636_v55  ;;  %v8612_v55 = vld [vmem:[#allocation8 + $0x58] sm:$0xf0] }
 0x200   :  { %v12070_v57 = vadd.f32 %v1951_v42, %v1950_v56  ;;  %v1948_v4 = vmul.f32 0.5, %v11276_v53  ;;  %v8643_v9 = vor.u32 %v10763_v22, %v8642_v47  ;;  %v8647_v7 = vor.u32 %v10761_v28, %v8644_v36  ;;  %v8618_v56 = vld [vmem:[#allocation8 + $0x60] sm:$0xf]  ;;  %v10758_v42 = vld [vmem:[#allocation8 + $0x6c] sm:$0xf0] }
 0x201   :  { %v8619_v37 = vor.u32 %v10758_v42, %v8618_v56  ;;  %v10757_v39 = vld [vmem:[#allocation8 + $0x6c] sm:$0xf]  ;;  %v8628_v53 = vld [vmem:[#allocation8 + $0x78] sm:$0xf0]  ;;  %v10755_v26 = vld [vmem:[#allocation8 + $0x54] sm:$0xf0] }
 0x202   :  { %11277 = vtanh.f32 %v12070_v57  ;;  %2705 = vmatpush.bf16.msra.mxu0 %v8667_v1  ;;  %2718 = vmatpush.bf16.msra.mxu1 %v8671_v24  ;;  %v1949_v19 = vadd.f32 0.5, %v1948_v4  ;;  %v10756_v24 = vld [vmem:[#allocation8 + $0x64] sm:$0xf]  ;;  %v8631_v59 = vor.u32 %v10757_v39, %v8628_v53  ;;  %v8586_v22 = vld [vmem:[#allocation8 + $0x20] sm:$0xf] }
 0x203   :  { %2731 = vmatpush.bf16.msra.mxu2 %v8675_v13  ;;  %2744 = vmatpush.bf16.msra.mxu3 %v8679_v60  ;;  %v8626_v13 = vld [vmem:[#allocation8 + $0x68] sm:$0xf]  ;;  %v10759_v60 = vld [vmem:[#allocation8 + $0x74] sm:$0xf0]  ;;  %v8623_v32 = vor.u32 %v10756_v24, %v8620_v20  ;;  %v10750_v28 = vld [vmem:[#allocation8 + $0x2c] sm:$0xf0] }
 0x204   :  { %v8627_v16 = vor.u32 %v10759_v60, %v8626_v13  ;;  %v10748_v36 = vld [vmem:[#allocation8 + $0x24] sm:$0xf]  ;;  %v8596_v56 = vld [vmem:[#allocation8 + $0x38] sm:$0xf0]  ;;  %v8570_v24 = vld [vmem:[#allocation8] sm:$0xf] }
 0x205   :  { %v10744_v20 = vld [vmem:[#allocation8 + $0x4] sm:$0xf]  ;;  %v8572_v60 = vld [vmem:[#allocation8 + $0x10] sm:$0xf0] }
 0x206   :  { %2706 = vmatpush.bf16.msra.mxu0 %v8651_v14  ;;  %2719 = vmatpush.bf16.msra.mxu1 %v8655_v62  ;;  %v10752_v14 = vld [vmem:[#allocation8 + $0x44] sm:$0xf]  ;;  %v8603_v62 = vor.u32 %v10754_v49, %v8602_v46  ;;  %v8575_v39 = vor.u32 %v10744_v20, %v8572_v60  ;;  %v8580_v46 = vld [vmem:[#allocation8 + $0x18] sm:$0xf0]  ;;  %v8810_v49 = vld [vmem:[#allocation10 + $0xe0] sm:$0xf] }
 0x207   :  { %2732 = vmatpush.bf16.msra.mxu2 %v8659_v21  ;;  %2745 = vmatpush.bf16.msra.mxu3 %v8663_v18  ;;  %v8607_v4 = vor.u32 %v10752_v14, %v8604_v58  ;;  %v8611_v21 = vor.u32 %v10755_v26, %v8610_v52  ;;  %v10753_v18 = vld [vmem:[#allocation8 + $0x4c] sm:$0xf]  ;;  %v10804_v58 = vld [vmem:[#allocation10 + $0xe4] sm:$0xf]  ;;  %v8812_v52 = vld [vmem:[#allocation10 + $0xf0] sm:$0xf0] }
 0x208   :  { %v11278_v5 = vpop.eup %11277  ;;  %v8615_v47 = vor.u32 %v10753_v18, %v8612_v55  ;;  %v10807_v18 = vld [vmem:[#allocation10 + $0xf4] sm:$0xf0]  ;;  %v10805_v55 = vld [vmem:[#allocation10 + $0xec] sm:$0xf]  ;;  %v8778_v20 = vld [vmem:[#allocation10 + $0xa0] sm:$0xf] }
 0x209   :  { %v12073_v50 = vmul.f32 %v11278_v5, %v1949_v19  ;;  %v8594_v19 = vld [vmem:[#allocation8 + $0x28] sm:$0xf]  ;;  %v10796_v60 = vld [vmem:[#allocation10 + $0xa4] sm:$0xf] }
 0x20a   :  { %2707 = vmatpush.bf16.msra.mxu0 %v8635_v6  ;;  %2720 = vmatpush.bf16.msra.mxu1 %v8639_v29  ;;  %v8587_v6 = vor.u32 %v10750_v28, %v8586_v22  ;;  %v8588_v29 = vld [vmem:[#allocation8 + $0x30] sm:$0xf0]  ;;  %v8820_v22 = vld [vmem:[#allocation10 + $0xf8] sm:$0xf0]  ;;  %v8794_v28 = vld [vmem:[#allocation10 + $0xc0] sm:$0xf] }
 0x20b   :  { %v2204_v1 = vpack.c.bf16 %v12073_v50, %v12073_v50  ;;  %2733 = vmatpush.bf16.msra.mxu2 %v8643_v9  ;;  %2746 = vmatpush.bf16.msra.mxu3 %v8647_v7  ;;  %v10751_v9 = vld [vmem:[#allocation8 + $0x34] sm:$0xf0]  ;;  %v8591_v7 = vor.u32 %v10748_v36, %v8588_v29  ;;  %v10802_v36 = vld [vmem:[#allocation10 + $0xcc] sm:$0xf0] }
 0x20c   :  { %v8595_v5 = vor.u32 %v10751_v9, %v8594_v19  ;;  %v8795_v29 = vor.u32 %v10802_v36, %v8794_v28  ;;  %v10800_v19 = vld [vmem:[#allocation10 + $0xc4] sm:$0xf]  ;;  %v8796_v9 = vld [vmem:[#allocation10 + $0xd0] sm:$0xf0]  ;;  %v10793_v28 = vld [vmem:[#allocation10 + $0x8c] sm:$0xf] }
 0x20d   :  { %2405 = vmatmul.bf16.vlgmr.msrb.gmra.mxu0 %v2204_v1  ;;  %2418 = vmatmul.bf16.vlgmr.msrb.gmra.mxu1 %v2204_v1  ;;  %v8772_v36 = vld [vmem:[#allocation10 + $0x98] sm:$0xf0] }
 0x20e   :  { %2431 = vmatmul.bf16.vlgmr.msrb.gmra.mxu2 %v2204_v1  ;;  %2444 = vmatmul.bf16.vlgmr.msrb.gmra.mxu3 %v2204_v1  ;;  %v10749_v1 = vld [vmem:[#allocation8 + $0x2c] sm:$0xf] }
 0x20f   :  { %2708 = vmatpush.bf16.msra.mxu0 %v8619_v37  ;;  %2721 = vmatpush.bf16.msra.mxu1 %v8623_v32  ;;  %v8599_v42 = vor.u32 %v10749_v1, %v8596_v56  ;;  %v10746_v37 = vld [vmem:[#allocation8 + $0xc] sm:$0xf0]  ;;  %v8578_v32 = vld [vmem:[#allocation8 + $0x8] sm:$0xf]  ;;  %v10803_v1 = vld [vmem:[#allocation10 + $0xd4] sm:$0xf0] }
 0x210   :  { %2734 = vmatpush.bf16.msra.mxu2 %v8627_v16  ;;  %2747 = vmatpush.bf16.msra.mxu3 %v8631_v59  ;;  %v8571_v13 = vor.u32 %v10746_v37, %v8570_v24  ;;  %v10747_v16 = vld [vmem:[#allocation8 + $0x14] sm:$0xf0]  ;;  %v10745_v59 = vld [vmem:[#allocation8 + $0xc] sm:$0xf] }
 0x211   :  { %v8579_v53 = vor.u32 %v10747_v16, %v8578_v32  ;;  %v8583_v14 = vor.u32 %v10745_v59, %v8580_v46  ;;  %v10801_v56 = vld [vmem:[#allocation10 + $0xcc] sm:$0xf]  ;;  %v8780_v16 = vld [vmem:[#allocation10 + $0xb0] sm:$0xf0] }
 0x212   :  { %v8783_v59 = vor.u32 %v10796_v60, %v8780_v16  ;;  %v8756_v16 = vld [vmem:[#allocation10 + $0x78] sm:$0xf0] }
 0x213   :  { %2709 = vmatpush.bf16.msra.mxu0 %v8603_v62  ;;  %2722 = vmatpush.bf16.msra.mxu1 %v8607_v4  ;;  %v10806_v62 = vld [vmem:[#allocation10 + $0xec] sm:$0xf0]  ;;  %v8815_v4 = vor.u32 %v10804_v58, %v8812_v52  ;;  %v8762_v58 = vld [vmem:[#allocation10 + $0x80] sm:$0xf] }
 0x214   :  { %2735 = vmatpush.bf16.msra.mxu2 %v8611_v21  ;;  %2748 = vmatpush.bf16.msra.mxu3 %v8615_v47  ;;  %v8811_v26 = vor.u32 %v10806_v62, %v8810_v49  ;;  %v8818_v21 = vld [vmem:[#allocation10 + $0xe8] sm:$0xf]  ;;  %v10797_v49 = vld [vmem:[#allocation10 + $0xac] sm:$0xf]  ;;  %v10794_v52 = vld [vmem:[#allocation10 + $0x8c] sm:$0xf0] }
 0x215   :  { %v8819_v47 = vor.u32 %v10807_v18, %v8818_v21  ;;  %v8764_v21 = vld [vmem:[#allocation10 + $0x90] sm:$0xf0]  ;;  %v8770_v18 = vld [vmem:[#allocation10 + $0x88] sm:$0xf] }
 0x217   :  { %2710 = vmatpush.bf16.msra.mxu0 %v8587_v6  ;;  %2723 = vmatpush.bf16.msra.mxu1 %v8591_v7  ;;  %v8823_v6 = vor.u32 %v10805_v55, %v8820_v22  ;;  %v8802_v7 = vld [vmem:[#allocation10 + $0xc8] sm:$0xf]  ;;  %v10795_v55 = vld [vmem:[#allocation10 + $0x94] sm:$0xf0] }
 0x218   :  { %2736 = vmatpush.bf16.msra.mxu2 %v8595_v5  ;;  %2749 = vmatpush.bf16.msra.mxu3 %v8599_v42  ;;  %v8799_v5 = vor.u32 %v10800_v19, %v8796_v9  ;;  %v8804_v42 = vld [vmem:[#allocation10 + $0xd8] sm:$0xf0]  ;;  %v8803_v24 = vor.u32 %v10803_v1, %v8802_v7  ;;  %v8771_v22 = vor.u32 %v10795_v55, %v8770_v18  ;;  %v10790_v19 = vld [vmem:[#allocation10 + $0x6c] sm:$0xf0]  ;;  %v10788_v9 = vld [vmem:[#allocation10 + $0x64] sm:$0xf] }
 0x219   :  { %v8807_v37 = vor.u32 %v10801_v56, %v8804_v42  ;;  %v8748_v56 = vld [vmem:[#allocation10 + $0x70] sm:$0xf0]  ;;  %v8754_v42 = vld [vmem:[#allocation10 + $0x68] sm:$0xf] }
 0x21b   :  { %2711 = vmatpush.bf16.msra.mxu0 %v8571_v13  ;;  %2724 = vmatpush.bf16.msra.mxu1 %v8575_v39  ;;  %v10798_v13 = vld [vmem:[#allocation10 + $0xac] sm:$0xf0]  ;;  %v8786_v39 = vld [vmem:[#allocation10 + $0xa8] sm:$0xf] }
 0x21c   :  { %2737 = vmatpush.bf16.msra.mxu2 %v8579_v53  ;;  %2750 = vmatpush.bf16.msra.mxu3 %v8583_v14  ;;  %v8779_v32 = vor.u32 %v10798_v13, %v8778_v20  ;;  %v10799_v53 = vld [vmem:[#allocation10 + $0xb4] sm:$0xf0]  ;;  %v8788_v14 = vld [vmem:[#allocation10 + $0xb8] sm:$0xf0]  ;;  %v8751_v13 = vor.u32 %v10788_v9, %v8748_v56 }
 0x21d   :  { %v8787_v46 = vor.u32 %v10799_v53, %v8786_v39  ;;  %v8791_v62 = vor.u32 %v10797_v49, %v8788_v14  ;;  %v10786_v49 = vld [vmem:[#allocation10 + $0x4c] sm:$0xf0]  ;;  %v10783_v56 = vld [vmem:[#allocation10 + $0x34] sm:$0xf0] }
 0x21f   :  { %2949 = vmatpush.bf16.msrb.mxu0 %v8811_v26  ;;  %2962 = vmatpush.bf16.msrb.mxu1 %v8815_v4  ;;  %v10792_v26 = vld [vmem:[#allocation10 + $0x84] sm:$0xf]  ;;  %v8763_v4 = vor.u32 %v10794_v52, %v8762_v58  ;;  %v8732_v58 = vld [vmem:[#allocation10 + $0x50] sm:$0xf0]  ;;  %v8738_v52 = vld [vmem:[#allocation10 + $0x48] sm:$0xf] }
 0x220   :  { %2975 = vmatpush.bf16.msrb.mxu2 %v8819_v47  ;;  %2988 = vmatpush.bf16.msrb.mxu3 %v8823_v6  ;;  %v8767_v47 = vor.u32 %v10792_v26, %v8764_v21  ;;  %v8775_v6 = vor.u32 %v10793_v28, %v8772_v36  ;;  %v10785_v26 = vld [vmem:[#allocation10 + $0x4c] sm:$0xf]  ;;  %v10782_v28 = vld [vmem:[#allocation10 + $0x2c] sm:$0xf0]  ;;  %v10780_v36 = vld [vmem:[#allocation10 + $0x24] sm:$0xf] }
 0x223   :  { %2950 = vmatpush.bf16.msrb.mxu0 %v8795_v29  ;;  %2963 = vmatpush.bf16.msrb.mxu1 %v8799_v5  ;;  %v8746_v29 = vld [vmem:[#allocation10 + $0x60] sm:$0xf] }
 0x224   :  { %2976 = vmatpush.bf16.msrb.mxu2 %v8803_v24  ;;  %2989 = vmatpush.bf16.msrb.mxu3 %v8807_v37  ;;  %v8747_v1 = vor.u32 %v10790_v19, %v8746_v29  ;;  %v10791_v24 = vld [vmem:[#allocation10 + $0x74] sm:$0xf0] }
 0x225   :  { %v8755_v60 = vor.u32 %v10791_v24, %v8754_v42 }
 0x227   :  { %2951 = vmatpush.bf16.msrb.mxu0 %v8779_v32  ;;  %2964 = vmatpush.bf16.msrb.mxu1 %v8783_v59  ;;  %v10789_v32 = vld [vmem:[#allocation10 + $0x6c] sm:$0xf] }
 0x228   :  { %2977 = vmatpush.bf16.msrb.mxu2 %v8787_v46  ;;  %2990 = vmatpush.bf16.msrb.mxu3 %v8791_v62  ;;  %v8759_v39 = vor.u32 %v10789_v32, %v8756_v16  ;;  %v8730_v46 = vld [vmem:[#allocation10 + $0x40] sm:$0xf]  ;;  %v10784_v62 = vld [vmem:[#allocation10 + $0x44] sm:$0xf] }
 0x229   :  { %v8731_v14 = vor.u32 %v10786_v49, %v8730_v46  ;;  %v8698_v32 = vld [vmem:[#allocation10] sm:$0xf]  ;;  %v10776_v16 = vld [vmem:[#allocation10 + $0x4] sm:$0xf]  ;;  %v8700_v46 = vld [vmem:[#allocation10 + $0x10] sm:$0xf0] }
 0x22a   :  { %v8706_v49 = vld [vmem:[#allocation10 + $0x8] sm:$0xf] }
 0x22b   :  { %2952 = vmatpush.bf16.msrb.mxu0 %v8763_v4  ;;  %2965 = vmatpush.bf16.msrb.mxu1 %v8767_v47  ;;  %v8740_v4 = vld [vmem:[#allocation10 + $0x58] sm:$0xf0] }
 0x22c   :  { %2978 = vmatpush.bf16.msrb.mxu2 %v8771_v22  ;;  %2991 = vmatpush.bf16.msrb.mxu3 %v8775_v6  ;;  %v8743_v18 = vor.u32 %v10785_v26, %v8740_v4  ;;  %v8714_v22 = vld [vmem:[#allocation10 + $0x20] sm:$0xf]  ;;  %v8708_v26 = vld [vmem:[#allocation10 + $0x18] sm:$0xf0] }
 0x22f   :  { %2953 = vmatpush.bf16.msrb.mxu0 %v8747_v1  ;;  %2966 = vmatpush.bf16.msrb.mxu1 %v8751_v13  ;;  %v8722_v1 = vld [vmem:[#allocation10 + $0x28] sm:$0xf] }
 0x230   :  { %2979 = vmatpush.bf16.msrb.mxu2 %v8755_v60  ;;  %2992 = vmatpush.bf16.msrb.mxu3 %v8759_v39  ;;  %v8723_v24 = vor.u32 %v10783_v56, %v8722_v1 }
 0x233   :  { %2954 = vmatpush.bf16.msrb.mxu0 %v8731_v14 }
 0x234   :  { %2993 = vmatpush.bf16.msrb.mxu3 %v8743_v18 }
 0x279   :  { %v2161_v7 = vpop.f32.mrf.mxu0  ;;  %v2174_v5 = vpop.f32.mrf.mxu1 }
 0x27a   :  { %v2456_v37 = vadd.f32 %v2161_v7, %v11864_v31  ;;  %v2457_v20 = vadd.f32 %v2174_v5, %v11867_v33  ;;  %v8735_v31 = vor.u32 %v10784_v62, %v8732_v58  ;;  %v10787_v33 = vld [vmem:[#allocation10 + $0x54] sm:$0xf0]  ;;  %v8715_v7 = vor.u32 %v10782_v28, %v8714_v22  ;;  %v8716_v5 = vld [vmem:[#allocation10 + $0x30] sm:$0xf0] }
 0x27b   :  { %v8739_v21 = vor.u32 %v10787_v33, %v8738_v52  ;;  %v8719_v42 = vor.u32 %v10780_v36, %v8716_v5  ;;  %v8703_v62 = vor.u32 %v10776_v16, %v8700_v46  ;;  %v10779_v58 = vld [vmem:[#allocation10 + $0x14] sm:$0xf0]  ;;  %v10777_v52 = vld [vmem:[#allocation10 + $0xc] sm:$0xf]  ;;  %v700_v22 = vadd.f32 %v11988_v61, %v11927_v2  ;;  %v10838_v16 = vld [vmem:[#allocation8 + $0xec] sm:$0xf0] }
 0x27c   :  { %v2471_v53 = vmul.f32 0.5, %v2456_v37  ;;  %v2475_v59 = vmul.f32 0.5, %v2457_v20  ;;  %2967 = vmatpush.bf16.msrb.mxu1 %v8735_v31  ;;  %v10781_v37 = vld [vmem:[#allocation10 + $0x2c] sm:$0xf]  ;;  %v8724_v20 = vld [vmem:[#allocation10 + $0x38] sm:$0xf0]  ;;  %2955 = vmatpush.bf16.msrb.mxu0 %v8715_v7  ;;  %v8707_v33 = vor.u32 %v10779_v58, %v8706_v49  ;;  %v729_v28 = vadd.f32 %v11993_v15, %v11929_v3 }
 0x27d   :  { %2980 = vmatpush.bf16.msrb.mxu2 %v8739_v21  ;;  %v8727_v60 = vor.u32 %v10781_v37, %v8724_v20  ;;  %v758_v15 = vadd.f32 %v11995_v30, %v11941_v11  ;;  %v8940_v46 = vld [vmem:[#allocation8 + $0xf0] sm:$0xf0]  ;;  %v8946_v49 = vld [vmem:[#allocation8 + $0xe8] sm:$0xf]  ;;  %v8948_v58 = vld [vmem:[#allocation8 + $0xf8] sm:$0xf0] }
 0x27e   :  { %11279 = vtanh.f32 %v2471_v53 }
 0x27f   :  { %11281 = vtanh.f32 %v2475_v59  ;;  %2994 = vmatpush.bf16.msrb.mxu3 %v8727_v60 }
 0x280   :  { %v2187_v55 = vpop.f32.mrf.mxu2  ;;  %v2200_v47 = vpop.f32.mrf.mxu3  ;;  %2968 = vmatpush.bf16.msrb.mxu1 %v8719_v42 }
 0x281   :  { %v2458_v6 = vadd.f32 %v2187_v55, %v11878_v38  ;;  %v2459_v29 = vadd.f32 %v2200_v47, %v11883_v41  ;;  %v2163_v19 = vpop.f32.mrf.mxu0  ;;  %v2176_v9 = vpop.f32.mrf.mxu1  ;;  %v10778_v41 = vld [vmem:[#allocation10 + $0xc] sm:$0xf0]  ;;  %2981 = vmatpush.bf16.msrb.mxu2 %v8723_v24  ;;  %v8711_v55 = vor.u32 %v10777_v52, %v8708_v26  ;;  %v8922_v26 = vld [vmem:[#allocation8 + $0xc0] sm:$0xf] }
 0x282   :  { %v8699_v59 = vor.u32 %v10778_v41, %v8698_v32  ;;  %v8938_v32 = vld [vmem:[#allocation8 + $0xe0] sm:$0xf] }
 0x283   :  { %11283 = vtanh.f32 %v2458_v6  ;;  %v2480_v13 = vmul.f32 0.5, %v2459_v29  ;;  %2995 = vmatpush.bf16.msrb.mxu3 %v8711_v55 }
 0x284   :  { %v11280_v38 = vpop.eup %11279  ;;  %2956 = vmatpush.bf16.msrb.mxu0 %v8699_v59  ;;  %2969 = vmatpush.bf16.msrb.mxu1 %v8703_v62  ;;  %v10837_v62 = vld [vmem:[#allocation8 + $0xec] sm:$0xf] }
 0x285   :  { %v11282_v39 = vpop.eup %11281  ;;  %v2473_v53 = vmul.f32 0.5, %v11280_v38  ;;  %11285 = vtanh.f32 %v2480_v13  ;;  %2982 = vmatpush.bf16.msrb.mxu2 %v8707_v33  ;;  %v8939_v33 = vor.u32 %v10838_v16, %v8938_v32  ;;  %v10828_v32 = vld [vmem:[#allocation8 + $0xa4] sm:$0xf]  ;;  %v8914_v16 = vld [vmem:[#allocation8 + $0xa8] sm:$0xf] }
 0x286   :  { %v2477_v14 = vmul.f32 0.5, %v11282_v39  ;;  %v10836_v39 = vld [vmem:[#allocation8 + $0xe4] sm:$0xf] }
 0x287   :  { %v2474_v31 = vadd.f32 0.5, %v2473_v53  ;;  %v8943_v55 = vor.u32 %v10836_v39, %v8940_v46  ;;  %v10829_v46 = vld [vmem:[#allocation8 + $0xac] sm:$0xf] }
 0x288   :  { %v2478_v4 = vadd.f32 0.5, %v2477_v14  ;;  %v2189_v21 = vpop.f32.mrf.mxu2  ;;  %v2202_v18 = vpop.f32.mrf.mxu3 }
 0x289   :  { %v11284_v47 = vpop.eup %11283 }
 0x28a   :  { %v2484_v36 = vmul.f32 %v2478_v4, %v12060_v23  ;;  %v2485_v6 = vmul.f32 %v11284_v47, %v2474_v31  ;;  %v2406_v29 = vpop.f32.mrf.mxu0  ;;  %v2419_v19 = vpop.f32.mrf.mxu1  ;;  %v787_v23 = vadd.f32 %v11997_v8, %v11943_v12  ;;  %v10839_v8 = vld [vmem:[#allocation8 + $0xf4] sm:$0xf0]  ;;  %v10834_v4 = vld [vmem:[#allocation8 + $0xcc] sm:$0xf0]  ;;  %v10832_v47 = vld [vmem:[#allocation8 + $0xc4] sm:$0xf] }
 0x28b   :  { %v2467_v9 = vadd.f32 %v2406_v29, %v700_v22  ;;  %v2468_v7 = vadd.f32 %v2419_v19, %v729_v28  ;;  %v11286_v5 = vpop.eup %11285  ;;  %v8924_v22 = vld [vmem:[#allocation8 + $0xd0] sm:$0xf0]  ;;  %v8930_v29 = vld [vmem:[#allocation8 + $0xc8] sm:$0xf]  ;;  %v10835_v19 = vld [vmem:[#allocation8 + $0xd4] sm:$0xf0] }
 0x28c   :  { %v12086_v1 = vadd.f32 %v2485_v6, %v2484_v36  ;;  %v2482_v61 = vmul.f32 0.5, %v11286_v5  ;;  %v8947_v36 = vor.u32 %v10839_v8, %v8946_v49  ;;  %v8951_v6 = vor.u32 %v10837_v62, %v8948_v58  ;;  %v8916_v49 = vld [vmem:[#allocation8 + $0xb8] sm:$0xf0]  ;;  %v8890_v8 = vld [vmem:[#allocation8 + $0x80] sm:$0xf] }
 0x28d   :  { %v2489_v56 = vmul.f32 0.5, %v2467_v9  ;;  %v2493_v42 = vmul.f32 0.5, %v2468_v7  ;;  %v10826_v62 = vld [vmem:[#allocation8 + $0x8c] sm:$0xf0]  ;;  %v10824_v58 = vld [vmem:[#allocation8 + $0x84] sm:$0xf] }
 0x28e   :  { %11287 = vtanh.f32 %v12086_v1  ;;  %v2483_v41 = vadd.f32 0.5, %v2482_v61 }
 0x28f   :  { %11289 = vtanh.f32 %v2489_v56  ;;  %v10833_v56 = vld [vmem:[#allocation8 + $0xcc] sm:$0xf] }
 0x290   :  { %11291 = vtanh.f32 %v2493_v42  ;;  %v8932_v42 = vld [vmem:[#allocation8 + $0xd8] sm:$0xf0] }
 0x291   :  { %v2432_v24 = vpop.f32.mrf.mxu2  ;;  %v2445_v37 = vpop.f32.mrf.mxu3 }
 0x292   :  { %v2469_v20 = vadd.f32 %v2432_v24, %v758_v15  ;;  %v2470_v13 = vadd.f32 %v2445_v37, %v787_v23  ;;  %v2408_v60 = vpop.f32.mrf.mxu0  ;;  %v2421_v38 = vpop.f32.mrf.mxu1  ;;  %v8923_v15 = vor.u32 %v10834_v4, %v8922_v26  ;;  %v8927_v37 = vor.u32 %v10832_v47, %v8924_v22  ;;  %v8892_v26 = vld [vmem:[#allocation8 + $0x90] sm:$0xf0]  ;;  %v8898_v4 = vld [vmem:[#allocation8 + $0x88] sm:$0xf] }
 0x293   :  { %v8931_v60 = vor.u32 %v10835_v19, %v8930_v29  ;;  %v8935_v38 = vor.u32 %v10833_v56, %v8932_v42  ;;  %v8891_v47 = vor.u32 %v10826_v62, %v8890_v8  ;;  %v8895_v22 = vor.u32 %v10824_v58, %v8892_v26  ;;  %v10820_v56 = vld [vmem:[#allocation8 + $0x64] sm:$0xf]  ;;  %v8868_v8 = vld [vmem:[#allocation8 + $0x58] sm:$0xf0]  ;;  %v8842_v58 = vld [vmem:[#allocation8 + $0x20] sm:$0xf] }
 0x294   :  { %v11288_v53 = vpop.eup %11287  ;;  %11293 = vtanh.f32 %v2469_v20  ;;  %v2498_v59 = vmul.f32 0.5, %v2470_v13  ;;  %v8906_v20 = vld [vmem:[#allocation8 + $0xa0] sm:$0xf]  ;;  %v10830_v13 = vld [vmem:[#allocation8 + $0xac] sm:$0xf0] }
 0x295   :  { %v11290_v30 = vpop.eup %11289  ;;  %v12093_v14 = vmul.f32 %v11288_v53, %v2483_v41  ;;  %v8908_v41 = vld [vmem:[#allocation8 + $0xb0] sm:$0xf0] }
 0x296   :  { %v11292_v52 = vpop.eup %11291  ;;  %v2491_v31 = vmul.f32 0.5, %v11290_v30  ;;  %11295 = vtanh.f32 %v2498_v59  ;;  %v10831_v59 = vld [vmem:[#allocation8 + $0xb4] sm:$0xf0]  ;;  %v8911_v30 = vor.u32 %v10828_v32, %v8908_v41  ;;  %v10818_v32 = vld [vmem:[#allocation8 + $0x4c] sm:$0xf0] }
 0x297   :  { %v2511_v21 = vpack.c.bf16 %v12093_v14, %v12093_v14  ;;  %v2495_v18 = vmul.f32 0.5, %v11292_v52  ;;  %v10816_v41 = vld [vmem:[#allocation8 + $0x44] sm:$0xf]  ;;  %v8844_v26 = vld [vmem:[#allocation8 + $0x30] sm:$0xf0] }
 0x298   :  { %v2492_v28 = vadd.f32 0.5, %v2491_v31  ;;  %v8915_v31 = vor.u32 %v10831_v59, %v8914_v16  ;;  %v8866_v59 = vld [vmem:[#allocation8 + $0x48] sm:$0xf] }
 0x299   :  { %v2496_v9 = vadd.f32 0.5, %v2495_v18  ;;  %v2434_v7 = vpop.f32.mrf.mxu2  ;;  %v2447_v5 = vpop.f32.mrf.mxu3  ;;  %2712 = vmatmul.bf16.vlgmr.msra.gmra.mxu0 %v2511_v21  ;;  %2725 = vmatmul.bf16.vlgmr.msra.gmra.mxu1 %v2511_v21  ;;  %v10825_v18 = vld [vmem:[#allocation8 + $0x8c] sm:$0xf] }
 0x29a   :  { %v11294_v61 = vpop.eup %11293  ;;  %2738 = vmatmul.bf16.vlgmr.msra.gmra.mxu2 %v2511_v21  ;;  %2751 = vmatmul.bf16.vlgmr.msra.gmra.mxu3 %v2511_v21  ;;  %v10827_v21 = vld [vmem:[#allocation8 + $0x94] sm:$0xf0]  ;;  %v8874_v7 = vld [vmem:[#allocation8 + $0x60] sm:$0xf]  ;;  %v10822_v5 = vld [vmem:[#allocation8 + $0x6c] sm:$0xf0] }
 0x29b   :  { %v2502_v23 = vmul.f32 %v2496_v9, %v12070_v57  ;;  %v2503_v24 = vmul.f32 %v11294_v61, %v2492_v28  ;;  %3256 = vmatpush.bf16.msra.mxu0 %v8939_v33  ;;  %3269 = vmatpush.bf16.msra.mxu1 %v8943_v55  ;;  %v8907_v57 = vor.u32 %v10830_v13, %v8906_v20  ;;  %v8900_v55 = vld [vmem:[#allocation8 + $0x98] sm:$0xf0]  ;;  %v8876_v61 = vld [vmem:[#allocation8 + $0x70] sm:$0xf0]  ;;  %v10821_v20 = vld [vmem:[#allocation8 + $0x6c] sm:$0xf] }
 0x29c   :  { %3282 = vmatpush.bf16.msra.mxu2 %v8947_v36  ;;  %3295 = vmatpush.bf16.msra.mxu3 %v8951_v6  ;;  %v11296_v39 = vpop.eup %11295  ;;  %v8919_v33 = vor.u32 %v10829_v46, %v8916_v49  ;;  %v8899_v36 = vor.u32 %v10827_v21, %v8898_v4  ;;  %v8903_v6 = vor.u32 %v10825_v18, %v8900_v55  ;;  %v8884_v13 = vld [vmem:[#allocation8 + $0x78] sm:$0xf0]  ;;  %v10819_v46 = vld [vmem:[#allocation8 + $0x54] sm:$0xf0]  ;;  %v8850_v4 = vld [vmem:[#allocation8 + $0x28] sm:$0xf] }
 0x29d   :  { %v12098_v53 = vadd.f32 %v2503_v24, %v2502_v23  ;;  %v2500_v52 = vmul.f32 0.5, %v11296_v39  ;;  %v8875_v42 = vor.u32 %v10822_v5, %v8874_v7  ;;  %v10823_v23 = vld [vmem:[#allocation8 + $0x74] sm:$0xf0]  ;;  %v8879_v24 = vor.u32 %v10820_v56, %v8876_v61  ;;  %v8860_v39 = vld [vmem:[#allocation8 + $0x50] sm:$0xf0] }
 0x29e   :  { %v8863_v49 = vor.u32 %v10816_v41, %v8860_v39  ;;  %v10815_v21 = vld [vmem:[#allocation8 + $0x34] sm:$0xf0]  ;;  %v8828_v7 = vld [vmem:[#allocation8 + $0x10] sm:$0xf0]  ;;  %v8834_v5 = vld [vmem:[#allocation8 + $0x8] sm:$0xf] }
 0x29f   :  { %11297 = vtanh.f32 %v12098_v53  ;;  %3257 = vmatpush.bf16.msra.mxu0 %v8923_v15  ;;  %3270 = vmatpush.bf16.msra.mxu1 %v8927_v37  ;;  %v2501_v28 = vadd.f32 0.5, %v2500_v52  ;;  %v8882_v15 = vld [vmem:[#allocation8 + $0x68] sm:$0xf]  ;;  %v10814_v52 = vld [vmem:[#allocation8 + $0x2c] sm:$0xf0]  ;;  %v8851_v55 = vor.u32 %v10815_v21, %v8850_v4 }
 0x2a0   :  { %3283 = vmatpush.bf16.msra.mxu2 %v8931_v60  ;;  %3296 = vmatpush.bf16.msra.mxu3 %v8935_v38  ;;  %v8883_v37 = vor.u32 %v10823_v23, %v8882_v15  ;;  %v8887_v60 = vor.u32 %v10821_v20, %v8884_v13  ;;  %v8858_v38 = vld [vmem:[#allocation8 + $0x40] sm:$0xf]  ;;  %v10811_v56 = vld [vmem:[#allocation8 + $0x14] sm:$0xf0]  ;;  %v10809_v15 = vld [vmem:[#allocation8 + $0xc] sm:$0xf] }
 0x2a1   :  { %v8859_v16 = vor.u32 %v10818_v32, %v8858_v38  ;;  %v8835_v61 = vor.u32 %v10811_v56, %v8834_v5  ;;  %v8836_v23 = vld [vmem:[#allocation8 + $0x18] sm:$0xf0]  ;;  %v10870_v20 = vld [vmem:[#allocation10 + $0xec] sm:$0xf0]  ;;  %v10868_v13 = vld [vmem:[#allocation10 + $0xe4] sm:$0xf] }
 0x2a2   :  { %v9074_v41 = vld [vmem:[#allocation10 + $0xe8] sm:$0xf]  ;;  %v10869_v39 = vld [vmem:[#allocation10 + $0xec] sm:$0xf]  ;;  %v9060_v4 = vld [vmem:[#allocation10 + $0xd8] sm:$0xf0] }
 0x2a3   :  { %3258 = vmatpush.bf16.msra.mxu0 %v8907_v57  ;;  %3271 = vmatpush.bf16.msra.mxu1 %v8911_v30  ;;  %v8867_v57 = vor.u32 %v10819_v46, %v8866_v59  ;;  %v10817_v30 = vld [vmem:[#allocation8 + $0x4c] sm:$0xf]  ;;  %v9076_v46 = vld [vmem:[#allocation10 + $0xf8] sm:$0xf0] }
 0x2a4   :  { %3284 = vmatpush.bf16.msra.mxu2 %v8915_v31  ;;  %3297 = vmatpush.bf16.msra.mxu3 %v8919_v33  ;;  %v8871_v62 = vor.u32 %v10817_v30, %v8868_v8  ;;  %v10812_v31 = vld [vmem:[#allocation8 + $0x24] sm:$0xf]  ;;  %v8843_v33 = vor.u32 %v10814_v52, %v8842_v58  ;;  %v9079_v30 = vor.u32 %v10869_v39, %v9076_v46  ;;  %v9052_v58 = vld [vmem:[#allocation10 + $0xd0] sm:$0xf0]  ;;  %v9058_v52 = vld [vmem:[#allocation10 + $0xc8] sm:$0xf] }
 0x2a5   :  { %v11298_v29 = vpop.eup %11297  ;;  %v8847_v18 = vor.u32 %v10812_v31, %v8844_v26  ;;  %v10865_v26 = vld [vmem:[#allocation10 + $0xcc] sm:$0xf]  ;;  %v9044_v56 = vld [vmem:[#allocation10 + $0xb8] sm:$0xf0]  ;;  %v579_v39 = vadd.f32 %v11880_v40, %v11855_v25  ;;  %v9002_v46 = vld [vmem:[#allocation10 + $0x60] sm:$0xf] }
 0x2a6   :  { %v12101_v19 = vmul.f32 %v11298_v29, %v2501_v28  ;;  %v10808_v29 = vld [vmem:[#allocation8 + $0x4] sm:$0xf]  ;;  %v10861_v5 = vld [vmem:[#allocation10 + $0xac] sm:$0xf] }
 0x2a7   :  { %3259 = vmatpush.bf16.msra.mxu0 %v8891_v47  ;;  %3272 = vmatpush.bf16.msra.mxu1 %v8895_v22  ;;  %v10813_v47 = vld [vmem:[#allocation8 + $0x2c] sm:$0xf]  ;;  %v8852_v22 = vld [vmem:[#allocation8 + $0x38] sm:$0xf0] }
 0x2a8   :  { %v2756_v9 = vpack.c.bf16 %v12101_v19, %v12101_v19  ;;  %3285 = vmatpush.bf16.msra.mxu2 %v8899_v36  ;;  %3298 = vmatpush.bf16.msra.mxu3 %v8903_v6  ;;  %v8855_v28 = vor.u32 %v10813_v47, %v8852_v22  ;;  %v8826_v36 = vld [vmem:[#allocation8] sm:$0xf]  ;;  %v10810_v6 = vld [vmem:[#allocation8 + $0xc] sm:$0xf0]  ;;  %v10860_v22 = vld [vmem:[#allocation10 + $0xa4] sm:$0xf] }
 0x2a9   :  { %v10862_v47 = vld [vmem:[#allocation10 + $0xac] sm:$0xf0]  ;;  %v10853_v40 = vld [vmem:[#allocation10 + $0x6c] sm:$0xf] }
 0x2aa   :  { %2957 = vmatmul.bf16.vlgmr.msrb.gmra.mxu0 %v2756_v9  ;;  %2970 = vmatmul.bf16.vlgmr.msrb.gmra.mxu1 %v2756_v9 }
 0x2ab   :  { %2983 = vmatmul.bf16.vlgmr.msrb.gmra.mxu2 %v2756_v9  ;;  %2996 = vmatmul.bf16.vlgmr.msrb.gmra.mxu3 %v2756_v9  ;;  %v8827_v9 = vor.u32 %v10810_v6, %v8826_v36  ;;  %v9036_v36 = vld [vmem:[#allocation10 + $0xb0] sm:$0xf0]  ;;  %v9042_v6 = vld [vmem:[#allocation10 + $0xa8] sm:$0xf] }
 0x2ac   :  { %3260 = vmatpush.bf16.msra.mxu0 %v8875_v42  ;;  %3273 = vmatpush.bf16.msra.mxu1 %v8879_v24  ;;  %v8831_v42 = vor.u32 %v10808_v29, %v8828_v7  ;;  %v9066_v24 = vld [vmem:[#allocation10 + $0xe0] sm:$0xf]  ;;  %v10863_v29 = vld [vmem:[#allocation10 + $0xb4] sm:$0xf0] }
 0x2ad   :  { %3286 = vmatpush.bf16.msra.mxu2 %v8883_v37  ;;  %3299 = vmatpush.bf16.msra.mxu3 %v8887_v60  ;;  %v8839_v37 = vor.u32 %v10809_v15, %v8836_v23  ;;  %v9068_v60 = vld [vmem:[#allocation10 + $0xf0] sm:$0xf0]  ;;  %v9067_v38 = vor.u32 %v10870_v20, %v9066_v24  ;;  %v9043_v7 = vor.u32 %v10863_v29, %v9042_v6  ;;  %v10858_v15 = vld [vmem:[#allocation10 + $0x8c] sm:$0xf0]  ;;  %v10856_v23 = vld [vmem:[#allocation10 + $0x84] sm:$0xf] }
 0x2ae   :  { %v9071_v32 = vor.u32 %v10868_v13, %v9068_v60  ;;  %v9026_v20 = vld [vmem:[#allocation10 + $0x88] sm:$0xf]  ;;  %v10859_v13 = vld [vmem:[#allocation10 + $0x94] sm:$0xf0]  ;;  %v10848_v6 = vld [vmem:[#allocation10 + $0x44] sm:$0xf] }
 0x2af   :  { %v8988_v29 = vld [vmem:[#allocation10 + $0x50] sm:$0xf0] }
 0x2b0   :  { %3261 = vmatpush.bf16.msra.mxu0 %v8859_v16  ;;  %3274 = vmatpush.bf16.msra.mxu1 %v8863_v49  ;;  %v10871_v16 = vld [vmem:[#allocation10 + $0xf4] sm:$0xf0]  ;;  %v9050_v49 = vld [vmem:[#allocation10 + $0xc0] sm:$0xf] }
 0x2b1   :  { %3287 = vmatpush.bf16.msra.mxu2 %v8867_v57  ;;  %3300 = vmatpush.bf16.msra.mxu3 %v8871_v62  ;;  %v9075_v59 = vor.u32 %v10871_v16, %v9074_v41  ;;  %v10866_v57 = vld [vmem:[#allocation10 + $0xcc] sm:$0xf0]  ;;  %v10864_v62 = vld [vmem:[#allocation10 + $0xc4] sm:$0xf]  ;;  %v9028_v41 = vld [vmem:[#allocation10 + $0x98] sm:$0xf0] }
 0x2b2   :  { %v9051_v8 = vor.u32 %v10866_v57, %v9050_v49  ;;  %v9055_v31 = vor.u32 %v10864_v62, %v9052_v58  ;;  %v10854_v49 = vld [vmem:[#allocation10 + $0x6c] sm:$0xf0]  ;;  %v10852_v57 = vld [vmem:[#allocation10 + $0x64] sm:$0xf]  ;;  %v9004_v58 = vld [vmem:[#allocation10 + $0x70] sm:$0xf0] }
 0x2b3   :  { %v9003_v62 = vor.u32 %v10854_v49, %v9002_v46  ;;  %v8978_v46 = vld [vmem:[#allocation10 + $0x28] sm:$0xf]  ;;  %v10847_v49 = vld [vmem:[#allocation10 + $0x34] sm:$0xf0] }
 0x2b4   :  { %3262 = vmatpush.bf16.msra.mxu0 %v8843_v33  ;;  %3275 = vmatpush.bf16.msra.mxu1 %v8847_v18  ;;  %v10867_v33 = vld [vmem:[#allocation10 + $0xd4] sm:$0xf0]  ;;  %v9063_v18 = vor.u32 %v10865_v26, %v9060_v4  ;;  %v9007_v4 = vor.u32 %v10852_v57, %v9004_v58  ;;  %v8979_v57 = vor.u32 %v10847_v49, %v8978_v46  ;;  %v10902_v49 = vld [vmem:[#allocation8 + $0xec] sm:$0xf0] }
 0x2b5   :  { %3288 = vmatpush.bf16.msra.mxu2 %v8851_v55  ;;  %3301 = vmatpush.bf16.msra.mxu3 %v8855_v28  ;;  %v9059_v21 = vor.u32 %v10867_v33, %v9058_v52  ;;  %v9034_v55 = vld [vmem:[#allocation10 + $0xa0] sm:$0xf]  ;;  %v9010_v52 = vld [vmem:[#allocation10 + $0x68] sm:$0xf] }
 0x2b6   :  { %v9035_v28 = vor.u32 %v10862_v47, %v9034_v55 }
 0x2b8   :  { %3263 = vmatpush.bf16.msra.mxu0 %v8827_v9  ;;  %3276 = vmatpush.bf16.msra.mxu1 %v8831_v42  ;;  %v9039_v9 = vor.u32 %v10860_v22, %v9036_v36  ;;  %v9047_v42 = vor.u32 %v10861_v5, %v9044_v56  ;;  %v8986_v22 = vld [vmem:[#allocation10 + $0x40] sm:$0xf]  ;;  %v8991_v5 = vor.u32 %v10848_v6, %v8988_v29  ;;  %v10851_v56 = vld [vmem:[#allocation10 + $0x54] sm:$0xf0]  ;;  %v8964_v29 = vld [vmem:[#allocation10 + $0x18] sm:$0xf0] }
 0x2b9   :  { %3289 = vmatpush.bf16.msra.mxu2 %v8835_v61  ;;  %3302 = vmatpush.bf16.msra.mxu3 %v8839_v37  ;;  %v9018_v61 = vld [vmem:[#allocation10 + $0x80] sm:$0xf]  ;;  %v9020_v37 = vld [vmem:[#allocation10 + $0x90] sm:$0xf0] }
 0x2ba   :  { %v9019_v24 = vor.u32 %v10858_v15, %v9018_v61  ;;  %v9023_v60 = vor.u32 %v10856_v23, %v9020_v37  ;;  %v8996_v61 = vld [vmem:[#allocation10 + $0x58] sm:$0xf0]  ;;  %v666_v15 = vadd.f32 %v11889_v45, %v11875_v35 }
 0x2bc   :  { %3501 = vmatpush.bf16.msrb.mxu0 %v9067_v38  ;;  %3514 = vmatpush.bf16.msrb.mxu1 %v9071_v32  ;;  %v9027_v38 = vor.u32 %v10859_v13, %v9026_v20  ;;  %v10857_v32 = vld [vmem:[#allocation10 + $0x8c] sm:$0xf]  ;;  %v8970_v13 = vld [vmem:[#allocation10 + $0x20] sm:$0xf] }
 0x2bd   :  { %3527 = vmatpush.bf16.msrb.mxu2 %v9075_v59  ;;  %3540 = vmatpush.bf16.msrb.mxu3 %v9079_v30  ;;  %v9031_v16 = vor.u32 %v10857_v32, %v9028_v41  ;;  %v608_v59 = vadd.f32 %v11885_v43, %v11859_v27 }
 0x2c0   :  { %3502 = vmatpush.bf16.msrb.mxu0 %v9051_v8  ;;  %3515 = vmatpush.bf16.msrb.mxu1 %v9055_v31  ;;  %v10855_v31 = vld [vmem:[#allocation10 + $0x74] sm:$0xf0] }
 0x2c1   :  { %3528 = vmatpush.bf16.msrb.mxu2 %v9059_v21  ;;  %3541 = vmatpush.bf16.msrb.mxu3 %v9063_v18  ;;  %v9011_v21 = vor.u32 %v10855_v31, %v9010_v52  ;;  %v9012_v18 = vld [vmem:[#allocation10 + $0x78] sm:$0xf0]  ;;  %v8954_v31 = vld [vmem:[#allocation10] sm:$0xf] }
 0x2c2   :  { %v9015_v43 = vor.u32 %v10853_v40, %v9012_v18  ;;  %v8956_v18 = vld [vmem:[#allocation10 + $0x10] sm:$0xf0] }
 0x2c4   :  { %3503 = vmatpush.bf16.msrb.mxu0 %v9035_v28  ;;  %3516 = vmatpush.bf16.msrb.mxu1 %v9039_v9  ;;  %v10850_v28 = vld [vmem:[#allocation10 + $0x4c] sm:$0xf0]  ;;  %v8994_v9 = vld [vmem:[#allocation10 + $0x48] sm:$0xf] }
 0x2c5   :  { %3529 = vmatpush.bf16.msrb.mxu2 %v9043_v7  ;;  %3542 = vmatpush.bf16.msrb.mxu3 %v9047_v42  ;;  %v8987_v36 = vor.u32 %v10850_v28, %v8986_v22  ;;  %v637_v7 = vadd.f32 %v11887_v44, %v11873_v34  ;;  %v10849_v42 = vld [vmem:[#allocation10 + $0x4c] sm:$0xf]  ;;  %v8995_v23 = vor.u32 %v10851_v56, %v8994_v9  ;;  %v10843_v22 = vld [vmem:[#allocation10 + $0x14] sm:$0xf0] }
 0x2c6   :  { %v10841_v28 = vld [vmem:[#allocation10 + $0xc] sm:$0xf] }
 0x2c7   :  { %v8967_v56 = vor.u32 %v10841_v28, %v8964_v29  ;;  %v9186_v29 = vld [vmem:[#allocation8 + $0xc8] sm:$0xf] }
 0x2c8   :  { %3504 = vmatpush.bf16.msrb.mxu0 %v9019_v24  ;;  %3517 = vmatpush.bf16.msrb.mxu1 %v9023_v60  ;;  %v8999_v24 = vor.u32 %v10849_v42, %v8996_v61  ;;  %v10846_v60 = vld [vmem:[#allocation10 + $0x2c] sm:$0xf0] }
 0x2c9   :  { %3530 = vmatpush.bf16.msrb.mxu2 %v9027_v38  ;;  %3543 = vmatpush.bf16.msrb.mxu3 %v9031_v16  ;;  %v10844_v38 = vld [vmem:[#allocation10 + $0x24] sm:$0xf] }
 0x2cc   :  { %3505 = vmatpush.bf16.msrb.mxu0 %v9003_v62  ;;  %3518 = vmatpush.bf16.msrb.mxu1 %v9007_v4 }
 0x2cd   :  { %3531 = vmatpush.bf16.msrb.mxu2 %v9011_v21  ;;  %3544 = vmatpush.bf16.msrb.mxu3 %v9015_v43  ;;  %v8962_v43 = vld [vmem:[#allocation10 + $0x8] sm:$0xf] }
 0x2ce   :  { %v8963_v6 = vor.u32 %v10843_v22, %v8962_v43  ;;  %v9180_v22 = vld [vmem:[#allocation8 + $0xd0] sm:$0xf0] }
 0x2d0   :  { %3506 = vmatpush.bf16.msrb.mxu0 %v8987_v36  ;;  %3519 = vmatpush.bf16.msrb.mxu1 %v8991_v5 }
 0x2d1   :  { %3532 = vmatpush.bf16.msrb.mxu2 %v8995_v23  ;;  %3545 = vmatpush.bf16.msrb.mxu3 %v8999_v24 }
 0x2d5   :  { %3533 = vmatpush.bf16.msrb.mxu2 %v8979_v57 }
 0x2d9   :  { %3534 = vmatpush.bf16.msrb.mxu2 %v8963_v6 }
 0x316   :  { %v2713_v30 = vpop.f32.mrf.mxu0  ;;  %v2726_v8 = vpop.f32.mrf.mxu1 }
 0x317   :  { %v3008_v33 = vadd.f32 %v2713_v30, %v579_v39  ;;  %v3009_v26 = vadd.f32 %v2726_v8, %v608_v59  ;;  %v8971_v39 = vor.u32 %v10846_v60, %v8970_v13  ;;  %v8972_v59 = vld [vmem:[#allocation10 + $0x30] sm:$0xf0]  ;;  %v10845_v30 = vld [vmem:[#allocation10 + $0x2c] sm:$0xf]  ;;  %v8980_v8 = vld [vmem:[#allocation10 + $0x38] sm:$0xf0] }
 0x318   :  { %v8975_v45 = vor.u32 %v10844_v38, %v8972_v59  ;;  %v8983_v58 = vor.u32 %v10845_v30, %v8980_v8  ;;  %v9196_v8 = vld [vmem:[#allocation8 + $0xf0] sm:$0xf0] }
 0x319   :  { %v3023_v55 = vmul.f32 0.5, %v3008_v33  ;;  %v3027_v47 = vmul.f32 0.5, %v3009_v26  ;;  %v10842_v33 = vld [vmem:[#allocation10 + $0xc] sm:$0xf0]  ;;  %v10840_v26 = vld [vmem:[#allocation10 + $0x4] sm:$0xf]  ;;  %3507 = vmatpush.bf16.msrb.mxu0 %v8971_v39 }
 0x31a   :  { %3520 = vmatpush.bf16.msrb.mxu1 %v8975_v45  ;;  %v8955_v40 = vor.u32 %v10842_v33, %v8954_v31  ;;  %3546 = vmatpush.bf16.msrb.mxu3 %v8983_v58  ;;  %v10900_v45 = vld [vmem:[#allocation8 + $0xe4] sm:$0xf]  ;;  %v10903_v31 = vld [vmem:[#allocation8 + $0xf4] sm:$0xf0]  ;;  %v10901_v33 = vld [vmem:[#allocation8 + $0xec] sm:$0xf] }
 0x31b   :  { %11299 = vtanh.f32 %v3023_v55 }
 0x31c   :  { %11301 = vtanh.f32 %v3027_v47  ;;  %v8959_v47 = vor.u32 %v10840_v26, %v8956_v18  ;;  %v9204_v26 = vld [vmem:[#allocation8 + $0xf8] sm:$0xf0] }
 0x31d   :  { %v2739_v37 = vpop.f32.mrf.mxu2  ;;  %v2752_v20 = vpop.f32.mrf.mxu3  ;;  %3508 = vmatpush.bf16.msrb.mxu0 %v8955_v40  ;;  %v10898_v40 = vld [vmem:[#allocation8 + $0xcc] sm:$0xf0]  ;;  %v9207_v6 = vor.u32 %v10901_v33, %v9204_v26  ;;  %v9154_v33 = vld [vmem:[#allocation8 + $0x88] sm:$0xf]  ;;  %v10891_v26 = vld [vmem:[#allocation8 + $0x94] sm:$0xf0] }
 0x31e   :  { %v3010_v32 = vadd.f32 %v2739_v37, %v637_v7  ;;  %v3011_v44 = vadd.f32 %v2752_v20, %v666_v15  ;;  %v2715_v41 = vpop.f32.mrf.mxu0  ;;  %v2728_v16 = vpop.f32.mrf.mxu1  ;;  %3521 = vmatpush.bf16.msrb.mxu1 %v8959_v47  ;;  %3547 = vmatpush.bf16.msrb.mxu3 %v8967_v56  ;;  %v10896_v47 = vld [vmem:[#allocation8 + $0xc4] sm:$0xf] }
 0x320   :  { %11303 = vtanh.f32 %v3010_v32  ;;  %v3032_v62 = vmul.f32 0.5, %v3011_v44 }
 0x321   :  { %v11300_v52 = vpop.eup %11299 }
 0x322   :  { %v11302_v4 = vpop.eup %11301  ;;  %v3025_v21 = vmul.f32 0.5, %v11300_v52  ;;  %11305 = vtanh.f32 %v3032_v62  ;;  %v9202_v62 = vld [vmem:[#allocation8 + $0xe8] sm:$0xf] }
 0x323   :  { %v3029_v55 = vmul.f32 0.5, %v11302_v4 }
 0x324   :  { %v3026_v36 = vadd.f32 0.5, %v3025_v21  ;;  %v9178_v21 = vld [vmem:[#allocation8 + $0xc0] sm:$0xf] }
 0x325   :  { %v3030_v9 = vadd.f32 0.5, %v3029_v55  ;;  %v2741_v7 = vpop.f32.mrf.mxu2  ;;  %v2754_v5 = vpop.f32.mrf.mxu3  ;;  %v9199_v55 = vor.u32 %v10900_v45, %v9196_v8  ;;  %v9146_v45 = vld [vmem:[#allocation8 + $0x80] sm:$0xf] }
 0x326   :  { %v11304_v42 = vpop.eup %11303 }
 0x327   :  { %v3036_v61 = vmul.f32 %v3030_v9, %v12086_v1  ;;  %v3037_v15 = vmul.f32 %v11304_v42, %v3026_v36  ;;  %v2958_v23 = vpop.f32.mrf.mxu0  ;;  %v2971_v24 = vpop.f32.mrf.mxu1  ;;  %v9203_v36 = vor.u32 %v10903_v31, %v9202_v62  ;;  %v10899_v9 = vld [vmem:[#allocation8 + $0xd4] sm:$0xf0]  ;;  %v10897_v42 = vld [vmem:[#allocation8 + $0xcc] sm:$0xf]  ;;  %v9148_v31 = vld [vmem:[#allocation8 + $0x90] sm:$0xf0] }
 0x328   :  { %v3019_v37 = vadd.f32 %v2958_v23, %v11980_v63  ;;  %v3020_v20 = vadd.f32 %v2971_v24, %v11983_v48  ;;  %v11306_v13 = vpop.eup %11305  ;;  %v9194_v48 = vld [vmem:[#allocation8 + $0xe0] sm:$0xf]  ;;  %v9179_v23 = vor.u32 %v10898_v40, %v9178_v21 }
 0x329   :  { %v12116_v60 = vadd.f32 %v3037_v15, %v3036_v61  ;;  %v3034_v44 = vmul.f32 0.5, %v11306_v13  ;;  %v9188_v61 = vld [vmem:[#allocation8 + $0xd8] sm:$0xf0]  ;;  %v9162_v13 = vld [vmem:[#allocation8 + $0xa0] sm:$0xf] }
 0x32a   :  { %v3041_v38 = vmul.f32 0.5, %v3019_v37  ;;  %v3045_v32 = vmul.f32 0.5, %v3020_v20  ;;  %v9183_v20 = vor.u32 %v10896_v47, %v9180_v22 }
 0x32b   :  { %11307 = vtanh.f32 %v12116_v60  ;;  %v3035_v46 = vadd.f32 0.5, %v3034_v44  ;;  %v9191_v44 = vor.u32 %v10897_v42, %v9188_v61  ;;  %v10885_v61 = vld [vmem:[#allocation8 + $0x6c] sm:$0xf] }
 0x32c   :  { %11309 = vtanh.f32 %v3041_v38  ;;  %v10894_v38 = vld [vmem:[#allocation8 + $0xac] sm:$0xf0] }
 0x32d   :  { %11311 = vtanh.f32 %v3045_v32  ;;  %v9187_v32 = vor.u32 %v10899_v9, %v9186_v29  ;;  %v9132_v9 = vld [vmem:[#allocation8 + $0x70] sm:$0xf0] }
 0x32e   :  { %v2984_v1 = vpop.f32.mrf.mxu2  ;;  %v2997_v41 = vpop.f32.mrf.mxu3 }
 0x32f   :  { %v3021_v16 = vadd.f32 %v2984_v1, %v11986_v10  ;;  %v3022_v39 = vadd.f32 %v2997_v41, %v11991_v17  ;;  %v2960_v63 = vpop.f32.mrf.mxu0  ;;  %v2973_v59 = vpop.f32.mrf.mxu1  ;;  %v9195_v17 = vor.u32 %v10902_v49, %v9194_v48  ;;  %v10892_v1 = vld [vmem:[#allocation8 + $0xa4] sm:$0xf]  ;;  %v9164_v41 = vld [vmem:[#allocation8 + $0xb0] sm:$0xf0]  ;;  %v10893_v48 = vld [vmem:[#allocation8 + $0xac] sm:$0xf] }
 0x330   :  { %v10895_v59 = vld [vmem:[#allocation8 + $0xb4] sm:$0xf0]  ;;  %v9167_v49 = vor.u32 %v10892_v1, %v9164_v41 }
 0x331   :  { %v11308_v57 = vpop.eup %11307  ;;  %11313 = vtanh.f32 %v3021_v16  ;;  %v3050_v30 = vmul.f32 0.5, %v3022_v39  ;;  %v9170_v16 = vld [vmem:[#allocation8 + $0xa8] sm:$0xf] }
 0x332   :  { %v11310_v58 = vpop.eup %11309  ;;  %v12121_v52 = vmul.f32 %v11308_v57, %v3035_v46  ;;  %v9172_v46 = vld [vmem:[#allocation8 + $0xb8] sm:$0xf0]  ;;  %v10890_v57 = vld [vmem:[#allocation8 + $0x8c] sm:$0xf0]  ;;  %v9171_v62 = vor.u32 %v10895_v59, %v9170_v16  ;;  %v10881_v16 = vld [vmem:[#allocation8 + $0x4c] sm:$0xf] }
 0x333   :  { %v11312_v10 = vpop.eup %11311  ;;  %v3043_v4 = vmul.f32 0.5, %v11310_v58  ;;  %11315 = vtanh.f32 %v3050_v30  ;;  %v10888_v30 = vld [vmem:[#allocation8 + $0x84] sm:$0xf]  ;;  %v9175_v58 = vor.u32 %v10893_v48, %v9172_v46  ;;  %v9098_v48 = vld [vmem:[#allocation8 + $0x20] sm:$0xf] }
 0x334   :  { %v3063_v18 = vpack.c.bf16 %v12121_v52, %v12121_v52  ;;  %v3047_v43 = vmul.f32 0.5, %v11312_v10  ;;  %v10889_v10 = vld [vmem:[#allocation8 + $0x8c] sm:$0xf]  ;;  %v9151_v21 = vor.u32 %v10888_v30, %v9148_v31  ;;  %v10878_v46 = vld [vmem:[#allocation8 + $0x2c] sm:$0xf0] }
 0x335   :  { %v3044_v28 = vadd.f32 0.5, %v3043_v4  ;;  %v9156_v4 = vld [vmem:[#allocation8 + $0x98] sm:$0xf0]  ;;  %v10879_v30 = vld [vmem:[#allocation8 + $0x34] sm:$0xf0] }
 0x336   :  { %v3048_v7 = vadd.f32 0.5, %v3047_v43  ;;  %v2986_v5 = vpop.f32.mrf.mxu2  ;;  %v2999_v56 = vpop.f32.mrf.mxu3  ;;  %3264 = vmatmul.bf16.vlgmr.msra.gmra.mxu0 %v3063_v18  ;;  %3277 = vmatmul.bf16.vlgmr.msra.gmra.mxu1 %v3063_v18  ;;  %v9159_v43 = vor.u32 %v10889_v10, %v9156_v4  ;;  %v9108_v31 = vld [vmem:[#allocation8 + $0x38] sm:$0xf0]  ;;  %v10874_v10 = vld [vmem:[#allocation8 + $0xc] sm:$0xf0] }
 0x337   :  { %v11314_v15 = vpop.eup %11313  ;;  %3290 = vmatmul.bf16.vlgmr.msra.gmra.mxu2 %v3063_v18  ;;  %3303 = vmatmul.bf16.vlgmr.msra.gmra.mxu3 %v3063_v18  ;;  %v9155_v18 = vor.u32 %v10891_v26, %v9154_v33  ;;  %v10887_v5 = vld [vmem:[#allocation8 + $0x74] sm:$0xf0]  ;;  %v9082_v26 = vld [vmem:[#allocation8] sm:$0xf]  ;;  %v10872_v4 = vld [vmem:[#allocation8 + $0x4] sm:$0xf] }
 0x338   :  { %v3054_v24 = vmul.f32 %v3048_v7, %v12098_v53  ;;  %v3055_v37 = vmul.f32 %v11314_v15, %v3044_v28  ;;  %3802 = vmatpush.bf16.msra.mxu0 %v9195_v17  ;;  %3815 = vmatpush.bf16.msra.mxu1 %v9199_v55  ;;  %v9163_v53 = vor.u32 %v10894_v38, %v9162_v13  ;;  %v9130_v28 = vld [vmem:[#allocation8 + $0x60] sm:$0xf]  ;;  %v9138_v7 = vld [vmem:[#allocation8 + $0x68] sm:$0xf]  ;;  %v9140_v15 = vld [vmem:[#allocation8 + $0x78] sm:$0xf0] }
 0x339   :  { %3828 = vmatpush.bf16.msra.mxu2 %v9203_v36  ;;  %3841 = vmatpush.bf16.msra.mxu3 %v9207_v6  ;;  %v11316_v39 = vpop.eup %11315  ;;  %v9147_v17 = vor.u32 %v10890_v57, %v9146_v45  ;;  %v10886_v36 = vld [vmem:[#allocation8 + $0x6c] sm:$0xf0]  ;;  %v10884_v6 = vld [vmem:[#allocation8 + $0x64] sm:$0xf]  ;;  %v9139_v42 = vor.u32 %v10887_v5, %v9138_v7  ;;  %v9116_v38 = vld [vmem:[#allocation8 + $0x50] sm:$0xf0] }
 0x33a   :  { %v12126_v63 = vadd.f32 %v3055_v37, %v3054_v24  ;;  %v3052_v8 = vmul.f32 0.5, %v11316_v39  ;;  %v9131_v29 = vor.u32 %v10886_v36, %v9130_v28  ;;  %v9135_v56 = vor.u32 %v10884_v6, %v9132_v9  ;;  %v9114_v24 = vld [vmem:[#allocation8 + $0x40] sm:$0xf]  ;;  %v10882_v37 = vld [vmem:[#allocation8 + $0x4c] sm:$0xf0] }
 0x33b   :  { %v9115_v13 = vor.u32 %v10882_v37, %v9114_v24  ;;  %v9124_v39 = vld [vmem:[#allocation8 + $0x58] sm:$0xf0]  ;;  %v9100_v45 = vld [vmem:[#allocation8 + $0x30] sm:$0xf0]  ;;  %v9106_v57 = vld [vmem:[#allocation8 + $0x28] sm:$0xf] }
 0x33c   :  { %11317 = vtanh.f32 %v12126_v63  ;;  %3803 = vmatpush.bf16.msra.mxu0 %v9179_v23  ;;  %3816 = vmatpush.bf16.msra.mxu1 %v9183_v20  ;;  %v3053_v40 = vadd.f32 0.5, %v3052_v8  ;;  %v9143_v23 = vor.u32 %v10885_v61, %v9140_v15  ;;  %v10880_v20 = vld [vmem:[#allocation8 + $0x44] sm:$0xf]  ;;  %v9127_v59 = vor.u32 %v10881_v16, %v9124_v39  ;;  %v9092_v28 = vld [vmem:[#allocation8 + $0x18] sm:$0xf0] }
 0x33d   :  { %3829 = vmatpush.bf16.msra.mxu2 %v9187_v32  ;;  %3842 = vmatpush.bf16.msra.mxu3 %v9191_v44  ;;  %v9122_v32 = vld [vmem:[#allocation8 + $0x48] sm:$0xf]  ;;  %v10883_v44 = vld [vmem:[#allocation8 + $0x54] sm:$0xf0]  ;;  %v9119_v1 = vor.u32 %v10880_v20, %v9116_v38  ;;  %v9322_v36 = vld [vmem:[#allocation10 + $0xe0] sm:$0xf] }
 0x33e   :  { %v9123_v41 = vor.u32 %v10883_v44, %v9122_v32  ;;  %v10932_v9 = vld [vmem:[#allocation10 + $0xe4] sm:$0xf]  ;;  %v9324_v7 = vld [vmem:[#allocation10 + $0xf0] sm:$0xf0]  ;;  %v10935_v61 = vld [vmem:[#allocation10 + $0xf4] sm:$0xf0] }
 0x33f   :  { %v10933_v15 = vld [vmem:[#allocation10 + $0xec] sm:$0xf]  ;;  %v9332_v24 = vld [vmem:[#allocation10 + $0xf8] sm:$0xf0]  ;;  %v9306_v37 = vld [vmem:[#allocation10 + $0xc0] sm:$0xf] }
 0x340   :  { %3804 = vmatpush.bf16.msra.mxu0 %v9163_v53  ;;  %3817 = vmatpush.bf16.msra.mxu1 %v9167_v49  ;;  %v10876_v53 = vld [vmem:[#allocation8 + $0x24] sm:$0xf]  ;;  %v9099_v49 = vor.u32 %v10878_v46, %v9098_v48  ;;  %v10930_v20 = vld [vmem:[#allocation10 + $0xcc] sm:$0xf0]  ;;  %v9308_v44 = vld [vmem:[#allocation10 + $0xd0] sm:$0xf0] }
 0x341   :  { %3830 = vmatpush.bf16.msra.mxu2 %v9171_v62  ;;  %3843 = vmatpush.bf16.msra.mxu3 %v9175_v58  ;;  %v9103_v8 = vor.u32 %v10876_v53, %v9100_v45  ;;  %v9107_v62 = vor.u32 %v10879_v30, %v9106_v57  ;;  %v10877_v58 = vld [vmem:[#allocation8 + $0x2c] sm:$0xf]  ;;  %v9307_v38 = vor.u32 %v10930_v20, %v9306_v37  ;;  %v10928_v32 = vld [vmem:[#allocation10 + $0xc4] sm:$0xf]  ;;  %v10931_v16 = vld [vmem:[#allocation10 + $0xd4] sm:$0xf0] }
 0x342   :  { %v11318_v55 = vpop.eup %11317  ;;  %v9111_v33 = vor.u32 %v10877_v58, %v9108_v31  ;;  %v10929_v39 = vld [vmem:[#allocation10 + $0xcc] sm:$0xf]  ;;  %v9290_v53 = vld [vmem:[#allocation10 + $0xa0] sm:$0xf]  ;;  %v10924_v45 = vld [vmem:[#allocation10 + $0xa4] sm:$0xf] }
 0x343   :  { %v12129_v47 = vmul.f32 %v11318_v55, %v3053_v40  ;;  %v9090_v40 = vld [vmem:[#allocation8 + $0x8] sm:$0xf]  ;;  %v9292_v30 = vld [vmem:[#allocation10 + $0xb0] sm:$0xf0]  ;;  %v12990_v37 = vld [vmem:[#allocation21_spill] sm:$0xff] }
 0x344   :  { %3805 = vmatpush.bf16.msra.mxu0 %v9147_v17  ;;  %3818 = vmatpush.bf16.msra.mxu1 %v9151_v21  ;;  %v9083_v17 = vor.u32 %v10874_v10, %v9082_v26  ;;  %v9084_v21 = vld [vmem:[#allocation8 + $0x10] sm:$0xf0]  ;;  %v9295_v58 = vor.u32 %v10924_v45, %v9292_v30  ;;  %v9300_v26 = vld [vmem:[#allocation10 + $0xb8] sm:$0xf0] }
 0x345   :  { %v3308_v22 = vpack.c.bf16 %v12129_v47, %v12129_v47  ;;  %3831 = vmatpush.bf16.msra.mxu2 %v9155_v18  ;;  %3844 = vmatpush.bf16.msra.mxu3 %v9159_v43  ;;  %v10875_v18 = vld [vmem:[#allocation8 + $0x14] sm:$0xf0]  ;;  %v9087_v43 = vor.u32 %v10872_v4, %v9084_v21  ;;  %v9274_v4 = vld [vmem:[#allocation10 + $0x80] sm:$0xf]  ;;  %v10920_v21 = vld [vmem:[#allocation10 + $0x84] sm:$0xf] }
 0x346   :  { %v9091_v55 = vor.u32 %v10875_v18, %v9090_v40  ;;  %v9276_v18 = vld [vmem:[#allocation10 + $0x90] sm:$0xf0] }
 0x347   :  { %3509 = vmatmul.bf16.vlgmr.msrb.gmra.mxu0 %v3308_v22  ;;  %3522 = vmatmul.bf16.vlgmr.msrb.gmra.mxu1 %v3308_v22  ;;  %v9244_v45 = vld [vmem:[#allocation10 + $0x50] sm:$0xf0] }
 0x348   :  { %3535 = vmatmul.bf16.vlgmr.msrb.gmra.mxu2 %v3308_v22  ;;  %3548 = vmatmul.bf16.vlgmr.msrb.gmra.mxu3 %v3308_v22  ;;  %v10873_v22 = vld [vmem:[#allocation8 + $0xc] sm:$0xf] }
 0x349   :  { %3806 = vmatpush.bf16.msra.mxu0 %v9131_v29  ;;  %3819 = vmatpush.bf16.msra.mxu1 %v9135_v56  ;;  %v9095_v6 = vor.u32 %v10873_v22, %v9092_v28  ;;  %v10934_v29 = vld [vmem:[#allocation10 + $0xec] sm:$0xf0]  ;;  %v9327_v56 = vor.u32 %v10932_v9, %v9324_v7  ;;  %v9279_v22 = vor.u32 %v10920_v21, %v9276_v18  ;;  %v9258_v9 = vld [vmem:[#allocation10 + $0x60] sm:$0xf]  ;;  %v10908_v21 = vld [vmem:[#allocation10 + $0x24] sm:$0xf] }
 0x34a   :  { %3832 = vmatpush.bf16.msra.mxu2 %v9139_v42  ;;  %3845 = vmatpush.bf16.msra.mxu3 %v9143_v23  ;;  %v9323_v5 = vor.u32 %v10934_v29, %v9322_v36  ;;  %v9330_v42 = vld [vmem:[#allocation10 + $0xe8] sm:$0xf]  ;;  %v10921_v36 = vld [vmem:[#allocation10 + $0x8c] sm:$0xf]  ;;  %v10918_v7 = vld [vmem:[#allocation10 + $0x6c] sm:$0xf0] }
 0x34b   :  { %v9331_v23 = vor.u32 %v10935_v61, %v9330_v42  ;;  %v9259_v61 = vor.u32 %v10918_v7, %v9258_v9  ;;  %v10911_v9 = vld [vmem:[#allocation10 + $0x34] sm:$0xf0] }
 0x34d   :  { %3807 = vmatpush.bf16.msra.mxu0 %v9115_v13  ;;  %3820 = vmatpush.bf16.msra.mxu1 %v9119_v1  ;;  %v9335_v13 = vor.u32 %v10933_v15, %v9332_v24  ;;  %v9314_v1 = vld [vmem:[#allocation10 + $0xc8] sm:$0xf]  ;;  %v9260_v15 = vld [vmem:[#allocation10 + $0x70] sm:$0xf0]  ;;  %v10919_v24 = vld [vmem:[#allocation10 + $0x74] sm:$0xf0] }
 0x34e   :  { %3833 = vmatpush.bf16.msra.mxu2 %v9123_v41  ;;  %3846 = vmatpush.bf16.msra.mxu3 %v9127_v59  ;;  %v9311_v41 = vor.u32 %v10928_v32, %v9308_v44  ;;  %v9316_v59 = vld [vmem:[#allocation10 + $0xd8] sm:$0xf0]  ;;  %v9315_v48 = vor.u32 %v10931_v16, %v9314_v1  ;;  %v10917_v1 = vld [vmem:[#allocation10 + $0x6c] sm:$0xf] }
 0x34f   :  { %v9319_v46 = vor.u32 %v10929_v39, %v9316_v59 }
 0x351   :  { %3808 = vmatpush.bf16.msra.mxu0 %v9099_v49  ;;  %3821 = vmatpush.bf16.msra.mxu1 %v9103_v8  ;;  %v10926_v49 = vld [vmem:[#allocation10 + $0xac] sm:$0xf0]  ;;  %v9298_v8 = vld [vmem:[#allocation10 + $0xa8] sm:$0xf] }
 0x352   :  { %3834 = vmatpush.bf16.msra.mxu2 %v9107_v62  ;;  %3847 = vmatpush.bf16.msra.mxu3 %v9111_v33  ;;  %v9291_v57 = vor.u32 %v10926_v49, %v9290_v53  ;;  %v10927_v62 = vld [vmem:[#allocation10 + $0xb4] sm:$0xf0]  ;;  %v10925_v33 = vld [vmem:[#allocation10 + $0xac] sm:$0xf]  ;;  %v10912_v49 = vld [vmem:[#allocation10 + $0x44] sm:$0xf] }
 0x353   :  { %v9299_v31 = vor.u32 %v10927_v62, %v9298_v8  ;;  %v9303_v10 = vor.u32 %v10925_v33, %v9300_v26  ;;  %v9247_v30 = vor.u32 %v10912_v49, %v9244_v45  ;;  %v10915_v8 = vld [vmem:[#allocation10 + $0x54] sm:$0xf0]  ;;  %v10913_v62 = vld [vmem:[#allocation10 + $0x4c] sm:$0xf] }
 0x355   :  { %3809 = vmatpush.bf16.msra.mxu0 %v9083_v17  ;;  %3822 = vmatpush.bf16.msra.mxu1 %v9087_v43  ;;  %v10922_v17 = vld [vmem:[#allocation10 + $0x8c] sm:$0xf0]  ;;  %v9282_v43 = vld [vmem:[#allocation10 + $0x88] sm:$0xf] }
 0x356   :  { %3835 = vmatpush.bf16.msra.mxu2 %v9091_v55  ;;  %3848 = vmatpush.bf16.msra.mxu3 %v9095_v6  ;;  %v9275_v40 = vor.u32 %v10922_v17, %v9274_v4  ;;  %v10923_v55 = vld [vmem:[#allocation10 + $0x94] sm:$0xf0]  ;;  %v9284_v6 = vld [vmem:[#allocation10 + $0x98] sm:$0xf0]  ;;  %v9226_v4 = vld [vmem:[#allocation10 + $0x20] sm:$0xf] }
 0x357   :  { %v9283_v28 = vor.u32 %v10923_v55, %v9282_v43  ;;  %v9287_v29 = vor.u32 %v10921_v36, %v9284_v6  ;;  %v10910_v17 = vld [vmem:[#allocation10 + $0x2c] sm:$0xf0]  ;;  %v12993_v43 = vld [vmem:[#allocation25_spill] sm:$0xff]  ;;  %v9228_v6 = vld [vmem:[#allocation10 + $0x30] sm:$0xf0] }
 0x358   :  { %v9227_v36 = vor.u32 %v10910_v17, %v9226_v4  ;;  %v9231_v7 = vor.u32 %v10908_v21, %v9228_v6 }
 0x359   :  { %4047 = vmatpush.bf16.msrb.mxu0 %v9323_v5  ;;  %4060 = vmatpush.bf16.msrb.mxu1 %v9327_v56  ;;  %v10916_v5 = vld [vmem:[#allocation10 + $0x64] sm:$0xf] }
 0x35a   :  { %4073 = vmatpush.bf16.msrb.mxu2 %v9331_v23  ;;  %4086 = vmatpush.bf16.msrb.mxu3 %v9335_v13  ;;  %v9266_v23 = vld [vmem:[#allocation10 + $0x68] sm:$0xf]  ;;  %v9263_v32 = vor.u32 %v10916_v5, %v9260_v15 }
 0x35b   :  { %v12991_v13 = vld [vmem:[#allocation22_spill] sm:$0xff]  ;;  %v9267_v44 = vor.u32 %v10919_v24, %v9266_v23  ;;  %v9210_v24 = vld [vmem:[#allocation10] sm:$0xf] }
 0x35d   :  { %4048 = vmatpush.bf16.msrb.mxu0 %v9307_v38  ;;  %4061 = vmatpush.bf16.msrb.mxu1 %v9311_v41  ;;  %v9268_v41 = vld [vmem:[#allocation10 + $0x78] sm:$0xf0] }
 0x35e   :  { %4074 = vmatpush.bf16.msrb.mxu2 %v9315_v48  ;;  %4087 = vmatpush.bf16.msrb.mxu3 %v9319_v46  ;;  %v9271_v16 = vor.u32 %v10917_v1, %v9268_v41  ;;  %v9242_v48 = vld [vmem:[#allocation10 + $0x40] sm:$0xf]  ;;  %v10914_v46 = vld [vmem:[#allocation10 + $0x4c] sm:$0xf0]  ;;  %v9218_v1 = vld [vmem:[#allocation10 + $0x8] sm:$0xf] }
 0x35f   :  { %v9243_v53 = vor.u32 %v10914_v46, %v9242_v48 }
 0x361   :  { %4049 = vmatpush.bf16.msrb.mxu0 %v9291_v57  ;;  %4062 = vmatpush.bf16.msrb.mxu1 %v9295_v58  ;;  %v9250_v57 = vld [vmem:[#allocation10 + $0x48] sm:$0xf]  ;;  %v9252_v58 = vld [vmem:[#allocation10 + $0x58] sm:$0xf0] }
 0x362   :  { %4075 = vmatpush.bf16.msrb.mxu2 %v9299_v31  ;;  %4088 = vmatpush.bf16.msrb.mxu3 %v9303_v10  ;;  %v9251_v31 = vor.u32 %v10915_v8, %v9250_v57  ;;  %v9255_v33 = vor.u32 %v10913_v62, %v9252_v58  ;;  %v12994_v62 = vld [vmem:[#allocation48_spill] sm:$0xff] }
 0x363   :  { %v695_v58 = vadd.f32 %v12994_v62, %v11927_v2  ;;  %v9436_v62 = vld [vmem:[#allocation8 + $0xd0] sm:$0xf0] }
 0x365   :  { %4050 = vmatpush.bf16.msrb.mxu0 %v9275_v40  ;;  %4063 = vmatpush.bf16.msrb.mxu1 %v9279_v22  ;;  %v12992_v40 = vld [vmem:[#allocation23_spill] sm:$0xff] }
 0x366   :  { %4076 = vmatpush.bf16.msrb.mxu2 %v9283_v28  ;;  %4089 = vmatpush.bf16.msrb.mxu3 %v9287_v29  ;;  %v9234_v29 = vld [vmem:[#allocation10 + $0x28] sm:$0xf] }
 0x367   :  { %v9235_v5 = vor.u32 %v10911_v9, %v9234_v29 }
 0x369   :  { %4051 = vmatpush.bf16.msrb.mxu0 %v9259_v61  ;;  %4064 = vmatpush.bf16.msrb.mxu1 %v9263_v32 }
 0x36a   :  { %4077 = vmatpush.bf16.msrb.mxu2 %v9267_v44  ;;  %4090 = vmatpush.bf16.msrb.mxu3 %v9271_v16  ;;  %v9212_v44 = vld [vmem:[#allocation10 + $0x10] sm:$0xf0] }
 0x36d   :  { %4052 = vmatpush.bf16.msrb.mxu0 %v9243_v53  ;;  %4065 = vmatpush.bf16.msrb.mxu1 %v9247_v30  ;;  %v9220_v53 = vld [vmem:[#allocation10 + $0x18] sm:$0xf0] }
 0x36e   :  { %4078 = vmatpush.bf16.msrb.mxu2 %v9251_v31  ;;  %4091 = vmatpush.bf16.msrb.mxu3 %v9255_v33  ;;  %v12995_v31 = vld [vmem:[#allocation50_spill] sm:$0xff] }
 0x36f   :  { %v724_v33 = vadd.f32 %v12995_v31, %v11929_v3 }
 0x371   :  { %4053 = vmatpush.bf16.msrb.mxu0 %v9227_v36  ;;  %4066 = vmatpush.bf16.msrb.mxu1 %v9231_v7  ;;  %v12996_v36 = vld [vmem:[#allocation51_spill] sm:$0xff] }
 0x372   :  { %4079 = vmatpush.bf16.msrb.mxu2 %v9235_v5  ;;  %v753_v6 = vadd.f32 %v12996_v36, %v11941_v11 }
 0x3b3   :  { %v3265_v56 = vpop.f32.mrf.mxu0  ;;  %v3278_v42 = vpop.f32.mrf.mxu1 }
 0x3b4   :  { %v3557_v20 = vadd.f32 %v3265_v56, %v12990_v37  ;;  %v3558_v38 = vadd.f32 %v3278_v42, %v12991_v13  ;;  %v10909_v56 = vld [vmem:[#allocation10 + $0x2c] sm:$0xf]  ;;  %v9236_v42 = vld [vmem:[#allocation10 + $0x38] sm:$0xf0]  ;;  %v10906_v37 = vld [vmem:[#allocation10 + $0xc] sm:$0xf0] }
 0x3b5   :  { %v9239_v15 = vor.u32 %v10909_v56, %v9236_v42  ;;  %v9211_v32 = vor.u32 %v10906_v37, %v9210_v24  ;;  %v10966_v24 = vld [vmem:[#allocation8 + $0xec] sm:$0xf0]  ;;  %v10964_v37 = vld [vmem:[#allocation8 + $0xe4] sm:$0xf] }
 0x3b6   :  { %v3569_v39 = vmul.f32 0.5, %v3557_v20  ;;  %v3573_v59 = vmul.f32 0.5, %v3558_v38  ;;  %v10904_v20 = vld [vmem:[#allocation10 + $0x4] sm:$0xf] }
 0x3b7   :  { %v9215_v16 = vor.u32 %v10904_v20, %v9212_v44  ;;  %4092 = vmatpush.bf16.msrb.mxu3 %v9239_v15  ;;  %4054 = vmatpush.bf16.msrb.mxu0 %v9211_v32  ;;  %v9450_v15 = vld [vmem:[#allocation8 + $0xe0] sm:$0xf]  ;;  %v9458_v32 = vld [vmem:[#allocation8 + $0xe8] sm:$0xf] }
 0x3b8   :  { %11319 = vtanh.f32 %v3569_v39  ;;  %v10907_v39 = vld [vmem:[#allocation10 + $0x14] sm:$0xf0] }
 0x3b9   :  { %11321 = vtanh.f32 %v3573_v59  ;;  %v10905_v59 = vld [vmem:[#allocation10 + $0xc] sm:$0xf]  ;;  %v9219_v46 = vor.u32 %v10907_v39, %v9218_v1  ;;  %4067 = vmatpush.bf16.msrb.mxu1 %v9215_v16  ;;  %v9460_v39 = vld [vmem:[#allocation8 + $0xf8] sm:$0xf0] }
 0x3ba   :  { %v3291_v26 = vpop.f32.mrf.mxu2  ;;  %v3304_v10 = vpop.f32.mrf.mxu3  ;;  %v9223_v30 = vor.u32 %v10905_v59, %v9220_v53  ;;  %v10965_v16 = vld [vmem:[#allocation8 + $0xec] sm:$0xf]  ;;  %v9434_v53 = vld [vmem:[#allocation8 + $0xc0] sm:$0xf] }
 0x3bb   :  { %v3559_v18 = vadd.f32 %v3291_v26, %v12992_v40  ;;  %v3560_v55 = vadd.f32 %v3304_v10, %v12993_v43  ;;  %v3267_v22 = vpop.f32.mrf.mxu0  ;;  %v3280_v28 = vpop.f32.mrf.mxu1  ;;  %4080 = vmatpush.bf16.msrb.mxu2 %v9219_v46  ;;  %v9451_v46 = vor.u32 %v10966_v24, %v9450_v15  ;;  %v10957_v24 = vld [vmem:[#allocation8 + $0xac] sm:$0xf] }
 0x3bc   :  { %4093 = vmatpush.bf16.msrb.mxu3 %v9223_v30 }
 0x3bd   :  { %11323 = vtanh.f32 %v3559_v18  ;;  %v3578_v61 = vmul.f32 0.5, %v3560_v55 }
 0x3be   :  { %v11320_v23 = vpop.eup %11319 }
 0x3bf   :  { %v11322_v13 = vpop.eup %11321  ;;  %v3571_v38 = vmul.f32 0.5, %v11320_v23  ;;  %11325 = vtanh.f32 %v3578_v61 }
 0x3c0   :  { %v3575_v41 = vmul.f32 0.5, %v11322_v13 }
 0x3c1   :  { %v3572_v48 = vadd.f32 0.5, %v3571_v38  ;;  %v9452_v38 = vld [vmem:[#allocation8 + $0xf0] sm:$0xf0] }
 0x3c2   :  { %v3576_v49 = vadd.f32 0.5, %v3575_v41  ;;  %v3293_v45 = vpop.f32.mrf.mxu2  ;;  %v3306_v57 = vpop.f32.mrf.mxu3  ;;  %v10967_v41 = vld [vmem:[#allocation8 + $0xf4] sm:$0xf0]  ;;  %v9455_v30 = vor.u32 %v10964_v37, %v9452_v38  ;;  %v9428_v37 = vld [vmem:[#allocation8 + $0xb8] sm:$0xf0] }
 0x3c3   :  { %v11324_v8 = vpop.eup %11323  ;;  %v9459_v31 = vor.u32 %v10967_v41, %v9458_v32  ;;  %v10954_v38 = vld [vmem:[#allocation8 + $0x8c] sm:$0xf0]  ;;  %v10952_v32 = vld [vmem:[#allocation8 + $0x84] sm:$0xf] }
 0x3c4   :  { %v3582_v26 = vmul.f32 %v3576_v49, %v12116_v60  ;;  %v3583_v10 = vmul.f32 %v11324_v8, %v3572_v48  ;;  %v3510_v4 = vpop.f32.mrf.mxu0  ;;  %v3523_v17 = vpop.f32.mrf.mxu1  ;;  %v12997_v60 = vld [vmem:[#allocation52_spill] sm:$0xff]  ;;  %v10962_v49 = vld [vmem:[#allocation8 + $0xcc] sm:$0xf0]  ;;  %v10960_v8 = vld [vmem:[#allocation8 + $0xc4] sm:$0xf] }
 0x3c5   :  { %v3565_v21 = vadd.f32 %v3510_v4, %v695_v58  ;;  %v3566_v40 = vadd.f32 %v3523_v17, %v724_v33  ;;  %v11326_v18 = vpop.eup %11325  ;;  %v782_v29 = vadd.f32 %v12997_v60, %v11943_v12  ;;  %v9463_v33 = vor.u32 %v10965_v16, %v9460_v39  ;;  %v9418_v60 = vld [vmem:[#allocation8 + $0xa0] sm:$0xf]  ;;  %v9404_v39 = vld [vmem:[#allocation8 + $0x90] sm:$0xf0] }
 0x3c6   :  { %v12142_v43 = vadd.f32 %v3583_v10, %v3582_v26  ;;  %v3580_v28 = vmul.f32 0.5, %v11326_v18  ;;  %v9442_v26 = vld [vmem:[#allocation8 + $0xc8] sm:$0xf]  ;;  %v10963_v10 = vld [vmem:[#allocation8 + $0xd4] sm:$0xf0]  ;;  %v9431_v16 = vor.u32 %v10957_v24, %v9428_v37 }
 0x3c7   :  { %v3587_v55 = vmul.f32 0.5, %v3565_v21  ;;  %v3591_v22 = vmul.f32 0.5, %v3566_v40  ;;  %v10961_v40 = vld [vmem:[#allocation8 + $0xcc] sm:$0xf]  ;;  %v9444_v18 = vld [vmem:[#allocation8 + $0xd8] sm:$0xf0] }
 0x3c8   :  { %11327 = vtanh.f32 %v12142_v43  ;;  %v3581_v23 = vadd.f32 0.5, %v3580_v28  ;;  %v9380_v24 = vld [vmem:[#allocation8 + $0x58] sm:$0xf0] }
 0x3c9   :  { %11329 = vtanh.f32 %v3587_v55 }
 0x3ca   :  { %11331 = vtanh.f32 %v3591_v22  ;;  %v9435_v22 = vor.u32 %v10962_v49, %v9434_v53  ;;  %v9412_v53 = vld [vmem:[#allocation8 + $0x98] sm:$0xf0] }
 0x3cb   :  { %v3536_v9 = vpop.f32.mrf.mxu2  ;;  %v3549_v7 = vpop.f32.mrf.mxu3 }
 0x3cc   :  { %v3567_v5 = vadd.f32 %v3536_v9, %v753_v6  ;;  %v3568_v56 = vadd.f32 %v3549_v7, %v782_v29  ;;  %v3512_v42 = vpop.f32.mrf.mxu0  ;;  %v3525_v61 = vpop.f32.mrf.mxu1  ;;  %v9439_v6 = vor.u32 %v10960_v8, %v9436_v62  ;;  %v10958_v29 = vld [vmem:[#allocation8 + $0xac] sm:$0xf0]  ;;  %v9443_v9 = vor.u32 %v10963_v10, %v9442_v26  ;;  %v10948_v10 = vld [vmem:[#allocation8 + $0x64] sm:$0xf] }
 0x3cd   :  { %v9447_v7 = vor.u32 %v10961_v40, %v9444_v18  ;;  %v9426_v42 = vld [vmem:[#allocation8 + $0xa8] sm:$0xf]  ;;  %v10950_v26 = vld [vmem:[#allocation8 + $0x6c] sm:$0xf0]  ;;  %v10951_v40 = vld [vmem:[#allocation8 + $0x74] sm:$0xf0] }
 0x3ce   :  { %v11328_v20 = vpop.eup %11327  ;;  %11333 = vtanh.f32 %v3567_v5  ;;  %v3596_v13 = vmul.f32 0.5, %v3568_v56  ;;  %v10956_v5 = vld [vmem:[#allocation8 + $0xa4] sm:$0xf]  ;;  %v9420_v56 = vld [vmem:[#allocation8 + $0xb0] sm:$0xf0] }
 0x3cf   :  { %v11330_v44 = vpop.eup %11329  ;;  %v12149_v1 = vmul.f32 %v11328_v20, %v3581_v23  ;;  %v10959_v23 = vld [vmem:[#allocation8 + $0xb4] sm:$0xf0]  ;;  %v9423_v20 = vor.u32 %v10956_v5, %v9420_v56  ;;  %v9378_v5 = vld [vmem:[#allocation8 + $0x48] sm:$0xf] }
 0x3d0   :  { %v11332_v59 = vpop.eup %11331  ;;  %v3589_v48 = vmul.f32 0.5, %v11330_v44  ;;  %11335 = vtanh.f32 %v3596_v13  ;;  %v9402_v13 = vld [vmem:[#allocation8 + $0x80] sm:$0xf]  ;;  %v9427_v41 = vor.u32 %v10959_v23, %v9426_v42  ;;  %v10947_v56 = vld [vmem:[#allocation8 + $0x54] sm:$0xf0] }
 0x3d1   :  { %v3609_v45 = vpack.c.bf16 %v12149_v1, %v12149_v1  ;;  %v3593_v57 = vmul.f32 0.5, %v11332_v59  ;;  %v9410_v59 = vld [vmem:[#allocation8 + $0x88] sm:$0xf]  ;;  %v9403_v49 = vor.u32 %v10954_v38, %v9402_v13  ;;  %v10945_v23 = vld [vmem:[#allocation8 + $0x4c] sm:$0xf] }
 0x3d2   :  { %v3590_v58 = vadd.f32 0.5, %v3589_v48  ;;  %v10955_v48 = vld [vmem:[#allocation8 + $0x94] sm:$0xf0]  ;;  %v9383_v37 = vor.u32 %v10945_v23, %v9380_v24  ;;  %v10940_v13 = vld [vmem:[#allocation8 + $0x24] sm:$0xf] }
 0x3d3   :  { %v3594_v4 = vadd.f32 0.5, %v3593_v57  ;;  %v3538_v17 = vpop.f32.mrf.mxu2  ;;  %v3551_v21 = vpop.f32.mrf.mxu3  ;;  %3810 = vmatmul.bf16.vlgmr.msra.gmra.mxu0 %v3609_v45  ;;  %3823 = vmatmul.bf16.vlgmr.msra.gmra.mxu1 %v3609_v45  ;;  %v9570_v23 = vld [vmem:[#allocation10 + $0xc8] sm:$0xf] }
 0x3d4   :  { %v11334_v55 = vpop.eup %11333  ;;  %3836 = vmatmul.bf16.vlgmr.msra.gmra.mxu2 %v3609_v45  ;;  %3849 = vmatmul.bf16.vlgmr.msra.gmra.mxu3 %v3609_v45  ;;  %v9407_v45 = vor.u32 %v10952_v32, %v9404_v39  ;;  %v9388_v17 = vld [vmem:[#allocation8 + $0x70] sm:$0xf0]  ;;  %v9394_v21 = vld [vmem:[#allocation8 + $0x68] sm:$0xf] }
 0x3d5   :  { %v3600_v28 = vmul.f32 %v3594_v4, %v12126_v63  ;;  %v3601_v36 = vmul.f32 %v11334_v55, %v3590_v58  ;;  %4348 = vmatpush.bf16.msra.mxu0 %v9451_v46  ;;  %4361 = vmatpush.bf16.msra.mxu1 %v9455_v30  ;;  %v9419_v63 = vor.u32 %v10958_v29, %v9418_v60  ;;  %v10953_v46 = vld [vmem:[#allocation8 + $0x8c] sm:$0xf]  ;;  %v10946_v60 = vld [vmem:[#allocation8 + $0x4c] sm:$0xf0]  ;;  %v10944_v29 = vld [vmem:[#allocation8 + $0x44] sm:$0xf] }
 0x3d6   :  { %4374 = vmatpush.bf16.msra.mxu2 %v9459_v31  ;;  %4387 = vmatpush.bf16.msra.mxu3 %v9463_v33  ;;  %v11336_v61 = vpop.eup %11335  ;;  %v9411_v30 = vor.u32 %v10955_v48, %v9410_v59  ;;  %v9415_v8 = vor.u32 %v10953_v46, %v9412_v53  ;;  %v9386_v33 = vld [vmem:[#allocation8 + $0x60] sm:$0xf]  ;;  %v9391_v18 = vor.u32 %v10948_v10, %v9388_v17  ;;  %v9356_v32 = vld [vmem:[#allocation8 + $0x30] sm:$0xf0]  ;;  %v10941_v59 = vld [vmem:[#allocation8 + $0x2c] sm:$0xf] }
 0x3d7   :  { %v12154_v15 = vadd.f32 %v3601_v36, %v3600_v28  ;;  %v3598_v44 = vmul.f32 0.5, %v11336_v61  ;;  %v9387_v4 = vor.u32 %v10950_v26, %v9386_v33  ;;  %v9395_v55 = vor.u32 %v10951_v40, %v9394_v21  ;;  %v9396_v28 = vld [vmem:[#allocation8 + $0x78] sm:$0xf0]  ;;  %v9338_v53 = vld [vmem:[#allocation8] sm:$0xf] }
 0x3d8   :  { %v9379_v61 = vor.u32 %v10947_v56, %v9378_v5  ;;  %v9364_v48 = vld [vmem:[#allocation8 + $0x38] sm:$0xf0]  ;;  %v10937_v26 = vld [vmem:[#allocation8 + $0xc] sm:$0xf]  ;;  %v10998_v21 = vld [vmem:[#allocation10 + $0xec] sm:$0xf0] }
 0x3d9   :  { %11337 = vtanh.f32 %v12154_v15  ;;  %4349 = vmatpush.bf16.msra.mxu0 %v9435_v22  ;;  %4362 = vmatpush.bf16.msra.mxu1 %v9439_v6  ;;  %v3599_v57 = vadd.f32 0.5, %v3598_v44  ;;  %v10949_v22 = vld [vmem:[#allocation8 + $0x6c] sm:$0xf]  ;;  %v9370_v6 = vld [vmem:[#allocation8 + $0x40] sm:$0xf]  ;;  %v9367_v46 = vor.u32 %v10941_v59, %v9364_v48 }
 0x3da   :  { %4375 = vmatpush.bf16.msra.mxu2 %v9443_v9  ;;  %4388 = vmatpush.bf16.msra.mxu3 %v9447_v7  ;;  %v9399_v36 = vor.u32 %v10949_v22, %v9396_v28  ;;  %v9371_v9 = vor.u32 %v10946_v60, %v9370_v6  ;;  %v9372_v7 = vld [vmem:[#allocation8 + $0x50] sm:$0xf0]  ;;  %v9362_v44 = vld [vmem:[#allocation8 + $0x28] sm:$0xf]  ;;  %v9348_v10 = vld [vmem:[#allocation8 + $0x18] sm:$0xf0] }
 0x3db   :  { %v9375_v42 = vor.u32 %v10944_v29, %v9372_v7  ;;  %v9351_v17 = vor.u32 %v10937_v26, %v9348_v10  ;;  %v10996_v40 = vld [vmem:[#allocation10 + $0xe4] sm:$0xf]  ;;  %v9586_v28 = vld [vmem:[#allocation10 + $0xe8] sm:$0xf]  ;;  %v10997_v6 = vld [vmem:[#allocation10 + $0xec] sm:$0xf] }
 0x3dc   :  { %v9588_v29 = vld [vmem:[#allocation10 + $0xf8] sm:$0xf0]  ;;  %v10994_v7 = vld [vmem:[#allocation10 + $0xcc] sm:$0xf0]  ;;  %v9554_v59 = vld [vmem:[#allocation10 + $0xa8] sm:$0xf] }
 0x3dd   :  { %4350 = vmatpush.bf16.msra.mxu0 %v9419_v63  ;;  %4363 = vmatpush.bf16.msra.mxu1 %v9423_v20  ;;  %v9354_v63 = vld [vmem:[#allocation8 + $0x20] sm:$0xf]  ;;  %v10942_v20 = vld [vmem:[#allocation8 + $0x2c] sm:$0xf0]  ;;  %v9591_v5 = vor.u32 %v10997_v6, %v9588_v29  ;;  %v10991_v48 = vld [vmem:[#allocation10 + $0xb4] sm:$0xf0] }
 0x3de   :  { %4376 = vmatpush.bf16.msra.mxu2 %v9427_v41  ;;  %4389 = vmatpush.bf16.msra.mxu3 %v9431_v16  ;;  %v9355_v38 = vor.u32 %v10942_v20, %v9354_v63  ;;  %v10943_v41 = vld [vmem:[#allocation8 + $0x34] sm:$0xf0]  ;;  %v9359_v16 = vor.u32 %v10940_v13, %v9356_v32  ;;  %v10993_v63 = vld [vmem:[#allocation10 + $0xcc] sm:$0xf]  ;;  %v9572_v20 = vld [vmem:[#allocation10 + $0xd8] sm:$0xf0] }
 0x3df   :  { %v11338_v62 = vpop.eup %11337  ;;  %v9363_v39 = vor.u32 %v10943_v41, %v9362_v44  ;;  %v9546_v32 = vld [vmem:[#allocation10 + $0xa0] sm:$0xf]  ;;  %v10990_v44 = vld [vmem:[#allocation10 + $0xac] sm:$0xf0]  ;;  %v10988_v41 = vld [vmem:[#allocation10 + $0xa4] sm:$0xf] }
 0x3e0   :  { %v12157_v58 = vmul.f32 %v11338_v62, %v3599_v57  ;;  %v10939_v62 = vld [vmem:[#allocation8 + $0x14] sm:$0xf0]  ;;  %v9538_v26 = vld [vmem:[#allocation10 + $0x88] sm:$0xf]  ;;  %v9514_v6 = vld [vmem:[#allocation10 + $0x60] sm:$0xf] }
 0x3e1   :  { %4351 = vmatpush.bf16.msra.mxu0 %v9403_v49  ;;  %4364 = vmatpush.bf16.msra.mxu1 %v9407_v45  ;;  %v10938_v49 = vld [vmem:[#allocation8 + $0xc] sm:$0xf0]  ;;  %v10936_v45 = vld [vmem:[#allocation8 + $0x4] sm:$0xf]  ;;  %v10987_v10 = vld [vmem:[#allocation10 + $0x94] sm:$0xf0] }
 0x3e2   :  { %v3854_v31 = vpack.c.bf16 %v12157_v58, %v12157_v58  ;;  %4377 = vmatpush.bf16.msra.mxu2 %v9411_v30  ;;  %4390 = vmatpush.bf16.msra.mxu3 %v9415_v8  ;;  %v9339_v57 = vor.u32 %v10938_v49, %v9338_v53  ;;  %v9340_v30 = vld [vmem:[#allocation8 + $0x10] sm:$0xf0]  ;;  %v9346_v8 = vld [vmem:[#allocation8 + $0x8] sm:$0xf]  ;;  %v9555_v53 = vor.u32 %v10991_v48, %v9554_v59  ;;  %v10989_v49 = vld [vmem:[#allocation10 + $0xac] sm:$0xf] }
 0x3e3   :  { %v9347_v33 = vor.u32 %v10939_v62, %v9346_v8  ;;  %v10986_v8 = vld [vmem:[#allocation10 + $0x8c] sm:$0xf0]  ;;  %v10984_v62 = vld [vmem:[#allocation10 + $0x84] sm:$0xf]  ;;  %v9500_v48 = vld [vmem:[#allocation10 + $0x50] sm:$0xf0] }
 0x3e4   :  { %4055 = vmatmul.bf16.vlgmr.msrb.gmra.mxu0 %v3854_v31  ;;  %4068 = vmatmul.bf16.vlgmr.msrb.gmra.mxu1 %v3854_v31  ;;  %v10980_v29 = vld [vmem:[#allocation10 + $0x64] sm:$0xf] }
 0x3e5   :  { %4081 = vmatmul.bf16.vlgmr.msrb.gmra.mxu2 %v3854_v31  ;;  %4094 = vmatmul.bf16.vlgmr.msrb.gmra.mxu3 %v3854_v31  ;;  %v9343_v31 = vor.u32 %v10936_v45, %v9340_v30  ;;  %v9556_v45 = vld [vmem:[#allocation10 + $0xb8] sm:$0xf0]  ;;  %v9530_v30 = vld [vmem:[#allocation10 + $0x80] sm:$0xf]  ;;  %v10976_v59 = vld [vmem:[#allocation10 + $0x44] sm:$0xf] }
 0x3e6   :  { %4352 = vmatpush.bf16.msra.mxu0 %v9387_v4  ;;  %4365 = vmatpush.bf16.msra.mxu1 %v9391_v18  ;;  %v9578_v4 = vld [vmem:[#allocation10 + $0xe0] sm:$0xf]  ;;  %v9580_v18 = vld [vmem:[#allocation10 + $0xf0] sm:$0xf0] }
 0x3e7   :  { %4378 = vmatpush.bf16.msra.mxu2 %v9395_v55  ;;  %4391 = vmatpush.bf16.msra.mxu3 %v9399_v36  ;;  %v9579_v55 = vor.u32 %v10998_v21, %v9578_v4  ;;  %v9583_v22 = vor.u32 %v10996_v40, %v9580_v18  ;;  %v10999_v36 = vld [vmem:[#allocation10 + $0xf4] sm:$0xf0]  ;;  %v10985_v21 = vld [vmem:[#allocation10 + $0x8c] sm:$0xf]  ;;  %v9540_v40 = vld [vmem:[#allocation10 + $0x98] sm:$0xf0] }
 0x3e8   :  { %v9587_v60 = vor.u32 %v10999_v36, %v9586_v28  ;;  %v9543_v18 = vor.u32 %v10985_v21, %v9540_v40  ;;  %v12999_v28 = vld [vmem:[#allocation26_spill] sm:$0xff]  ;;  %v10974_v21 = vld [vmem:[#allocation10 + $0x2c] sm:$0xf0]  ;;  %v10972_v40 = vld [vmem:[#allocation10 + $0x24] sm:$0xf] }
 0x3e9   :  { %v613_v36 = vadd.f32 %v12999_v28, %v11859_v27 }
 0x3ea   :  { %4353 = vmatpush.bf16.msra.mxu0 %v9371_v9  ;;  %4366 = vmatpush.bf16.msra.mxu1 %v9375_v42  ;;  %v9562_v9 = vld [vmem:[#allocation10 + $0xc0] sm:$0xf]  ;;  %v10992_v42 = vld [vmem:[#allocation10 + $0xc4] sm:$0xf] }
 0x3eb   :  { %4379 = vmatpush.bf16.msra.mxu2 %v9379_v61  ;;  %4392 = vmatpush.bf16.msra.mxu3 %v9383_v37  ;;  %v9563_v56 = vor.u32 %v10994_v7, %v9562_v9  ;;  %v9564_v61 = vld [vmem:[#allocation10 + $0xd0] sm:$0xf0]  ;;  %v10995_v37 = vld [vmem:[#allocation10 + $0xd4] sm:$0xf0] }
 0x3ec   :  { %v9567_v24 = vor.u32 %v10992_v42, %v9564_v61  ;;  %v9571_v13 = vor.u32 %v10995_v37, %v9570_v23  ;;  %v9522_v42 = vld [vmem:[#allocation10 + $0x68] sm:$0xf]  ;;  %v10983_v61 = vld [vmem:[#allocation10 + $0x74] sm:$0xf0] }
 0x3ee   :  { %4354 = vmatpush.bf16.msra.mxu0 %v9355_v38  ;;  %4367 = vmatpush.bf16.msra.mxu1 %v9359_v16  ;;  %v9575_v38 = vor.u32 %v10993_v63, %v9572_v20  ;;  %v9547_v16 = vor.u32 %v10990_v44, %v9546_v32  ;;  %v9523_v63 = vor.u32 %v10983_v61, %v9522_v42  ;;  %v10981_v20 = vld [vmem:[#allocation10 + $0x6c] sm:$0xf] }
 0x3ef   :  { %4380 = vmatpush.bf16.msra.mxu2 %v9363_v39  ;;  %4393 = vmatpush.bf16.msra.mxu3 %v9367_v46  ;;  %v9548_v39 = vld [vmem:[#allocation10 + $0xb0] sm:$0xf0] }
 0x3f0   :  { %v9551_v46 = vor.u32 %v10988_v41, %v9548_v39  ;;  %v9498_v41 = vld [vmem:[#allocation10 + $0x40] sm:$0xf] }
 0x3f2   :  { %4355 = vmatpush.bf16.msra.mxu0 %v9339_v57  ;;  %4368 = vmatpush.bf16.msra.mxu1 %v9343_v31  ;;  %v9559_v57 = vor.u32 %v10989_v49, %v9556_v45  ;;  %v9531_v31 = vor.u32 %v10986_v8, %v9530_v30  ;;  %v9503_v45 = vor.u32 %v10976_v59, %v9500_v48  ;;  %v10977_v30 = vld [vmem:[#allocation10 + $0x4c] sm:$0xf]  ;;  %v9508_v8 = vld [vmem:[#allocation10 + $0x58] sm:$0xf0] }
 0x3f3   :  { %4381 = vmatpush.bf16.msra.mxu2 %v9347_v33  ;;  %4394 = vmatpush.bf16.msra.mxu3 %v9351_v17  ;;  %v9532_v33 = vld [vmem:[#allocation10 + $0x90] sm:$0xf0]  ;;  %v9539_v17 = vor.u32 %v10987_v10, %v9538_v26  ;;  %v9511_v26 = vor.u32 %v10977_v30, %v9508_v8  ;;  %v10969_v59 = vld [vmem:[#allocation10 + $0xc] sm:$0xf] }
 0x3f4   :  { %v9535_v4 = vor.u32 %v10984_v62, %v9532_v33  ;;  %v13001_v62 = vld [vmem:[#allocation28_spill] sm:$0xff] }
 0x3f6   :  { %4593 = vmatpush.bf16.msrb.mxu0 %v9579_v55  ;;  %4606 = vmatpush.bf16.msrb.mxu1 %v9583_v22  ;;  %v12998_v55 = vld [vmem:[#allocation24_spill] sm:$0xff] }
 0x3f7   :  { %4619 = vmatpush.bf16.msrb.mxu2 %v9587_v60  ;;  %4632 = vmatpush.bf16.msrb.mxu3 %v9591_v5  ;;  %v584_v22 = vadd.f32 %v12998_v55, %v11855_v25  ;;  %v10982_v60 = vld [vmem:[#allocation10 + $0x6c] sm:$0xf0] }
 0x3f8   :  { %v9515_v5 = vor.u32 %v10982_v60, %v9514_v6  ;;  %v9484_v6 = vld [vmem:[#allocation10 + $0x30] sm:$0xf0]  ;;  %v9490_v60 = vld [vmem:[#allocation10 + $0x28] sm:$0xf] }
 0x3fa   :  { %4594 = vmatpush.bf16.msrb.mxu0 %v9563_v56  ;;  %4607 = vmatpush.bf16.msrb.mxu1 %v9567_v24  ;;  %v9516_v56 = vld [vmem:[#allocation10 + $0x70] sm:$0xf0] }
 0x3fb   :  { %4620 = vmatpush.bf16.msrb.mxu2 %v9571_v13  ;;  %4633 = vmatpush.bf16.msrb.mxu3 %v9575_v38  ;;  %v9519_v37 = vor.u32 %v10980_v29, %v9516_v56  ;;  %v9524_v13 = vld [vmem:[#allocation10 + $0x78] sm:$0xf0]  ;;  %v10975_v29 = vld [vmem:[#allocation10 + $0x34] sm:$0xf0] }
 0x3fc   :  { %v9527_v38 = vor.u32 %v10981_v20, %v9524_v13  ;;  %v9492_v56 = vld [vmem:[#allocation10 + $0x38] sm:$0xf0] }
 0x3fe   :  { %4595 = vmatpush.bf16.msrb.mxu0 %v9547_v16  ;;  %4608 = vmatpush.bf16.msrb.mxu1 %v9551_v46  ;;  %v10978_v16 = vld [vmem:[#allocation10 + $0x4c] sm:$0xf0]  ;;  %v9506_v46 = vld [vmem:[#allocation10 + $0x48] sm:$0xf] }
 0x3ff   :  { %4621 = vmatpush.bf16.msrb.mxu2 %v9555_v53  ;;  %4634 = vmatpush.bf16.msrb.mxu3 %v9559_v57  ;;  %v9499_v39 = vor.u32 %v10978_v16, %v9498_v41  ;;  %v13000_v53 = vld [vmem:[#allocation27_spill] sm:$0xff]  ;;  %v10979_v57 = vld [vmem:[#allocation10 + $0x54] sm:$0xf0] }
 0x400   :  { %v642_v49 = vadd.f32 %v13000_v53, %v11873_v34  ;;  %v9507_v33 = vor.u32 %v10979_v57, %v9506_v46  ;;  %v9476_v53 = vld [vmem:[#allocation10 + $0x18] sm:$0xf0] }
 0x401   :  { %v9479_v30 = vor.u32 %v10969_v59, %v9476_v53 }
 0x402   :  { %4596 = vmatpush.bf16.msrb.mxu0 %v9531_v31  ;;  %4609 = vmatpush.bf16.msrb.mxu1 %v9535_v4  ;;  %v671_v31 = vadd.f32 %v13001_v62, %v11875_v35 }
 0x403   :  { %4622 = vmatpush.bf16.msrb.mxu2 %v9539_v17  ;;  %4635 = vmatpush.bf16.msrb.mxu3 %v9543_v18  ;;  %v9482_v17 = vld [vmem:[#allocation10 + $0x20] sm:$0xf] }
 0x406   :  { %4597 = vmatpush.bf16.msrb.mxu0 %v9515_v5  ;;  %4610 = vmatpush.bf16.msrb.mxu1 %v9519_v37  ;;  %v10973_v5 = vld [vmem:[#allocation10 + $0x2c] sm:$0xf]  ;;  %v10970_v37 = vld [vmem:[#allocation10 + $0xc] sm:$0xf0] }
 0x407   :  { %4623 = vmatpush.bf16.msrb.mxu2 %v9523_v63  ;;  %4636 = vmatpush.bf16.msrb.mxu3 %v9527_v38  ;;  %v9495_v61 = vor.u32 %v10973_v5, %v9492_v56  ;;  %v10968_v63 = vld [vmem:[#allocation10 + $0x4] sm:$0xf]  ;;  %v9706_v56 = vld [vmem:[#allocation8 + $0xe0] sm:$0xf] }
 0x40a   :  { %4598 = vmatpush.bf16.msrb.mxu0 %v9499_v39  ;;  %4611 = vmatpush.bf16.msrb.mxu1 %v9503_v45  ;;  %v10971_v39 = vld [vmem:[#allocation10 + $0x14] sm:$0xf0] }
 0x40b   :  { %4624 = vmatpush.bf16.msrb.mxu2 %v9507_v33  ;;  %4637 = vmatpush.bf16.msrb.mxu3 %v9511_v26 }
 0x40f   :  { %4638 = vmatpush.bf16.msrb.mxu3 %v9495_v61  ;;  %v11030_v61 = vld [vmem:[#allocation8 + $0xec] sm:$0xf0] }
 0x410   :  { %v9707_v59 = vor.u32 %v11030_v61, %v9706_v56  ;;  %v11020_v56 = vld [vmem:[#allocation8 + $0xa4] sm:$0xf] }
 0x413   :  { %4639 = vmatpush.bf16.msrb.mxu3 %v9479_v30  ;;  %v11027_v30 = vld [vmem:[#allocation8 + $0xd4] sm:$0xf0] }
 0x450   :  { %v3811_v9 = vpop.f32.mrf.mxu0  ;;  %v3824_v7 = vpop.f32.mrf.mxu1 }
 0x451   :  { %v4103_v23 = vadd.f32 %v3811_v9, %v584_v22  ;;  %v4104_v24 = vadd.f32 %v3824_v7, %v613_v36  ;;  %v9483_v36 = vor.u32 %v10974_v21, %v9482_v17  ;;  %v9487_v9 = vor.u32 %v10972_v40, %v9484_v6  ;;  %v13003_v17 = vld [vmem:[#allocation46_spill] sm:$0xff]  ;;  %v13004_v6 = vld [vmem:[#allocation47_spill] sm:$0xff] }
 0x452   :  { %v9491_v7 = vor.u32 %v10975_v29, %v9490_v60  ;;  %v13005_v29 = vld [vmem:[#allocation49_spill] sm:$0xff] }
 0x453   :  { %v4115_v32 = vmul.f32 0.5, %v4103_v23  ;;  %v4119_v44 = vmul.f32 0.5, %v4104_v24  ;;  %v9466_v24 = vld [vmem:[#allocation10] sm:$0xf]  ;;  %4599 = vmatpush.bf16.msrb.mxu0 %v9483_v36  ;;  %4612 = vmatpush.bf16.msrb.mxu1 %v9487_v9 }
 0x454   :  { %v9467_v38 = vor.u32 %v10970_v37, %v9466_v24  ;;  %4625 = vmatpush.bf16.msrb.mxu2 %v9491_v7 }
 0x455   :  { %11339 = vtanh.f32 %v4115_v32  ;;  %v9468_v32 = vld [vmem:[#allocation10 + $0x10] sm:$0xf0] }
 0x456   :  { %11341 = vtanh.f32 %v4119_v44  ;;  %v9474_v44 = vld [vmem:[#allocation10 + $0x8] sm:$0xf]  ;;  %v9471_v16 = vor.u32 %v10968_v63, %v9468_v32  ;;  %v11031_v63 = vld [vmem:[#allocation8 + $0xf4] sm:$0xf0]  ;;  %v9708_v32 = vld [vmem:[#allocation8 + $0xf0] sm:$0xf0] }
 0x457   :  { %v3837_v10 = vpop.f32.mrf.mxu2  ;;  %v3850_v4 = vpop.f32.mrf.mxu3  ;;  %v9475_v46 = vor.u32 %v10971_v39, %v9474_v44  ;;  %4600 = vmatpush.bf16.msrb.mxu0 %v9467_v38  ;;  %v11029_v44 = vld [vmem:[#allocation8 + $0xec] sm:$0xf] }
 0x458   :  { %v4105_v18 = vadd.f32 %v3837_v10, %v642_v49  ;;  %v4106_v55 = vadd.f32 %v3850_v4, %v671_v31  ;;  %v3813_v22 = vpop.f32.mrf.mxu0  ;;  %v3826_v28 = vpop.f32.mrf.mxu1  ;;  %4613 = vmatpush.bf16.msrb.mxu1 %v9471_v16  ;;  %v13002_v10 = vld [vmem:[#allocation45_spill] sm:$0xff] }
 0x459   :  { %4626 = vmatpush.bf16.msrb.mxu2 %v9475_v46  ;;  %v11026_v46 = vld [vmem:[#allocation8 + $0xcc] sm:$0xf0] }
 0x45a   :  { %11343 = vtanh.f32 %v4105_v18  ;;  %v4124_v42 = vmul.f32 0.5, %v4106_v55 }
 0x45b   :  { %v11340_v23 = vpop.eup %11339 }
 0x45c   :  { %v11342_v20 = vpop.eup %11341  ;;  %v4117_v13 = vmul.f32 0.5, %v11340_v23  ;;  %11345 = vtanh.f32 %v4124_v42  ;;  %v9714_v23 = vld [vmem:[#allocation8 + $0xe8] sm:$0xf] }
 0x45d   :  { %v4121_v41 = vmul.f32 0.5, %v11342_v20  ;;  %v11028_v20 = vld [vmem:[#allocation8 + $0xe4] sm:$0xf] }
 0x45e   :  { %v4118_v48 = vadd.f32 0.5, %v4117_v13 }
 0x45f   :  { %v4122_v49 = vadd.f32 0.5, %v4121_v41  ;;  %v3839_v45 = vpop.f32.mrf.mxu2  ;;  %v3852_v57 = vpop.f32.mrf.mxu3  ;;  %v9716_v41 = vld [vmem:[#allocation8 + $0xf8] sm:$0xf0] }
 0x460   :  { %v11344_v8 = vpop.eup %11343  ;;  %v9715_v45 = vor.u32 %v11031_v63, %v9714_v23  ;;  %v9698_v57 = vld [vmem:[#allocation8 + $0xc8] sm:$0xf]  ;;  %v9676_v23 = vld [vmem:[#allocation8 + $0xb0] sm:$0xf0] }
 0x461   :  { %v4128_v62 = vmul.f32 %v4122_v49, %v12142_v43  ;;  %v4129_v31 = vmul.f32 %v11344_v8, %v4118_v48  ;;  %v4056_v33 = vpop.f32.mrf.mxu0  ;;  %v4069_v26 = vpop.f32.mrf.mxu1  ;;  %v9690_v48 = vld [vmem:[#allocation8 + $0xc0] sm:$0xf] }
 0x462   :  { %v4111_v4 = vadd.f32 %v4056_v33, %v13002_v10  ;;  %v4112_v21 = vadd.f32 %v4069_v26, %v13003_v17  ;;  %v11346_v40 = vpop.eup %11345  ;;  %v11024_v33 = vld [vmem:[#allocation8 + $0xc4] sm:$0xf]  ;;  %v9692_v26 = vld [vmem:[#allocation8 + $0xd0] sm:$0xf0] }
 0x463   :  { %v12172_v18 = vadd.f32 %v4129_v31, %v4128_v62  ;;  %v4126_v28 = vmul.f32 0.5, %v11346_v40  ;;  %v9711_v62 = vor.u32 %v11028_v20, %v9708_v32  ;;  %v9719_v31 = vor.u32 %v11029_v44, %v9716_v41  ;;  %v9700_v40 = vld [vmem:[#allocation8 + $0xd8] sm:$0xf0]  ;;  %v9658_v20 = vld [vmem:[#allocation8 + $0x80] sm:$0xf] }
 0x464   :  { %v4133_v55 = vmul.f32 0.5, %v4111_v4  ;;  %v4137_v22 = vmul.f32 0.5, %v4112_v21  ;;  %v11025_v21 = vld [vmem:[#allocation8 + $0xcc] sm:$0xf]  ;;  %v9666_v32 = vld [vmem:[#allocation8 + $0x88] sm:$0xf] }
 0x465   :  { %11347 = vtanh.f32 %v12172_v18  ;;  %v4127_v42 = vadd.f32 0.5, %v4126_v28  ;;  %v11019_v41 = vld [vmem:[#allocation8 + $0x94] sm:$0xf0] }
 0x466   :  { %11349 = vtanh.f32 %v4133_v55 }
 0x467   :  { %11351 = vtanh.f32 %v4137_v22  ;;  %v9691_v22 = vor.u32 %v11026_v46, %v9690_v48  ;;  %v9660_v48 = vld [vmem:[#allocation8 + $0x90] sm:$0xf0]  ;;  %v11017_v46 = vld [vmem:[#allocation8 + $0x8c] sm:$0xf] }
 0x468   :  { %v4082_v43 = vpop.f32.mrf.mxu2  ;;  %v4095_v36 = vpop.f32.mrf.mxu3 }
 0x469   :  { %v4113_v60 = vadd.f32 %v4082_v43, %v13004_v6  ;;  %v4114_v9 = vadd.f32 %v4095_v36, %v13005_v29  ;;  %v4058_v7 = vpop.f32.mrf.mxu0  ;;  %v4071_v5 = vpop.f32.mrf.mxu1  ;;  %v9699_v36 = vor.u32 %v11027_v30, %v9698_v57  ;;  %v9674_v6 = vld [vmem:[#allocation8 + $0xa0] sm:$0xf]  ;;  %v9682_v29 = vld [vmem:[#allocation8 + $0xa8] sm:$0xf] }
 0x46a   :  { %v9695_v7 = vor.u32 %v11024_v33, %v9692_v26  ;;  %v9703_v5 = vor.u32 %v11025_v21, %v9700_v40  ;;  %v9642_v30 = vld [vmem:[#allocation8 + $0x60] sm:$0xf]  ;;  %v11014_v33 = vld [vmem:[#allocation8 + $0x6c] sm:$0xf0]  ;;  %v9650_v26 = vld [vmem:[#allocation8 + $0x68] sm:$0xf] }
 0x46b   :  { %v11348_v24 = vpop.eup %11347  ;;  %11353 = vtanh.f32 %v4113_v60  ;;  %v4142_v37 = vmul.f32 0.5, %v4114_v9  ;;  %v11022_v60 = vld [vmem:[#allocation8 + $0xac] sm:$0xf0]  ;;  %v11023_v9 = vld [vmem:[#allocation8 + $0xb4] sm:$0xf0]  ;;  %v9643_v21 = vor.u32 %v11014_v33, %v9642_v30 }
 0x46c   :  { %v11350_v13 = vpop.eup %11349  ;;  %v12177_v38 = vmul.f32 %v11348_v24, %v4127_v42  ;;  %v11021_v24 = vld [vmem:[#allocation8 + $0xac] sm:$0xf]  ;;  %v9683_v63 = vor.u32 %v11023_v9, %v9682_v29  ;;  %v11006_v29 = vld [vmem:[#allocation8 + $0x2c] sm:$0xf0]  ;;  %v9618_v9 = vld [vmem:[#allocation8 + $0x28] sm:$0xf] }
 0x46d   :  { %v11352_v16 = vpop.eup %11351  ;;  %v4135_v39 = vmul.f32 0.5, %v11350_v13  ;;  %11355 = vtanh.f32 %v4142_v37  ;;  %v9684_v37 = vld [vmem:[#allocation8 + $0xb8] sm:$0xf0]  ;;  %v11018_v13 = vld [vmem:[#allocation8 + $0x8c] sm:$0xf0] }
 0x46e   :  { %v4155_v53 = vpack.c.bf16 %v12177_v38, %v12177_v38  ;;  %v4139_v49 = vmul.f32 0.5, %v11352_v16  ;;  %v9679_v16 = vor.u32 %v11020_v56, %v9676_v23  ;;  %v11002_v23 = vld [vmem:[#allocation8 + $0xc] sm:$0xf0]  ;;  %v11009_v30 = vld [vmem:[#allocation8 + $0x4c] sm:$0xf] }
 0x46f   :  { %v4136_v8 = vadd.f32 0.5, %v4135_v39  ;;  %v9687_v39 = vor.u32 %v11021_v24, %v9684_v37  ;;  %v9602_v24 = vld [vmem:[#allocation8 + $0x8] sm:$0xf]  ;;  %v11058_v33 = vld [vmem:[#allocation10 + $0xcc] sm:$0xf0] }
 0x470   :  { %v4140_v10 = vadd.f32 0.5, %v4139_v49  ;;  %v4084_v4 = vpop.f32.mrf.mxu2  ;;  %v4097_v17 = vpop.f32.mrf.mxu3  ;;  %4356 = vmatmul.bf16.vlgmr.msra.gmra.mxu0 %v4155_v53  ;;  %4369 = vmatmul.bf16.vlgmr.msra.gmra.mxu1 %v4155_v53  ;;  %v9659_v49 = vor.u32 %v11018_v13, %v9658_v20  ;;  %v9644_v20 = vld [vmem:[#allocation8 + $0x70] sm:$0xf0] }
 0x471   :  { %v11354_v55 = vpop.eup %11353  ;;  %4382 = vmatmul.bf16.vlgmr.msra.gmra.mxu2 %v4155_v53  ;;  %4395 = vmatmul.bf16.vlgmr.msra.gmra.mxu3 %v4155_v53  ;;  %v9668_v53 = vld [vmem:[#allocation8 + $0x98] sm:$0xf0] }
 0x472   :  { %v4146_v28 = vmul.f32 %v4140_v10, %v12154_v15  ;;  %v4147_v43 = vmul.f32 %v11354_v55, %v4136_v8  ;;  %4894 = vmatpush.bf16.msra.mxu0 %v9707_v59  ;;  %4920 = vmatpush.bf16.msra.mxu2 %v9715_v45  ;;  %v9675_v15 = vor.u32 %v11022_v60, %v9674_v6  ;;  %v11016_v59 = vld [vmem:[#allocation8 + $0x84] sm:$0xf]  ;;  %v11015_v10 = vld [vmem:[#allocation8 + $0x74] sm:$0xf0]  ;;  %v9626_v55 = vld [vmem:[#allocation8 + $0x40] sm:$0xf] }
 0x473   :  { %4907 = vmatpush.bf16.msra.mxu1 %v9711_v62  ;;  %4933 = vmatpush.bf16.msra.mxu3 %v9719_v31  ;;  %v11356_v42 = vpop.eup %11355  ;;  %v9667_v45 = vor.u32 %v11019_v41, %v9666_v32  ;;  %v9663_v8 = vor.u32 %v11016_v59, %v9660_v48  ;;  %v9671_v62 = vor.u32 %v11017_v46, %v9668_v53  ;;  %v9610_v60 = vld [vmem:[#allocation8 + $0x20] sm:$0xf]  ;;  %v9652_v41 = vld [vmem:[#allocation8 + $0x78] sm:$0xf0]  ;;  %v11062_v59 = vld [vmem:[#allocation10 + $0xec] sm:$0xf0] }
 0x474   :  { %v12182_v61 = vadd.f32 %v4147_v43, %v4146_v28  ;;  %v4144_v44 = vmul.f32 0.5, %v11356_v42  ;;  %v9651_v40 = vor.u32 %v11015_v10, %v9650_v26  ;;  %v9634_v28 = vld [vmem:[#allocation8 + $0x48] sm:$0xf]  ;;  %v11011_v43 = vld [vmem:[#allocation8 + $0x54] sm:$0xf0] }
 0x475   :  { %v9635_v6 = vor.u32 %v11011_v43, %v9634_v28  ;;  %v9594_v42 = vld [vmem:[#allocation8] sm:$0xf]  ;;  %v9842_v48 = vld [vmem:[#allocation10 + $0xe8] sm:$0xf]  ;;  %v11063_v46 = vld [vmem:[#allocation10 + $0xf4] sm:$0xf0] }
 0x476   :  { %11357 = vtanh.f32 %v12182_v61  ;;  %4895 = vmatpush.bf16.msra.mxu0 %v9691_v22  ;;  %4921 = vmatpush.bf16.msra.mxu2 %v9699_v36  ;;  %v4145_v57 = vadd.f32 0.5, %v4144_v44  ;;  %v11010_v22 = vld [vmem:[#allocation8 + $0x4c] sm:$0xf0]  ;;  %v9595_v37 = vor.u32 %v11002_v23, %v9594_v42  ;;  %v11013_v44 = vld [vmem:[#allocation8 + $0x6c] sm:$0xf] }
 0x477   :  { %4908 = vmatpush.bf16.msra.mxu1 %v9695_v7  ;;  %4934 = vmatpush.bf16.msra.mxu3 %v9703_v5  ;;  %v9627_v36 = vor.u32 %v11010_v22, %v9626_v55  ;;  %v11007_v7 = vld [vmem:[#allocation8 + $0x34] sm:$0xf0]  ;;  %v9611_v5 = vor.u32 %v11006_v29, %v9610_v60  ;;  %v11004_v55 = vld [vmem:[#allocation8 + $0x24] sm:$0xf]  ;;  %v9612_v22 = vld [vmem:[#allocation8 + $0x30] sm:$0xf0] }
 0x478   :  { %v9619_v56 = vor.u32 %v11007_v7, %v9618_v9  ;;  %v11005_v28 = vld [vmem:[#allocation8 + $0x2c] sm:$0xf]  ;;  %v9615_v43 = vor.u32 %v11004_v55, %v9612_v22  ;;  %v11054_v60 = vld [vmem:[#allocation10 + $0xac] sm:$0xf0]  ;;  %v9810_v7 = vld [vmem:[#allocation10 + $0xa8] sm:$0xf] }
 0x479   :  { %v11000_v42 = vld [vmem:[#allocation8 + $0x4] sm:$0xf]  ;;  %v9596_v23 = vld [vmem:[#allocation8 + $0x10] sm:$0xf0]  ;;  %v9754_v55 = vld [vmem:[#allocation10 + $0x40] sm:$0xf] }
 0x47a   :  { %4896 = vmatpush.bf16.msra.mxu0 %v9675_v15  ;;  %4922 = vmatpush.bf16.msra.mxu2 %v9683_v63  ;;  %v11003_v15 = vld [vmem:[#allocation8 + $0x14] sm:$0xf0]  ;;  %v11012_v63 = vld [vmem:[#allocation8 + $0x64] sm:$0xf]  ;;  %v11042_v22 = vld [vmem:[#allocation10 + $0x4c] sm:$0xf0] }
 0x47b   :  { %4909 = vmatpush.bf16.msra.mxu1 %v9679_v16  ;;  %4935 = vmatpush.bf16.msra.mxu3 %v9687_v39  ;;  %v9603_v13 = vor.u32 %v11003_v15, %v9602_v24  ;;  %v9647_v32 = vor.u32 %v11012_v63, %v9644_v20  ;;  %v9834_v16 = vld [vmem:[#allocation10 + $0xe0] sm:$0xf]  ;;  %v9655_v39 = vor.u32 %v11013_v44, %v9652_v41  ;;  %v11001_v24 = vld [vmem:[#allocation8 + $0xc] sm:$0xf]  ;;  %v9604_v15 = vld [vmem:[#allocation8 + $0x18] sm:$0xf0] }
 0x47c   :  { %v11358_v31 = vpop.eup %11357  ;;  %v9835_v53 = vor.u32 %v11062_v59, %v9834_v16  ;;  %v9786_v63 = vld [vmem:[#allocation10 + $0x80] sm:$0xf]  ;;  %v11050_v20 = vld [vmem:[#allocation10 + $0x8c] sm:$0xf0]  ;;  %v9794_v44 = vld [vmem:[#allocation10 + $0x88] sm:$0xf] }
 0x47d   :  { %v12185_v4 = vmul.f32 %v11358_v31, %v4145_v57  ;;  %v9628_v57 = vld [vmem:[#allocation8 + $0x50] sm:$0xf0]  ;;  %v9818_v31 = vld [vmem:[#allocation10 + $0xc0] sm:$0xf]  ;;  %v11051_v41 = vld [vmem:[#allocation10 + $0x94] sm:$0xf0] }
 0x47e   :  { %4897 = vmatpush.bf16.msra.mxu0 %v9659_v49  ;;  %4923 = vmatpush.bf16.msra.mxu2 %v9667_v45  ;;  %v9843_v49 = vor.u32 %v11063_v46, %v9842_v48  ;;  %v11008_v45 = vld [vmem:[#allocation8 + $0x44] sm:$0xf]  ;;  %v9819_v10 = vor.u32 %v11058_v33, %v9818_v31  ;;  %v9836_v59 = vld [vmem:[#allocation10 + $0xf0] sm:$0xf0]  ;;  %v11061_v48 = vld [vmem:[#allocation10 + $0xec] sm:$0xf] }
 0x47f   :  { %v4400_v17 = vpack.c.bf16 %v12185_v4, %v12185_v4  ;;  %4910 = vmatpush.bf16.msra.mxu1 %v9663_v8  ;;  %4936 = vmatpush.bf16.msra.mxu3 %v9671_v62  ;;  %v9631_v8 = vor.u32 %v11008_v45, %v9628_v57  ;;  %v9636_v62 = vld [vmem:[#allocation8 + $0x58] sm:$0xf0]  ;;  %v11060_v16 = vld [vmem:[#allocation10 + $0xe4] sm:$0xf]  ;;  %v9770_v45 = vld [vmem:[#allocation10 + $0x60] sm:$0xf] }
 0x480   :  { %v9639_v26 = vor.u32 %v11009_v30, %v9636_v62  ;;  %v9844_v46 = vld [vmem:[#allocation10 + $0xf8] sm:$0xf0]  ;;  %v11046_v57 = vld [vmem:[#allocation10 + $0x6c] sm:$0xf0]  ;;  %v9778_v30 = vld [vmem:[#allocation10 + $0x68] sm:$0xf] }
 0x481   :  { %4601 = vmatmul.bf16.vlgmr.msrb.gmra.mxu0 %v4400_v17  ;;  %4614 = vmatmul.bf16.vlgmr.msrb.gmra.mxu1 %v4400_v17  ;;  %v11047_v62 = vld [vmem:[#allocation10 + $0x74] sm:$0xf0]  ;;  %v11056_v31 = vld [vmem:[#allocation10 + $0xc4] sm:$0xf]  ;;  %v9820_v33 = vld [vmem:[#allocation10 + $0xd0] sm:$0xf0] }
 0x482   :  { %4627 = vmatmul.bf16.vlgmr.msrb.gmra.mxu2 %v4400_v17  ;;  %4640 = vmatmul.bf16.vlgmr.msrb.gmra.mxu3 %v4400_v17  ;;  %v9826_v17 = vld [vmem:[#allocation10 + $0xc8] sm:$0xf] }
 0x483   :  { %4898 = vmatpush.bf16.msra.mxu0 %v9643_v21  ;;  %4924 = vmatpush.bf16.msra.mxu2 %v9651_v40  ;;  %v11059_v21 = vld [vmem:[#allocation10 + $0xd4] sm:$0xf0] }
 0x484   :  { %4911 = vmatpush.bf16.msra.mxu1 %v9647_v32  ;;  %4937 = vmatpush.bf16.msra.mxu3 %v9655_v39  ;;  %v9827_v40 = vor.u32 %v11059_v21, %v9826_v17  ;;  %v9787_v32 = vor.u32 %v11050_v20, %v9786_v63  ;;  %v9795_v39 = vor.u32 %v11051_v41, %v9794_v44  ;;  %v11057_v17 = vld [vmem:[#allocation10 + $0xcc] sm:$0xf]  ;;  %v9828_v21 = vld [vmem:[#allocation10 + $0xd8] sm:$0xf0]  ;;  %v11048_v63 = vld [vmem:[#allocation10 + $0x84] sm:$0xf] }
 0x485   :  { %v9788_v20 = vld [vmem:[#allocation10 + $0x90] sm:$0xf0]  ;;  %v11049_v44 = vld [vmem:[#allocation10 + $0x8c] sm:$0xf]  ;;  %v9796_v41 = vld [vmem:[#allocation10 + $0x98] sm:$0xf0] }
 0x487   :  { %4899 = vmatpush.bf16.msra.mxu0 %v9627_v36  ;;  %4925 = vmatpush.bf16.msra.mxu2 %v9635_v6  ;;  %v9620_v36 = vld [vmem:[#allocation8 + $0x38] sm:$0xf0]  ;;  %v9802_v6 = vld [vmem:[#allocation10 + $0xa0] sm:$0xf] }
 0x488   :  { %4912 = vmatpush.bf16.msra.mxu1 %v9631_v8  ;;  %4938 = vmatpush.bf16.msra.mxu3 %v9639_v26  ;;  %v9623_v29 = vor.u32 %v11005_v28, %v9620_v36  ;;  %v9803_v9 = vor.u32 %v11054_v60, %v9802_v6  ;;  %v9771_v8 = vor.u32 %v11046_v57, %v9770_v45  ;;  %v9762_v28 = vld [vmem:[#allocation10 + $0x48] sm:$0xf]  ;;  %v11043_v36 = vld [vmem:[#allocation10 + $0x54] sm:$0xf0]  ;;  %v11052_v6 = vld [vmem:[#allocation10 + $0xa4] sm:$0xf] }
 0x489   :  { %v9779_v26 = vor.u32 %v11047_v62, %v9778_v30  ;;  %v9804_v60 = vld [vmem:[#allocation10 + $0xb0] sm:$0xf0] }
 0x48a   :  { %v9772_v45 = vld [vmem:[#allocation10 + $0x70] sm:$0xf0] }
 0x48b   :  { %4900 = vmatpush.bf16.msra.mxu0 %v9611_v5  ;;  %4926 = vmatpush.bf16.msra.mxu2 %v9619_v56  ;;  %v11055_v5 = vld [vmem:[#allocation10 + $0xb4] sm:$0xf0] }
 0x48c   :  { %4913 = vmatpush.bf16.msra.mxu1 %v9615_v43  ;;  %v9811_v56 = vor.u32 %v11055_v5, %v9810_v7  ;;  %4939 = vmatpush.bf16.msra.mxu3 %v9623_v29  ;;  %v9755_v43 = vor.u32 %v11042_v22, %v9754_v55  ;;  %v9763_v29 = vor.u32 %v11043_v36, %v9762_v28  ;;  %v11053_v7 = vld [vmem:[#allocation10 + $0xac] sm:$0xf]  ;;  %v9812_v5 = vld [vmem:[#allocation10 + $0xb8] sm:$0xf0]  ;;  %v11040_v28 = vld [vmem:[#allocation10 + $0x44] sm:$0xf] }
 0x48f   :  { %4901 = vmatpush.bf16.msra.mxu0 %v9595_v37  ;;  %4927 = vmatpush.bf16.msra.mxu2 %v9603_v13  ;;  %v9599_v37 = vor.u32 %v11000_v42, %v9596_v23  ;;  %v9607_v13 = vor.u32 %v11001_v24, %v9604_v15  ;;  %v9738_v42 = vld [vmem:[#allocation10 + $0x20] sm:$0xf]  ;;  %v11038_v23 = vld [vmem:[#allocation10 + $0x2c] sm:$0xf0]  ;;  %v9746_v24 = vld [vmem:[#allocation10 + $0x28] sm:$0xf] }
 0x490   :  { %v11039_v15 = vld [vmem:[#allocation10 + $0x34] sm:$0xf0] }
 0x491   :  { %4914 = vmatpush.bf16.msra.mxu1 %v9599_v37  ;;  %4940 = vmatpush.bf16.msra.mxu3 %v9607_v13  ;;  %v9739_v37 = vor.u32 %v11038_v23, %v9738_v42  ;;  %v9747_v13 = vor.u32 %v11039_v15, %v9746_v24  ;;  %v11037_v42 = vld [vmem:[#allocation10 + $0x2c] sm:$0xf]  ;;  %v13008_v23 = vld [vmem:[#allocation31_spill] sm:$0xff] }
 0x493   :  { %5139 = vmatpush.bf16.msrb.mxu0 %v9835_v53  ;;  %5165 = vmatpush.bf16.msrb.mxu2 %v9843_v49  ;;  %v9839_v53 = vor.u32 %v11060_v16, %v9836_v59  ;;  %v9847_v49 = vor.u32 %v11061_v48, %v9844_v46  ;;  %v9799_v16 = vor.u32 %v11049_v44, %v9796_v41  ;;  %v11034_v59 = vld [vmem:[#allocation10 + $0xc] sm:$0xf0]  ;;  %v9730_v48 = vld [vmem:[#allocation10 + $0x8] sm:$0xf] }
 0x495   :  { %5152 = vmatpush.bf16.msrb.mxu1 %v9839_v53  ;;  %5178 = vmatpush.bf16.msrb.mxu3 %v9847_v49  ;;  %v11035_v53 = vld [vmem:[#allocation10 + $0x14] sm:$0xf0]  ;;  %v11044_v49 = vld [vmem:[#allocation10 + $0x64] sm:$0xf] }
 0x496   :  { %v9775_v62 = vor.u32 %v11044_v49, %v9772_v45  ;;  %v9732_v45 = vld [vmem:[#allocation10 + $0x18] sm:$0xf0] }
 0x497   :  { %5140 = vmatpush.bf16.msrb.mxu0 %v9819_v10  ;;  %5166 = vmatpush.bf16.msrb.mxu2 %v9827_v40  ;;  %v9823_v10 = vor.u32 %v11056_v31, %v9820_v33  ;;  %v9831_v40 = vor.u32 %v11057_v17, %v9828_v21  ;;  %v11045_v31 = vld [vmem:[#allocation10 + $0x6c] sm:$0xf]  ;;  %v9780_v33 = vld [vmem:[#allocation10 + $0x78] sm:$0xf0] }
 0x498   :  { %v13007_v17 = vld [vmem:[#allocation30_spill] sm:$0xff] }
 0x499   :  { %5153 = vmatpush.bf16.msrb.mxu1 %v9823_v10  ;;  %5179 = vmatpush.bf16.msrb.mxu3 %v9831_v40  ;;  %v9783_v40 = vor.u32 %v11045_v31, %v9780_v33 }
 0x49b   :  { %5141 = vmatpush.bf16.msrb.mxu0 %v9803_v9  ;;  %5167 = vmatpush.bf16.msrb.mxu2 %v9811_v56  ;;  %v9807_v9 = vor.u32 %v11052_v6, %v9804_v60  ;;  %v9815_v56 = vor.u32 %v11053_v7, %v9812_v5  ;;  %v11041_v6 = vld [vmem:[#allocation10 + $0x4c] sm:$0xf]  ;;  %v9764_v60 = vld [vmem:[#allocation10 + $0x58] sm:$0xf0]  ;;  %v11036_v5 = vld [vmem:[#allocation10 + $0x24] sm:$0xf] }
 0x49d   :  { %5154 = vmatpush.bf16.msrb.mxu1 %v9807_v9  ;;  %5180 = vmatpush.bf16.msrb.mxu3 %v9815_v56  ;;  %v9740_v56 = vld [vmem:[#allocation10 + $0x30] sm:$0xf0] }
 0x49f   :  { %5142 = vmatpush.bf16.msrb.mxu0 %v9787_v32  ;;  %5168 = vmatpush.bf16.msrb.mxu2 %v9795_v39  ;;  %v9791_v32 = vor.u32 %v11048_v63, %v9788_v20  ;;  %v9722_v39 = vld [vmem:[#allocation10] sm:$0xf] }
 0x4a0   :  { %v9723_v46 = vor.u32 %v11034_v59, %v9722_v39  ;;  %v11032_v39 = vld [vmem:[#allocation10 + $0x4] sm:$0xf]  ;;  %v9724_v59 = vld [vmem:[#allocation10 + $0x10] sm:$0xf0] }
 0x4a1   :  { %5155 = vmatpush.bf16.msrb.mxu1 %v9791_v32  ;;  %5181 = vmatpush.bf16.msrb.mxu3 %v9799_v16  ;;  %v9748_v32 = vld [vmem:[#allocation10 + $0x38] sm:$0xf0]  ;;  %v9727_v49 = vor.u32 %v11032_v39, %v9724_v59  ;;  %v10076_v39 = vld [vmem:[#allocation11 + $0x1e0] sm:$0xf0] }
 0x4a2   :  { %v9751_v44 = vor.u32 %v11037_v42, %v9748_v32  ;;  %v11124_v32 = vld [vmem:[#allocation11 + $0x1dc] sm:$0xf0] }
 0x4a3   :  { %5143 = vmatpush.bf16.msrb.mxu0 %v9771_v8  ;;  %5169 = vmatpush.bf16.msrb.mxu2 %v9779_v26  ;;  %v9731_v8 = vor.u32 %v11035_v53, %v9730_v48  ;;  %v13006_v26 = vld [vmem:[#allocation29_spill] sm:$0xff]  ;;  %v11033_v48 = vld [vmem:[#allocation10 + $0xc] sm:$0xf] }
 0x4a5   :  { %5156 = vmatpush.bf16.msrb.mxu1 %v9775_v62  ;;  %5182 = vmatpush.bf16.msrb.mxu3 %v9783_v40 }
 0x4a7   :  { %5144 = vmatpush.bf16.msrb.mxu0 %v9755_v43  ;;  %5170 = vmatpush.bf16.msrb.mxu2 %v9763_v29  ;;  %v9756_v43 = vld [vmem:[#allocation10 + $0x50] sm:$0xf0]  ;;  %v9767_v29 = vor.u32 %v11041_v6, %v9764_v60 }
 0x4a8   :  { %v9759_v36 = vor.u32 %v11040_v28, %v9756_v43 }
 0x4a9   :  { %5183 = vmatpush.bf16.msrb.mxu3 %v9767_v29 }
 0x4aa   :  { %5157 = vmatpush.bf16.msrb.mxu1 %v9759_v36 }
 0x4ab   :  { %5145 = vmatpush.bf16.msrb.mxu0 %v9739_v37  ;;  %5171 = vmatpush.bf16.msrb.mxu2 %v9747_v13  ;;  %v13009_v37 = vld [vmem:[#allocation33_spill] sm:$0xff]  ;;  %v9743_v13 = vor.u32 %v11036_v5, %v9740_v56  ;;  %v13013_v56 = vld [vmem:[#allocation44_spill] sm:$0xff] }
 0x4ad   :  { %5184 = vmatpush.bf16.msrb.mxu3 %v9751_v44 }
 0x4ae   :  { %5158 = vmatpush.bf16.msrb.mxu1 %v9743_v13  ;;  %v10074_v13 = vld [vmem:[#allocation11 + $0x1c0] sm:$0xf] }
 0x4af   :  { %5146 = vmatpush.bf16.msrb.mxu0 %v9723_v46  ;;  %5172 = vmatpush.bf16.msrb.mxu2 %v9731_v8 }
 0x4b2   :  { %5159 = vmatpush.bf16.msrb.mxu1 %v9727_v49 }
 0x4ed   :  { %v4357_v57 = vpop.f32.mrf.mxu0  ;;  %v4370_v30 = vpop.f32.mrf.mxu1 }
 0x4ee   :  { %v4649_v10 = vadd.f32 %v4357_v57, %v13006_v26  ;;  %v4650_v21 = vadd.f32 %v4370_v30, %v13007_v17  ;;  %v9735_v30 = vor.u32 %v11033_v48, %v9732_v45 }
 0x4f0   :  { %v4661_v55 = vmul.f32 0.5, %v4649_v10  ;;  %v4665_v22 = vmul.f32 0.5, %v4650_v21  ;;  %v13010_v10 = vld [vmem:[#allocation40_spill] sm:$0xff]  ;;  %v13011_v21 = vld [vmem:[#allocation42_spill] sm:$0xff]  ;;  %5185 = vmatpush.bf16.msrb.mxu3 %v9735_v30  ;;  %v11116_v30 = vld [vmem:[#allocation11 + $0x19c] sm:$0xf0] }
 0x4f1   :  { %v690_v17 = vadd.f32 %v13010_v10, %v11927_v2  ;;  %v719_v40 = vadd.f32 %v13011_v21, %v11929_v3  ;;  %v13012_v3 = vld [vmem:[#allocation43_spill] sm:$0xff] }
 0x4f2   :  { %11359 = vtanh.f32 %v4661_v55  ;;  %v748_v5 = vadd.f32 %v13012_v3, %v11941_v11  ;;  %v9978_v3 = vld [vmem:[#allocation11 + $0x100] sm:$0xf] }
 0x4f3   :  { %11361 = vtanh.f32 %v4665_v22 }
 0x4f4   :  { %v4383_v9 = vpop.f32.mrf.mxu2  ;;  %v4396_v7 = vpop.f32.mrf.mxu3 }
 0x4f5   :  { %v4651_v24 = vadd.f32 %v4383_v9, %v13008_v23  ;;  %v4652_v15 = vadd.f32 %v4396_v7, %v13009_v37  ;;  %v4359_v63 = vpop.f32.mrf.mxu0  ;;  %v4372_v20 = vpop.f32.mrf.mxu1 }
 0x4f7   :  { %11363 = vtanh.f32 %v4651_v24  ;;  %v4670_v41 = vmul.f32 0.5, %v4652_v15 }
 0x4f8   :  { %v11360_v16 = vpop.eup %11359 }
 0x4f9   :  { %v11362_v46 = vpop.eup %11361  ;;  %v4663_v53 = vmul.f32 0.5, %v11360_v16  ;;  %11365 = vtanh.f32 %v4670_v41  ;;  %v11120_v16 = vld [vmem:[#allocation11 + $0x1c4] sm:$0xf] }
 0x4fa   :  { %v4667_v57 = vmul.f32 0.5, %v11362_v46  ;;  %v10075_v46 = vor.u32 %v11124_v32, %v10074_v13  ;;  %v10079_v45 = vor.u32 %v11120_v16, %v10076_v39  ;;  %v9948_v13 = vld [vmem:[#allocation11 + $0xe0] sm:$0xf0]  ;;  %v9914_v39 = vld [vmem:[#allocation11 + $0x80] sm:$0xf] }
 0x4fb   :  { %v4664_v8 = vadd.f32 0.5, %v4663_v53 }
 0x4fc   :  { %v4668_v62 = vadd.f32 0.5, %v4667_v57  ;;  %v4385_v31 = vpop.f32.mrf.mxu2  ;;  %v4398_v33 = vpop.f32.mrf.mxu3  ;;  %v10042_v57 = vld [vmem:[#allocation11 + $0x180] sm:$0xf] }
 0x4fd   :  { %v11364_v26 = vpop.eup %11363  ;;  %v10044_v31 = vld [vmem:[#allocation11 + $0x1a0] sm:$0xf0]  ;;  %v10043_v21 = vor.u32 %v11116_v30, %v10042_v57 }
 0x4fe   :  { %v4674_v55 = vmul.f32 %v4668_v62, %v12172_v18  ;;  %v4675_v22 = vmul.f32 %v11364_v26, %v4664_v8  ;;  %v4602_v28 = vpop.f32.mrf.mxu0  ;;  %v4615_v43 = vpop.f32.mrf.mxu1  ;;  %v777_v18 = vadd.f32 %v13013_v56, %v11943_v12  ;;  %v11112_v62 = vld [vmem:[#allocation11 + $0x184] sm:$0xf] }
 0x4ff   :  { %v4657_v36 = vadd.f32 %v4602_v28, %v690_v17  ;;  %v4658_v6 = vadd.f32 %v4615_v43, %v719_v40  ;;  %v11366_v60 = vpop.eup %11365  ;;  %v10010_v28 = vld [vmem:[#allocation11 + $0x140] sm:$0xf]  ;;  %v11096_v56 = vld [vmem:[#allocation11 + $0x104] sm:$0xf] }
 0x500   :  { %v12198_v29 = vadd.f32 %v4675_v22, %v4674_v55  ;;  %v4672_v2 = vmul.f32 0.5, %v11366_v60  ;;  %v10047_v22 = vor.u32 %v11112_v62, %v10044_v31  ;;  %v11108_v43 = vld [vmem:[#allocation11 + $0x15c] sm:$0xf0]  ;;  %v11072_v57 = vld [vmem:[#allocation11 + $0x44] sm:$0xf] }
 0x501   :  { %v4679_v9 = vmul.f32 0.5, %v4657_v36  ;;  %v4683_v7 = vmul.f32 0.5, %v4658_v6  ;;  %v11104_v36 = vld [vmem:[#allocation11 + $0x144] sm:$0xf]  ;;  %v9850_v31 = vld [vmem:[#allocation11] sm:$0xf] }
 0x502   :  { %11367 = vtanh.f32 %v12198_v29  ;;  %v4673_v20 = vadd.f32 0.5, %v4672_v2  ;;  %v10012_v6 = vld [vmem:[#allocation11 + $0x160] sm:$0xf0] }
 0x503   :  { %11369 = vtanh.f32 %v4679_v9  ;;  %v10015_v2 = vor.u32 %v11104_v36, %v10012_v6  ;;  %v9884_v30 = vld [vmem:[#allocation11 + $0x60] sm:$0xf0]  ;;  %v10082_v6 = vld [vmem:[#allocation11 + $0x1c8] sm:$0xf] }
 0x504   :  { %11371 = vtanh.f32 %v4683_v7  ;;  %v10011_v7 = vor.u32 %v11108_v43, %v10010_v28  ;;  %v9887_v62 = vor.u32 %v11072_v57, %v9884_v30  ;;  %v11184_v28 = vld [vmem:[#allocation11 + $0x3c4] sm:$0xf]  ;;  %v11164_v57 = vld [vmem:[#allocation11 + $0x31c] sm:$0xf0] }
 0x505   :  { %v4628_v42 = vpop.f32.mrf.mxu2  ;;  %v4641_v23 = vpop.f32.mrf.mxu3  ;;  %v10332_v36 = vld [vmem:[#allocation11 + $0x3e0] sm:$0xf0] }
 0x506   :  { %v4659_v24 = vadd.f32 %v4628_v42, %v748_v5  ;;  %v4660_v37 = vadd.f32 %v4641_v23, %v777_v18  ;;  %v4604_v15 = vpop.f32.mrf.mxu0  ;;  %v4617_v63 = vpop.f32.mrf.mxu1  ;;  %v11100_v5 = vld [vmem:[#allocation11 + $0x11c] sm:$0xf0]  ;;  %v9980_v18 = vld [vmem:[#allocation11 + $0x120] sm:$0xf0] }
 0x507   :  { %v9979_v42 = vor.u32 %v11100_v5, %v9978_v3  ;;  %v9983_v23 = vor.u32 %v11096_v56, %v9980_v18  ;;  %v11092_v63 = vld [vmem:[#allocation11 + $0xdc] sm:$0xf0]  ;;  %v11176_v5 = vld [vmem:[#allocation11 + $0x384] sm:$0xf]  ;;  %v10050_v18 = vld [vmem:[#allocation11 + $0x188] sm:$0xf] }
 0x508   :  { %v11368_v44 = vpop.eup %11367  ;;  %11373 = vtanh.f32 %v4659_v24  ;;  %v4688_v41 = vmul.f32 0.5, %v4660_v37  ;;  %v9946_v37 = vld [vmem:[#allocation11 + $0xc0] sm:$0xf]  ;;  %v10300_v56 = vld [vmem:[#allocation11 + $0x3a0] sm:$0xf0] }
 0x509   :  { %v11370_v59 = vpop.eup %11369  ;;  %v12205_v11 = vmul.f32 %v11368_v44, %v4673_v20  ;;  %v11088_v20 = vld [vmem:[#allocation11 + $0xc4] sm:$0xf] }
 0x50a   :  { %v11372_v48 = vpop.eup %11371  ;;  %v4681_v12 = vmul.f32 0.5, %v11370_v59  ;;  %11375 = vtanh.f32 %v4688_v41  ;;  %v9947_v41 = vor.u32 %v11092_v63, %v9946_v37  ;;  %v9951_v16 = vor.u32 %v11088_v20, %v9948_v13  ;;  %v11084_v59 = vld [vmem:[#allocation11 + $0x9c] sm:$0xf0]  ;;  %v11113_v37 = vld [vmem:[#allocation11 + $0x18c] sm:$0xf] }
 0x50b   :  { %v4701_v53 = vpack.c.bf16 %v12205_v11, %v12205_v11  ;;  %v4685_v49 = vmul.f32 0.5, %v11372_v48  ;;  %v11080_v48 = vld [vmem:[#allocation11 + $0x84] sm:$0xf]  ;;  %v10266_v20 = vld [vmem:[#allocation11 + $0x340] sm:$0xf] }
 0x50c   :  { %v4682_v8 = vadd.f32 0.5, %v4681_v12  ;;  %v9916_v12 = vld [vmem:[#allocation11 + $0xa0] sm:$0xf0]  ;;  %v11172_v13 = vld [vmem:[#allocation11 + $0x35c] sm:$0xf0] }
 0x50d   :  { %v4686_v33 = vadd.f32 0.5, %v4685_v49  ;;  %v4630_v26 = vpop.f32.mrf.mxu2  ;;  %v4643_v10 = vpop.f32.mrf.mxu3  ;;  %4902 = vmatmul.bf16.vlgmr.msra.gmra.mxu0 %v4701_v53  ;;  %4915 = vmatmul.bf16.vlgmr.msra.gmra.mxu1 %v4701_v53  ;;  %v9882_v49 = vld [vmem:[#allocation11 + $0x40] sm:$0xf]  ;;  %v11160_v30 = vld [vmem:[#allocation11 + $0x304] sm:$0xf] }
 0x50e   :  { %v11374_v17 = vpop.eup %11373  ;;  %4928 = vmatmul.bf16.vlgmr.msra.gmra.mxu2 %v4701_v53  ;;  %4941 = vmatmul.bf16.vlgmr.msra.gmra.mxu3 %v4701_v53  ;;  %v9919_v53 = vor.u32 %v11080_v48, %v9916_v12  ;;  %v11064_v26 = vld [vmem:[#allocation11 + $0x4] sm:$0xf] }
 0x50f   :  { %v4692_v40 = vmul.f32 %v4686_v33, %v12182_v61  ;;  %v4693_v55 = vmul.f32 %v11374_v17, %v4682_v8  ;;  %6056 = vmatpush.bf16.msra.mxu0 %v10075_v46  ;;  %6114 = vmatpush.bf16.msra.mxu2 %v10079_v45  ;;  %v9915_v46 = vor.u32 %v11084_v59, %v9914_v39  ;;  %v11076_v45 = vld [vmem:[#allocation11 + $0x5c] sm:$0xf0]  ;;  %v9852_v10 = vld [vmem:[#allocation11 + $0x20] sm:$0xf0]  ;;  %v10018_v39 = vld [vmem:[#allocation11 + $0x148] sm:$0xf] }
 0x510   :  { %v11376_v60 = vpop.eup %11375  ;;  %v9883_v8 = vor.u32 %v11076_v45, %v9882_v49  ;;  %v11068_v33 = vld [vmem:[#allocation11 + $0x1c] sm:$0xf0]  ;;  %v11109_v59 = vld [vmem:[#allocation11 + $0x164] sm:$0xf0] }
 0x511   :  { %v12210_v9 = vadd.f32 %v4693_v55, %v4692_v40  ;;  %v4690_v61 = vmul.f32 0.5, %v11376_v60  ;;  %v9851_v17 = vor.u32 %v11068_v33, %v9850_v31  ;;  %v12219_v40 = vpack.c.bf16 %v12065_v51, %v12038_v54  ;;  %v10330_v54 = vld [vmem:[#allocation11 + $0x3c0] sm:$0xf]  ;;  %v9986_v31 = vld [vmem:[#allocation11 + $0x108] sm:$0xf] }
 0x512   :  { %v12225_v55 = vpack.c.bf16 %v12121_v52, %v12093_v14  ;;  %v11188_v51 = vld [vmem:[#allocation11 + $0x3dc] sm:$0xf0]  ;;  %v11125_v14 = vld [vmem:[#allocation11 + $0x1e4] sm:$0xf0]  ;;  %v10335_v52 = vor.u32 %v11184_v28, %v10332_v36  ;;  %v10019_v12 = vor.u32 %v11109_v59, %v10018_v39 }
 0x513   :  { %11377 = vtanh.f32 %v12210_v9  ;;  %6057 = vmatpush.bf16.msra.mxu0 %v10043_v21  ;;  %6115 = vmatpush.bf16.msra.mxu2 %v10047_v22  ;;  %v4691_v24 = vadd.f32 0.5, %v4690_v61  ;;  %v9855_v21 = vor.u32 %v11064_v26, %v9852_v10  ;;  %v12231_v22 = vpack.c.bf16 %v12177_v38, %v12149_v1  ;;  %v10298_v1 = vld [vmem:[#allocation11 + $0x380] sm:$0xf]  ;;  %v11101_v33 = vld [vmem:[#allocation11 + $0x124] sm:$0xf0] }
 0x514   :  { %v10331_v43 = vor.u32 %v11188_v51, %v10330_v54  ;;  %v10083_v60 = vor.u32 %v11125_v14, %v10082_v6  ;;  %6143 = vmatpush.bf16.msra.mxu3 %v10335_v52  ;;  %v11180_v38 = vld [vmem:[#allocation11 + $0x39c] sm:$0xf0]  ;;  %v9987_v10 = vor.u32 %v11101_v33, %v9986_v31  ;;  %v13014_v51 = vld [vmem:[#allocation32_spill] sm:$0xff]  ;;  %v11152_v52 = vld [vmem:[#allocation11 + $0x2c4] sm:$0xf] }
 0x515   :  { %v10299_v61 = vor.u32 %v11180_v38, %v10298_v1  ;;  %v10234_v45 = vld [vmem:[#allocation11 + $0x300] sm:$0xf]  ;;  %v589_v28 = vadd.f32 %v13014_v51, %v11855_v25  ;;  %v9954_v1 = vld [vmem:[#allocation11 + $0xc8] sm:$0xf] }
 0x516   :  { %6085 = vmatpush.bf16.msra.mxu1 %v10331_v43  ;;  %v13015_v43 = vld [vmem:[#allocation34_spill] sm:$0xff]  ;;  %v10202_v6 = vld [vmem:[#allocation11 + $0x2c0] sm:$0xf] }
 0x517   :  { %6058 = vmatpush.bf16.msra.mxu0 %v10011_v7  ;;  %6116 = vmatpush.bf16.msra.mxu2 %v10015_v2  ;;  %v11121_v7 = vld [vmem:[#allocation11 + $0x1cc] sm:$0xf]  ;;  %v618_v36 = vadd.f32 %v13015_v43, %v11859_v27  ;;  %v11156_v14 = vld [vmem:[#allocation11 + $0x2dc] sm:$0xf0]  ;;  %v11085_v59 = vld [vmem:[#allocation11 + $0xa4] sm:$0xf0] }
 0x518   :  { %v10084_v2 = vld [vmem:[#allocation11 + $0x1e8] sm:$0xf0]  ;;  %v11077_v51 = vld [vmem:[#allocation11 + $0x64] sm:$0xf0] }
 0x519   :  { %v11378_v15 = vpop.eup %11377  ;;  %v10087_v3 = vor.u32 %v11121_v7, %v10084_v2  ;;  %v10203_v2 = vor.u32 %v11156_v14, %v10202_v6  ;;  %v9892_v43 = vld [vmem:[#allocation11 + $0x68] sm:$0xf0] }
 0x51a   :  { %v12213_v32 = vmul.f32 %v11378_v15, %v4691_v24  ;;  %v10052_v15 = vld [vmem:[#allocation11 + $0x1a8] sm:$0xf0]  ;;  %6086 = vmatpush.bf16.msra.mxu1 %v10299_v61 }
 0x51b   :  { %6059 = vmatpush.bf16.msra.mxu0 %v9979_v42  ;;  %6117 = vmatpush.bf16.msra.mxu2 %v9983_v23  ;;  %v11117_v42 = vld [vmem:[#allocation11 + $0x1a4] sm:$0xf0]  ;;  %v10303_v23 = vor.u32 %v11176_v5, %v10300_v56  ;;  %v10055_v63 = vor.u32 %v11113_v37, %v10052_v15  ;;  %v10170_v37 = vld [vmem:[#allocation11 + $0x280] sm:$0xf] }
 0x51c   :  { %v4946_v44 = vpack.c.bf16 %v12213_v32, %v12213_v32  ;;  %v10051_v24 = vor.u32 %v11117_v42, %v10050_v18  ;;  %v11093_v56 = vld [vmem:[#allocation11 + $0xe4] sm:$0xf0]  ;;  %v11089_v18 = vld [vmem:[#allocation11 + $0xcc] sm:$0xf]  ;;  %v11148_v15 = vld [vmem:[#allocation11 + $0x29c] sm:$0xf0] }
 0x51d   :  { %6144 = vmatpush.bf16.msra.mxu3 %v10303_v23  ;;  %v9955_v25 = vor.u32 %v11093_v56, %v9954_v1  ;;  %v9956_v42 = vld [vmem:[#allocation11 + $0xe8] sm:$0xf0] }
 0x51e   :  { %5147 = vmatmul.bf16.vlgmr.msrb.gmra.mxu0 %v4946_v44  ;;  %5160 = vmatmul.bf16.vlgmr.msrb.gmra.mxu1 %v4946_v44 }
 0x51f   :  { %5173 = vmatmul.bf16.vlgmr.msrb.gmra.mxu2 %v4946_v44  ;;  %5186 = vmatmul.bf16.vlgmr.msrb.gmra.mxu3 %v4946_v44  ;;  %v11168_v44 = vld [vmem:[#allocation11 + $0x344] sm:$0xf] }
 0x520   :  { %6060 = vmatpush.bf16.msra.mxu0 %v9947_v41  ;;  %6118 = vmatpush.bf16.msra.mxu2 %v9951_v16  ;;  %v10267_v41 = vor.u32 %v11172_v13, %v10266_v20  ;;  %v10268_v16 = vld [vmem:[#allocation11 + $0x360] sm:$0xf0] }
 0x521   :  { %v10271_v48 = vor.u32 %v11168_v44, %v10268_v16  ;;  %v11144_v20 = vld [vmem:[#allocation11 + $0x284] sm:$0xf]  ;;  %v9922_v44 = vld [vmem:[#allocation11 + $0x88] sm:$0xf] }
 0x522   :  { %6087 = vmatpush.bf16.msra.mxu1 %v10267_v41  ;;  %v10172_v13 = vld [vmem:[#allocation11 + $0x2a0] sm:$0xf0]  ;;  %v13016_v41 = vld [vmem:[#allocation35_spill] sm:$0xff] }
 0x523   :  { %6145 = vmatpush.bf16.msra.mxu3 %v10271_v48  ;;  %v647_v16 = vadd.f32 %v13016_v41, %v11873_v34  ;;  %v10175_v39 = vor.u32 %v11144_v20, %v10172_v13  ;;  %v11081_v48 = vld [vmem:[#allocation11 + $0x8c] sm:$0xf] }
 0x524   :  { %6061 = vmatpush.bf16.msra.mxu0 %v9915_v46  ;;  %6119 = vmatpush.bf16.msra.mxu2 %v9919_v53  ;;  %v11105_v46 = vld [vmem:[#allocation11 + $0x14c] sm:$0xf] }
 0x525   :  { %v10020_v53 = vld [vmem:[#allocation11 + $0x168] sm:$0xf0] }
 0x526   :  { %v10023_v49 = vor.u32 %v11105_v46, %v10020_v53  ;;  %v13017_v46 = vld [vmem:[#allocation36_spill] sm:$0xff] }
 0x527   :  { %v676_v53 = vadd.f32 %v13017_v46, %v11875_v35 }
 0x528   :  { %6062 = vmatpush.bf16.msra.mxu0 %v9883_v8  ;;  %6120 = vmatpush.bf16.msra.mxu2 %v9887_v62  ;;  %v10235_v8 = vor.u32 %v11164_v57, %v10234_v45  ;;  %v10236_v62 = vld [vmem:[#allocation11 + $0x320] sm:$0xf0] }
 0x529   :  { %v10239_v26 = vor.u32 %v11160_v30, %v10236_v62  ;;  %v11140_v62 = vld [vmem:[#allocation11 + $0x25c] sm:$0xf0] }
 0x52a   :  { %6088 = vmatpush.bf16.msra.mxu1 %v10235_v8  ;;  %v10138_v8 = vld [vmem:[#allocation11 + $0x240] sm:$0xf] }
 0x52b   :  { %6146 = vmatpush.bf16.msra.mxu3 %v10239_v26 }
 0x52c   :  { %6063 = vmatpush.bf16.msra.mxu0 %v9851_v17  ;;  %6121 = vmatpush.bf16.msra.mxu2 %v9855_v21  ;;  %v11097_v17 = vld [vmem:[#allocation11 + $0x10c] sm:$0xf] }
 0x52d   :  { %v9988_v21 = vld [vmem:[#allocation11 + $0x128] sm:$0xf0] }
 0x52e   :  { %v9991_v54 = vor.u32 %v11097_v17, %v9988_v21  ;;  %6089 = vmatpush.bf16.msra.mxu1 %v10203_v2  ;;  %v11136_v17 = vld [vmem:[#allocation11 + $0x244] sm:$0xf] }
 0x52f   :  { %6064 = vmatmul.bf16.vlgmr.msra.gmra.mxu0 %v12219_v40  ;;  %6122 = vmatmul.bf16.vlgmr.msra.gmra.mxu2 %v12219_v40  ;;  %v10140_v21 = vld [vmem:[#allocation11 + $0x260] sm:$0xf0] }
 0x530   :  { %6172 = vmatpush.bf16.msrb.mxu0 %v10083_v60  ;;  %6230 = vmatpush.bf16.msrb.mxu2 %v10087_v3  ;;  %v10204_v3 = vld [vmem:[#allocation11 + $0x2e0] sm:$0xf0]  ;;  %v10143_v35 = vor.u32 %v11136_v17, %v10140_v21  ;;  %v13020_v17 = vld [vmem:[#allocation39_spill] sm:$0xff] }
 0x531   :  { %v10207_v61 = vor.u32 %v11152_v52, %v10204_v3  ;;  %v11128_v2 = vld [vmem:[#allocation11 + $0x204] sm:$0xf] }
 0x533   :  { %6147 = vmatpush.bf16.msra.mxu3 %v10207_v61  ;;  %v9858_v61 = vld [vmem:[#allocation11 + $0x8] sm:$0xf] }
 0x534   :  { %6173 = vmatpush.bf16.msrb.mxu0 %v10051_v24  ;;  %6231 = vmatpush.bf16.msrb.mxu2 %v10055_v63  ;;  %v9959_v24 = vor.u32 %v11089_v18, %v9956_v42  ;;  %v10171_v63 = vor.u32 %v11148_v15, %v10170_v37  ;;  %v11065_v42 = vld [vmem:[#allocation11 + $0xc] sm:$0xf] }
 0x536   :  { %6090 = vmatpush.bf16.msra.mxu1 %v10171_v63 }
 0x537   :  { %6148 = vmatpush.bf16.msra.mxu3 %v10175_v39 }
 0x538   :  { %6174 = vmatpush.bf16.msrb.mxu0 %v10019_v12  ;;  %6232 = vmatpush.bf16.msrb.mxu2 %v10023_v49  ;;  %v9924_v12 = vld [vmem:[#allocation11 + $0xa8] sm:$0xf0]  ;;  %v9923_v49 = vor.u32 %v11085_v59, %v9922_v44  ;;  %v10338_v59 = vld [vmem:[#allocation11 + $0x3c8] sm:$0xf] }
 0x539   :  { %v9927_v45 = vor.u32 %v11081_v48, %v9924_v12  ;;  %v11189_v48 = vld [vmem:[#allocation11 + $0x3e4] sm:$0xf0]  ;;  %v13018_v12 = vld [vmem:[#allocation37_spill] sm:$0xff] }
 0x53b   :  { %6149 = vmatpush.bf16.msra.mxu3 %v10143_v35 }
 0x53c   :  { %6175 = vmatpush.bf16.msrb.mxu0 %v9987_v10  ;;  %6233 = vmatpush.bf16.msrb.mxu2 %v9991_v54  ;;  %v10139_v10 = vor.u32 %v11140_v62, %v10138_v8  ;;  %v9890_v54 = vld [vmem:[#allocation11 + $0x48] sm:$0xf]  ;;  %v11185_v8 = vld [vmem:[#allocation11 + $0x3cc] sm:$0xf] }
 0x53d   :  { %v9891_v6 = vor.u32 %v11077_v51, %v9890_v54  ;;  %v10340_v62 = vld [vmem:[#allocation11 + $0x3e8] sm:$0xf0]  ;;  %v13021_v54 = vld [vmem:[#allocation41_spill] sm:$0xff] }
 0x53e   :  { %6091 = vmatpush.bf16.msra.mxu1 %v10139_v10 }
 0x53f   :  { %6069 = vmatmul.bf16.gmra.mxu0 %v12225_v55  ;;  %6127 = vmatmul.bf16.gmra.mxu2 %v12225_v55 }
 0x540   :  { %6176 = vmatpush.bf16.msrb.mxu0 %v9955_v25  ;;  %6234 = vmatpush.bf16.msrb.mxu2 %v9959_v24  ;;  %v11069_v25 = vld [vmem:[#allocation11 + $0x24] sm:$0xf0]  ;;  %v9860_v24 = vld [vmem:[#allocation11 + $0x28] sm:$0xf0] }
 0x541   :  { %v9863_v20 = vor.u32 %v11065_v42, %v9860_v24 }
 0x544   :  { %6177 = vmatpush.bf16.msrb.mxu0 %v9923_v49  ;;  %6235 = vmatpush.bf16.msrb.mxu2 %v9927_v45  ;;  %v10339_v45 = vor.u32 %v11189_v48, %v10338_v59  ;;  %v10242_v48 = vld [vmem:[#allocation11 + $0x308] sm:$0xf] }
 0x548   :  { %6178 = vmatpush.bf16.msrb.mxu0 %v9891_v6 }
 0x54f   :  { %6074 = vmatmul.bf16.gmra.mxu0 %v12231_v22  ;;  %6132 = vmatmul.bf16.gmra.mxu2 %v12231_v22 }
 0x58a   :  { %v4903_v60 = vpop.f32.mrf.mxu0  ;;  %v4916_v7 = vpop.f32.mrf.mxu1 }
 0x58b   :  { %v5195_v38 = vadd.f32 %v4903_v60, %v589_v28  ;;  %v5196_v5 = vadd.f32 %v4916_v7, %v618_v36  ;;  %v11073_v28 = vld [vmem:[#allocation11 + $0x4c] sm:$0xf]  ;;  %v10106_v60 = vld [vmem:[#allocation11 + $0x200] sm:$0xf] }
 0x58c   :  { %v9895_v14 = vor.u32 %v11073_v28, %v9892_v43  ;;  %v11132_v7 = vld [vmem:[#allocation11 + $0x21c] sm:$0xf0]  ;;  %v10306_v43 = vld [vmem:[#allocation11 + $0x388] sm:$0xf] }
 0x58d   :  { %v5207_v27 = vmul.f32 0.5, %v5195_v38  ;;  %v5211_v23 = vmul.f32 0.5, %v5196_v5  ;;  %v10107_v38 = vor.u32 %v11132_v7, %v10106_v60  ;;  %v10108_v5 = vld [vmem:[#allocation11 + $0x220] sm:$0xf0]  ;;  %v11177_v7 = vld [vmem:[#allocation11 + $0x38c] sm:$0xf] }
 0x58e   :  { %6236 = vmatpush.bf16.msrb.mxu2 %v9895_v14  ;;  %v10111_v18 = vor.u32 %v11128_v2, %v10108_v5  ;;  %v10308_v2 = vld [vmem:[#allocation11 + $0x3a8] sm:$0xf0] }
 0x58f   :  { %11379 = vtanh.f32 %v5207_v27  ;;  %6092 = vmatpush.bf16.msra.mxu1 %v10107_v38  ;;  %v10311_v38 = vor.u32 %v11177_v7, %v10308_v2  ;;  %v10026_v7 = vld [vmem:[#allocation11 + $0x150] sm:$0xf] }
 0x590   :  { %11381 = vtanh.f32 %v5211_v23  ;;  %v9859_v23 = vor.u32 %v11069_v25, %v9858_v61  ;;  %6150 = vmatpush.bf16.msra.mxu3 %v10111_v18  ;;  %v11110_v2 = vld [vmem:[#allocation11 + $0x16c] sm:$0xf0] }
 0x591   :  { %v4929_v57 = vpop.f32.mrf.mxu2  ;;  %v4942_v30 = vpop.f32.mrf.mxu3 }
 0x592   :  { %v5197_v31 = vadd.f32 %v4929_v57, %v647_v16  ;;  %v5198_v34 = vadd.f32 %v4942_v30, %v676_v53  ;;  %v4905_v33 = vpop.f32.mrf.mxu0  ;;  %v4918_v26 = vpop.f32.mrf.mxu1  ;;  %6179 = vmatpush.bf16.msrb.mxu0 %v9859_v23  ;;  %6237 = vmatpush.bf16.msrb.mxu2 %v9863_v20  ;;  %v13019_v53 = vld [vmem:[#allocation38_spill] sm:$0xff] }
 0x593   :  { %6201 = vmatpush.bf16.msrb.mxu1 %v10339_v45  ;;  %v10343_v33 = vor.u32 %v11185_v8, %v10340_v62  ;;  %v10244_v45 = vld [vmem:[#allocation11 + $0x328] sm:$0xf0]  ;;  %v10090_v62 = vld [vmem:[#allocation11 + $0x1d0] sm:$0xf] }
 0x594   :  { %11383 = vtanh.f32 %v5197_v31  ;;  %v5216_v36 = vmul.f32 0.5, %v5198_v34 }
 0x595   :  { %v11380_v52 = vpop.eup %11379  ;;  %6259 = vmatpush.bf16.msrb.mxu3 %v10343_v33 }
 0x596   :  { %v11382_v3 = vpop.eup %11381  ;;  %v5209_v1 = vmul.f32 0.5, %v11380_v52  ;;  %11385 = vtanh.f32 %v5216_v36  ;;  %v11181_v36 = vld [vmem:[#allocation11 + $0x3a4] sm:$0xf0] }
 0x597   :  { %v5213_v56 = vmul.f32 0.5, %v11382_v3  ;;  %v10307_v14 = vor.u32 %v11181_v36, %v10306_v43  ;;  %v11114_v36 = vld [vmem:[#allocation11 + $0x194] sm:$0xf] }
 0x598   :  { %v5210_v27 = vadd.f32 0.5, %v5209_v1 }
 0x599   :  { %v5214_v37 = vadd.f32 0.5, %v5213_v56  ;;  %v4931_v15 = vpop.f32.mrf.mxu2  ;;  %v4944_v63 = vpop.f32.mrf.mxu3  ;;  %6202 = vmatpush.bf16.msrb.mxu1 %v10307_v14  ;;  %6260 = vmatpush.bf16.msrb.mxu3 %v10311_v38  ;;  %v10178_v14 = vld [vmem:[#allocation11 + $0x288] sm:$0xf]  ;;  %v10028_v38 = vld [vmem:[#allocation11 + $0x170] sm:$0xf0] }
 0x59a   :  { %v11384_v13 = vpop.eup %11383  ;;  %v11173_v15 = vld [vmem:[#allocation11 + $0x364] sm:$0xf0] }
 0x59b   :  { %v5220_v44 = vmul.f32 %v5214_v37, %v12198_v29  ;;  %v5221_v41 = vmul.f32 %v11384_v13, %v5210_v27  ;;  %v5148_v16 = vpop.f32.mrf.mxu0  ;;  %v5161_v39 = vpop.f32.mrf.mxu1  ;;  %v10274_v37 = vld [vmem:[#allocation11 + $0x348] sm:$0xf] }
 0x59c   :  { %v5203_v46 = vadd.f32 %v5148_v16, %v13018_v12  ;;  %v5204_v49 = vadd.f32 %v5161_v39, %v13019_v53  ;;  %v11386_v57 = vpop.eup %11385  ;;  %v10275_v13 = vor.u32 %v11173_v15, %v10274_v37  ;;  %v11165_v12 = vld [vmem:[#allocation11 + $0x324] sm:$0xf0]  ;;  %v9996_v37 = vld [vmem:[#allocation11 + $0x130] sm:$0xf0] }
 0x59d   :  { %v5222_v30 = vadd.f32 %v5221_v41, %v5220_v44  ;;  %v5218_v29 = vmul.f32 0.5, %v11386_v57  ;;  %v10276_v44 = vld [vmem:[#allocation11 + $0x368] sm:$0xf0] }
 0x59e   :  { %v5225_v31 = vmul.f32 0.5, %v5203_v46  ;;  %v5229_v34 = vmul.f32 0.5, %v5204_v49  ;;  %6203 = vmatpush.bf16.msrb.mxu1 %v10275_v13  ;;  %v10243_v46 = vor.u32 %v11165_v12, %v10242_v48  ;;  %v11161_v49 = vld [vmem:[#allocation11 + $0x30c] sm:$0xf]  ;;  %v9962_v13 = vld [vmem:[#allocation11 + $0xd0] sm:$0xf] }
 0x59f   :  { %11387 = vtanh.f32 %v5222_v30  ;;  %v5219_v6 = vadd.f32 0.5, %v5218_v29  ;;  %v10092_v29 = vld [vmem:[#allocation11 + $0x1f0] sm:$0xf0]  ;;  %v11137_v12 = vld [vmem:[#allocation11 + $0x24c] sm:$0xf] }
 0x5a0   :  { %11389 = vtanh.f32 %v5225_v31  ;;  %v11126_v31 = vld [vmem:[#allocation11 + $0x1ec] sm:$0xf0] }
 0x5a1   :  { %11391 = vtanh.f32 %v5229_v34  ;;  %v11122_v34 = vld [vmem:[#allocation11 + $0x1d4] sm:$0xf]  ;;  %v10091_v33 = vor.u32 %v11126_v31, %v10090_v62  ;;  %v11133_v31 = vld [vmem:[#allocation11 + $0x224] sm:$0xf0] }
 0x5a2   :  { %v5174_v26 = vpop.f32.mrf.mxu2  ;;  %v5187_v10 = vpop.f32.mrf.mxu3  ;;  %6204 = vmatpush.bf16.msrb.mxu1 %v10243_v46  ;;  %v9930_v46 = vld [vmem:[#allocation11 + $0x90] sm:$0xf] }
 0x5a3   :  { %v5205_v21 = vadd.f32 %v5174_v26, %v13020_v17  ;;  %v5206_v35 = vadd.f32 %v5187_v10, %v13021_v54  ;;  %v5150_v51 = vpop.f32.mrf.mxu0  ;;  %v5163_v28 = vpop.f32.mrf.mxu1  ;;  %v10210_v26 = vld [vmem:[#allocation11 + $0x2c8] sm:$0xf]  ;;  %v10095_v17 = vor.u32 %v11122_v34, %v10092_v29  ;;  %6288 = vmatpush.bf16.msra.mxu0 %v10091_v33  ;;  %v9898_v34 = vld [vmem:[#allocation11 + $0x50] sm:$0xf] }
 0x5a4   :  { %v11157_v10 = vld [vmem:[#allocation11 + $0x2e4] sm:$0xf0]  ;;  %v11118_v51 = vld [vmem:[#allocation11 + $0x1ac] sm:$0xf0] }
 0x5a5   :  { %v11388_v52 = vpop.eup %11387  ;;  %11393 = vtanh.f32 %v5205_v21  ;;  %v5234_v60 = vmul.f32 0.5, %v5206_v35  ;;  %v11153_v21 = vld [vmem:[#allocation11 + $0x2cc] sm:$0xf]  ;;  %v10211_v54 = vor.u32 %v11157_v10, %v10210_v26  ;;  %v10058_v35 = vld [vmem:[#allocation11 + $0x190] sm:$0xf]  ;;  %6346 = vmatpush.bf16.msra.mxu2 %v10095_v17 }
 0x5a6   :  { %v11390_v3 = vpop.eup %11389  ;;  %v5224_v1 = vmul.f32 %v11388_v52, %v5219_v6  ;;  %v10059_v43 = vor.u32 %v11118_v51, %v10058_v35  ;;  %v10060_v6 = vld [vmem:[#allocation11 + $0x1b0] sm:$0xf0]  ;;  %v11078_v33 = vld [vmem:[#allocation11 + $0x6c] sm:$0xf0]  ;;  %v11129_v17 = vld [vmem:[#allocation11 + $0x20c] sm:$0xf] }
 0x5a7   :  { %v11392_v5 = vpop.eup %11391  ;;  %v5227_v61 = vmul.f32 0.5, %v11390_v3  ;;  %11395 = vtanh.f32 %v5234_v60  ;;  %6205 = vmatpush.bf16.msrb.mxu1 %v10211_v54  ;;  %v10063_v52 = vor.u32 %v11114_v36, %v10060_v6  ;;  %v11149_v60 = vld [vmem:[#allocation11 + $0x2a4] sm:$0xf0]  ;;  %v11074_v26 = vld [vmem:[#allocation11 + $0x54] sm:$0xf] }
 0x5a8   :  { %v12249_v56 = vpack.c.bf16 %v5224_v1, %v12205_v11  ;;  %v5231_v18 = vmul.f32 0.5, %v11392_v5  ;;  %v11169_v11 = vld [vmem:[#allocation11 + $0x34c] sm:$0xf]  ;;  %v10179_v3 = vor.u32 %v11149_v60, %v10178_v14  ;;  %v11106_v1 = vld [vmem:[#allocation11 + $0x154] sm:$0xf]  ;;  %6289 = vmatpush.bf16.msra.mxu0 %v10059_v43 }
 0x5a9   :  { %v5228_v25 = vadd.f32 0.5, %v5227_v61  ;;  %v10279_v39 = vor.u32 %v11169_v11, %v10276_v44  ;;  %v11145_v5 = vld [vmem:[#allocation11 + $0x28c] sm:$0xf]  ;;  %v10027_v61 = vor.u32 %v11110_v2, %v10026_v7  ;;  %6347 = vmatpush.bf16.msra.mxu2 %v10063_v52  ;;  %v11094_v11 = vld [vmem:[#allocation11 + $0xec] sm:$0xf0]  ;;  %v12271_v52 = vpack.c.bf16 %v12101_v19, %v12129_v47 }
 0x5aa   :  { %v5232_v42 = vadd.f32 0.5, %v5231_v18  ;;  %v5176_v27 = vpop.f32.mrf.mxu2  ;;  %v5189_v23 = vpop.f32.mrf.mxu3  ;;  %6079 = vmatmul.bf16.gmra.mxu0 %v12249_v56  ;;  %6137 = vmatmul.bf16.gmra.mxu2 %v12249_v56  ;;  %v10180_v18 = vld [vmem:[#allocation11 + $0x2a8] sm:$0xf0]  ;;  %v11090_v44 = vld [vmem:[#allocation11 + $0xd4] sm:$0xf] }
 0x5ab   :  { %v11394_v24 = vpop.eup %11393  ;;  %6261 = vmatpush.bf16.msrb.mxu3 %v10279_v39  ;;  %v9994_v27 = vld [vmem:[#allocation11 + $0x110] sm:$0xf]  ;;  %6206 = vmatpush.bf16.msrb.mxu1 %v10179_v3  ;;  %v10146_v39 = vld [vmem:[#allocation11 + $0x248] sm:$0xf]  ;;  %v9900_v10 = vld [vmem:[#allocation11 + $0x70] sm:$0xf0] }
 0x5ac   :  { %v5238_v63 = vmul.f32 %v5232_v42, %v12210_v9  ;;  %v5239_v20 = vmul.f32 %v11394_v24, %v5228_v25  ;;  %v10247_v9 = vor.u32 %v11161_v49, %v10244_v45  ;;  %v10031_v25 = vor.u32 %v11106_v1, %v10028_v38  ;;  %v11102_v23 = vld [vmem:[#allocation11 + $0x12c] sm:$0xf0]  ;;  %v11098_v24 = vld [vmem:[#allocation11 + $0x114] sm:$0xf]  ;;  %6290 = vmatpush.bf16.msra.mxu0 %v10027_v61  ;;  %v10116_v54 = vld [vmem:[#allocation11 + $0x228] sm:$0xf0] }
 0x5ad   :  { %v11396_v41 = vpop.eup %11395  ;;  %v10183_v42 = vor.u32 %v11145_v5, %v10180_v18  ;;  %v9995_v15 = vor.u32 %v11102_v23, %v9994_v27  ;;  %v10119_v35 = vor.u32 %v11129_v17, %v10116_v54  ;;  %v9866_v51 = vld [vmem:[#allocation11 + $0x10] sm:$0xf]  ;;  %v11066_v43 = vld [vmem:[#allocation11 + $0x14] sm:$0xf] }
 0x5ae   :  { %v5240_v16 = vadd.f32 %v5239_v20, %v5238_v63  ;;  %v5236_v59 = vmul.f32 0.5, %v11396_v41  ;;  %6348 = vmatpush.bf16.msra.mxu2 %v10031_v25  ;;  %v9999_v63 = vor.u32 %v11098_v24, %v9996_v37  ;;  %v12263_v20 = vpack.c.bf16 %v12157_v58, %v12185_v4  ;;  %v10148_v4 = vld [vmem:[#allocation11 + $0x268] sm:$0xf0]  ;;  %v9868_v36 = vld [vmem:[#allocation11 + $0x30] sm:$0xf0] }
 0x5af   :  { %6262 = vmatpush.bf16.msrb.mxu3 %v10247_v9  ;;  %v9963_v41 = vor.u32 %v11094_v11, %v9962_v13  ;;  %v10151_v49 = vor.u32 %v11137_v12, %v10148_v4  ;;  %v9932_v9 = vld [vmem:[#allocation11 + $0xb0] sm:$0xf0]  ;;  %v9871_v14 = vor.u32 %v11066_v43, %v9868_v36  ;;  %v10346_v60 = vld [vmem:[#allocation11 + $0x3d0] sm:$0xf]  ;;  %v12285_v11 = vpop.f32.mrf.mxu0  ;;  %v11127_v12 = vld [vmem:[#allocation11 + $0x1f4] sm:$0xf0] }
 0x5b0   :  { %11397 = vtanh.f32 %v5240_v16  ;;  %v5237_v53 = vadd.f32 0.5, %v5236_v59  ;;  %6291 = vmatpush.bf16.msra.mxu0 %v9995_v15  ;;  %v9964_v16 = vld [vmem:[#allocation11 + $0xf0] sm:$0xf0]  ;;  %v11141_v59 = vld [vmem:[#allocation11 + $0x264] sm:$0xf0] }
 0x5b1   :  { %v9967_v48 = vor.u32 %v11090_v44, %v9964_v16  ;;  %v10147_v58 = vor.u32 %v11141_v59, %v10146_v39  ;;  %v11190_v7 = vld [vmem:[#allocation11 + $0x3ec] sm:$0xf0]  ;;  %v11186_v2 = vld [vmem:[#allocation11 + $0x3d4] sm:$0xf]  ;;  %v10036_v43 = vld [vmem:[#allocation11 + $0x178] sm:$0xf0] }
 0x5b2   :  { %6349 = vmatpush.bf16.msra.mxu2 %v9999_v63  ;;  %v10347_v3 = vor.u32 %v11190_v7, %v10346_v60  ;;  %v10348_v1 = vld [vmem:[#allocation11 + $0x3f0] sm:$0xf0]  ;;  %v10314_v38 = vld [vmem:[#allocation11 + $0x390] sm:$0xf]  ;;  %v12287_v39 = vpop.f32.mrf.mxu2  ;;  %v10002_v60 = vld [vmem:[#allocation11 + $0x118] sm:$0xf] }
 0x5b3   :  { %6207 = vmatpush.bf16.msrb.mxu1 %v10147_v58  ;;  %v11182_v5 = vld [vmem:[#allocation11 + $0x3ac] sm:$0xf0]  ;;  %v10351_v61 = vor.u32 %v11186_v2, %v10348_v1  ;;  %v11178_v18 = vld [vmem:[#allocation11 + $0x394] sm:$0xf]  ;;  %v11123_v58 = vld [vmem:[#allocation11 + $0x1dc] sm:$0xf] }
 0x5b4   :  { %6292 = vmatpush.bf16.msra.mxu0 %v9963_v41  ;;  %v10316_v19 = vld [vmem:[#allocation11 + $0x3b0] sm:$0xf0]  ;;  %v10315_v47 = vor.u32 %v11182_v5, %v10314_v38  ;;  %v10282_v27 = vld [vmem:[#allocation11 + $0x350] sm:$0xf]  ;;  %v11103_v7 = vld [vmem:[#allocation11 + $0x134] sm:$0xf0] }
 0x5b5   :  { %v10319_v25 = vor.u32 %v11178_v18, %v10316_v19  ;;  %v11174_v23 = vld [vmem:[#allocation11 + $0x36c] sm:$0xf0]  ;;  %v11170_v24 = vld [vmem:[#allocation11 + $0x354] sm:$0xf]  ;;  %v11099_v2 = vld [vmem:[#allocation11 + $0x11c] sm:$0xf] }
 0x5b6   :  { %v11398_v57 = vpop.eup %11397  ;;  %6350 = vmatpush.bf16.msra.mxu2 %v9967_v48  ;;  %v10283_v37 = vor.u32 %v11174_v23, %v10282_v27  ;;  %v10284_v15 = vld [vmem:[#allocation11 + $0x370] sm:$0xf0]  ;;  %v10250_v63 = vld [vmem:[#allocation11 + $0x310] sm:$0xf]  ;;  %v10098_v48 = vld [vmem:[#allocation11 + $0x1d8] sm:$0xf] }
 0x5b7   :  { %v5242_v30 = vmul.f32 %v11398_v57, %v5237_v53  ;;  %v11086_v53 = vld [vmem:[#allocation11 + $0xac] sm:$0xf0]  ;;  %v11082_v57 = vld [vmem:[#allocation11 + $0x94] sm:$0xf]  ;;  %v10287_v44 = vor.u32 %v11170_v24, %v10284_v15  ;;  %v12289_v59 = vpop.f32.mrf.mxu0  ;;  %v10099_v4 = vor.u32 %v11127_v12, %v10098_v48  ;;  %v10004_v1 = vld [vmem:[#allocation11 + $0x138] sm:$0xf0] }
 0x5b8   :  { %v9931_v45 = vor.u32 %v11086_v53, %v9930_v46  ;;  %v9935_v62 = vor.u32 %v11082_v57, %v9932_v9  ;;  %v11166_v13 = vld [vmem:[#allocation11 + $0x32c] sm:$0xf0]  ;;  %v10100_v46 = vld [vmem:[#allocation11 + $0x1f8] sm:$0xf0]  ;;  %v11154_v57 = vld [vmem:[#allocation11 + $0x2d4] sm:$0xf]  ;;  %v10007_v5 = vor.u32 %v11099_v2, %v10004_v1 }
 0x5b9   :  { %v12255_v8 = vpack.c.bf16 %v12213_v32, %v5242_v30  ;;  %v10212_v32 = vld [vmem:[#allocation11 + $0x2e8] sm:$0xf0]  ;;  %v10114_v30 = vld [vmem:[#allocation11 + $0x208] sm:$0xf]  ;;  %v10251_v41 = vor.u32 %v11166_v13, %v10250_v63  ;;  %v10218_v53 = vld [vmem:[#allocation11 + $0x2d0] sm:$0xf] }
 0x5ba   :  { %6180 = vmatmul.bf16.vlgmr.msrb.gmra.mxu0 %v12219_v40  ;;  %6238 = vmatmul.bf16.vlgmr.msrb.gmra.mxu2 %v12219_v40  ;;  %v10215_v28 = vor.u32 %v11153_v21, %v10212_v32  ;;  %v10115_v29 = vor.u32 %v11133_v31, %v10114_v30  ;;  %v9899_v21 = vor.u32 %v11078_v33, %v9898_v34  ;;  %v10220_v30 = vld [vmem:[#allocation11 + $0x2f0] sm:$0xf0]  ;;  %v11119_v31 = vld [vmem:[#allocation11 + $0x1b4] sm:$0xf0]  ;;  %v12295_v34 = vpop.f32.mrf.mxu2  ;;  %v10186_v17 = vld [vmem:[#allocation11 + $0x290] sm:$0xf] }
 0x5bb   :  { %6093 = vmatmul.bf16.vlgmr.msra.gmra.mxu1 %v12255_v8  ;;  %6151 = vmatmul.bf16.vlgmr.msra.gmra.mxu3 %v12255_v8  ;;  %v9903_v32 = vor.u32 %v11074_v26, %v9900_v10  ;;  %v10223_v33 = vor.u32 %v11154_v57, %v10220_v30  ;;  %v11115_v26 = vld [vmem:[#allocation11 + $0x19c] sm:$0xf]  ;;  %v11150_v54 = vld [vmem:[#allocation11 + $0x2ac] sm:$0xf0]  ;;  %v10188_v18 = vld [vmem:[#allocation11 + $0x2b0] sm:$0xf0] }
 0x5bc   :  { %6263 = vmatpush.bf16.msrb.mxu3 %v10215_v28  ;;  %6293 = vmatpush.bf16.msra.mxu0 %v9931_v45  ;;  %v11070_v28 = vld [vmem:[#allocation11 + $0x2c] sm:$0xf0]  ;;  %v10103_v45 = vor.u32 %v11123_v58, %v10100_v46  ;;  %v10068_v10 = vld [vmem:[#allocation11 + $0x1b8] sm:$0xf0]  ;;  %v11138_v58 = vld [vmem:[#allocation11 + $0x254] sm:$0xf] }
 0x5bd   :  { %6351 = vmatpush.bf16.msra.mxu2 %v9935_v62  ;;  %6208 = vmatpush.bf16.msrb.mxu1 %v10115_v29  ;;  %v9867_v6 = vor.u32 %v11070_v28, %v9866_v51  ;;  %v10066_v62 = vld [vmem:[#allocation11 + $0x198] sm:$0xf]  ;;  %v10187_v51 = vor.u32 %v11150_v54, %v10186_v17  ;;  %v11107_v28 = vld [vmem:[#allocation11 + $0x15c] sm:$0xf]  ;;  %v10154_v15 = vld [vmem:[#allocation11 + $0x250] sm:$0xf] }
 0x5be   :  { %v10067_v29 = vor.u32 %v11119_v31, %v10066_v62  ;;  %v11091_v27 = vld [vmem:[#allocation11 + $0xdc] sm:$0xf]  ;;  %v11142_v63 = vld [vmem:[#allocation11 + $0x26c] sm:$0xf0]  ;;  %v9906_v57 = vld [vmem:[#allocation11 + $0x58] sm:$0xf] }
 0x5bf   :  { %v9972_v24 = vld [vmem:[#allocation11 + $0xf8] sm:$0xf0]  ;;  %v10122_v46 = vld [vmem:[#allocation11 + $0x210] sm:$0xf]  ;;  %v10124_v17 = vld [vmem:[#allocation11 + $0x230] sm:$0xf0] }
 0x5c0   :  { %6264 = vmatpush.bf16.msrb.mxu3 %v10183_v42  ;;  %6294 = vmatpush.bf16.msra.mxu0 %v9899_v21  ;;  %v12279_v42 = vpack.c.bf16 %v12045_v0, %v12073_v50  ;;  %v11162_v0 = vld [vmem:[#allocation11 + $0x314] sm:$0xf]  ;;  %v10071_v21 = vor.u32 %v11115_v26, %v10068_v10  ;;  %v9975_v13 = vor.u32 %v11091_v27, %v9972_v24  ;;  %v9940_v48 = vld [vmem:[#allocation11 + $0xb8] sm:$0xf0] }
 0x5c1   :  { %6352 = vmatpush.bf16.msra.mxu2 %v9903_v32  ;;  %6317 = vmatpush.bf16.msra.mxu1 %v10347_v3  ;;  %v10252_v50 = vld [vmem:[#allocation11 + $0x330] sm:$0xf0]  ;;  %v10034_v32 = vld [vmem:[#allocation11 + $0x158] sm:$0xf]  ;;  %v10003_v3 = vor.u32 %v11103_v7, %v10002_v60  ;;  %v11075_v31 = vld [vmem:[#allocation11 + $0x5c] sm:$0xf] }
 0x5c2   :  { %v10255_v16 = vor.u32 %v11162_v0, %v10252_v50  ;;  %v12299_v38 = vpop.f32.mrf.mxu2  ;;  %v9938_v0 = vld [vmem:[#allocation11 + $0x98] sm:$0xf]  ;;  %v11130_v10 = vld [vmem:[#allocation11 + $0x214] sm:$0xf]  ;;  %v10356_v1 = vld [vmem:[#allocation11 + $0x3f8] sm:$0xf0] }
 0x5c3   :  { %v11087_v50 = vld [vmem:[#allocation11 + $0xb4] sm:$0xf0]  ;;  %v10127_v54 = vor.u32 %v11130_v10, %v10124_v17  ;;  %v11179_v27 = vld [vmem:[#allocation11 + $0x39c] sm:$0xf]  ;;  %v11222_v17 = vld [vmem:[#allocation13 + $0xec] sm:$0xf0] }
 0x5c4   :  { %6265 = vmatpush.bf16.msrb.mxu3 %v10151_v49  ;;  %6295 = vmatpush.bf16.msra.mxu0 %v9867_v6  ;;  %v11158_v49 = vld [vmem:[#allocation11 + $0x2ec] sm:$0xf0]  ;;  %v12297_v6 = vpop.f32.mrf.mxu0  ;;  %v11191_v60 = vld [vmem:[#allocation11 + $0x3f4] sm:$0xf0] }
 0x5c5   :  { %6353 = vmatpush.bf16.msra.mxu2 %v9871_v14  ;;  %6318 = vmatpush.bf16.msra.mxu1 %v10315_v47  ;;  %v10219_v9 = vor.u32 %v11158_v49, %v10218_v53  ;;  %v10039_v14 = vor.u32 %v11107_v28, %v10036_v43  ;;  %v9970_v47 = vld [vmem:[#allocation11 + $0xd8] sm:$0xf] }
 0x5c8   :  { %6266 = vmatpush.bf16.msrb.mxu3 %v10119_v35  ;;  %6404 = vmatpush.bf16.msrb.mxu0 %v10099_v4  ;;  %v11111_v35 = vld [vmem:[#allocation11 + $0x174] sm:$0xf0]  ;;  %v10156_v4 = vld [vmem:[#allocation11 + $0x270] sm:$0xf0] }
 0x5c9   :  { %6319 = vmatpush.bf16.msra.mxu1 %v10283_v37  ;;  %6462 = vmatpush.bf16.msrb.mxu2 %v10103_v45  ;;  %v10035_v36 = vor.u32 %v11111_v35, %v10034_v32  ;;  %v10159_v49 = vor.u32 %v11138_v58, %v10156_v4  ;;  %v11134_v45 = vld [vmem:[#allocation11 + $0x22c] sm:$0xf0]  ;;  %v11071_v32 = vld [vmem:[#allocation11 + $0x34] sm:$0xf0]  ;;  %v11067_v35 = vld [vmem:[#allocation11 + $0x1c] sm:$0xf] }
 0x5ca   :  { %6185 = vmatmul.bf16.gmra.mxu0 %v12225_v55  ;;  %6243 = vmatmul.bf16.gmra.mxu2 %v12225_v55  ;;  %v12307_v53 = vpop.f32.mrf.mxu2  ;;  %v10123_v30 = vor.u32 %v11134_v45, %v10122_v46  ;;  %v11167_v58 = vld [vmem:[#allocation11 + $0x334] sm:$0xf0] }
 0x5cb   :  { %6098 = vmatmul.bf16.gmra.mxu1 %v12263_v20  ;;  %6156 = vmatmul.bf16.gmra.mxu3 %v12263_v20  ;;  %13023 = vst [vmem:[#allocation22_spill] sm:$0xff] %v12307_v53 }
 0x5cc   :  { %6375 = vmatpush.bf16.msra.mxu3 %v10351_v61  ;;  %6405 = vmatpush.bf16.msrb.mxu0 %v10067_v29  ;;  %v11146_v61 = vld [vmem:[#allocation11 + $0x294] sm:$0xf]  ;;  %v12303_v37 = vpop.f32.mrf.mxu0 }
 0x5cd   :  { %6320 = vmatpush.bf16.msra.mxu1 %v10251_v41  ;;  %6463 = vmatpush.bf16.msrb.mxu2 %v10071_v21  ;;  %v10191_v19 = vor.u32 %v11146_v61, %v10188_v18  ;;  %13022 = vst [vmem:[#allocation21_spill] sm:$0xff] %v12303_v37  ;;  %v11083_v41 = vld [vmem:[#allocation11 + $0x9c] sm:$0xf]  ;;  %v9874_v21 = vld [vmem:[#allocation11 + $0x18] sm:$0xf] }
 0x5ce   :  { %v9943_v12 = vor.u32 %v11083_v41, %v9940_v48  ;;  %v9875_v28 = vor.u32 %v11071_v32, %v9874_v21  ;;  %v11183_v18 = vld [vmem:[#allocation11 + $0x3b4] sm:$0xf0]  ;;  %v11171_v41 = vld [vmem:[#allocation11 + $0x35c] sm:$0xf]  ;;  %v10482_v21 = vld [vmem:[#allocation13 + $0xe8] sm:$0xf] }
 0x5cf   :  { %v10258_v48 = vld [vmem:[#allocation11 + $0x318] sm:$0xf] }
 0x5d0   :  { %6376 = vmatpush.bf16.msra.mxu3 %v10319_v25  ;;  %6406 = vmatpush.bf16.msrb.mxu0 %v10035_v36  ;;  %v11095_v25 = vld [vmem:[#allocation11 + $0xf4] sm:$0xf0]  ;;  %v10259_v46 = vor.u32 %v11167_v58, %v10258_v48  ;;  %v11214_v48 = vld [vmem:[#allocation13 + $0xac] sm:$0xf0] }
 0x5d1   :  { %6321 = vmatpush.bf16.msra.mxu1 %v10219_v9  ;;  %6464 = vmatpush.bf16.msrb.mxu2 %v10039_v14  ;;  %v9971_v23 = vor.u32 %v11095_v25, %v9970_v47  ;;  %v11079_v9 = vld [vmem:[#allocation11 + $0x74] sm:$0xf0] }
 0x5d2   :  { %v9907_v62 = vor.u32 %v11079_v9, %v9906_v57  ;;  %v12313_v36 = vpop.f32.mrf.mxu2  ;;  %v10354_v14 = vld [vmem:[#allocation11 + $0x3d8] sm:$0xf] }
 0x5d3   :  { %v10355_v7 = vor.u32 %v11191_v60, %v10354_v14  ;;  %v11159_v32 = vld [vmem:[#allocation11 + $0x2f4] sm:$0xf0]  ;;  %v10458_v14 = vld [vmem:[#allocation13 + $0xc0] sm:$0xf]  ;;  %v11218_v60 = vld [vmem:[#allocation13 + $0xcc] sm:$0xf0] }
 0x5d4   :  { %6377 = vmatpush.bf16.msra.mxu3 %v10287_v44  ;;  %6407 = vmatpush.bf16.msrb.mxu0 %v10003_v3  ;;  %v10155_v44 = vor.u32 %v11142_v63, %v10154_v15  ;;  %v12309_v26 = vpop.f32.mrf.mxu0  ;;  %v11187_v3 = vld [vmem:[#allocation11 + $0x3dc] sm:$0xf]  ;;  %v10290_v15 = vld [vmem:[#allocation11 + $0x358] sm:$0xf] }
 0x5d5   :  { %6322 = vmatpush.bf16.msra.mxu1 %v10187_v51  ;;  %6465 = vmatpush.bf16.msrb.mxu2 %v10007_v5  ;;  %v9876_v51 = vld [vmem:[#allocation11 + $0x38] sm:$0xf0]  ;;  %v10322_v5 = vld [vmem:[#allocation11 + $0x398] sm:$0xf]  ;;  %v10359_v61 = vor.u32 %v11187_v3, %v10356_v1 }
 0x5d6   :  { %v9879_v43 = vor.u32 %v11067_v35, %v9876_v51  ;;  %v11175_v63 = vld [vmem:[#allocation11 + $0x374] sm:$0xf0] }
 0x5d8   :  { %6378 = vmatpush.bf16.msra.mxu3 %v10255_v16  ;;  %6408 = vmatpush.bf16.msrb.mxu0 %v9971_v23  ;;  %v9939_v16 = vor.u32 %v11087_v50, %v9938_v0  ;;  %v10324_v23 = vld [vmem:[#allocation11 + $0x3b8] sm:$0xf0]  ;;  %v12334_v50 = vld [vmem:[%s12946_s6] sm:$0xff] }
 0x5d9   :  { %6466 = vmatpush.bf16.msrb.mxu2 %v9975_v13  ;;  %6323 = vmatpush.bf16.msra.mxu1 %v10155_v44  ;;  %v10327_v24 = vor.u32 %v11179_v27, %v10324_v23  ;;  %v10291_v13 = vor.u32 %v11175_v63, %v10290_v15  ;;  %v12337_v4 = vperm.slane %v12334_v50, 0  ;;  %v12346_v9 = vperm.slane %v12334_v50, 1  ;;  %v10228_v15 = vld [vmem:[#allocation11 + $0x2f8] sm:$0xf0]  ;;  %v10194_v63 = vld [vmem:[#allocation11 + $0x298] sm:$0xf] }
 0x5da   :  { %6190 = vmatmul.bf16.gmra.mxu0 %v12231_v22  ;;  %6248 = vmatmul.bf16.gmra.mxu2 %v12231_v22  ;;  %v12319_v47 = vpop.f32.mrf.mxu2  ;;  %v12365_v3 = vperm.slane %v12334_v50, 2 }
 0x5db   :  { %6103 = vmatmul.bf16.gmra.mxu1 %v12271_v52  ;;  %6161 = vmatmul.bf16.gmra.mxu3 %v12271_v52  ;;  %13025 = vst [vmem:[#allocation25_spill] sm:$0xff] %v12319_v47  ;;  %v6066_v45 = vadd.f32 %v12285_v11, %v12337_v4  ;;  %v10226_v11 = vld [vmem:[#allocation11 + $0x2d8] sm:$0xf] }
 0x5dc   :  { %6379 = vmatpush.bf16.msra.mxu3 %v10223_v33  ;;  %6409 = vmatpush.bf16.msrb.mxu0 %v9939_v16  ;;  %v9908_v33 = vld [vmem:[#allocation11 + $0x78] sm:$0xf0]  ;;  %v12317_v2 = vpop.f32.mrf.mxu0  ;;  %13026 = vst [vmem:[#allocation48_spill] sm:$0xff] %v12365_v3 }
 0x5dd   :  { %6467 = vmatpush.bf16.msrb.mxu2 %v9943_v12  ;;  %v9911_v29 = vor.u32 %v11075_v31, %v9908_v33  ;;  %6324 = vmatpush.bf16.msra.mxu1 %v10123_v30  ;;  %13024 = vst [vmem:[#allocation23_spill] sm:$0xff] %v12317_v2  ;;  %v10292_v16 = vld [vmem:[#allocation11 + $0x378] sm:$0xf0] }
 0x5de   :  { %v10295_v12 = vor.u32 %v11171_v41, %v10292_v16  ;;  %v11163_v31 = vld [vmem:[#allocation11 + $0x31c] sm:$0xf]  ;;  %v11151_v41 = vld [vmem:[#allocation11 + $0x2b4] sm:$0xf0]  ;;  %v10442_v16 = vld [vmem:[#allocation13 + $0xa0] sm:$0xf] }
 0x5df   :  { %v10260_v33 = vld [vmem:[#allocation11 + $0x338] sm:$0xf0]  ;;  %v12380_v58 = vor.u32 %v11214_v48, %v10442_v16  ;;  %v11143_v16 = vld [vmem:[#allocation11 + $0x274] sm:$0xf0] }
 0x5e0   :  { %6380 = vmatpush.bf16.msra.mxu3 %v10191_v19  ;;  %6410 = vmatpush.bf16.msrb.mxu0 %v9907_v62  ;;  %v10323_v19 = vor.u32 %v11183_v18, %v10322_v5  ;;  %v10263_v10 = vor.u32 %v11163_v31, %v10260_v33  ;;  %v12367_v5 = vor.u32 %v11218_v60, %v10458_v14 }
 0x5e1   :  { %6468 = vmatpush.bf16.msrb.mxu2 %v9911_v29  ;;  %v10474_v29 = vld [vmem:[#allocation13 + $0xe0] sm:$0xf] }
 0x5e2   :  { %v12354_v35 = vor.u32 %v11222_v17, %v10474_v29  ;;  %v10426_v29 = vld [vmem:[#allocation13 + $0x80] sm:$0xf]  ;;  %v10434_v17 = vld [vmem:[#allocation13 + $0x88] sm:$0xf] }
 0x5e4   :  { %6381 = vmatpush.bf16.msra.mxu3 %v10159_v49  ;;  %6411 = vmatpush.bf16.msrb.mxu0 %v9875_v28  ;;  %v10227_v28 = vor.u32 %v11159_v32, %v10226_v11  ;;  %v11211_v32 = vld [vmem:[#allocation13 + $0x94] sm:$0xf0] }
 0x5e5   :  { %6469 = vmatpush.bf16.msrb.mxu2 %v9879_v43  ;;  %v6124_v43 = vadd.f32 %v12287_v39, %v12346_v9 }
 0x5e8   :  { %6382 = vmatpush.bf16.msra.mxu3 %v10127_v54  ;;  %v11223_v54 = vld [vmem:[#allocation13 + $0xf4] sm:$0xf0] }
 0x5e9   :  { %v12356_v51 = vor.u32 %v11223_v54, %v10482_v21 }
 0x5ea   :  { %6195 = vmatmul.bf16.gmra.mxu0 %v12249_v56  ;;  %6253 = vmatmul.bf16.gmra.mxu2 %v12249_v56 }
 0x5eb   :  { %6108 = vmatmul.bf16.gmra.mxu1 %v12279_v42  ;;  %6166 = vmatmul.bf16.gmra.mxu3 %v12279_v42 }
 0x5fa   :  { %6296 = vmatmul.bf16.vlgmr.msra.gmra.mxu0 %v12219_v40  ;;  %6354 = vmatmul.bf16.vlgmr.msra.gmra.mxu2 %v12219_v40 }
 0x5fb   :  { %6209 = vmatmul.bf16.vlgmr.msrb.gmra.mxu1 %v12255_v8  ;;  %6267 = vmatmul.bf16.vlgmr.msrb.gmra.mxu3 %v12255_v8 }
 0x5fc   :  { %6433 = vmatpush.bf16.msrb.mxu1 %v10355_v7  ;;  %6491 = vmatpush.bf16.msrb.mxu3 %v10359_v61  ;;  %v10466_v7 = vld [vmem:[#allocation13 + $0xc8] sm:$0xf]  ;;  %v11219_v61 = vld [vmem:[#allocation13 + $0xd4] sm:$0xf0] }
 0x5fd   :  { %6782 = vmatpush.bf16.msra.mxu0 %v12354_v35  ;;  %6808 = vmatpush.bf16.msra.mxu2 %v12356_v51 }
 0x600   :  { %6434 = vmatpush.bf16.msrb.mxu1 %v10323_v19  ;;  %6492 = vmatpush.bf16.msrb.mxu3 %v10327_v24  ;;  %v12371_v19 = vor.u32 %v11219_v61, %v10466_v7  ;;  %v11155_v24 = vld [vmem:[#allocation11 + $0x2dc] sm:$0xf]  ;;  %v12401_v7 = vor.u32 %v11211_v32, %v10434_v17 }
 0x601   :  { %6783 = vmatpush.bf16.msra.mxu0 %v12367_v5  ;;  %v11147_v61 = vld [vmem:[#allocation11 + $0x29c] sm:$0xf] }
 0x602   :  { %6809 = vmatpush.bf16.msra.mxu2 %v12371_v19 }
 0x604   :  { %6435 = vmatpush.bf16.msrb.mxu1 %v10291_v13  ;;  %6493 = vmatpush.bf16.msrb.mxu3 %v10295_v12  ;;  %v10231_v13 = vor.u32 %v11155_v24, %v10228_v15  ;;  %v10195_v12 = vor.u32 %v11151_v41, %v10194_v63  ;;  %v10410_v24 = vld [vmem:[#allocation13 + $0x60] sm:$0xf]  ;;  %v10418_v63 = vld [vmem:[#allocation13 + $0x68] sm:$0xf]  ;;  %v10162_v41 = vld [vmem:[#allocation11 + $0x258] sm:$0xf] }
 0x605   :  { %6784 = vmatpush.bf16.msra.mxu0 %v12380_v58 }
 0x608   :  { %6436 = vmatpush.bf16.msrb.mxu1 %v10259_v46  ;;  %6494 = vmatpush.bf16.msrb.mxu3 %v10263_v10  ;;  %v10450_v46 = vld [vmem:[#allocation13 + $0xa8] sm:$0xf]  ;;  %v11210_v10 = vld [vmem:[#allocation13 + $0x8c] sm:$0xf0] }
 0x609   :  { %v12394_v11 = vor.u32 %v11210_v10, %v10426_v29  ;;  %v11202_v29 = vld [vmem:[#allocation13 + $0x4c] sm:$0xf0]  ;;  %v10402_v10 = vld [vmem:[#allocation13 + $0x48] sm:$0xf] }
 0x60a   :  { %6301 = vmatmul.bf16.gmra.mxu0 %v12225_v55  ;;  %6359 = vmatmul.bf16.gmra.mxu2 %v12225_v55 }
 0x60b   :  { %6214 = vmatmul.bf16.gmra.mxu1 %v12263_v20  ;;  %6272 = vmatmul.bf16.gmra.mxu3 %v12263_v20 }
 0x60c   :  { %6437 = vmatpush.bf16.msrb.mxu1 %v10227_v28  ;;  %6495 = vmatpush.bf16.msrb.mxu3 %v10231_v13  ;;  %v6071_v28 = vadd.f32 %v12297_v6, %v12337_v4  ;;  %v11206_v6 = vld [vmem:[#allocation13 + $0x6c] sm:$0xf0]  ;;  %v11207_v13 = vld [vmem:[#allocation13 + $0x74] sm:$0xf0] }
 0x60d   :  { %6785 = vmatpush.bf16.msra.mxu0 %v12394_v11  ;;  %v12410_v48 = vor.u32 %v11206_v6, %v10410_v24  ;;  %v11139_v24 = vld [vmem:[#allocation11 + $0x25c] sm:$0xf]  ;;  %v10130_v6 = vld [vmem:[#allocation11 + $0x218] sm:$0xf] }
 0x610   :  { %6438 = vmatpush.bf16.msrb.mxu1 %v10195_v12  ;;  %v10163_v12 = vor.u32 %v11143_v16, %v10162_v41  ;;  %v10378_v41 = vld [vmem:[#allocation13 + $0x20] sm:$0xf]  ;;  %v11198_v16 = vld [vmem:[#allocation13 + $0x2c] sm:$0xf0] }
 0x611   :  { %6786 = vmatpush.bf16.msra.mxu0 %v12410_v48 }
 0x614   :  { %6439 = vmatpush.bf16.msrb.mxu1 %v10163_v12 }
 0x61a   :  { %6306 = vmatmul.bf16.gmra.mxu0 %v12231_v22  ;;  %6364 = vmatmul.bf16.gmra.mxu2 %v12231_v22 }
 0x61b   :  { %6219 = vmatmul.bf16.gmra.mxu1 %v12271_v52  ;;  %6277 = vmatmul.bf16.gmra.mxu3 %v12271_v52 }
 0x627   :  { %v12321_v25 = vpop.f32.mrf.mxu0 }
 0x62a   :  { %6311 = vmatmul.bf16.gmra.mxu0 %v12249_v56  ;;  %6369 = vmatmul.bf16.gmra.mxu2 %v12249_v56 }
 0x62b   :  { %6224 = vmatmul.bf16.gmra.mxu1 %v12279_v42  ;;  %6282 = vmatmul.bf16.gmra.mxu3 %v12279_v42 }
 0x62d   :  { %v12327_v44 = vpop.f32.mrf.mxu2 }
 0x62f   :  { %v12329_v0 = vpop.f32.mrf.mxu0 }
 0x635   :  { %v12339_v49 = vpop.f32.mrf.mxu2 }
 0x637   :  { %v12343_v57 = vpop.f32.mrf.mxu0 }
 0x638   :  { %v6094_v30 = vpop.f32.mrf.mxu1 }
 0x639   :  { %v12348_v62 = vadd.f32 %v6094_v30, %v6066_v45  ;;  %v11215_v45 = vld [vmem:[#allocation13 + $0xb4] sm:$0xf0]  ;;  %v12383_v30 = vperm.slane %v12334_v50, 3 }
 0x63a   :  { %6412 = vmatmul.bf16.vlgmr.msrb.gmra.mxu0 %v12219_v40  ;;  %6470 = vmatmul.bf16.vlgmr.msrb.gmra.mxu2 %v12219_v40  ;;  %v12385_v31 = vor.u32 %v11215_v45, %v10450_v46  ;;  %v12413_v46 = vor.u32 %v11207_v13, %v10418_v63  ;;  %v11135_v13 = vld [vmem:[#allocation11 + $0x234] sm:$0xf0] }
 0x63b   :  { %6325 = vmatmul.bf16.vlgmr.msra.gmra.mxu1 %v12255_v8  ;;  %6383 = vmatmul.bf16.vlgmr.msra.gmra.mxu3 %v12255_v8  ;;  %13028 = vst [vmem:[#allocation51_spill] sm:$0xff] %v12383_v30  ;;  %v10131_v12 = vor.u32 %v11135_v13, %v10130_v6  ;;  %v11194_v13 = vld [vmem:[#allocation13 + $0xc] sm:$0xf0] }
 0x63c   :  { %6810 = vmatpush.bf16.msra.mxu2 %v12385_v31 }
 0x63d   :  { %v12360_v40 = vpop.f32.mrf.mxu2  ;;  %6440 = vmatpush.bf16.msrb.mxu1 %v10131_v12 }
 0x63e   :  { %v6152_v1 = vpop.f32.mrf.mxu3 }
 0x63f   :  { %v12369_v18 = vadd.f32 %v6152_v1, %v6124_v43  ;;  %v6183_v39 = vpop.f32.mrf.mxu0 }
 0x640   :  { %v12373_v27 = vpop.f32.mrf.mxu1  ;;  %v12376_v23 = vadd.f32 %v6183_v39, %v12365_v3  ;;  %v10196_v39 = vld [vmem:[#allocation11 + $0x2b8] sm:$0xf0]  ;;  %6811 = vmatpush.bf16.msra.mxu2 %v12401_v7 }
 0x641   :  { %13027 = vst [vmem:[#allocation50_spill] sm:$0xff] %v12373_v27  ;;  %v10199_v15 = vor.u32 %v11147_v61, %v10196_v39 }
 0x643   :  { %6496 = vmatpush.bf16.msrb.mxu3 %v10199_v15  ;;  %v10164_v15 = vld [vmem:[#allocation11 + $0x278] sm:$0xf0] }
 0x644   :  { %6812 = vmatpush.bf16.msra.mxu2 %v12413_v46  ;;  %v10167_v63 = vor.u32 %v11139_v24, %v10164_v15  ;;  %v10362_v24 = vld [vmem:[#allocation13] sm:$0xf] }
 0x645   :  { %v6241_v33 = vpop.f32.mrf.mxu2 }
 0x646   :  { %v12388_v21 = vpop.f32.mrf.mxu3  ;;  %v12391_v54 = vadd.f32 %v6241_v33, %v12383_v30  ;;  %v10394_v33 = vld [vmem:[#allocation13 + $0x40] sm:$0xf] }
 0x647   :  { %13029 = vst [vmem:[#allocation52_spill] sm:$0xff] %v12388_v21  ;;  %v6186_v43 = vpop.f32.mrf.mxu0  ;;  %6497 = vmatpush.bf16.msrb.mxu3 %v10167_v63  ;;  %v6076_v63 = vadd.f32 %v12309_v26, %v12337_v4  ;;  %v11220_v26 = vld [vmem:[#allocation13 + $0xe4] sm:$0xf] }
 0x648   :  { %v6099_v14 = vpop.f32.mrf.mxu1  ;;  %v12399_v60 = vadd.f32 %v6186_v43, %v12365_v3  ;;  %v11203_v43 = vld [vmem:[#allocation13 + $0x54] sm:$0xf0] }
 0x649   :  { %v12403_v1 = vadd.f32 %v6099_v14, %v6071_v28  ;;  %v12421_v28 = vor.u32 %v11202_v29, %v10394_v33  ;;  %v11199_v33 = vld [vmem:[#allocation13 + $0x34] sm:$0xf0] }
 0x64a   :  { %6417 = vmatmul.bf16.gmra.mxu0 %v12225_v55  ;;  %6475 = vmatmul.bf16.gmra.mxu2 %v12225_v55  ;;  %v6129_v55 = vadd.f32 %v12299_v38, %v12346_v9  ;;  %v12430_v38 = vor.u32 %v11203_v43, %v10402_v10  ;;  %v10132_v43 = vld [vmem:[#allocation11 + $0x238] sm:$0xf0] }
 0x64b   :  { %13030 = vst [vmem:[#allocation24_spill] sm:$0xff] %v12403_v1  ;;  %6330 = vmatmul.bf16.gmra.mxu1 %v12263_v20  ;;  %6388 = vmatmul.bf16.gmra.mxu3 %v12263_v20 }
 0x64c   :  { %6787 = vmatpush.bf16.msra.mxu0 %v12421_v28  ;;  %6813 = vmatpush.bf16.msra.mxu2 %v12430_v38 }
 0x64d   :  { %v6244_v45 = vpop.f32.mrf.mxu2 }
 0x64e   :  { %v6157_v17 = vpop.f32.mrf.mxu3  ;;  %v12419_v32 = vadd.f32 %v6244_v45, %v12383_v30  ;;  %v10386_v45 = vld [vmem:[#allocation13 + $0x28] sm:$0xf] }
 0x64f   :  { %v12423_v14 = vadd.f32 %v6157_v17, %v6129_v55  ;;  %v12425_v61 = vpop.f32.mrf.mxu0  ;;  %v12433_v55 = vor.u32 %v11198_v16, %v10378_v41  ;;  %v12436_v29 = vor.u32 %v11199_v33, %v10386_v45  ;;  %v11131_v17 = vld [vmem:[#allocation11 + $0x21c] sm:$0xf]  ;;  %v10370_v41 = vld [vmem:[#allocation13 + $0x8] sm:$0xf]  ;;  %v11195_v16 = vld [vmem:[#allocation13 + $0x14] sm:$0xf0]  ;;  %v12445_v45 = vor.u32 %v11194_v13, %v10362_v24 }
 0x650   :  { %13032 = vst [vmem:[#allocation27_spill] sm:$0xff] %v12425_v61  ;;  %v12427_v39 = vpop.f32.mrf.mxu1  ;;  %v10135_v6 = vor.u32 %v11131_v17, %v10132_v43  ;;  %v12451_v2 = vor.u32 %v11195_v16, %v10370_v41  ;;  %v6134_v43 = vadd.f32 %v12313_v36, %v12346_v9  ;;  %v11216_v36 = vld [vmem:[#allocation13 + $0xc4] sm:$0xf]  ;;  %v10452_v61 = vld [vmem:[#allocation13 + $0xb8] sm:$0xf0] }
 0x651   :  { %13031 = vst [vmem:[#allocation26_spill] sm:$0xff] %v12423_v14  ;;  %6788 = vmatpush.bf16.msra.mxu0 %v12433_v55  ;;  %6814 = vmatpush.bf16.msra.mxu2 %v12436_v29 }
 0x652   :  { %13033 = vst [vmem:[#allocation28_spill] sm:$0xff] %v12427_v39  ;;  %6498 = vmatpush.bf16.msrb.mxu3 %v10135_v6  ;;  %v10428_v39 = vld [vmem:[#allocation13 + $0x90] sm:$0xf0] }
 0x655   :  { %v12438_v10 = vpop.f32.mrf.mxu2  ;;  %6789 = vmatpush.bf16.msra.mxu0 %v12445_v45  ;;  %6815 = vmatpush.bf16.msra.mxu2 %v12451_v2 }
 0x656   :  { %13034 = vst [vmem:[#allocation45_spill] sm:$0xff] %v12438_v10  ;;  %v12441_v15 = vpop.f32.mrf.mxu3 }
 0x657   :  { %13035 = vst [vmem:[#allocation46_spill] sm:$0xff] %v12441_v15  ;;  %v6191_v47 = vpop.f32.mrf.mxu0  ;;  %v11208_v15 = vld [vmem:[#allocation13 + $0x84] sm:$0xf] }
 0x658   :  { %v6104_v33 = vpop.f32.mrf.mxu1  ;;  %v12448_v12 = vadd.f32 %v6191_v47, %v12365_v3  ;;  %v10476_v47 = vld [vmem:[#allocation13 + $0xf0] sm:$0xf0]  ;;  %v12529_v53 = vor.u32 %v11208_v15, %v10428_v39 }
 0x659   :  { %v12453_v10 = vadd.f32 %v6104_v33, %v6076_v63  ;;  %v12461_v17 = vor.u32 %v11220_v26, %v10476_v47  ;;  %6863 = vmatpush.bf16.msrb.mxu0 %v12354_v35  ;;  %6889 = vmatpush.bf16.msrb.mxu2 %v12356_v51  ;;  %v11221_v63 = vld [vmem:[#allocation13 + $0xec] sm:$0xf]  ;;  %v10484_v33 = vld [vmem:[#allocation13 + $0xf8] sm:$0xf0]  ;;  %v10460_v47 = vld [vmem:[#allocation13 + $0xd0] sm:$0xf0] }
 0x65a   :  { %6422 = vmatmul.bf16.gmra.mxu0 %v12231_v22  ;;  %6480 = vmatmul.bf16.gmra.mxu2 %v12231_v22  ;;  %v12479_v26 = vor.u32 %v11221_v63, %v10484_v33 }
 0x65b   :  { %13036 = vst [vmem:[#allocation47_spill] sm:$0xff] %v12453_v10  ;;  %6335 = vmatmul.bf16.gmra.mxu1 %v12271_v52  ;;  %6393 = vmatmul.bf16.gmra.mxu3 %v12271_v52  ;;  %v11213_v10 = vld [vmem:[#allocation13 + $0xac] sm:$0xf] }
 0x65c   :  { %6795 = vmatpush.bf16.msra.mxu1 %v12461_v17  ;;  %6821 = vmatpush.bf16.msra.mxu3 %v12479_v26 }
 0x65d   :  { %v6249_v24 = vpop.f32.mrf.mxu2  ;;  %6864 = vmatpush.bf16.msrb.mxu0 %v12367_v5  ;;  %6890 = vmatpush.bf16.msrb.mxu2 %v12371_v19 }
 0x65e   :  { %v6162_v6 = vpop.f32.mrf.mxu3  ;;  %v12468_v22 = vadd.f32 %v6249_v24, %v12383_v30  ;;  %v12481_v24 = vor.u32 %v11216_v36, %v10460_v47 }
 0x65f   :  { %v12471_v13 = vadd.f32 %v6162_v6, %v6134_v43  ;;  %v12473_v41 = vpop.f32.mrf.mxu0 }
 0x660   :  { %13038 = vst [vmem:[#allocation29_spill] sm:$0xff] %v12473_v41  ;;  %v12475_v16 = vpop.f32.mrf.mxu1  ;;  %6796 = vmatpush.bf16.msra.mxu1 %v12481_v24  ;;  %v6081_v41 = vadd.f32 %v12321_v25, %v12337_v4  ;;  %v11212_v25 = vld [vmem:[#allocation13 + $0xa4] sm:$0xf] }
 0x661   :  { %13037 = vst [vmem:[#allocation49_spill] sm:$0xff] %v12471_v13  ;;  %6865 = vmatpush.bf16.msrb.mxu0 %v12380_v58  ;;  %6891 = vmatpush.bf16.msrb.mxu2 %v12385_v31 }
 0x662   :  { %13039 = vst [vmem:[#allocation30_spill] sm:$0xff] %v12475_v16  ;;  %v11217_v16 = vld [vmem:[#allocation13 + $0xcc] sm:$0xf] }
 0x665   :  { %v12485_v43 = vpop.f32.mrf.mxu2  ;;  %6866 = vmatpush.bf16.msrb.mxu0 %v12394_v11  ;;  %6892 = vmatpush.bf16.msrb.mxu2 %v12401_v7 }
 0x666   :  { %13040 = vst [vmem:[#allocation31_spill] sm:$0xff] %v12485_v43  ;;  %v12489_v6 = vpop.f32.mrf.mxu3  ;;  %v10468_v43 = vld [vmem:[#allocation13 + $0xd8] sm:$0xf0] }
 0x667   :  { %13041 = vst [vmem:[#allocation33_spill] sm:$0xff] %v12489_v6  ;;  %v6196_v63 = vpop.f32.mrf.mxu0  ;;  %v12502_v6 = vor.u32 %v11217_v16, %v10468_v43  ;;  %v6083_v43 = vadd.f32 %v12329_v0, %v12337_v4  ;;  %v6141_v0 = vadd.f32 %v12339_v49, %v12346_v9  ;;  %v10436_v49 = vld [vmem:[#allocation13 + $0x98] sm:$0xf0] }
 0x668   :  { %v6109_v33 = vpop.f32.mrf.mxu1  ;;  %v12494_v36 = vadd.f32 %v6196_v63, %v12365_v3  ;;  %v10444_v63 = vld [vmem:[#allocation13 + $0xb0] sm:$0xf0] }
 0x669   :  { %v12497_v47 = vadd.f32 %v6109_v33, %v6081_v41  ;;  %6822 = vmatpush.bf16.msra.mxu3 %v12502_v6  ;;  %v12507_v41 = vor.u32 %v11212_v25, %v10444_v63  ;;  %6867 = vmatpush.bf16.msrb.mxu0 %v12410_v48  ;;  %v6139_v33 = vadd.f32 %v12327_v44, %v12346_v9 }
 0x66a   :  { %6427 = vmatmul.bf16.gmra.mxu0 %v12249_v56  ;;  %6485 = vmatmul.bf16.gmra.mxu2 %v12249_v56 }
 0x66b   :  { %13042 = vst [vmem:[#allocation40_spill] sm:$0xff] %v12497_v47  ;;  %6340 = vmatmul.bf16.gmra.mxu1 %v12279_v42  ;;  %6398 = vmatmul.bf16.gmra.mxu3 %v12279_v42 }
 0x66c   :  { %6893 = vmatpush.bf16.msrb.mxu2 %v12413_v46  ;;  %6797 = vmatpush.bf16.msra.mxu1 %v12507_v41 }
 0x66d   :  { %v6254_v47 = vpop.f32.mrf.mxu2  ;;  %6868 = vmatpush.bf16.msrb.mxu0 %v12421_v28 }
 0x66e   :  { %v6167_v56 = vpop.f32.mrf.mxu3  ;;  %v12514_v16 = vadd.f32 %v6254_v47, %v12383_v30  ;;  %v12527_v47 = vor.u32 %v11213_v10, %v10452_v61  ;;  %v6182_v61 = vadd.f32 %v12343_v57, %v12365_v3  ;;  %v11204_v57 = vld [vmem:[#allocation13 + $0x64] sm:$0xf] }
 0x66f   :  { %v12519_v13 = vadd.f32 %v6167_v56, %v6139_v33  ;;  %v12521_v25 = vpop.f32.mrf.mxu0 }
 0x670   :  { %13044 = vst [vmem:[#allocation43_spill] sm:$0xff] %v12521_v25  ;;  %v6111_v63 = vpop.f32.mrf.mxu1  ;;  %6894 = vmatpush.bf16.msrb.mxu2 %v12430_v38  ;;  %6823 = vmatpush.bf16.msra.mxu3 %v12527_v47 }
 0x671   :  { %13043 = vst [vmem:[#allocation42_spill] sm:$0xff] %v12519_v13  ;;  %v12524_v44 = vadd.f32 %v6111_v63, %v6083_v43  ;;  %6869 = vmatpush.bf16.msrb.mxu0 %v12433_v55  ;;  %6798 = vmatpush.bf16.msra.mxu1 %v12529_v53  ;;  %v11209_v63 = vld [vmem:[#allocation13 + $0x8c] sm:$0xf] }
 0x672   :  { %v12549_v25 = vor.u32 %v11209_v63, %v10436_v49 }
 0x673   :  { %13045 = vst [vmem:[#allocation44_spill] sm:$0xff] %v12524_v44  ;;  %v11200_v44 = vld [vmem:[#allocation13 + $0x44] sm:$0xf] }
 0x674   :  { %6895 = vmatpush.bf16.msrb.mxu2 %v12436_v29  ;;  %6824 = vmatpush.bf16.msra.mxu3 %v12549_v25 }
 0x675   :  { %v12535_v33 = vpop.f32.mrf.mxu2  ;;  %6870 = vmatpush.bf16.msrb.mxu0 %v12445_v45 }
 0x676   :  { %13046 = vst [vmem:[#allocation32_spill] sm:$0xff] %v12535_v33  ;;  %v6169_v56 = vpop.f32.mrf.mxu3  ;;  %v13048_v33 = vmov 0  }
 0x677   :  { %v12541_v10 = vadd.f32 %v6169_v56, %v6141_v0  ;;  %v6297_v39 = vpop.f32.mrf.mxu0  ;;  %v10412_v0 = vld [vmem:[#allocation13 + $0x70] sm:$0xf0] }
 0x678   :  { %v6210_v15 = vpop.f32.mrf.mxu1  ;;  %6896 = vmatpush.bf16.msrb.mxu2 %v12451_v2  ;;  %v12554_v56 = vor.u32 %v11204_v57, %v10412_v0  ;;  %v11205_v0 = vld [vmem:[#allocation13 + $0x6c] sm:$0xf] }
 0x679   :  { %13047 = vst [vmem:[#allocation34_spill] sm:$0xff] %v12541_v10  ;;  %v12544_v43 = vadd.f32 %v6210_v15, %v6182_v61  ;;  %v6240_v61 = vadd.f32 %v12360_v40, %v12383_v30  ;;  %v10420_v10 = vld [vmem:[#allocation13 + $0x78] sm:$0xf0] }
 0x67a   :  { %6790 = vmatmul.bf16.vlgmr.msra.gmra.mxu0 %v13048_v33  ;;  %6816 = vmatmul.bf16.vlgmr.msra.gmra.mxu2 %v13048_v33  ;;  %v12568_v40 = vor.u32 %v11205_v0, %v10420_v10  ;;  %v11201_v10 = vld [vmem:[#allocation13 + $0x4c] sm:$0xf]  ;;  %v10404_v0 = vld [vmem:[#allocation13 + $0x58] sm:$0xf0] }
 0x67b   :  { %6441 = vmatmul.bf16.vlgmr.msrb.gmra.mxu1 %v12255_v8  ;;  %6499 = vmatmul.bf16.vlgmr.msrb.gmra.mxu3 %v12255_v8  ;;  %v10388_v30 = vld [vmem:[#allocation13 + $0x38] sm:$0xf0] }
 0x67c   :  { %6944 = vmatpush.bf16.msra.mxu0 %v12354_v35  ;;  %6970 = vmatpush.bf16.msra.mxu2 %v12356_v51 }
 0x67d   :  { %v6355_v39 = vpop.f32.mrf.mxu2  ;;  %6799 = vmatpush.bf16.msra.mxu1 %v12554_v56  ;;  %6825 = vmatpush.bf16.msra.mxu3 %v12568_v40 }
 0x67e   :  { %v6268_v15 = vpop.f32.mrf.mxu3  ;;  %v10396_v39 = vld [vmem:[#allocation13 + $0x50] sm:$0xf0] }
 0x67f   :  { %v12561_v63 = vadd.f32 %v6268_v15, %v6240_v61  ;;  %v6299_v8 = vpop.f32.mrf.mxu0  ;;  %v12570_v13 = vor.u32 %v11200_v44, %v10396_v39  ;;  %v12584_v39 = vor.u32 %v11201_v10, %v10404_v0 }
 0x680   :  { %v6212_v49 = vpop.f32.mrf.mxu1  ;;  %6945 = vmatpush.bf16.msra.mxu0 %v12367_v5  ;;  %6971 = vmatpush.bf16.msra.mxu2 %v12371_v19 }
 0x681   :  { %v12565_v57 = vadd.f32 %v6212_v49, %v12376_v23  ;;  %6800 = vmatpush.bf16.msra.mxu1 %v12570_v13  ;;  %6826 = vmatpush.bf16.msra.mxu3 %v12584_v39 }
 0x683   :  { %13049 = vst [vmem:[#allocation35_spill] sm:$0xff] %v12565_v57 }
 0x684   :  { %6946 = vmatpush.bf16.msra.mxu0 %v12380_v58  ;;  %6972 = vmatpush.bf16.msra.mxu2 %v12385_v31 }
 0x685   :  { %v6357_v61 = vpop.f32.mrf.mxu2 }
 0x686   :  { %v6270_v23 = vpop.f32.mrf.mxu3  ;;  %v11196_v61 = vld [vmem:[#allocation13 + $0x24] sm:$0xf] }
 0x687   :  { %v12577_v15 = vadd.f32 %v6270_v23, %v12391_v54  ;;  %v6302_v8 = vpop.f32.mrf.mxu0  ;;  %v10380_v54 = vld [vmem:[#allocation13 + $0x30] sm:$0xf0] }
 0x688   :  { %v6215_v49 = vpop.f32.mrf.mxu1  ;;  %6947 = vmatpush.bf16.msra.mxu0 %v12394_v11  ;;  %6973 = vmatpush.bf16.msra.mxu2 %v12401_v7  ;;  %v12589_v23 = vor.u32 %v11196_v61, %v10380_v54  ;;  %v11192_v61 = vld [vmem:[#allocation13 + $0x4] sm:$0xf] }
 0x689   :  { %13050 = vst [vmem:[#allocation36_spill] sm:$0xff] %v12577_v15  ;;  %v12581_v44 = vadd.f32 %v6215_v49, %v12399_v60 }
 0x68a   :  { %6801 = vmatpush.bf16.msra.mxu1 %v12589_v23 }
 0x68b   :  { %13051 = vst [vmem:[#allocation37_spill] sm:$0xff] %v12581_v44  ;;  %6446 = vmatmul.bf16.gmra.mxu1 %v12263_v20  ;;  %6504 = vmatmul.bf16.gmra.mxu3 %v12263_v20  ;;  %v11197_v20 = vld [vmem:[#allocation13 + $0x2c] sm:$0xf] }
 0x68c   :  { %6948 = vmatpush.bf16.msra.mxu0 %v12410_v48  ;;  %6974 = vmatpush.bf16.msra.mxu2 %v12413_v46  ;;  %v12601_v54 = vor.u32 %v11197_v20, %v10388_v30 }
 0x68d   :  { %v6360_v60 = vpop.f32.mrf.mxu2 }
 0x68e   :  { %v6273_v8 = vpop.f32.mrf.mxu3  ;;  %v10364_v60 = vld [vmem:[#allocation13 + $0x10] sm:$0xf0]  ;;  %6827 = vmatpush.bf16.msra.mxu3 %v12601_v54 }
 0x68f   :  { %v12595_v49 = vadd.f32 %v6273_v8, %v12419_v32  ;;  %v6304_v10 = vpop.f32.mrf.mxu0  ;;  %v12603_v3 = vor.u32 %v11192_v61, %v10364_v60  ;;  %v11193_v8 = vld [vmem:[#allocation13 + $0xc] sm:$0xf] }
 0x690   :  { %v12597_v0 = vpop.f32.mrf.mxu1  ;;  %6949 = vmatpush.bf16.msra.mxu0 %v12421_v28  ;;  %6975 = vmatpush.bf16.msra.mxu2 %v12430_v38  ;;  %v10372_v10 = vld [vmem:[#allocation13 + $0x18] sm:$0xf0] }
 0x691   :  { %13052 = vst [vmem:[#allocation38_spill] sm:$0xff] %v12595_v49  ;;  %6802 = vmatpush.bf16.msra.mxu1 %v12603_v3  ;;  %v12611_v37 = vor.u32 %v11193_v8, %v10372_v10 }
 0x692   :  { %13053 = vst [vmem:[#allocation39_spill] sm:$0xff] %v12597_v0 }
 0x693   :  { %6828 = vmatpush.bf16.msra.mxu3 %v12611_v37 }
 0x694   :  { %6950 = vmatpush.bf16.msra.mxu0 %v12433_v55  ;;  %6976 = vmatpush.bf16.msra.mxu2 %v12436_v29 }
 0x695   :  { %v6362_v32 = vpop.f32.mrf.mxu2  ;;  %6876 = vmatpush.bf16.msrb.mxu1 %v12461_v17 }
 0x696   :  { %v12609_v0 = vpop.f32.mrf.mxu3 }
 0x697   :  { %13054 = vst [vmem:[#allocation41_spill] sm:$0xff] %v12609_v0  ;;  %v6307_v30 = vpop.f32.mrf.mxu0  ;;  %6902 = vmatpush.bf16.msrb.mxu3 %v12479_v26 }
 0x698   :  { %v6220_v20 = vpop.f32.mrf.mxu1  ;;  %6951 = vmatpush.bf16.msra.mxu0 %v12445_v45  ;;  %6977 = vmatpush.bf16.msra.mxu2 %v12451_v2 }
 0x699   :  { %v12617_v61 = vadd.f32 %v6220_v20, %v12448_v12  ;;  %6877 = vmatpush.bf16.msrb.mxu1 %v12481_v24 }
 0x69b   :  { %13055 = vst [vmem:[#allocation53_spill] sm:$0xff] %v12617_v61  ;;  %6451 = vmatmul.bf16.gmra.mxu1 %v12271_v52  ;;  %6509 = vmatmul.bf16.gmra.mxu3 %v12271_v52 }
 0x69c   :  { %6903 = vmatpush.bf16.msrb.mxu3 %v12502_v6 }
 0x69d   :  { %v6365_v60 = vpop.f32.mrf.mxu2  ;;  %6878 = vmatpush.bf16.msrb.mxu1 %v12507_v41 }
 0x69e   :  { %v6278_v32 = vpop.f32.mrf.mxu3 }
 0x69f   :  { %v12627_v8 = vadd.f32 %v6278_v32, %v12468_v22  ;;  %v6309_v12 = vpop.f32.mrf.mxu0 }
 0x6a0   :  { %v12629_v10 = vpop.f32.mrf.mxu1  ;;  %6904 = vmatpush.bf16.msrb.mxu3 %v12527_v47 }
 0x6a1   :  { %13056 = vst [vmem:[#allocation54_spill] sm:$0xff] %v12627_v8  ;;  %6879 = vmatpush.bf16.msrb.mxu1 %v12529_v53 }
 0x6a2   :  { %13057 = vst [vmem:[#allocation55_spill] sm:$0xff] %v12629_v10 }
 0x6a4   :  { %6905 = vmatpush.bf16.msrb.mxu3 %v12549_v25 }
 0x6a5   :  { %v6367_v30 = vpop.f32.mrf.mxu2  ;;  %6880 = vmatpush.bf16.msrb.mxu1 %v12554_v56 }
 0x6a6   :  { %v12634_v52 = vpop.f32.mrf.mxu3 }
 0x6a7   :  { %13058 = vst [vmem:[#allocation56_spill] sm:$0xff] %v12634_v52  ;;  %v6312_v20 = vpop.f32.mrf.mxu0 }
 0x6a8   :  { %v6225_v60 = vpop.f32.mrf.mxu1  ;;  %6906 = vmatpush.bf16.msrb.mxu3 %v12568_v40 }
 0x6a9   :  { %v12638_v61 = vadd.f32 %v6225_v60, %v12494_v36  ;;  %6881 = vmatpush.bf16.msrb.mxu1 %v12570_v13 }
 0x6ab   :  { %13059 = vst [vmem:[#allocation57_spill] sm:$0xff] %v12638_v61  ;;  %6456 = vmatmul.bf16.gmra.mxu1 %v12279_v42  ;;  %6514 = vmatmul.bf16.gmra.mxu3 %v12279_v42 }
 0x6ac   :  { %6907 = vmatpush.bf16.msrb.mxu3 %v12584_v39 }
 0x6ad   :  { %v6370_v22 = vpop.f32.mrf.mxu2  ;;  %6882 = vmatpush.bf16.msrb.mxu1 %v12589_v23 }
 0x6ae   :  { %v6283_v32 = vpop.f32.mrf.mxu3 }
 0x6af   :  { %v12647_v12 = vadd.f32 %v6283_v32, %v12514_v16  ;;  %v12649_v30 = vpop.f32.mrf.mxu0 }
 0x6b0   :  { %v12651_v36 = vpop.f32.mrf.mxu1  ;;  %6908 = vmatpush.bf16.msrb.mxu3 %v12601_v54 }
 0x6b1   :  { %13060 = vst [vmem:[#allocation58_spill] sm:$0xff] %v12647_v12  ;;  %6883 = vmatpush.bf16.msrb.mxu1 %v12603_v3 }
 0x6b2   :  { %13061 = vst [vmem:[#allocation59_spill] sm:$0xff] %v12651_v36 }
 0x6b4   :  { %6909 = vmatpush.bf16.msrb.mxu3 %v12611_v37 }
 0x6b5   :  { %v12655_v20 = vpop.f32.mrf.mxu2 }
 0x6b6   :  { %v12658_v42 = vpop.f32.mrf.mxu3 }
 0x6b7   :  { %13062 = vst [vmem:[#allocation60_spill] sm:$0xff] %v12658_v42  ;;  %v6413_v60 = vpop.f32.mrf.mxu0 }
 0x6b8   :  { %v6326_v22 = vpop.f32.mrf.mxu1 }
 0x6bb   :  { %6803 = vmatmul.bf16.vlgmr.msra.gmra.mxu1 %v13048_v33  ;;  %6829 = vmatmul.bf16.vlgmr.msra.gmra.mxu3 %v13048_v33 }
 0x6bc   :  { %6957 = vmatpush.bf16.msra.mxu1 %v12461_v17  ;;  %6983 = vmatpush.bf16.msra.mxu3 %v12479_v26 }
 0x6bd   :  { %v6471_v16 = vpop.f32.mrf.mxu2 }
 0x6be   :  { %v6384_v32 = vpop.f32.mrf.mxu3 }
 0x6bf   :  { %v6415_v36 = vpop.f32.mrf.mxu0 }
 0x6c0   :  { %v6328_v12 = vpop.f32.mrf.mxu1  ;;  %6958 = vmatpush.bf16.msra.mxu1 %v12481_v24  ;;  %6984 = vmatpush.bf16.msra.mxu3 %v12502_v6 }
 0x6c4   :  { %6959 = vmatpush.bf16.msra.mxu1 %v12507_v41  ;;  %6985 = vmatpush.bf16.msra.mxu3 %v12527_v47 }
 0x6c5   :  { %v6473_v60 = vpop.f32.mrf.mxu2 }
 0x6c6   :  { %v6386_v22 = vpop.f32.mrf.mxu3 }
 0x6c7   :  { %v6418_v42 = vpop.f32.mrf.mxu0 }
 0x6c8   :  { %v6331_v33 = vpop.f32.mrf.mxu1  ;;  %6960 = vmatpush.bf16.msra.mxu1 %v12529_v53  ;;  %6986 = vmatpush.bf16.msra.mxu3 %v12549_v25 }
 0x6cc   :  { %6961 = vmatpush.bf16.msra.mxu1 %v12554_v56  ;;  %6987 = vmatpush.bf16.msra.mxu3 %v12568_v40 }
 0x6cd   :  { %v6476_v12 = vpop.f32.mrf.mxu2 }
 0x6ce   :  { %v6389_v36 = vpop.f32.mrf.mxu3 }
 0x6cf   :  { %v6420_v16 = vpop.f32.mrf.mxu0 }
 0x6d0   :  { %v6333_v32 = vpop.f32.mrf.mxu1  ;;  %6962 = vmatpush.bf16.msra.mxu1 %v12570_v13  ;;  %6988 = vmatpush.bf16.msra.mxu3 %v12584_v39 }
 0x6d4   :  { %6963 = vmatpush.bf16.msra.mxu1 %v12589_v23  ;;  %6989 = vmatpush.bf16.msra.mxu3 %v12601_v54 }
 0x6d5   :  { %v6478_v42 = vpop.f32.mrf.mxu2 }
 0x6d6   :  { %v6391_v60 = vpop.f32.mrf.mxu3 }
 0x6d7   :  { %v6423_v22 = vpop.f32.mrf.mxu0 }
 0x6d8   :  { %v6336_v33 = vpop.f32.mrf.mxu1  ;;  %6964 = vmatpush.bf16.msra.mxu1 %v12603_v3  ;;  %6990 = vmatpush.bf16.msra.mxu3 %v12611_v37 }
 0x6dd   :  { %v6481_v12 = vpop.f32.mrf.mxu2 }
 0x6de   :  { %v6394_v36 = vpop.f32.mrf.mxu3 }
 0x6df   :  { %v6425_v16 = vpop.f32.mrf.mxu0 }
 0x6e0   :  { %v6338_v32 = vpop.f32.mrf.mxu1 }
 0x6e5   :  { %v6483_v61 = vpop.f32.mrf.mxu2 }
 0x6e6   :  { %v6396_v52 = vpop.f32.mrf.mxu3 }
 0x6e7   :  { %v6428_v10 = vpop.f32.mrf.mxu0 }
 0x6e8   :  { %v6341_v8 = vpop.f32.mrf.mxu1 }
 0x6ed   :  { %v6486_v0 = vpop.f32.mrf.mxu2 }
 0x6ee   :  { %v6399_v49 = vpop.f32.mrf.mxu3 }
 0x6ef   :  { %v6430_v44 = vpop.f32.mrf.mxu0 }
 0x6f0   :  { %v6343_v14 = vpop.f32.mrf.mxu1 }
 0x6f5   :  { %v6488_v42 = vpop.f32.mrf.mxu2 }
 0x6f6   :  { %v6401_v60 = vpop.f32.mrf.mxu3 }
 0x6f7   :  { %v6791_v22 = vpop.f32.mrf.mxu0 }
 0x6f8   :  { %v6442_v33 = vpop.f32.mrf.mxu1  ;;  %v6834_v1 = vadd.f32 %v6791_v22, %v12348_v62  ;;  %v5405_v22 = vperm.slane %v12334_v50, 5 }
 0x6fa   :  { %v6838_v15 = vmul.f32 0.5, %v6834_v1 }
 0x6fc   :  { %11399 = vtanh.f32 %v6838_v15 }
 0x6fd   :  { %v6817_v12 = vpop.f32.mrf.mxu2 }
 0x6fe   :  { %v6500_v36 = vpop.f32.mrf.mxu3  ;;  %v6836_v16 = vadd.f32 %v6817_v12, %v12544_v43  ;;  %v5404_v43 = vperm.slane %v12334_v50, 4 }
 0x6ff   :  { %v6793_v61 = vpop.f32.mrf.mxu0  ;;  %v6373_v36 = vadd.f32 %v12655_v20, %v5405_v22  ;;  %v5407_v20 = vperm.slane %v12334_v50, 7 }
 0x700   :  { %11401 = vtanh.f32 %v6836_v16  ;;  %v6444_v10 = vpop.f32.mrf.mxu1  ;;  %v6315_v61 = vadd.f32 %v12649_v30, %v5404_v43 }
 0x701   :  { %v6402_v10 = vadd.f32 %v6401_v60, %v6373_v36 }
 0x702   :  { %v11400_v8 = vpop.eup %11399 }
 0x703   :  { %v6840_v0 = vmul.f32 0.5, %v11400_v8  ;;  %v6344_v8 = vadd.f32 %v6343_v14, %v6315_v61  ;;  %v6489_v14 = vadd.f32 %v6488_v42, %v5407_v20 }
 0x705   :  { %v6841_v49 = vadd.f32 0.5, %v6840_v0  ;;  %v6819_v52 = vpop.f32.mrf.mxu2 }
 0x706   :  { %v11402_v32 = vpop.eup %11401  ;;  %v6502_v57 = vpop.f32.mrf.mxu3 }
 0x707   :  { %v12680_v21 = vmul.f32 %v11402_v32, %v6841_v49  ;;  %v7431_v57 = vmul.f32 0.5, %v6402_v10  ;;  %v7427_v49 = vmul.f32 0.5, %v6344_v8 }
 0x708   :  { %v6447_v33 = vpop.f32.mrf.mxu1 }
 0x709   :  { %11403 = vtanh.f32 %v7431_v57 }
 0x70a   :  { %11405 = vtanh.f32 %v7427_v49 }
 0x70e   :  { %v6505_v27 = vpop.f32.mrf.mxu3 }
 0x70f   :  { %v5406_v27 = vperm.slane %v12334_v50, 6  ;;  %v11404_v33 = vpop.eup %11403 }
 0x710   :  { %v6449_v62 = vpop.f32.mrf.mxu1 }
 0x711   :  { %v6431_v62 = vadd.f32 %v6430_v44, %v5406_v27 }
 0x716   :  { %v6507_v1 = vpop.f32.mrf.mxu3 }
 0x718   :  { %v6452_v15 = vpop.f32.mrf.mxu1 }
 0x719   :  { %v11406_v15 = vpop.eup %11405 }
 0x71a   :  { %v7429_v30 = vmul.f32 0.5, %v11406_v15 }
 0x71e   :  { %v6510_v12 = vpop.f32.mrf.mxu3 }
 0x71f   :  { %v7433_v12 = vmul.f32 0.5, %v11404_v33 }
 0x720   :  { %v6454_v16 = vpop.f32.mrf.mxu1 }
 0x721   :  { %v7434_v60 = vadd.f32 0.5, %v7433_v12  ;;  %v7430_v16 = vadd.f32 0.5, %v7429_v30 }
 0x726   :  { %v6512_v0 = vpop.f32.mrf.mxu3 }
 0x727   :  { %v7440_v0 = vmul.f32 0.0, %v7434_v60 }
 0x728   :  { %v6457_v52 = vpop.f32.mrf.mxu1 }
 0x72e   :  { %v6515_v32 = vpop.f32.mrf.mxu3 }
 0x730   :  { %v6459_v1 = vpop.f32.mrf.mxu1 }
 0x731   :  { %v6460_v22 = vadd.f32 %v6459_v1, %v6431_v62 }
 0x733   :  { %11407 = vtanh.f32 %v6460_v22 }
 0x736   :  { %v6517_v43 = vpop.f32.mrf.mxu3 }
 0x737   :  { %v6518_v36 = vadd.f32 %v6517_v43, %v6489_v14 }
 0x738   :  { %v6804_v61 = vpop.f32.mrf.mxu1 }
 0x739   :  { %v11408_v10 = vpop.eup %11407  ;;  %v7436_v8 = vmul.f32 0.5, %v6518_v36  ;;  %v6835_v57 = vadd.f32 %v6804_v61, %v12369_v18 }
 0x73a   :  { %v7441_v44 = vmul.f32 %v11408_v10, %v7430_v16 }
 0x73b   :  { %11409 = vtanh.f32 %v7436_v8  ;;  %v6842_v49 = vmul.f32 0.5, %v6835_v57  ;;  %v6126_v8 = vadd.f32 %v12295_v34, %v12346_v9  ;;  %v13063_v57 = vld [vmem:[#allocation50_spill] sm:$0xff] }
 0x73c   :  { %v7442_v52 = vadd.f32 %v7441_v44, %v7440_v0  ;;  %v13064_v44 = vld [vmem:[#allocation52_spill] sm:$0xff] }
 0x73d   :  { %11411 = vtanh.f32 %v6842_v49  ;;  %v6155_v49 = vadd.f32 %v13064_v44, %v6126_v8 }
 0x73e   :  { %11413 = vtanh.f32 %v7442_v52  ;;  %v6830_v50 = vpop.f32.mrf.mxu3 }
 0x73f   :  { %v6837_v27 = vadd.f32 %v6830_v50, %v12561_v63 }
 0x740   :  { %v6806_v42 = vpop.f32.mrf.mxu1 }
 0x741   :  { %v11410_v32 = vpop.eup %11409  ;;  %v6847_v33 = vmul.f32 0.5, %v6837_v27 }
 0x742   :  { %v7438_v62 = vmul.f32 0.5, %v11410_v32 }
 0x743   :  { %v11412_v1 = vpop.eup %11411  ;;  %11415 = vtanh.f32 %v6847_v33 }
 0x744   :  { %v11414_v15 = vpop.eup %11413  ;;  %v7439_v20 = vadd.f32 0.5, %v7438_v62  ;;  %v6844_v22 = vmul.f32 0.5, %v11412_v1 }
 0x746   :  { %v12690_v18 = vmul.f32 %v11414_v15, %v7439_v20  ;;  %v6845_v12 = vadd.f32 0.5, %v6844_v22  ;;  %v6832_v30 = vpop.f32.mrf.mxu3  ;;  %v13065_v15 = vld [vmem:[#allocation35_spill] sm:$0xff] }
 0x748   :  { %v6851_v14 = vmul.f32 0.0, %v6845_v12 }
 0x749   :  { %v11416_v60 = vpop.eup %11415 }
 0x74a   :  { %v12693_v43 = vadd.f32 %v12680_v21, %v6851_v14  ;;  %v6849_v63 = vmul.f32 0.5, %v11416_v60  ;;  %v6068_v21 = vadd.f32 %v12289_v59, %v12337_v4  ;;  %v13066_v59 = vld [vmem:[#allocation36_spill] sm:$0xff] }
 0x74c   :  { %11417 = vtanh.f32 %v12693_v43  ;;  %v6850_v36 = vadd.f32 0.5, %v6849_v63  ;;  %v6097_v0 = vadd.f32 %v13063_v57, %v6068_v21 }
 0x752   :  { %v11418_v16 = vpop.eup %11417 }
 0x753   :  { %v6855_v61 = vmul.f32 %v11418_v16, %v6850_v36 }
 0x755   :  { %v6862_v10 = vpack.c.bf16 %v6855_v61, %v6855_v61 }
 0x757   :  { %6871 = vmatmul.bf16.vlgmr.msrb.gmra.mxu0 %v6862_v10  ;;  %6884 = vmatmul.bf16.vlgmr.msrb.gmra.mxu1 %v6862_v10 }
 0x758   :  { %6897 = vmatmul.bf16.vlgmr.msrb.gmra.mxu2 %v6862_v10  ;;  %6910 = vmatmul.bf16.vlgmr.msrb.gmra.mxu3 %v6862_v10 }
 0x759   :  { %7025 = vmatpush.bf16.msrb.mxu0 %v12354_v35  ;;  %7038 = vmatpush.bf16.msrb.mxu1 %v12461_v17 }
 0x75a   :  { %7051 = vmatpush.bf16.msrb.mxu2 %v12356_v51  ;;  %7064 = vmatpush.bf16.msrb.mxu3 %v12479_v26 }
 0x75d   :  { %7026 = vmatpush.bf16.msrb.mxu0 %v12367_v5  ;;  %7039 = vmatpush.bf16.msrb.mxu1 %v12481_v24 }
 0x75e   :  { %7052 = vmatpush.bf16.msrb.mxu2 %v12371_v19  ;;  %7065 = vmatpush.bf16.msrb.mxu3 %v12502_v6 }
 0x761   :  { %7027 = vmatpush.bf16.msrb.mxu0 %v12380_v58  ;;  %7040 = vmatpush.bf16.msrb.mxu1 %v12507_v41 }
 0x762   :  { %7053 = vmatpush.bf16.msrb.mxu2 %v12385_v31  ;;  %7066 = vmatpush.bf16.msrb.mxu3 %v12527_v47 }
 0x765   :  { %7028 = vmatpush.bf16.msrb.mxu0 %v12394_v11  ;;  %7041 = vmatpush.bf16.msrb.mxu1 %v12529_v53 }
 0x766   :  { %7054 = vmatpush.bf16.msrb.mxu2 %v12401_v7  ;;  %7067 = vmatpush.bf16.msrb.mxu3 %v12549_v25 }
 0x769   :  { %7029 = vmatpush.bf16.msrb.mxu0 %v12410_v48  ;;  %7042 = vmatpush.bf16.msrb.mxu1 %v12554_v56 }
 0x76a   :  { %7055 = vmatpush.bf16.msrb.mxu2 %v12413_v46  ;;  %7068 = vmatpush.bf16.msrb.mxu3 %v12568_v40 }
 0x76d   :  { %7030 = vmatpush.bf16.msrb.mxu0 %v12421_v28  ;;  %7043 = vmatpush.bf16.msrb.mxu1 %v12570_v13 }
 0x76e   :  { %7056 = vmatpush.bf16.msrb.mxu2 %v12430_v38  ;;  %7069 = vmatpush.bf16.msrb.mxu3 %v12584_v39 }
 0x771   :  { %7031 = vmatpush.bf16.msrb.mxu0 %v12433_v55  ;;  %7044 = vmatpush.bf16.msrb.mxu1 %v12589_v23 }
 0x772   :  { %7057 = vmatpush.bf16.msrb.mxu2 %v12436_v29  ;;  %7070 = vmatpush.bf16.msrb.mxu3 %v12601_v54 }
 0x775   :  { %7032 = vmatpush.bf16.msrb.mxu0 %v12445_v45  ;;  %7045 = vmatpush.bf16.msrb.mxu1 %v12603_v3 }
 0x776   :  { %7058 = vmatpush.bf16.msrb.mxu2 %v12451_v2  ;;  %7071 = vmatpush.bf16.msrb.mxu3 %v12611_v37 }
 0x7d4   :  { %v6872_v52 = vpop.f32.mrf.mxu0  ;;  %v6885_v50 = vpop.f32.mrf.mxu1 }
 0x7d5   :  { %v6915_v27 = vadd.f32 %v6872_v52, %v6097_v0  ;;  %v6916_v42 = vadd.f32 %v6885_v50, %v6155_v49 }
 0x7d7   :  { %v6919_v32 = vmul.f32 0.5, %v6915_v27  ;;  %v6923_v33 = vmul.f32 0.5, %v6916_v42 }
 0x7d9   :  { %11419 = vtanh.f32 %v6919_v32 }
 0x7da   :  { %11421 = vtanh.f32 %v6923_v33 }
 0x7db   :  { %v6898_v62 = vpop.f32.mrf.mxu2  ;;  %v6911_v1 = vpop.f32.mrf.mxu3 }
 0x7dc   :  { %v6917_v20 = vadd.f32 %v6898_v62, %v13065_v15  ;;  %v6918_v22 = vadd.f32 %v6911_v1, %v13066_v59  ;;  %v6874_v12 = vpop.f32.mrf.mxu0  ;;  %v6887_v34 = vpop.f32.mrf.mxu1  ;;  %v13067_v62 = vld [vmem:[#allocation24_spill] sm:$0xff]  ;;  %v13068_v15 = vld [vmem:[#allocation26_spill] sm:$0xff] }
 0x7de   :  { %11423 = vtanh.f32 %v6917_v20  ;;  %v6928_v30 = vmul.f32 0.5, %v6918_v22 }
 0x7df   :  { %v11420_v14 = vpop.eup %11419 }
 0x7e0   :  { %v11422_v60 = vpop.eup %11421  ;;  %v6921_v63 = vmul.f32 0.5, %v11420_v14  ;;  %11425 = vtanh.f32 %v6928_v30  ;;  %v13069_v30 = vld [vmem:[#allocation37_spill] sm:$0xff] }
 0x7e1   :  { %v6925_v36 = vmul.f32 0.5, %v11422_v60  ;;  %v13070_v60 = vld [vmem:[#allocation38_spill] sm:$0xff] }
 0x7e2   :  { %v6922_v16 = vadd.f32 0.5, %v6921_v63 }
 0x7e3   :  { %v6926_v61 = vadd.f32 0.5, %v6925_v36  ;;  %v6900_v10 = vpop.f32.mrf.mxu2  ;;  %v6913_v21 = vpop.f32.mrf.mxu3 }
 0x7e4   :  { %v11424_v8 = vpop.eup %11423 }
 0x7e5   :  { %v6932_v57 = vmul.f32 %v6926_v61, %v12693_v43  ;;  %v6933_v0 = vmul.f32 %v11424_v8, %v6922_v16 }
 0x7e6   :  { %v11426_v44 = vpop.eup %11425 }
 0x7e7   :  { %v12737_v49 = vadd.f32 %v6933_v0, %v6932_v57  ;;  %v6930_v52 = vmul.f32 0.5, %v11426_v44 }
 0x7e9   :  { %11427 = vtanh.f32 %v12737_v49  ;;  %v6931_v50 = vadd.f32 0.5, %v6930_v52 }
 0x7ef   :  { %v11428_v27 = vpop.eup %11427 }
 0x7f0   :  { %v6936_v42 = vmul.f32 %v11428_v27, %v6931_v50 }
 0x7f2   :  { %v6943_v32 = vpack.c.bf16 %v6936_v42, %v6936_v42 }
 0x7f4   :  { %6952 = vmatmul.bf16.vlgmr.msra.gmra.mxu0 %v6943_v32  ;;  %6965 = vmatmul.bf16.vlgmr.msra.gmra.mxu1 %v6943_v32 }
 0x7f5   :  { %6978 = vmatmul.bf16.vlgmr.msra.gmra.mxu2 %v6943_v32  ;;  %6991 = vmatmul.bf16.vlgmr.msra.gmra.mxu3 %v6943_v32 }
 0x7f6   :  { %7106 = vmatpush.bf16.msra.mxu0 %v12354_v35  ;;  %7119 = vmatpush.bf16.msra.mxu1 %v12461_v17 }
 0x7f7   :  { %7132 = vmatpush.bf16.msra.mxu2 %v12356_v51  ;;  %7145 = vmatpush.bf16.msra.mxu3 %v12479_v26 }
 0x7fa   :  { %7107 = vmatpush.bf16.msra.mxu0 %v12367_v5  ;;  %7120 = vmatpush.bf16.msra.mxu1 %v12481_v24 }
 0x7fb   :  { %7133 = vmatpush.bf16.msra.mxu2 %v12371_v19  ;;  %7146 = vmatpush.bf16.msra.mxu3 %v12502_v6 }
 0x7fe   :  { %7108 = vmatpush.bf16.msra.mxu0 %v12380_v58  ;;  %7121 = vmatpush.bf16.msra.mxu1 %v12507_v41 }
 0x7ff   :  { %7134 = vmatpush.bf16.msra.mxu2 %v12385_v31  ;;  %7147 = vmatpush.bf16.msra.mxu3 %v12527_v47 }
 0x802   :  { %7109 = vmatpush.bf16.msra.mxu0 %v12394_v11  ;;  %7122 = vmatpush.bf16.msra.mxu1 %v12529_v53 }
 0x803   :  { %7135 = vmatpush.bf16.msra.mxu2 %v12401_v7  ;;  %7148 = vmatpush.bf16.msra.mxu3 %v12549_v25 }
 0x806   :  { %7110 = vmatpush.bf16.msra.mxu0 %v12410_v48  ;;  %7123 = vmatpush.bf16.msra.mxu1 %v12554_v56 }
 0x807   :  { %7136 = vmatpush.bf16.msra.mxu2 %v12413_v46  ;;  %7149 = vmatpush.bf16.msra.mxu3 %v12568_v40 }
 0x80a   :  { %7111 = vmatpush.bf16.msra.mxu0 %v12421_v28  ;;  %7124 = vmatpush.bf16.msra.mxu1 %v12570_v13 }
 0x80b   :  { %7137 = vmatpush.bf16.msra.mxu2 %v12430_v38  ;;  %7150 = vmatpush.bf16.msra.mxu3 %v12584_v39 }
 0x80e   :  { %7112 = vmatpush.bf16.msra.mxu0 %v12433_v55  ;;  %7125 = vmatpush.bf16.msra.mxu1 %v12589_v23 }
 0x80f   :  { %7138 = vmatpush.bf16.msra.mxu2 %v12436_v29  ;;  %7151 = vmatpush.bf16.msra.mxu3 %v12601_v54 }
 0x812   :  { %7113 = vmatpush.bf16.msra.mxu0 %v12445_v45  ;;  %7126 = vmatpush.bf16.msra.mxu1 %v12603_v3 }
 0x813   :  { %7139 = vmatpush.bf16.msra.mxu2 %v12451_v2  ;;  %7152 = vmatpush.bf16.msra.mxu3 %v12611_v37 }
 0x871   :  { %v6953_v43 = vpop.f32.mrf.mxu0  ;;  %v6966_v33 = vpop.f32.mrf.mxu1 }
 0x872   :  { %v6996_v1 = vadd.f32 %v6953_v43, %v13067_v62  ;;  %v6997_v20 = vadd.f32 %v6966_v33, %v13068_v15 }
 0x874   :  { %v7000_v59 = vmul.f32 0.5, %v6996_v1  ;;  %v7004_v22 = vmul.f32 0.5, %v6997_v20 }
 0x876   :  { %11429 = vtanh.f32 %v7000_v59 }
 0x877   :  { %11431 = vtanh.f32 %v7004_v22 }
 0x878   :  { %v6979_v12 = vpop.f32.mrf.mxu2  ;;  %v6992_v34 = vpop.f32.mrf.mxu3 }
 0x879   :  { %v6998_v14 = vadd.f32 %v6979_v12, %v13069_v30  ;;  %v6999_v63 = vadd.f32 %v6992_v34, %v13070_v60  ;;  %v6955_v36 = vpop.f32.mrf.mxu0  ;;  %v6968_v16 = vpop.f32.mrf.mxu1  ;;  %v13072_v12 = vld [vmem:[#allocation22_spill] sm:$0xff]  ;;  %v13073_v30 = vld [vmem:[#allocation28_spill] sm:$0xff] }
 0x87a   :  { %v6131_v34 = vadd.f32 %v13072_v12, %v12346_v9  ;;  %v13074_v60 = vld [vmem:[#allocation46_spill] sm:$0xff] }
 0x87b   :  { %11433 = vtanh.f32 %v6998_v14  ;;  %v7009_v61 = vmul.f32 0.5, %v6999_v63 }
 0x87c   :  { %v11430_v10 = vpop.eup %11429  ;;  %v6160_v63 = vadd.f32 %v13074_v60, %v6131_v34 }
 0x87d   :  { %v11432_v21 = vpop.eup %11431  ;;  %v7002_v8 = vmul.f32 0.5, %v11430_v10  ;;  %11435 = vtanh.f32 %v7009_v61 }
 0x87e   :  { %v7006_v57 = vmul.f32 0.5, %v11432_v21 }
 0x87f   :  { %v7003_v0 = vadd.f32 0.5, %v7002_v8 }
 0x880   :  { %v7007_v44 = vadd.f32 0.5, %v7006_v57  ;;  %v6981_v52 = vpop.f32.mrf.mxu2  ;;  %v6994_v50 = vpop.f32.mrf.mxu3  ;;  %v13075_v57 = vld [vmem:[#allocation48_spill] sm:$0xff] }
 0x881   :  { %v11434_v27 = vpop.eup %11433  ;;  %v13077_v52 = vld [vmem:[#allocation51_spill] sm:$0xff]  ;;  %v13078_v50 = vld [vmem:[#allocation45_spill] sm:$0xff] }
 0x882   :  { %v7013_v42 = vmul.f32 %v7007_v44, %v12737_v49  ;;  %v7014_v32 = vmul.f32 %v11434_v27, %v7003_v0  ;;  %v13071_v49 = vld [vmem:[#allocation21_spill] sm:$0xff]  ;;  %v13076_v0 = vld [vmem:[#allocation27_spill] sm:$0xff]  ;;  %v6247_v27 = vadd.f32 %v13078_v50, %v13077_v52 }
 0x883   :  { %v11436_v43 = vpop.eup %11435  ;;  %v6073_v22 = vadd.f32 %v13071_v49, %v12337_v4  ;;  %v6189_v44 = vadd.f32 %v13076_v0, %v13075_v57 }
 0x884   :  { %v12777_v33 = vadd.f32 %v7014_v32, %v7013_v42  ;;  %v7011_v62 = vmul.f32 0.5, %v11436_v43  ;;  %v13079_v42 = vld [vmem:[#allocation39_spill] sm:$0xff]  ;;  %v13080_v43 = vld [vmem:[#allocation41_spill] sm:$0xff] }
 0x885   :  { %v6102_v14 = vadd.f32 %v13073_v30, %v6073_v22  ;;  %v6218_v32 = vadd.f32 %v13079_v42, %v6189_v44 }
 0x886   :  { %11437 = vtanh.f32 %v12777_v33  ;;  %v7012_v1 = vadd.f32 0.5, %v7011_v62  ;;  %v6276_v62 = vadd.f32 %v13080_v43, %v6247_v27 }
 0x88c   :  { %v11438_v15 = vpop.eup %11437 }
 0x88d   :  { %v7017_v20 = vmul.f32 %v11438_v15, %v7012_v1 }
 0x88f   :  { %v7024_v59 = vpack.c.bf16 %v7017_v20, %v7017_v20 }
 0x891   :  { %7033 = vmatmul.bf16.vlgmr.msrb.gmra.mxu0 %v7024_v59  ;;  %7046 = vmatmul.bf16.vlgmr.msrb.gmra.mxu1 %v7024_v59 }
 0x892   :  { %7059 = vmatmul.bf16.vlgmr.msrb.gmra.mxu2 %v7024_v59  ;;  %7072 = vmatmul.bf16.vlgmr.msrb.gmra.mxu3 %v7024_v59 }
 0x893   :  { %7187 = vmatpush.bf16.msrb.mxu0 %v12354_v35  ;;  %7200 = vmatpush.bf16.msrb.mxu1 %v12461_v17 }
 0x894   :  { %7213 = vmatpush.bf16.msrb.mxu2 %v12356_v51  ;;  %7226 = vmatpush.bf16.msrb.mxu3 %v12479_v26 }
 0x897   :  { %7188 = vmatpush.bf16.msrb.mxu0 %v12367_v5  ;;  %7201 = vmatpush.bf16.msrb.mxu1 %v12481_v24 }
 0x898   :  { %7214 = vmatpush.bf16.msrb.mxu2 %v12371_v19  ;;  %7227 = vmatpush.bf16.msrb.mxu3 %v12502_v6 }
 0x89b   :  { %7189 = vmatpush.bf16.msrb.mxu0 %v12380_v58  ;;  %7202 = vmatpush.bf16.msrb.mxu1 %v12507_v41 }
 0x89c   :  { %7215 = vmatpush.bf16.msrb.mxu2 %v12385_v31  ;;  %7228 = vmatpush.bf16.msrb.mxu3 %v12527_v47 }
 0x89f   :  { %7190 = vmatpush.bf16.msrb.mxu0 %v12394_v11  ;;  %7203 = vmatpush.bf16.msrb.mxu1 %v12529_v53 }
 0x8a0   :  { %7216 = vmatpush.bf16.msrb.mxu2 %v12401_v7  ;;  %7229 = vmatpush.bf16.msrb.mxu3 %v12549_v25 }
 0x8a3   :  { %7191 = vmatpush.bf16.msrb.mxu0 %v12410_v48  ;;  %7204 = vmatpush.bf16.msrb.mxu1 %v12554_v56 }
 0x8a4   :  { %7217 = vmatpush.bf16.msrb.mxu2 %v12413_v46  ;;  %7230 = vmatpush.bf16.msrb.mxu3 %v12568_v40 }
 0x8a7   :  { %7192 = vmatpush.bf16.msrb.mxu0 %v12421_v28  ;;  %7205 = vmatpush.bf16.msrb.mxu1 %v12570_v13 }
 0x8a8   :  { %7218 = vmatpush.bf16.msrb.mxu2 %v12430_v38  ;;  %7231 = vmatpush.bf16.msrb.mxu3 %v12584_v39 }
 0x8ab   :  { %7193 = vmatpush.bf16.msrb.mxu0 %v12433_v55  ;;  %7206 = vmatpush.bf16.msrb.mxu1 %v12589_v23 }
 0x8ac   :  { %7219 = vmatpush.bf16.msrb.mxu2 %v12436_v29  ;;  %7232 = vmatpush.bf16.msrb.mxu3 %v12601_v54 }
 0x8af   :  { %7194 = vmatpush.bf16.msrb.mxu0 %v12445_v45  ;;  %7207 = vmatpush.bf16.msrb.mxu1 %v12603_v3 }
 0x8b0   :  { %7220 = vmatpush.bf16.msrb.mxu2 %v12451_v2  ;;  %7233 = vmatpush.bf16.msrb.mxu3 %v12611_v37 }
 0x90e   :  { %v7034_v36 = vpop.f32.mrf.mxu0  ;;  %v7047_v16 = vpop.f32.mrf.mxu1 }
 0x90f   :  { %v7077_v61 = vadd.f32 %v7034_v36, %v6102_v14  ;;  %v7078_v10 = vadd.f32 %v7047_v16, %v6160_v63 }
 0x911   :  { %v7081_v21 = vmul.f32 0.5, %v7077_v61  ;;  %v7085_v8 = vmul.f32 0.5, %v7078_v10 }
 0x913   :  { %11439 = vtanh.f32 %v7081_v21 }
 0x914   :  { %11441 = vtanh.f32 %v7085_v8 }
 0x915   :  { %v7060_v1 = vpop.f32.mrf.mxu2  ;;  %v7073_v15 = vpop.f32.mrf.mxu3 }
 0x916   :  { %v7079_v20 = vadd.f32 %v7060_v1, %v6218_v32  ;;  %v7080_v59 = vadd.f32 %v7073_v15, %v6276_v62  ;;  %v7036_v49 = vpop.f32.mrf.mxu0  ;;  %v7049_v22 = vpop.f32.mrf.mxu1  ;;  %v13081_v1 = vld [vmem:[#allocation47_spill] sm:$0xff] }
 0x918   :  { %11443 = vtanh.f32 %v7079_v20  ;;  %v7090_v12 = vmul.f32 0.5, %v7080_v59  ;;  %v13082_v20 = vld [vmem:[#allocation49_spill] sm:$0xff] }
 0x919   :  { %v11440_v34 = vpop.eup %11439 }
 0x91a   :  { %v11442_v30 = vpop.eup %11441  ;;  %v7083_v14 = vmul.f32 0.5, %v11440_v34  ;;  %11445 = vtanh.f32 %v7090_v12 }
 0x91b   :  { %v7087_v60 = vmul.f32 0.5, %v11442_v30  ;;  %v13083_v30 = vld [vmem:[#allocation53_spill] sm:$0xff] }
 0x91c   :  { %v7084_v63 = vadd.f32 0.5, %v7083_v14 }
 0x91d   :  { %v7088_v36 = vadd.f32 0.5, %v7087_v60  ;;  %v7062_v16 = vpop.f32.mrf.mxu2  ;;  %v7075_v61 = vpop.f32.mrf.mxu3  ;;  %v13084_v60 = vld [vmem:[#allocation54_spill] sm:$0xff] }
 0x91e   :  { %v11444_v10 = vpop.eup %11443 }
 0x91f   :  { %v7094_v21 = vmul.f32 %v7088_v36, %v12777_v33  ;;  %v7095_v8 = vmul.f32 %v11444_v10, %v7084_v63 }
 0x920   :  { %v11446_v0 = vpop.eup %11445 }
 0x921   :  { %v12825_v44 = vadd.f32 %v7095_v8, %v7094_v21  ;;  %v7092_v50 = vmul.f32 0.5, %v11446_v0 }
 0x923   :  { %11447 = vtanh.f32 %v12825_v44  ;;  %v7093_v27 = vadd.f32 0.5, %v7092_v50 }
 0x929   :  { %v11448_v42 = vpop.eup %11447 }
 0x92a   :  { %v7098_v32 = vmul.f32 %v11448_v42, %v7093_v27 }
 0x92c   :  { %v7105_v43 = vpack.c.bf16 %v7098_v32, %v7098_v32 }
 0x92e   :  { %7114 = vmatmul.bf16.vlgmr.msra.gmra.mxu0 %v7105_v43  ;;  %7127 = vmatmul.bf16.vlgmr.msra.gmra.mxu1 %v7105_v43 }
 0x92f   :  { %7140 = vmatmul.bf16.vlgmr.msra.gmra.mxu2 %v7105_v43  ;;  %7153 = vmatmul.bf16.vlgmr.msra.gmra.mxu3 %v7105_v43 }
 0x930   :  { %7268 = vmatpush.bf16.msra.mxu0 %v12354_v35  ;;  %7281 = vmatpush.bf16.msra.mxu1 %v12461_v17 }
 0x931   :  { %7294 = vmatpush.bf16.msra.mxu2 %v12356_v51  ;;  %7307 = vmatpush.bf16.msra.mxu3 %v12479_v26 }
 0x934   :  { %7269 = vmatpush.bf16.msra.mxu0 %v12367_v5  ;;  %7282 = vmatpush.bf16.msra.mxu1 %v12481_v24 }
 0x935   :  { %7295 = vmatpush.bf16.msra.mxu2 %v12371_v19  ;;  %7308 = vmatpush.bf16.msra.mxu3 %v12502_v6 }
 0x938   :  { %7270 = vmatpush.bf16.msra.mxu0 %v12380_v58  ;;  %7283 = vmatpush.bf16.msra.mxu1 %v12507_v41 }
 0x939   :  { %7296 = vmatpush.bf16.msra.mxu2 %v12385_v31  ;;  %7309 = vmatpush.bf16.msra.mxu3 %v12527_v47 }
 0x93c   :  { %7271 = vmatpush.bf16.msra.mxu0 %v12394_v11  ;;  %7284 = vmatpush.bf16.msra.mxu1 %v12529_v53 }
 0x93d   :  { %7297 = vmatpush.bf16.msra.mxu2 %v12401_v7  ;;  %7310 = vmatpush.bf16.msra.mxu3 %v12549_v25 }
 0x940   :  { %7272 = vmatpush.bf16.msra.mxu0 %v12410_v48  ;;  %7285 = vmatpush.bf16.msra.mxu1 %v12554_v56 }
 0x941   :  { %7298 = vmatpush.bf16.msra.mxu2 %v12413_v46  ;;  %7311 = vmatpush.bf16.msra.mxu3 %v12568_v40 }
 0x944   :  { %7273 = vmatpush.bf16.msra.mxu0 %v12421_v28  ;;  %7286 = vmatpush.bf16.msra.mxu1 %v12570_v13 }
 0x945   :  { %7299 = vmatpush.bf16.msra.mxu2 %v12430_v38  ;;  %7312 = vmatpush.bf16.msra.mxu3 %v12584_v39 }
 0x948   :  { %7274 = vmatpush.bf16.msra.mxu0 %v12433_v55  ;;  %7287 = vmatpush.bf16.msra.mxu1 %v12589_v23 }
 0x949   :  { %7300 = vmatpush.bf16.msra.mxu2 %v12436_v29  ;;  %7313 = vmatpush.bf16.msra.mxu3 %v12601_v54 }
 0x94c   :  { %7275 = vmatpush.bf16.msra.mxu0 %v12445_v45  ;;  %7288 = vmatpush.bf16.msra.mxu1 %v12603_v3 }
 0x94d   :  { %7301 = vmatpush.bf16.msra.mxu2 %v12451_v2  ;;  %7314 = vmatpush.bf16.msra.mxu3 %v12611_v37 }
 0x9ab   :  { %v7115_v33 = vpop.f32.mrf.mxu0  ;;  %v7128_v62 = vpop.f32.mrf.mxu1 }
 0x9ac   :  { %v7158_v15 = vadd.f32 %v7115_v33, %v13081_v1  ;;  %v7159_v59 = vadd.f32 %v7128_v62, %v13082_v20 }
 0x9ae   :  { %v7162_v49 = vmul.f32 0.5, %v7158_v15  ;;  %v7166_v22 = vmul.f32 0.5, %v7159_v59 }
 0x9b0   :  { %11449 = vtanh.f32 %v7162_v49 }
 0x9b1   :  { %11451 = vtanh.f32 %v7166_v22 }
 0x9b2   :  { %v7141_v12 = vpop.f32.mrf.mxu2  ;;  %v7154_v34 = vpop.f32.mrf.mxu3 }
 0x9b3   :  { %v7160_v14 = vadd.f32 %v7141_v12, %v13083_v30  ;;  %v7161_v63 = vadd.f32 %v7154_v34, %v13084_v60  ;;  %v7117_v36 = vpop.f32.mrf.mxu0  ;;  %v7130_v16 = vpop.f32.mrf.mxu1 }
 0x9b5   :  { %11453 = vtanh.f32 %v7160_v14  ;;  %v7171_v61 = vmul.f32 0.5, %v7161_v63 }
 0x9b6   :  { %v11450_v10 = vpop.eup %11449 }
 0x9b7   :  { %v11452_v21 = vpop.eup %11451  ;;  %v7164_v8 = vmul.f32 0.5, %v11450_v10  ;;  %11455 = vtanh.f32 %v7171_v61 }
 0x9b8   :  { %v7168_v0 = vmul.f32 0.5, %v11452_v21 }
 0x9b9   :  { %v7165_v50 = vadd.f32 0.5, %v7164_v8 }
 0x9ba   :  { %v7169_v27 = vadd.f32 0.5, %v7168_v0  ;;  %v7143_v42 = vpop.f32.mrf.mxu2  ;;  %v7156_v32 = vpop.f32.mrf.mxu3 }
 0x9bb   :  { %v11454_v43 = vpop.eup %11453  ;;  %v7474_v42 = vld [vmem:[#allocation16 + $0xe8] sm:$0xff]  ;;  %v7473_v32 = vld [vmem:[#allocation16 + $0xe0] sm:$0xff] }
 0x9bc   :  { %v7175_v33 = vmul.f32 %v7169_v27, %v12825_v44  ;;  %v7176_v62 = vmul.f32 %v11454_v43, %v7165_v50  ;;  %v7476_v50 = vld [vmem:[#allocation16 + $0xf8] sm:$0xff]  ;;  %v7475_v27 = vld [vmem:[#allocation16 + $0xf0] sm:$0xff] }
 0x9bd   :  { %v11456_v1 = vpop.eup %11455  ;;  %v7472_v43 = vld [vmem:[#allocation16 + $0xd8] sm:$0xff] }
 0x9be   :  { %v12865_v15 = vadd.f32 %v7176_v62, %v7175_v33  ;;  %v7173_v20 = vmul.f32 0.5, %v11456_v1  ;;  %v7471_v33 = vld [vmem:[#allocation16 + $0xd0] sm:$0xff]  ;;  %v7470_v62 = vld [vmem:[#allocation16 + $0xc8] sm:$0xff]  ;;  %v7469_v1 = vld [vmem:[#allocation16 + $0xc0] sm:$0xff] }
 0x9c0   :  { %11457 = vtanh.f32 %v12865_v15  ;;  %v7174_v59 = vadd.f32 0.5, %v7173_v20 }
 0x9c6   :  { %v11458_v49 = vpop.eup %11457 }
 0x9c7   :  { %v7179_v22 = vmul.f32 %v11458_v49, %v7174_v59  ;;  %v13093_v59 = vld [vmem:[#allocation40_spill] sm:$0xff] }
 0x9c9   :  { %v7186_v12 = vpack.c.bf16 %v7179_v22, %v7179_v22  ;;  %v13094_v22 = vld [vmem:[#allocation42_spill] sm:$0xff] }
 0x9cb   :  { %7195 = vmatmul.bf16.vlgmr.msrb.gmra.mxu0 %v7186_v12  ;;  %7208 = vmatmul.bf16.vlgmr.msrb.gmra.mxu1 %v7186_v12 }
 0x9cc   :  { %7221 = vmatmul.bf16.vlgmr.msrb.gmra.mxu2 %v7186_v12  ;;  %7234 = vmatmul.bf16.vlgmr.msrb.gmra.mxu3 %v7186_v12 }
 0x9cd   :  { %7362 = vmatpush.bf16.msrb.mxu1 %v12461_v17  ;;  %7349 = vmatpush.bf16.msrb.mxu0 %v12354_v35 }
 0x9ce   :  { %7375 = vmatpush.bf16.msrb.mxu2 %v12356_v51  ;;  %7388 = vmatpush.bf16.msrb.mxu3 %v12479_v26  ;;  %v13086_v51 = vld [vmem:[#allocation25_spill] sm:$0xff] }
 0x9d1   :  { %7363 = vmatpush.bf16.msrb.mxu1 %v12481_v24  ;;  %7350 = vmatpush.bf16.msrb.mxu0 %v12367_v5  ;;  %v6136_v5 = vadd.f32 %v13086_v51, %v12346_v9  ;;  %v13092_v9 = vld [vmem:[#allocation56_spill] sm:$0xff] }
 0x9d2   :  { %7376 = vmatpush.bf16.msrb.mxu2 %v12371_v19  ;;  %7389 = vmatpush.bf16.msrb.mxu3 %v12502_v6  ;;  %v13087_v19 = vld [vmem:[#allocation30_spill] sm:$0xff] }
 0x9d5   :  { %7364 = vmatpush.bf16.msrb.mxu1 %v12507_v41  ;;  %7351 = vmatpush.bf16.msrb.mxu0 %v12380_v58 }
 0x9d6   :  { %7377 = vmatpush.bf16.msrb.mxu2 %v12385_v31  ;;  %7390 = vmatpush.bf16.msrb.mxu3 %v12527_v47  ;;  %v13088_v31 = vld [vmem:[#allocation33_spill] sm:$0xff] }
 0x9d9   :  { %7365 = vmatpush.bf16.msrb.mxu1 %v12529_v53  ;;  %7352 = vmatpush.bf16.msrb.mxu0 %v12394_v11  ;;  %v13085_v53 = vld [vmem:[#allocation23_spill] sm:$0xff]  ;;  %v6165_v11 = vadd.f32 %v13088_v31, %v6136_v5 }
 0x9da   :  { %7378 = vmatpush.bf16.msrb.mxu2 %v12401_v7  ;;  %7391 = vmatpush.bf16.msrb.mxu3 %v12549_v25  ;;  %v6078_v35 = vadd.f32 %v13085_v53, %v12337_v4  ;;  %v13091_v4 = vld [vmem:[#allocation55_spill] sm:$0xff]  ;;  %v7468_v53 = vld [vmem:[#allocation16 + $0xb8] sm:$0xff] }
 0x9dc   :  { %v6107_v58 = vadd.f32 %v13087_v19, %v6078_v35  ;;  %v7467_v35 = vld [vmem:[#allocation16 + $0xb0] sm:$0xff]  ;;  %v7466_v19 = vld [vmem:[#allocation16 + $0xa8] sm:$0xff] }
 0x9dd   :  { %7366 = vmatpush.bf16.msrb.mxu1 %v12554_v56  ;;  %7353 = vmatpush.bf16.msrb.mxu0 %v12410_v48 }
 0x9de   :  { %7379 = vmatpush.bf16.msrb.mxu2 %v12413_v46  ;;  %7392 = vmatpush.bf16.msrb.mxu3 %v12568_v40 }
 0x9e1   :  { %7367 = vmatpush.bf16.msrb.mxu1 %v12570_v13  ;;  %7354 = vmatpush.bf16.msrb.mxu0 %v12421_v28 }
 0x9e2   :  { %7380 = vmatpush.bf16.msrb.mxu2 %v12430_v38  ;;  %7393 = vmatpush.bf16.msrb.mxu3 %v12584_v39 }
 0x9e5   :  { %7368 = vmatpush.bf16.msrb.mxu1 %v12589_v23  ;;  %7355 = vmatpush.bf16.msrb.mxu0 %v12433_v55 }
 0x9e6   :  { %7381 = vmatpush.bf16.msrb.mxu2 %v12436_v29  ;;  %7394 = vmatpush.bf16.msrb.mxu3 %v12601_v54 }
 0x9e9   :  { %7369 = vmatpush.bf16.msrb.mxu1 %v12603_v3  ;;  %7356 = vmatpush.bf16.msrb.mxu0 %v12445_v45 }
 0x9ea   :  { %7382 = vmatpush.bf16.msrb.mxu2 %v12451_v2  ;;  %7395 = vmatpush.bf16.msrb.mxu3 %v12611_v37  ;;  %v13089_v2 = vld [vmem:[#allocation29_spill] sm:$0xff]  ;;  %v13090_v37 = vld [vmem:[#allocation31_spill] sm:$0xff] }
 0x9eb   :  { %v6194_v55 = vadd.f32 %v13089_v2, %v13075_v57  ;;  %v6252_v29 = vadd.f32 %v13090_v37, %v13077_v52 }
 0x9ed   :  { %v6223_v45 = vadd.f32 %v13091_v4, %v6194_v55  ;;  %v6281_v17 = vadd.f32 %v13092_v9, %v6252_v29  ;;  %v7463_v55 = vld [vmem:[#allocation16 + $0x90] sm:$0xff]  ;;  %v7462_v4 = vld [vmem:[#allocation16 + $0x88] sm:$0xff] }
 0xa48   :  { %v7196_v7 = vpop.f32.mrf.mxu0  ;;  %v7209_v48 = vpop.f32.mrf.mxu1 }
 0xa49   :  { %v7239_v46 = vadd.f32 %v7196_v7, %v6107_v58  ;;  %v7240_v3 = vadd.f32 %v7209_v48, %v6165_v11  ;;  %v7465_v58 = vld [vmem:[#allocation16 + $0xa0] sm:$0xff]  ;;  %v7464_v7 = vld [vmem:[#allocation16 + $0x98] sm:$0xff] }
 0xa4a   :  { %v13095_v48 = vld [vmem:[#allocation57_spill] sm:$0xff] }
 0xa4b   :  { %v7243_v28 = vmul.f32 0.5, %v7239_v46  ;;  %v7247_v38 = vmul.f32 0.5, %v7240_v3  ;;  %v13096_v3 = vld [vmem:[#allocation58_spill] sm:$0xff] }
 0xa4d   :  { %11459 = vtanh.f32 %v7243_v28 }
 0xa4e   :  { %11461 = vtanh.f32 %v7247_v38 }
 0xa4f   :  { %v7222_v13 = vpop.f32.mrf.mxu2  ;;  %v7235_v26 = vpop.f32.mrf.mxu3 }
 0xa50   :  { %v7241_v24 = vadd.f32 %v7222_v13, %v6223_v45  ;;  %v7242_v6 = vadd.f32 %v7235_v26, %v6281_v17  ;;  %v7198_v41 = vpop.f32.mrf.mxu0  ;;  %v7211_v25 = vpop.f32.mrf.mxu1  ;;  %v7461_v13 = vld [vmem:[#allocation16 + $0x80] sm:$0xff] }
 0xa52   :  { %11463 = vtanh.f32 %v7241_v24  ;;  %v7252_v47 = vmul.f32 0.5, %v7242_v6 }
 0xa53   :  { %v11460_v56 = vpop.eup %11459 }
 0xa54   :  { %v11462_v40 = vpop.eup %11461  ;;  %v7245_v39 = vmul.f32 0.5, %v11460_v56  ;;  %11465 = vtanh.f32 %v7252_v47  ;;  %v7460_v47 = vld [vmem:[#allocation16 + $0x78] sm:$0xff] }
 0xa55   :  { %v7249_v23 = vmul.f32 0.5, %v11462_v40 }
 0xa56   :  { %v7246_v54 = vadd.f32 0.5, %v7245_v39 }
 0xa57   :  { %v7250_v44 = vadd.f32 0.5, %v7249_v23  ;;  %v7224_v34 = vpop.f32.mrf.mxu2  ;;  %v7237_v30 = vpop.f32.mrf.mxu3 }
 0xa58   :  { %v11464_v14 = vpop.eup %11463 }
 0xa59   :  { %v7256_v60 = vmul.f32 %v7250_v44, %v12865_v15  ;;  %v7257_v63 = vmul.f32 %v11464_v14, %v7246_v54 }
 0xa5a   :  { %v11466_v36 = vpop.eup %11465 }
 0xa5b   :  { %v12913_v16 = vadd.f32 %v7257_v63, %v7256_v60  ;;  %v7254_v61 = vmul.f32 0.5, %v11466_v36  ;;  %v7459_v60 = vld [vmem:[#allocation16 + $0x70] sm:$0xff]  ;;  %v7458_v63 = vld [vmem:[#allocation16 + $0x68] sm:$0xff]  ;;  %v7457_v36 = vld [vmem:[#allocation16 + $0x60] sm:$0xff] }
 0xa5d   :  { %11467 = vtanh.f32 %v12913_v16  ;;  %v7255_v10 = vadd.f32 0.5, %v7254_v61  ;;  %v7455_v61 = vld [vmem:[#allocation16 + $0x50] sm:$0xff] }
 0xa63   :  { %v11468_v21 = vpop.eup %11467 }
 0xa64   :  { %v7260_v8 = vmul.f32 %v11468_v21, %v7255_v10  ;;  %v7454_v10 = vld [vmem:[#allocation16 + $0x48] sm:$0xff]  ;;  %v7453_v21 = vld [vmem:[#allocation16 + $0x40] sm:$0xff] }
 0xa66   :  { %v7267_v0 = vpack.c.bf16 %v7260_v8, %v7260_v8  ;;  %v7452_v8 = vld [vmem:[#allocation16 + $0x38] sm:$0xff] }
 0xa68   :  { %7276 = vmatmul.bf16.vlgmr.msra.gmra.mxu0 %v7267_v0  ;;  %7289 = vmatmul.bf16.vlgmr.msra.gmra.mxu1 %v7267_v0 }
 0xa69   :  { %7302 = vmatmul.bf16.vlgmr.msra.gmra.mxu2 %v7267_v0  ;;  %7315 = vmatmul.bf16.vlgmr.msra.gmra.mxu3 %v7267_v0  ;;  %v7451_v0 = vld [vmem:[#allocation16 + $0x30] sm:$0xff] }
 0xa6a   :  { %7501 = vmatpush.msra.mxu1 %v7476_v50  ;;  %7481 = vmatpush.msra.mxu0 %v7460_v47  ;;  %v7450_v50 = vld [vmem:[#allocation16 + $0x28] sm:$0xff] }
 0xa6c   :  { %7502 = vmatpush.msra.mxu1 %v7475_v27  ;;  %7482 = vmatpush.msra.mxu0 %v7459_v60  ;;  %v7448_v27 = vld [vmem:[#allocation16 + $0x18] sm:$0xff] }
 0xa6e   :  { %7503 = vmatpush.msra.mxu1 %v7474_v42  ;;  %7483 = vmatpush.msra.mxu0 %v7458_v63  ;;  %v7447_v42 = vld [vmem:[#allocation16 + $0x10] sm:$0xff] }
 0xa70   :  { %7504 = vmatpush.msra.mxu1 %v7473_v32  ;;  %7484 = vmatpush.msra.mxu0 %v7457_v36  ;;  %v7446_v32 = vld [vmem:[#allocation16 + $0x8] sm:$0xff] }
 0xa72   :  { %7505 = vmatpush.msra.mxu1 %v7472_v43  ;;  %v7445_v43 = vld [vmem:[#allocation16] sm:$0xff] }
 0xa74   :  { %7506 = vmatpush.msra.mxu1 %v7471_v33 }
 0xa76   :  { %7507 = vmatpush.msra.mxu1 %v7470_v62 }
 0xa78   :  { %7508 = vmatpush.msra.mxu1 %v7469_v1  ;;  %v13097_v1 = vld [vmem:[#allocation44_spill] sm:$0xff] }
 0xa7a   :  { %7509 = vmatpush.msra.mxu1 %v7468_v53 }
 0xa7c   :  { %7510 = vmatpush.msra.mxu1 %v7467_v35  ;;  %v13100_v35 = vld [vmem:[#allocation32_spill] sm:$0xff] }
 0xa7e   :  { %7511 = vmatpush.msra.mxu1 %v7466_v19 }
 0xa80   :  { %7512 = vmatpush.msra.mxu1 %v7465_v58  ;;  %v13102_v58 = vld [vmem:[#allocation60_spill] sm:$0xff] }
 0xa82   :  { %7513 = vmatpush.msra.mxu1 %v7464_v7 }
 0xa84   :  { %7514 = vmatpush.msra.mxu1 %v7463_v55 }
 0xa86   :  { %7515 = vmatpush.msra.mxu1 %v7462_v4 }
 0xa88   :  { %7516 = vmatpush.msra.mxu1 %v7461_v13 }
 0xae5   :  { %v7277_v15 = vpop.f32.mrf.mxu0  ;;  %v7290_v20 = vpop.f32.mrf.mxu1 }
 0xae6   :  { %v7320_v49 = vadd.f32 %v7277_v15, %v13093_v59  ;;  %v7321_v12 = vadd.f32 %v7290_v20, %v13094_v22  ;;  %v13098_v20 = vld [vmem:[#allocation34_spill] sm:$0xff] }
 0xae8   :  { %v7324_v51 = vmul.f32 0.5, %v7320_v49  ;;  %v7328_v5 = vmul.f32 0.5, %v7321_v12  ;;  %v13099_v12 = vld [vmem:[#allocation43_spill] sm:$0xff] }
 0xae9   :  { %v6199_v53 = vadd.f32 %v13099_v12, %v13075_v57 }
 0xaea   :  { %11469 = vtanh.f32 %v7324_v51  ;;  %v6257_v51 = vadd.f32 %v13100_v35, %v13077_v52 }
 0xaeb   :  { %11471 = vtanh.f32 %v7328_v5  ;;  %v13101_v5 = vld [vmem:[#allocation59_spill] sm:$0xff] }
 0xaec   :  { %v7303_v31 = vpop.f32.mrf.mxu2  ;;  %v7316_v11 = vpop.f32.mrf.mxu3  ;;  %v6228_v19 = vadd.f32 %v13101_v5, %v6199_v53 }
 0xaed   :  { %v7322_v46 = vadd.f32 %v7303_v31, %v13095_v48  ;;  %v7323_v28 = vadd.f32 %v7316_v11, %v13096_v3  ;;  %v7279_v38 = vpop.f32.mrf.mxu0  ;;  %v7292_v2 = vpop.f32.mrf.mxu1  ;;  %v6286_v31 = vadd.f32 %v13102_v58, %v6257_v51 }
 0xaef   :  { %11473 = vtanh.f32 %v7322_v46  ;;  %v7333_v37 = vmul.f32 0.5, %v7323_v28 }
 0xaf0   :  { %v11470_v29 = vpop.eup %11469 }
 0xaf1   :  { %v11472_v45 = vpop.eup %11471  ;;  %v7326_v9 = vmul.f32 0.5, %v11470_v29  ;;  %11475 = vtanh.f32 %v7333_v37 }
 0xaf2   :  { %v7330_v17 = vmul.f32 0.5, %v11472_v45 }
 0xaf3   :  { %v7327_v26 = vadd.f32 0.5, %v7326_v9 }
 0xaf4   :  { %v7331_v24 = vadd.f32 0.5, %v7330_v17  ;;  %v7305_v6 = vpop.f32.mrf.mxu2  ;;  %v7318_v41 = vpop.f32.mrf.mxu3 }
 0xaf5   :  { %v11474_v25 = vpop.eup %11473 }
 0xaf6   :  { %v7337_v56 = vmul.f32 %v7331_v24, %v12913_v16  ;;  %v7338_v40 = vmul.f32 %v11474_v25, %v7327_v26  ;;  %v7456_v16 = vld [vmem:[#allocation16 + $0x58] sm:$0xff] }
 0xaf7   :  { %v11476_v39 = vpop.eup %11475  ;;  %7485 = vmatpush.msra.mxu0 %v7456_v16 }
 0xaf8   :  { %v12921_v23 = vadd.f32 %v7338_v40, %v7337_v56  ;;  %v7335_v54 = vmul.f32 0.5, %v11476_v39  ;;  %v11238_v56 = vld [vmem:[%s12950_s10] ss:$0 sm:$0xff] }
 0xaf9   :  { %7486 = vmatpush.msra.mxu0 %v7455_v61 }
 0xafa   :  { %11477 = vtanh.f32 %v12921_v23  ;;  %v7336_v44 = vadd.f32 0.5, %v7335_v54 }
 0xafb   :  { %7487 = vmatpush.msra.mxu0 %v7454_v10 }
 0xafd   :  { %7488 = vmatpush.msra.mxu0 %v7453_v21 }
 0xaff   :  { %7489 = vmatpush.msra.mxu0 %v7452_v8 }
 0xb00   :  { %v11478_v34 = vpop.eup %11477 }
 0xb01   :  { %v7341_v30 = vmul.f32 %v11478_v34, %v7336_v44  ;;  %7490 = vmatpush.msra.mxu0 %v7451_v0 }
 0xb03   :  { %v7348_v14 = vpack.c.bf16 %v7341_v30, %v7341_v30  ;;  %7491 = vmatpush.msra.mxu0 %v7450_v50 }
 0xb05   :  { %7357 = vmatmul.bf16.vlgmr.msrb.gmra.mxu0 %v7348_v14  ;;  %7370 = vmatmul.bf16.vlgmr.msrb.gmra.mxu1 %v7348_v14 }
 0xb06   :  { %7383 = vmatmul.bf16.vlgmr.msrb.gmra.mxu2 %v7348_v14  ;;  %7396 = vmatmul.bf16.vlgmr.msrb.gmra.mxu3 %v7348_v14 }
 0xb15   :  { %7517 = vmatmul.f32.vlgmr.msra.gmra.mxu1 %v12690_v18  ;;  %v7449_v18 = vld [vmem:[#allocation16 + $0x20] sm:$0xff] }
 0xb16   :  { %7492 = vmatpush.msra.mxu0 %v7449_v18 }
 0xb18   :  { %7493 = vmatpush.msra.mxu0 %v7448_v27 }
 0xb1a   :  { %7494 = vmatpush.msra.mxu0 %v7447_v42 }
 0xb1c   :  { %7495 = vmatpush.msra.mxu0 %v7446_v32 }
 0xb1e   :  { %7496 = vmatpush.msra.mxu0 %v7445_v43 }
 0xb82   :  { %v7358_v33 = vpop.f32.mrf.mxu0  ;;  %v7371_v62 = vpop.f32.mrf.mxu1 }
 0xb83   :  { %v7401_v15 = vadd.f32 %v7358_v33, %v13097_v1  ;;  %v7402_v59 = vadd.f32 %v7371_v62, %v13098_v20 }
 0xb85   :  { %v7405_v49 = vmul.f32 0.5, %v7401_v15  ;;  %v7409_v22 = vmul.f32 0.5, %v7402_v59 }
 0xb87   :  { %11479 = vtanh.f32 %v7405_v49 }
 0xb88   :  { %11481 = vtanh.f32 %v7409_v22 }
 0xb89   :  { %v7384_v11 = vpop.f32.mrf.mxu2  ;;  %v7397_v7 = vpop.f32.mrf.mxu3 }
 0xb8a   :  { %v7403_v48 = vadd.f32 %v7384_v11, %v6228_v19  ;;  %v7404_v46 = vadd.f32 %v7397_v7, %v6286_v31  ;;  %v7360_v3 = vpop.f32.mrf.mxu0  ;;  %v7373_v28 = vpop.f32.mrf.mxu1 }
 0xb8c   :  { %11483 = vtanh.f32 %v7403_v48  ;;  %v7414_v38 = vmul.f32 0.5, %v7404_v46 }
 0xb8d   :  { %v11480_v2 = vpop.eup %11479 }
 0xb8e   :  { %v11482_v55 = vpop.eup %11481  ;;  %v7407_v57 = vmul.f32 0.5, %v11480_v2  ;;  %11485 = vtanh.f32 %v7414_v38 }
 0xb8f   :  { %v7411_v37 = vmul.f32 0.5, %v11482_v55 }
 0xb90   :  { %v7408_v52 = vadd.f32 0.5, %v7407_v57 }
 0xb91   :  { %v7412_v29 = vadd.f32 0.5, %v7411_v37  ;;  %v7386_v4 = vpop.f32.mrf.mxu2  ;;  %v7399_v45 = vpop.f32.mrf.mxu3 }
 0xb92   :  { %v11484_v9 = vpop.eup %11483  ;;  %v7518_v54 = vpop.f32.mrf.mxu1 }
 0xb93   :  { %v7418_v17 = vmul.f32 %v7412_v29, %v12921_v23  ;;  %v7419_v13 = vmul.f32 %v11484_v9, %v7408_v52 }
 0xb94   :  { %v11486_v26 = vpop.eup %11485 }
 0xb95   :  { %v7420_v24 = vadd.f32 %v7419_v13, %v7418_v17  ;;  %v7416_v6 = vmul.f32 0.5, %v11486_v26 }
 0xb97   :  { %11487 = vtanh.f32 %v7420_v24  ;;  %v7417_v41 = vadd.f32 0.5, %v7416_v6 }
 0xb9d   :  { %v11488_v25 = vpop.eup %11487 }
 0xb9e   :  { %v7422_v47 = vmul.f32 %v11488_v25, %v7417_v41 }
 0xba0   :  { %7497 = vmatmul.f32.vlgmr.msra.gmra.mxu0 %v7422_v47 }
 0xc1d   :  { %v7498_v40 = vpop.f32.mrf.mxu0 }
 0xc1e   :  { %v7499_v39 = vadd.f32 %v11238_v56, %v7498_v40 }
 0xc20   :  { %v7519_v44 = vadd.f32 %v7518_v54, %v7499_v39 }
 0xc22   :  { %7521 = vst [vmem:[%s12951_s11] sm:$0xff] %v7519_v44 }
 0xc23   :  { %7526 = vsyncpa [#allocation7], 1 }
 0xc24   :  { %7527 = vsyncpa [#allocation9], 1 }
 0xc25   :  { %7528 = vsyncpa [#allocation12], 1 }
 0xc26   :  { %7529 = vsyncpa [#allocation15], 1 }

</bundles_post_ra>
